<compile_context>
chip_gen: v6e
topology: v6e:2x2x1
jax: 0.10.0
libtpu: 0.0.40
codegen_flags: <defaults>
</compile_context>

<pallas_src>
import jax
import jax.numpy as jnp
from jax.experimental import pallas as pl
from jax.experimental.pallas import tpu as pltpu


# -----------------------------------------------------------------------------
# Pallas kernel
# -----------------------------------------------------------------------------
def tfe_kernel(x_ref, w_ref, b_ref, dyn_ref, stat_ref):
    # x_ref:   (bn, s, CH)       block of the flattened input (CH = c*h lanes)
    # w_ref:   (6, 3, CH, CH)    folded (conv*BN) per-tap dense weights, bf16 (resident)
    # b_ref:   (6, 1, CH)        folded biases, f32 (resident)
    # dyn_ref: (bn, s, CH)       dynamic multi-scale feature
    # stat_ref:(bn, CH)          temporal mean only (broadcast done in wrapper)
    x = x_ref[...]                                  # (bn, s, ch) f32
    bn, s, ch = x.shape
    m = bn * s
    x2 = x.reshape(m, ch)                           # free: s % 8 == 0, ch % 128 == 0

    # Temporal index of each row within its own sequence.  Rows that receive
    # wrapped values from the whole-(bn*s) roll are exactly the rows this masks
    # to zero, so rolling across the flattened batch*time axis is safe.
    t_idx = jax.lax.broadcasted_iota(jnp.int32, (bn, s, ch), 1).reshape(m, ch)

    def conv(v, lmask, rmask, d, idx):
        # Dilated conv1d (kernel=3, padding=d, dilation=d), groups folded into the
        # lane dim: 3 accumulating (m, ch) x (ch, ch) bf16 MXU matmuls, f32 acc.
        left = jnp.where(lmask, pltpu.roll(v, shift=d, axis=0), 0.0)       # v[t-d]
        right = jnp.where(rmask, pltpu.roll(v, shift=m - d, axis=0), 0.0)  # v[t+d]
        y = jnp.dot(left.astype(jnp.bfloat16), w_ref[idx, 0],
                    preferred_element_type=jnp.float32)
        y = y + jnp.dot(v.astype(jnp.bfloat16), w_ref[idx, 1],
                        preferred_element_type=jnp.float32)
        y = y + jnp.dot(right.astype(jnp.bfloat16), w_ref[idx, 2],
                        preferred_element_type=jnp.float32)
        return y + b_ref[idx]                        # (m, ch) + (1, ch), f32

    total = jnp.zeros((m, ch), jnp.float32)
    for j, d in enumerate((1, 2, 3)):                # dynamic1 / dynamic2 / dynamic3
        lmask = t_idx >= d
        rmask = t_idx < (s - d)
        t = conv(x2, lmask, rmask, d, 2 * j)
        total = total + t + conv(t, lmask, rmask, d, 2 * j + 1)

    dyn_ref[...] = total.reshape(bn, s, ch).astype(dyn_ref.dtype)   # single dense store
    stat_ref[...] = jnp.mean(x, axis=1).astype(stat_ref.dtype)      # (bn, ch) dense store


# -----------------------------------------------------------------------------
# Wrapper
# -----------------------------------------------------------------------------
def tfe_forward(x, W, B, *, bn=None, materialize_static=True):
    """x: (n, s, c, h); W: (6, 3, c*h, c*h); B: (6, 1, c*h). Returns [x, dynamic, static]."""
    n, s, c, h = x.shape
    ch = c * h
    assert ch % 128 == 0, "c*h must be a multiple of 128 lanes"
    assert s % 8 == 0, "s must be a multiple of 8 sublanes (pad the sequence)"
    if bn is None:
        # Fill the MXU (M = bn*s) while keeping grid >= 2 so both v7x TCs get work.
        bn = max(1, n // 2)
    assert n % bn == 0, "batch must be divisible by the batch tile bn"

    xf = x.reshape(n, s, ch)                         # free reshape (c-major, h-minor lanes)

    dyn_f, stat_mean = pl.pallas_call(
        tfe_kernel,
        out_shape=(jax.ShapeDtypeStruct((n, s, ch), x.dtype),
                   jax.ShapeDtypeStruct((n, ch), x.dtype)),
        grid_spec=pltpu.PrefetchScalarGridSpec(
            num_scalar_prefetch=0,
            grid=(n // bn,),
            in_specs=[
                pl.BlockSpec((bn, s, ch), lambda i: (i, 0, 0)),
                pl.BlockSpec((6, 3, ch, ch), lambda i: (0, 0, 0, 0)),   # resident in VMEM
                pl.BlockSpec((6, 1, ch), lambda i: (0, 0, 0)),          # resident in VMEM
            ],
            out_specs=[
                pl.BlockSpec((bn, s, ch), lambda i: (i, 0, 0)),
                pl.BlockSpec((bn, ch), lambda i: (i, 0)),
            ],
        ),
        compiler_params=pltpu.CompilerParams(dimension_semantics=("parallel",)),
    )(xf, W.astype(jnp.bfloat16), B.astype(jnp.float32))

    dyn = dyn_f.reshape(n, s, c, h)
    stat_mean = stat_mean.reshape(n, 1, c, h)
    if materialize_static:
        stat = jnp.broadcast_to(stat_mean, (n, s, c, h))   # matches torch output shape
    else:
        stat = stat_mean                                   # consumer broadcasts lazily
    return [x, dyn, stat]


# -----------------------------------------------------------------------------
# Deterministic parameter init (conv weight + eval-mode BatchNorm, folded).
# Returns both the kernel layout (per-tap dense) and torch layout (for the ref).
# -----------------------------------------------------------------------------
def init_tfe_params(key, in_planes, out_planes, part_num):
    assert in_planes == out_planes, "TFE's .view() requires out_planes == in_planes"
    eps = 1e-5
    c, h = in_planes, part_num
    C = out_planes * part_num
    keys = jax.random.split(key, 24)
    eye_h = jnp.eye(h, dtype=jnp.float32)
    Wk, Bk, Wt, Bt = [], [], [], []
    for i in range(6):  # convs: (dyn1_a, dyn1_b, dyn2_a, dyn2_b, dyn3_a, dyn3_b)
        w = 0.1 * jax.random.normal(keys[4 * i], (C, in_planes, 3), jnp.float32)   # torch OIW
        gamma = 1.0 + 0.1 * jax.random.normal(keys[4 * i + 1], (C,), jnp.float32)
        beta = 0.1 * jax.random.normal(keys[4 * i + 2], (C,), jnp.float32)
        mean = 0.1 * jax.random.normal(keys[4 * i + 3], (C,), jnp.float32)
        var = jnp.ones((C,), jnp.float32)
        scale = gamma / jnp.sqrt(var + eps)
        wf = w * scale[:, None, None]        # fold BN scale: (C, c, 3)
        bf = beta - mean * scale             # fold BN bias:  (C,)
        Wt.append(wf)
        Bt.append(bf)

        # Per-tap dense weight in flattened-lane layout (f = channel*h + part):
        #   dense[k, ci, hi, co, ho] = wf[ho*c + co, ci, k] * delta(hi, ho)
        wf_r = wf.reshape(h, c, c, 3)                 # (ho, co, ci, k)
        wk = jnp.transpose(wf_r, (3, 2, 0, 1))        # (k, ci, hg, co)
        dense = wk[:, :, :, :, None] * eye_h[None, None, :, None, :]  # (k, ci, hi, co, ho)
        Wk.append(dense.reshape(3, c * h, c * h))     # (3, CH, CH): K=CH per tap
        Bk.append(bf.reshape(h, c).T.reshape(1, c * h))  # cols: co*h + ho

    W = jnp.stack(Wk, axis=0)    # (6, 3, c*h, c*h)
    B = jnp.stack(Bk, axis=0)    # (6, 1, c*h)
    Wt = jnp.stack(Wt, axis=0)   # (6, h*c, c, 3)  torch layout
    Bt = jnp.stack(Bt, axis=0)   # (6, h*c)
    return W, B, Wt, Bt


# -----------------------------------------------------------------------------
# Pure-JAX reference (independent path via lax.conv_general_dilated)
# -----------------------------------------------------------------------------
def tfe_reference(x, Wt, Bt):
    n, s, c, h = x.shape
    xc = jnp.transpose(x, (0, 3, 2, 1)).reshape(n, h * c, s)   # (n, C, s) like torch

    def conv_bn(inp, idx, d):
        out = jax.lax.conv_general_dilated(
            inp, Wt[idx], window_strides=(1,), padding=[(d, d)],
            rhs_dilation=(d,), feature_group_count=h,
            dimension_numbers=('NCH', 'OIH', 'NCH'))
        return out + Bt[idx][None, :, None]

    total = jnp.zeros_like(xc)
    for j, d in enumerate((1, 2, 3)):
        t = conv_bn(xc, 2 * j, d)
        total = total + t + conv_bn(t, 2 * j + 1, d)
    dyn = jnp.transpose(total.reshape(n, h, c, s), (0, 3, 2, 1))
    stat = jnp.broadcast_to(jnp.mean(x, axis=1, keepdims=True), x.shape)
    return [x, dyn, stat]


if __name__ == "__main__":
    # n=16, s=32, in_planes=out_planes=16, part_num=8  ->  c*h = 128 lanes,
    # default bn = 8 -> matmul M = bn*s = 256, grid = (2,).
    n, s, in_planes, part_num = 16, 32, 16, 8
    out_planes = in_planes

    key = jax.random.PRNGKey(0)
    kx, kp = jax.random.split(key)
    x = jax.random.normal(kx, (n, s, in_planes, part_num), jnp.float32)
    W, B, Wt, Bt = init_tfe_params(kp, in_planes, out_planes, part_num)

    outs = tfe_forward(x, W, B)
    outs = [jax.block_until_ready(o) for o in outs]

    refs = tfe_reference(x, Wt, Bt)
    names = ["identity", "dynamic", "static"]
    for name, o, r in zip(names, outs, refs):
        assert o.shape == r.shape, (name, o.shape, r.shape)
        err = float(jnp.max(jnp.abs(o - r)))
        # Tolerance loosened for the bf16-MXU dynamic branch (f32 accumulation).
        assert jnp.allclose(o, r, atol=6e-2, rtol=6e-2), (name, err)

    print("KERNEL_OK")
</pallas_src>

<mosaic_0001>
module attributes {stable_mosaic.version = 11 : i64} {
  func.func @tfe_kernel(%arg0: i32, %arg1: memref<8x32x128xf32, #tpu.memory_space<vmem>>, %arg2: memref<6x3x128x128xbf16, #tpu.memory_space<vmem>>, %arg3: memref<6x1x128xf32, #tpu.memory_space<vmem>>, %arg4: memref<8x32x128xf32, #tpu.memory_space<vmem>>, %arg5: memref<8x128xf32, #tpu.memory_space<vmem>>) attributes {dimension_semantics = [#tpu.dimension_semantics<parallel>], iteration_bounds = array<i64: 2>, scalar_prefetch = 0 : i64, scratch_operands = 0 : i64, tpu.core_type = #tpu.core_type<tc>, window_params = [{transform_indices = @transform_0, window_bounds = array<i64: 8, 32, 128>}, {pipeline_mode = #tpu.pipeline_mode<synchronous>, transform_indices = @transform_1, window_bounds = array<i64: 6, 3, 128, 128>}, {pipeline_mode = #tpu.pipeline_mode<synchronous>, transform_indices = @transform_2, window_bounds = array<i64: 6, 1, 128>}, {transform_indices = @transform_3, window_bounds = array<i64: 8, 32, 128>}, {transform_indices = @transform_4, window_bounds = array<i64: 8, 128>}]} {
    %c0 = arith.constant 0 : index
    %c0_0 = arith.constant 0 : index
    %c0_1 = arith.constant 0 : index
    %0 = vector.load %arg1[%c0, %c0_0, %c0_1] : memref<8x32x128xf32, #tpu.memory_space<vmem>>, vector<8x32x128xf32>
    %1 = vector.shape_cast %0 : vector<8x32x128xf32> to vector<256x128xf32>
    %2 = tpu.iota {dimensions = array<i32: 1>} : vector<8x32x128xi32>
    %3 = vector.shape_cast %2 : vector<8x32x128xi32> to vector<256x128xi32>
    %cst = arith.constant 0.000000e+00 : f32
    %4 = vector.broadcast %cst : f32 to vector<256x128xf32>
    %c1_i32 = arith.constant 1 : i32
    %5 = vector.broadcast %c1_i32 : i32 to vector<256x128xi32>
    %6 = arith.cmpi sge, %3, %5 : vector<256x128xi32>
    %c31_i32 = arith.constant 31 : i32
    %7 = vector.broadcast %c31_i32 : i32 to vector<256x128xi32>
    %8 = arith.cmpi slt, %3, %7 : vector<256x128xi32>
    %c1_i32_2 = arith.constant 1 : i32
    %9 = tpu.dynamic_rotate %1 by %c1_i32_2 dim 0 : vector<256x128xf32>, i32 -> vector<256x128xf32>
    %cst_3 = arith.constant 0.000000e+00 : f32
    %10 = vector.broadcast %cst_3 : f32 to vector<256x128xf32>
    %11 = arith.select %6, %9, %10 : vector<256x128xi1>, vector<256x128xf32>
    %c255_i32 = arith.constant 255 : i32
    %12 = tpu.dynamic_rotate %1 by %c255_i32 dim 0 : vector<256x128xf32>, i32 -> vector<256x128xf32>
    %cst_4 = arith.constant 0.000000e+00 : f32
    %13 = vector.broadcast %cst_4 : f32 to vector<256x128xf32>
    %14 = arith.select %8, %12, %13 : vector<256x128xi1>, vector<256x128xf32>
    %15 = arith.truncf %11 : vector<256x128xf32> to vector<256x128xbf16>
    %c0_5 = arith.constant 0 : index
    %c0_6 = arith.constant 0 : index
    %c0_7 = arith.constant 0 : index
    %c0_8 = arith.constant 0 : index
    %16 = vector.load %arg2[%c0_5, %c0_6, %c0_7, %c0_8] : memref<6x3x128x128xbf16, #tpu.memory_space<vmem>>, vector<1x1x128x128xbf16>
    %17 = vector.shape_cast %16 : vector<1x1x128x128xbf16> to vector<128x128xbf16>
    %cst_9 = arith.constant dense<0.000000e+00> : vector<256x128xf32>
    %18 = tpu.matmul %15, %17, %cst_9 {dimension_numbers = #tpu.dot_dimension_numbers<[1], [0], [0], [1], [0, 0, 1, 1], [], []>} : vector<256x128xbf16>, vector<128x128xbf16>, vector<256x128xf32> -> vector<256x128xf32>
    %19 = arith.truncf %1 : vector<256x128xf32> to vector<256x128xbf16>
    %c0_10 = arith.constant 0 : index
    %c1 = arith.constant 1 : index
    %c0_11 = arith.constant 0 : index
    %c0_12 = arith.constant 0 : index
    %20 = vector.load %arg2[%c0_10, %c1, %c0_11, %c0_12] : memref<6x3x128x128xbf16, #tpu.memory_space<vmem>>, vector<1x1x128x128xbf16>
    %21 = vector.shape_cast %20 : vector<1x1x128x128xbf16> to vector<128x128xbf16>
    %cst_13 = arith.constant dense<0.000000e+00> : vector<256x128xf32>
    %22 = tpu.matmul %19, %21, %cst_13 {dimension_numbers = #tpu.dot_dimension_numbers<[1], [0], [0], [1], [0, 0, 1, 1], [], []>} : vector<256x128xbf16>, vector<128x128xbf16>, vector<256x128xf32> -> vector<256x128xf32>
    %23 = arith.addf %18, %22 : vector<256x128xf32>
    %24 = arith.truncf %14 : vector<256x128xf32> to vector<256x128xbf16>
    %c0_14 = arith.constant 0 : index
    %c2 = arith.constant 2 : index
    %c0_15 = arith.constant 0 : index
    %c0_16 = arith.constant 0 : index
    %25 = vector.load %arg2[%c0_14, %c2, %c0_15, %c0_16] : memref<6x3x128x128xbf16, #tpu.memory_space<vmem>>, vector<1x1x128x128xbf16>
    %26 = vector.shape_cast %25 : vector<1x1x128x128xbf16> to vector<128x128xbf16>
    %cst_17 = arith.constant dense<0.000000e+00> : vector<256x128xf32>
    %27 = tpu.matmul %24, %26, %cst_17 {dimension_numbers = #tpu.dot_dimension_numbers<[1], [0], [0], [1], [0, 0, 1, 1], [], []>} : vector<256x128xbf16>, vector<128x128xbf16>, vector<256x128xf32> -> vector<256x128xf32>
    %28 = arith.addf %23, %27 : vector<256x128xf32>
    %c0_18 = arith.constant 0 : index
    %c0_19 = arith.constant 0 : index
    %c0_20 = arith.constant 0 : index
    %29 = vector.load %arg3[%c0_18, %c0_19, %c0_20] : memref<6x1x128xf32, #tpu.memory_space<vmem>>, vector<1x1x128xf32>
    %30 = vector.shape_cast %29 : vector<1x1x128xf32> to vector<1x128xf32>
    %31 = vector.broadcast %30 : vector<1x128xf32> to vector<256x128xf32>
    %32 = arith.addf %28, %31 : vector<256x128xf32>
    %33 = arith.addf %4, %32 : vector<256x128xf32>
    %c1_i32_21 = arith.constant 1 : i32
    %34 = tpu.dynamic_rotate %32 by %c1_i32_21 dim 0 : vector<256x128xf32>, i32 -> vector<256x128xf32>
    %cst_22 = arith.constant 0.000000e+00 : f32
    %35 = vector.broadcast %cst_22 : f32 to vector<256x128xf32>
    %36 = arith.select %6, %34, %35 : vector<256x128xi1>, vector<256x128xf32>
    %c255_i32_23 = arith.constant 255 : i32
    %37 = tpu.dynamic_rotate %32 by %c255_i32_23 dim 0 : vector<256x128xf32>, i32 -> vector<256x128xf32>
    %cst_24 = arith.constant 0.000000e+00 : f32
    %38 = vector.broadcast %cst_24 : f32 to vector<256x128xf32>
    %39 = arith.select %8, %37, %38 : vector<256x128xi1>, vector<256x128xf32>
    %40 = arith.truncf %36 : vector<256x128xf32> to vector<256x128xbf16>
    %c1_25 = arith.constant 1 : index
    %c0_26 = arith.constant 0 : index
    %c0_27 = arith.constant 0 : index
    %c0_28 = arith.constant 0 : index
    %41 = vector.load %arg2[%c1_25, %c0_26, %c0_27, %c0_28] : memref<6x3x128x128xbf16, #tpu.memory_space<vmem>>, vector<1x1x128x128xbf16>
    %42 = vector.shape_cast %41 : vector<1x1x128x128xbf16> to vector<128x128xbf16>
    %cst_29 = arith.constant dense<0.000000e+00> : vector<256x128xf32>
    %43 = tpu.matmul %40, %42, %cst_29 {dimension_numbers = #tpu.dot_dimension_numbers<[1], [0], [0], [1], [0, 0, 1, 1], [], []>} : vector<256x128xbf16>, vector<128x128xbf16>, vector<256x128xf32> -> vector<256x128xf32>
    %44 = arith.truncf %32 : vector<256x128xf32> to vector<256x128xbf16>
    %c1_30 = arith.constant 1 : index
    %c1_31 = arith.constant 1 : index
    %c0_32 = arith.constant 0 : index
    %c0_33 = arith.constant 0 : index
    %45 = vector.load %arg2[%c1_30, %c1_31, %c0_32, %c0_33] : memref<6x3x128x128xbf16, #tpu.memory_space<vmem>>, vector<1x1x128x128xbf16>
    %46 = vector.shape_cast %45 : vector<1x1x128x128xbf16> to vector<128x128xbf16>
    %cst_34 = arith.constant dense<0.000000e+00> : vector<256x128xf32>
    %47 = tpu.matmul %44, %46, %cst_34 {dimension_numbers = #tpu.dot_dimension_numbers<[1], [0], [0], [1], [0, 0, 1, 1], [], []>} : vector<256x128xbf16>, vector<128x128xbf16>, vector<256x128xf32> -> vector<256x128xf32>
    %48 = arith.addf %43, %47 : vector<256x128xf32>
    %49 = arith.truncf %39 : vector<256x128xf32> to vector<256x128xbf16>
    %c1_35 = arith.constant 1 : index
    %c2_36 = arith.constant 2 : index
    %c0_37 = arith.constant 0 : index
    %c0_38 = arith.constant 0 : index
    %50 = vector.load %arg2[%c1_35, %c2_36, %c0_37, %c0_38] : memref<6x3x128x128xbf16, #tpu.memory_space<vmem>>, vector<1x1x128x128xbf16>
    %51 = vector.shape_cast %50 : vector<1x1x128x128xbf16> to vector<128x128xbf16>
    %cst_39 = arith.constant dense<0.000000e+00> : vector<256x128xf32>
    %52 = tpu.matmul %49, %51, %cst_39 {dimension_numbers = #tpu.dot_dimension_numbers<[1], [0], [0], [1], [0, 0, 1, 1], [], []>} : vector<256x128xbf16>, vector<128x128xbf16>, vector<256x128xf32> -> vector<256x128xf32>
    %53 = arith.addf %48, %52 : vector<256x128xf32>
    %c1_40 = arith.constant 1 : index
    %c0_41 = arith.constant 0 : index
    %c0_42 = arith.constant 0 : index
    %54 = vector.load %arg3[%c1_40, %c0_41, %c0_42] : memref<6x1x128xf32, #tpu.memory_space<vmem>>, vector<1x1x128xf32>
    %55 = vector.shape_cast %54 : vector<1x1x128xf32> to vector<1x128xf32>
    %56 = vector.broadcast %55 : vector<1x128xf32> to vector<256x128xf32>
    %57 = arith.addf %53, %56 : vector<256x128xf32>
    %58 = arith.addf %33, %57 : vector<256x128xf32>
    %c2_i32 = arith.constant 2 : i32
    %59 = vector.broadcast %c2_i32 : i32 to vector<256x128xi32>
    %60 = arith.cmpi sge, %3, %59 : vector<256x128xi32>
    %c30_i32 = arith.constant 30 : i32
    %61 = vector.broadcast %c30_i32 : i32 to vector<256x128xi32>
    %62 = arith.cmpi slt, %3, %61 : vector<256x128xi32>
    %c2_i32_43 = arith.constant 2 : i32
    %63 = tpu.dynamic_rotate %1 by %c2_i32_43 dim 0 : vector<256x128xf32>, i32 -> vector<256x128xf32>
    %cst_44 = arith.constant 0.000000e+00 : f32
    %64 = vector.broadcast %cst_44 : f32 to vector<256x128xf32>
    %65 = arith.select %60, %63, %64 : vector<256x128xi1>, vector<256x128xf32>
    %c254_i32 = arith.constant 254 : i32
    %66 = tpu.dynamic_rotate %1 by %c254_i32 dim 0 : vector<256x128xf32>, i32 -> vector<256x128xf32>
    %cst_45 = arith.constant 0.000000e+00 : f32
    %67 = vector.broadcast %cst_45 : f32 to vector<256x128xf32>
    %68 = arith.select %62, %66, %67 : vector<256x128xi1>, vector<256x128xf32>
    %69 = arith.truncf %65 : vector<256x128xf32> to vector<256x128xbf16>
    %c2_46 = arith.constant 2 : index
    %c0_47 = arith.constant 0 : index
    %c0_48 = arith.constant 0 : index
    %c0_49 = arith.constant 0 : index
    %70 = vector.load %arg2[%c2_46, %c0_47, %c0_48, %c0_49] : memref<6x3x128x128xbf16, #tpu.memory_space<vmem>>, vector<1x1x128x128xbf16>
    %71 = vector.shape_cast %70 : vector<1x1x128x128xbf16> to vector<128x128xbf16>
    %cst_50 = arith.constant dense<0.000000e+00> : vector<256x128xf32>
    %72 = tpu.matmul %69, %71, %cst_50 {dimension_numbers = #tpu.dot_dimension_numbers<[1], [0], [0], [1], [0, 0, 1, 1], [], []>} : vector<256x128xbf16>, vector<128x128xbf16>, vector<256x128xf32> -> vector<256x128xf32>
    %73 = arith.truncf %1 : vector<256x128xf32> to vector<256x128xbf16>
    %c2_51 = arith.constant 2 : index
    %c1_52 = arith.constant 1 : index
    %c0_53 = arith.constant 0 : index
    %c0_54 = arith.constant 0 : index
    %74 = vector.load %arg2[%c2_51, %c1_52, %c0_53, %c0_54] : memref<6x3x128x128xbf16, #tpu.memory_space<vmem>>, vector<1x1x128x128xbf16>
    %75 = vector.shape_cast %74 : vector<1x1x128x128xbf16> to vector<128x128xbf16>
    %cst_55 = arith.constant dense<0.000000e+00> : vector<256x128xf32>
    %76 = tpu.matmul %73, %75, %cst_55 {dimension_numbers = #tpu.dot_dimension_numbers<[1], [0], [0], [1], [0, 0, 1, 1], [], []>} : vector<256x128xbf16>, vector<128x128xbf16>, vector<256x128xf32> -> vector<256x128xf32>
    %77 = arith.addf %72, %76 : vector<256x128xf32>
    %78 = arith.truncf %68 : vector<256x128xf32> to vector<256x128xbf16>
    %c2_56 = arith.constant 2 : index
    %c2_57 = arith.constant 2 : index
    %c0_58 = arith.constant 0 : index
    %c0_59 = arith.constant 0 : index
    %79 = vector.load %arg2[%c2_56, %c2_57, %c0_58, %c0_59] : memref<6x3x128x128xbf16, #tpu.memory_space<vmem>>, vector<1x1x128x128xbf16>
    %80 = vector.shape_cast %79 : vector<1x1x128x128xbf16> to vector<128x128xbf16>
    %cst_60 = arith.constant dense<0.000000e+00> : vector<256x128xf32>
    %81 = tpu.matmul %78, %80, %cst_60 {dimension_numbers = #tpu.dot_dimension_numbers<[1], [0], [0], [1], [0, 0, 1, 1], [], []>} : vector<256x128xbf16>, vector<128x128xbf16>, vector<256x128xf32> -> vector<256x128xf32>
    %82 = arith.addf %77, %81 : vector<256x128xf32>
    %c2_61 = arith.constant 2 : index
    %c0_62 = arith.constant 0 : index
    %c0_63 = arith.constant 0 : index
    %83 = vector.load %arg3[%c2_61, %c0_62, %c0_63] : memref<6x1x128xf32, #tpu.memory_space<vmem>>, vector<1x1x128xf32>
    %84 = vector.shape_cast %83 : vector<1x1x128xf32> to vector<1x128xf32>
    %85 = vector.broadcast %84 : vector<1x128xf32> to vector<256x128xf32>
    %86 = arith.addf %82, %85 : vector<256x128xf32>
    %87 = arith.addf %58, %86 : vector<256x128xf32>
    %c2_i32_64 = arith.constant 2 : i32
    %88 = tpu.dynamic_rotate %86 by %c2_i32_64 dim 0 : vector<256x128xf32>, i32 -> vector<256x128xf32>
    %cst_65 = arith.constant 0.000000e+00 : f32
    %89 = vector.broadcast %cst_65 : f32 to vector<256x128xf32>
    %90 = arith.select %60, %88, %89 : vector<256x128xi1>, vector<256x128xf32>
    %c254_i32_66 = arith.constant 254 : i32
    %91 = tpu.dynamic_rotate %86 by %c254_i32_66 dim 0 : vector<256x128xf32>, i32 -> vector<256x128xf32>
    %cst_67 = arith.constant 0.000000e+00 : f32
    %92 = vector.broadcast %cst_67 : f32 to vector<256x128xf32>
    %93 = arith.select %62, %91, %92 : vector<256x128xi1>, vector<256x128xf32>
    %94 = arith.truncf %90 : vector<256x128xf32> to vector<256x128xbf16>
    %c3 = arith.constant 3 : index
    %c0_68 = arith.constant 0 : index
    %c0_69 = arith.constant 0 : index
    %c0_70 = arith.constant 0 : index
    %95 = vector.load %arg2[%c3, %c0_68, %c0_69, %c0_70] : memref<6x3x128x128xbf16, #tpu.memory_space<vmem>>, vector<1x1x128x128xbf16>
    %96 = vector.shape_cast %95 : vector<1x1x128x128xbf16> to vector<128x128xbf16>
    %cst_71 = arith.constant dense<0.000000e+00> : vector<256x128xf32>
    %97 = tpu.matmul %94, %96, %cst_71 {dimension_numbers = #tpu.dot_dimension_numbers<[1], [0], [0], [1], [0, 0, 1, 1], [], []>} : vector<256x128xbf16>, vector<128x128xbf16>, vector<256x128xf32> -> vector<256x128xf32>
    %98 = arith.truncf %86 : vector<256x128xf32> to vector<256x128xbf16>
    %c3_72 = arith.constant 3 : index
    %c1_73 = arith.constant 1 : index
    %c0_74 = arith.constant 0 : index
    %c0_75 = arith.constant 0 : index
    %99 = vector.load %arg2[%c3_72, %c1_73, %c0_74, %c0_75] : memref<6x3x128x128xbf16, #tpu.memory_space<vmem>>, vector<1x1x128x128xbf16>
    %100 = vector.shape_cast %99 : vector<1x1x128x128xbf16> to vector<128x128xbf16>
    %cst_76 = arith.constant dense<0.000000e+00> : vector<256x128xf32>
    %101 = tpu.matmul %98, %100, %cst_76 {dimension_numbers = #tpu.dot_dimension_numbers<[1], [0], [0], [1], [0, 0, 1, 1], [], []>} : vector<256x128xbf16>, vector<128x128xbf16>, vector<256x128xf32> -> vector<256x128xf32>
    %102 = arith.addf %97, %101 : vector<256x128xf32>
    %103 = arith.truncf %93 : vector<256x128xf32> to vector<256x128xbf16>
    %c3_77 = arith.constant 3 : index
    %c2_78 = arith.constant 2 : index
    %c0_79 = arith.constant 0 : index
    %c0_80 = arith.constant 0 : index
    %104 = vector.load %arg2[%c3_77, %c2_78, %c0_79, %c0_80] : memref<6x3x128x128xbf16, #tpu.memory_space<vmem>>, vector<1x1x128x128xbf16>
    %105 = vector.shape_cast %104 : vector<1x1x128x128xbf16> to vector<128x128xbf16>
    %cst_81 = arith.constant dense<0.000000e+00> : vector<256x128xf32>
    %106 = tpu.matmul %103, %105, %cst_81 {dimension_numbers = #tpu.dot_dimension_numbers<[1], [0], [0], [1], [0, 0, 1, 1], [], []>} : vector<256x128xbf16>, vector<128x128xbf16>, vector<256x128xf32> -> vector<256x128xf32>
    %107 = arith.addf %102, %106 : vector<256x128xf32>
    %c3_82 = arith.constant 3 : index
    %c0_83 = arith.constant 0 : index
    %c0_84 = arith.constant 0 : index
    %108 = vector.load %arg3[%c3_82, %c0_83, %c0_84] : memref<6x1x128xf32, #tpu.memory_space<vmem>>, vector<1x1x128xf32>
    %109 = vector.shape_cast %108 : vector<1x1x128xf32> to vector<1x128xf32>
    %110 = vector.broadcast %109 : vector<1x128xf32> to vector<256x128xf32>
    %111 = arith.addf %107, %110 : vector<256x128xf32>
    %112 = arith.addf %87, %111 : vector<256x128xf32>
    %c3_i32 = arith.constant 3 : i32
    %113 = vector.broadcast %c3_i32 : i32 to vector<256x128xi32>
    %114 = arith.cmpi sge, %3, %113 : vector<256x128xi32>
    %c29_i32 = arith.constant 29 : i32
    %115 = vector.broadcast %c29_i32 : i32 to vector<256x128xi32>
    %116 = arith.cmpi slt, %3, %115 : vector<256x128xi32>
    %c3_i32_85 = arith.constant 3 : i32
    %117 = tpu.dynamic_rotate %1 by %c3_i32_85 dim 0 : vector<256x128xf32>, i32 -> vector<256x128xf32>
    %cst_86 = arith.constant 0.000000e+00 : f32
    %118 = vector.broadcast %cst_86 : f32 to vector<256x128xf32>
    %119 = arith.select %114, %117, %118 : vector<256x128xi1>, vector<256x128xf32>
    %c253_i32 = arith.constant 253 : i32
    %120 = tpu.dynamic_rotate %1 by %c253_i32 dim 0 : vector<256x128xf32>, i32 -> vector<256x128xf32>
    %cst_87 = arith.constant 0.000000e+00 : f32
    %121 = vector.broadcast %cst_87 : f32 to vector<256x128xf32>
    %122 = arith.select %116, %120, %121 : vector<256x128xi1>, vector<256x128xf32>
    %123 = arith.truncf %119 : vector<256x128xf32> to vector<256x128xbf16>
    %c4 = arith.constant 4 : index
    %c0_88 = arith.constant 0 : index
    %c0_89 = arith.constant 0 : index
    %c0_90 = arith.constant 0 : index
    %124 = vector.load %arg2[%c4, %c0_88, %c0_89, %c0_90] : memref<6x3x128x128xbf16, #tpu.memory_space<vmem>>, vector<1x1x128x128xbf16>
    %125 = vector.shape_cast %124 : vector<1x1x128x128xbf16> to vector<128x128xbf16>
    %cst_91 = arith.constant dense<0.000000e+00> : vector<256x128xf32>
    %126 = tpu.matmul %123, %125, %cst_91 {dimension_numbers = #tpu.dot_dimension_numbers<[1], [0], [0], [1], [0, 0, 1, 1], [], []>} : vector<256x128xbf16>, vector<128x128xbf16>, vector<256x128xf32> -> vector<256x128xf32>
    %127 = arith.truncf %1 : vector<256x128xf32> to vector<256x128xbf16>
    %c4_92 = arith.constant 4 : index
    %c1_93 = arith.constant 1 : index
    %c0_94 = arith.constant 0 : index
    %c0_95 = arith.constant 0 : index
    %128 = vector.load %arg2[%c4_92, %c1_93, %c0_94, %c0_95] : memref<6x3x128x128xbf16, #tpu.memory_space<vmem>>, vector<1x1x128x128xbf16>
    %129 = vector.shape_cast %128 : vector<1x1x128x128xbf16> to vector<128x128xbf16>
    %cst_96 = arith.constant dense<0.000000e+00> : vector<256x128xf32>
    %130 = tpu.matmul %127, %129, %cst_96 {dimension_numbers = #tpu.dot_dimension_numbers<[1], [0], [0], [1], [0, 0, 1, 1], [], []>} : vector<256x128xbf16>, vector<128x128xbf16>, vector<256x128xf32> -> vector<256x128xf32>
    %131 = arith.addf %126, %130 : vector<256x128xf32>
    %132 = arith.truncf %122 : vector<256x128xf32> to vector<256x128xbf16>
    %c4_97 = arith.constant 4 : index
    %c2_98 = arith.constant 2 : index
    %c0_99 = arith.constant 0 : index
    %c0_100 = arith.constant 0 : index
    %133 = vector.load %arg2[%c4_97, %c2_98, %c0_99, %c0_100] : memref<6x3x128x128xbf16, #tpu.memory_space<vmem>>, vector<1x1x128x128xbf16>
    %134 = vector.shape_cast %133 : vector<1x1x128x128xbf16> to vector<128x128xbf16>
    %cst_101 = arith.constant dense<0.000000e+00> : vector<256x128xf32>
    %135 = tpu.matmul %132, %134, %cst_101 {dimension_numbers = #tpu.dot_dimension_numbers<[1], [0], [0], [1], [0, 0, 1, 1], [], []>} : vector<256x128xbf16>, vector<128x128xbf16>, vector<256x128xf32> -> vector<256x128xf32>
    %136 = arith.addf %131, %135 : vector<256x128xf32>
    %c4_102 = arith.constant 4 : index
    %c0_103 = arith.constant 0 : index
    %c0_104 = arith.constant 0 : index
    %137 = vector.load %arg3[%c4_102, %c0_103, %c0_104] : memref<6x1x128xf32, #tpu.memory_space<vmem>>, vector<1x1x128xf32>
    %138 = vector.shape_cast %137 : vector<1x1x128xf32> to vector<1x128xf32>
    %139 = vector.broadcast %138 : vector<1x128xf32> to vector<256x128xf32>
    %140 = arith.addf %136, %139 : vector<256x128xf32>
    %141 = arith.addf %112, %140 : vector<256x128xf32>
    %c3_i32_105 = arith.constant 3 : i32
    %142 = tpu.dynamic_rotate %140 by %c3_i32_105 dim 0 : vector<256x128xf32>, i32 -> vector<256x128xf32>
    %cst_106 = arith.constant 0.000000e+00 : f32
    %143 = vector.broadcast %cst_106 : f32 to vector<256x128xf32>
    %144 = arith.select %114, %142, %143 : vector<256x128xi1>, vector<256x128xf32>
    %c253_i32_107 = arith.constant 253 : i32
    %145 = tpu.dynamic_rotate %140 by %c253_i32_107 dim 0 : vector<256x128xf32>, i32 -> vector<256x128xf32>
    %cst_108 = arith.constant 0.000000e+00 : f32
    %146 = vector.broadcast %cst_108 : f32 to vector<256x128xf32>
    %147 = arith.select %116, %145, %146 : vector<256x128xi1>, vector<256x128xf32>
    %148 = arith.truncf %144 : vector<256x128xf32> to vector<256x128xbf16>
    %c5 = arith.constant 5 : index
    %c0_109 = arith.constant 0 : index
    %c0_110 = arith.constant 0 : index
    %c0_111 = arith.constant 0 : index
    %149 = vector.load %arg2[%c5, %c0_109, %c0_110, %c0_111] : memref<6x3x128x128xbf16, #tpu.memory_space<vmem>>, vector<1x1x128x128xbf16>
    %150 = vector.shape_cast %149 : vector<1x1x128x128xbf16> to vector<128x128xbf16>
    %cst_112 = arith.constant dense<0.000000e+00> : vector<256x128xf32>
    %151 = tpu.matmul %148, %150, %cst_112 {dimension_numbers = #tpu.dot_dimension_numbers<[1], [0], [0], [1], [0, 0, 1, 1], [], []>} : vector<256x128xbf16>, vector<128x128xbf16>, vector<256x128xf32> -> vector<256x128xf32>
    %152 = arith.truncf %140 : vector<256x128xf32> to vector<256x128xbf16>
    %c5_113 = arith.constant 5 : index
    %c1_114 = arith.constant 1 : index
    %c0_115 = arith.constant 0 : index
    %c0_116 = arith.constant 0 : index
    %153 = vector.load %arg2[%c5_113, %c1_114, %c0_115, %c0_116] : memref<6x3x128x128xbf16, #tpu.memory_space<vmem>>, vector<1x1x128x128xbf16>
    %154 = vector.shape_cast %153 : vector<1x1x128x128xbf16> to vector<128x128xbf16>
    %cst_117 = arith.constant dense<0.000000e+00> : vector<256x128xf32>
    %155 = tpu.matmul %152, %154, %cst_117 {dimension_numbers = #tpu.dot_dimension_numbers<[1], [0], [0], [1], [0, 0, 1, 1], [], []>} : vector<256x128xbf16>, vector<128x128xbf16>, vector<256x128xf32> -> vector<256x128xf32>
    %156 = arith.addf %151, %155 : vector<256x128xf32>
    %157 = arith.truncf %147 : vector<256x128xf32> to vector<256x128xbf16>
    %c5_118 = arith.constant 5 : index
    %c2_119 = arith.constant 2 : index
    %c0_120 = arith.constant 0 : index
    %c0_121 = arith.constant 0 : index
    %158 = vector.load %arg2[%c5_118, %c2_119, %c0_120, %c0_121] : memref<6x3x128x128xbf16, #tpu.memory_space<vmem>>, vector<1x1x128x128xbf16>
    %159 = vector.shape_cast %158 : vector<1x1x128x128xbf16> to vector<128x128xbf16>
    %cst_122 = arith.constant dense<0.000000e+00> : vector<256x128xf32>
    %160 = tpu.matmul %157, %159, %cst_122 {dimension_numbers = #tpu.dot_dimension_numbers<[1], [0], [0], [1], [0, 0, 1, 1], [], []>} : vector<256x128xbf16>, vector<128x128xbf16>, vector<256x128xf32> -> vector<256x128xf32>
    %161 = arith.addf %156, %160 : vector<256x128xf32>
    %c5_123 = arith.constant 5 : index
    %c0_124 = arith.constant 0 : index
    %c0_125 = arith.constant 0 : index
    %162 = vector.load %arg3[%c5_123, %c0_124, %c0_125] : memref<6x1x128xf32, #tpu.memory_space<vmem>>, vector<1x1x128xf32>
    %163 = vector.shape_cast %162 : vector<1x1x128xf32> to vector<1x128xf32>
    %164 = vector.broadcast %163 : vector<1x128xf32> to vector<256x128xf32>
    %165 = arith.addf %161, %164 : vector<256x128xf32>
    %166 = arith.addf %141, %165 : vector<256x128xf32>
    %167 = vector.shape_cast %166 : vector<256x128xf32> to vector<8x32x128xf32>
    %c0_126 = arith.constant 0 : index
    %c0_127 = arith.constant 0 : index
    %c0_128 = arith.constant 0 : index
    %168 = vector.load %arg4[%c0_126, %c0_127, %c0_128] : memref<8x32x128xf32, #tpu.memory_space<vmem>>, vector<8x32x128xf32>
    tpu.vector_store %arg4[%c0_126, %c0_127, %c0_128], %167 {strides = array<i32>} : memref<8x32x128xf32, #tpu.memory_space<vmem>>, vector<8x32x128xf32>,
    %cst_129 = arith.constant dense<0.000000e+00> : vector<8x128xf32>
    %169 = vector.multi_reduction <add>, %0, %cst_129 [1] : vector<8x32x128xf32> to vector<8x128xf32>
    %cst_130 = arith.constant 3.200000e+01 : f32
    %170 = vector.broadcast %cst_130 : f32 to vector<8x128xf32>
    %171 = arith.divf %169, %170 : vector<8x128xf32>
    %c0_131 = arith.constant 0 : index
    %c0_132 = arith.constant 0 : index
    %172 = vector.load %arg5[%c0_131, %c0_132] : memref<8x128xf32, #tpu.memory_space<vmem>>, vector<8x128xf32>
    tpu.vector_store %arg5[%c0_131, %c0_132], %171 {strides = array<i32>} : memref<8x128xf32, #tpu.memory_space<vmem>>, vector<8x128xf32>,
    return
  }
  func.func @transform_0(%arg0: i32) -> (i32, i32, i32) {
    %c0_i32 = arith.constant 0 : i32
    %c0_i32_0 = arith.constant 0 : i32
    %c0_i32_1 = arith.constant 0 : i32
    return %arg0, %c0_i32, %c0_i32_0 : i32, i32, i32
  }
  func.func @transform_1(%arg0: i32) -> (i32, i32, i32, i32) {
    %c0_i32 = arith.constant 0 : i32
    %c0_i32_0 = arith.constant 0 : i32
    %c0_i32_1 = arith.constant 0 : i32
    %c0_i32_2 = arith.constant 0 : i32
    %c0_i32_3 = arith.constant 0 : i32
    return %c0_i32, %c0_i32_0, %c0_i32_1, %c0_i32_2 : i32, i32, i32, i32
  }
  func.func @transform_2(%arg0: i32) -> (i32, i32, i32) {
    %c0_i32 = arith.constant 0 : i32
    %c0_i32_0 = arith.constant 0 : i32
    %c0_i32_1 = arith.constant 0 : i32
    %c0_i32_2 = arith.constant 0 : i32
    return %c0_i32, %c0_i32_0, %c0_i32_1 : i32, i32, i32
  }
  func.func @transform_3(%arg0: i32) -> (i32, i32, i32) {
    %c0_i32 = arith.constant 0 : i32
    %c0_i32_0 = arith.constant 0 : i32
    %c0_i32_1 = arith.constant 0 : i32
    return %arg0, %c0_i32, %c0_i32_0 : i32, i32, i32
  }
  func.func @transform_4(%arg0: i32) -> (i32, i32) {
    %c0_i32 = arith.constant 0 : i32
    %c0_i32_0 = arith.constant 0 : i32
    return %arg0, %c0_i32 : i32, i32
  }
}

</mosaic_0001>

<bundles_post_ra>
// kernel: tpu_custom_call.1
= control target key start
LH: loop header
LB: loop body
LE: loop exit
PB: predicated region body
PF: predicated region fallthrough
CT: control target
= control target key end

     0   :  { %10 = vsyncpa [#allocation3], 0  ;;  %s13385_s0 = inlined_call_operand.hbm [shape: f32[16,32,128], index: 0, kind: input, shape index: {}]   ;;  %s13386_s1 = inlined_call_operand.hbm [shape: bf16[6,3,128,128], index: 1, kind: input, shape index: {}]   ;;  %s13387_s2 = inlined_call_operand.hbm [shape: f32[6,1,128], index: 2, kind: input, shape index: {}]   ;;  %s13388_s3 = inlined_call_operand.hbm [shape: f32[16,32,128], index: 3, kind: output, shape index: {0}]   ;;  %s13389_s4 = inlined_call_operand.hbm [shape: f32[16,128], index: 4, kind: output, shape index: {1}]  }
   0x1   :  { %12 = vsyncpa [#allocation3 + $0x1], 0 }
   0x2   :  { %13 = vsyncpa [#allocation6], 0 }
   0x3   :  { %14 = vsyncpa [#allocation4], 0 }
   0x4   :  { %16 = vsyncpa [#allocation4 + $0x1], 0 }
   0x5   :  { %17 = vsyncpa [#allocation10], 0 }
   0x6   :  { %19 = vsyncpa [#allocation10 + $0x1], 0  ;;  %s9024_s15 = smov 0   ;;  %s9026_s16 = smov 0  }
   0x7   :  { %s9028_s17 = smov 0   ;;  %s9030_s18 = smov 0  }
   0x8 LB: > { %s9045_s19 = sadd.s32 4294967295, %s8983_s18   ;;  %s6719_s20 = sadd.s32 4294967294, %s8983_s18   ;;  %s8983_s18 = sphi %s9030_s18, %s14204_s18   ;;  %s8979_s17 = sphi %s9028_s17, %s14203_s17   ;;  %s8975_s16 = sphi %s9026_s16, %s14202_s16   ;;  %s8971_s15 = sphi %s9024_s15, %s14201_s15  }
   0x9   : > { %p45_p0 = scmp.ne.s32.totalorder %s8975_s16, %s8971_s15  ;;  %p13390_p1 = scmp.eq.s32.totalorder %s9045_s19, 0 }
   0xa   : > { %p117_p3 = scmp.eq.s32.totalorder %s6719_s20, 1  ;;  %p6720_p5 = scmp.ge.s32.totalorder %s8983_s18, 1 }
   0xb   : > { %p9054_p4 = por %p13390_p1, %p45_p0  ;;  %p150_p7 = scmp.lt.s32.totalorder %s8983_s18, 3 }
   0xc   : > { %p9059_p6 = por %p117_p3, %p45_p0  ;;  %s8985_s24 = smov [#allocation5]  }
   0xd   : > { %s13543_s21 = scalar_select %p9054_p4, 1, 0 }
   0xe   : > { %s13544_s22 = scalar_select %p9059_p6, 1, 0 }
   0xf   : > { %p9064_p8 = pnand %p6720_p5, %p150_p7  ;;  %s162_s25 = sshll.u32 %s8985_s24, 4  ;;  %s163_s25 = int_to_ptr.vmem [resolvable:$true] %s162_s25 }
  0x10   : > { %s8986_s27 = smov [#allocation7]   ;;  %s8816_s29 = scalar_lea.vmem %s163_s25, 18432 }
  0x11   : > { %s13545_s23 = scalar_select %p9064_p8, 1, 0 }
  0x12   : > { %p8494_p9 = pneg %p9064_p8  ;;  %s175_s28 = sshll.u32 %s8986_s27, 4  ;;  %s176_s28 = int_to_ptr.vmem [resolvable:$true] %s175_s28 }
  0x13   : > { %p8817_p13 = scmp.ne.s32.totalorder %s163_s25, %s8816_s29  ;;  %p8824_p5 = scmp.lt.s32.totalorder %s163_s25, %s163_s25 }
  0x14   : > { %p9073_p11 = pnand %p8494_p9, %p13390_p1  ;;  %p8825_p7 = scmp.lt.s32.totalorder %s8816_s29, %s8816_s29 }
  0x16   : > { %p8807_p12 = pneg %p9073_p11  ;;  %p8826_p10 = por %p8825_p7, %p8824_p5 }
  0x18   : > { %p8819_p0 = pnand %p8817_p13, %p8807_p12 }
  0x1a   : > { %p8820_p3 = pneg %p8819_p0 }
  0x1c   : > { %p8827_p9 = pnand %p8826_p10, %p8820_p3 }
  0x1e   : > { %8830 = shalt.err (!%p8827_p9)
}
  0x1f   : > { %s8987_s30 = smov 64   ;;  %s8988_s5 = smov 4  }
  0x20   : > { %8497 = dma.hbm_to_vmem [thread:$0]  (!%p9073_p11), %s13386_s1, 18432, %s163_s25, [#allocation6], %s8987_s30, %s8987_s30, %s8988_s5  }
  0x21   : > { %s8842_s8 = scalar_lea.vmem %s176_s28, 96  ;;  %p8850_p2 = scmp.lt.s32.totalorder %s176_s28, %s176_s28 }
  0x22   : > { %p8843_p1 = scmp.ne.s32.totalorder %s176_s28, %s8842_s8  ;;  %p8851_p6 = scmp.lt.s32.totalorder %s8842_s8, %s8842_s8 }
  0x24   : > { %p8845_p13 = pnand %p8843_p1, %p8807_p12  ;;  %p8852_p5 = por %p8851_p6, %p8850_p2 }
  0x26   : > { %p8846_p0 = pneg %p8845_p13 }
  0x28   : > { %p8853_p10 = pnand %p8852_p5, %p8846_p0 }
  0x2a   : > { %8856 = shalt.err (!%p8853_p10)
}
  0x2b   : > { %s8989_s9 = smov 16   ;;  %s8990_s10 = smov 1  }
  0x2c   : > { %8500 = dma.hbm_to_vmem [thread:$0]  (!%p9073_p11), %s13387_s2, 96, %s176_s28, [#allocation6], %s8989_s9, %s8989_s9, %s8990_s10  }
  0x2d   : > { %s9096_s13 = sadd.s32 1, %s8983_s18   ;;  %s32_s20 = sadd.s32 1, %s8979_s17 }
  0x2e   : > { %s29_s14 = ssub.s32 %s8983_s18, %s9096_s13  ;;  %p39_p2 = scmp.ne.s32.totalorder %s8979_s17, %s8975_s16 }
  0x2f   : > { %p30_p1 = scmp.eq.s32.totalorder %s29_s14, 0  ;;  %p40_p6 = scmp.eq.s32.totalorder %s8983_s18, 0 }
  0x30   : > { %p13547_p3 = scmp.eq.s32.totalorder %s9045_s19, 1  ;;  %p8514_p9 = scmp.lt.s32.totalorder %s8983_s18, 2 }
  0x31   : > { %s9105_s24 = scalar_select %p30_p1, %s8979_s17, %s32_s20  }
  0x32   : > { %p41_p12 = por %p40_p6, %p39_p2  ;;  %p9109_p7 = por %p13547_p3, %p39_p2 }
  0x33   : > { %s189_s26 = sand.u32 1, %s8979_s17   ;;  %s7181_s28 = sshll.u32 %s8983_s18, 12 }
  0x34   : > { %s13548_s25 = scalar_select %p9109_p7, 1, 0 }
  0x35   : > { %s6724_s27 = sshll.u32 %s189_s26, 8  ;;  %s9119_s5 = scalar_lea.hbm %s13385_s0, %s7181_s28 }
  0x36   : > { %s193_s6 = scalar_lea.vmem [#allocation2], %s6724_s27  ;;  %p9123_p11 = pnand %p8514_p9, %p41_p12 }
  0x37   : > { %s201_s7 = sshll.u32 %s193_s6, 4  ;;  %s9127_s9 = scalar_lea.sflag [#allocation3], %s189_s26  ;;  %s9121_s7 = int_to_ptr.vmem [resolvable:$true] %s201_s7 }
  0x38   : > { %s8857_s10 = scalar_lea.hbm %s9119_s5, 4096  ;;  %p8859_p0 = pneg %p9123_p11 }
  0x39   : > { %p8858_p13 = scmp.ne.s32.totalorder %s9119_s5, %s8857_s10  ;;  %s8862_s14 = scalar_lea.hbm %s13385_s0, 8192 }
  0x3a   : > { %p8863_p1 = scmp.lt.s32.totalorder %s9119_s5, %s13385_s0  ;;  %p8864_p2 = scmp.lt.s32.totalorder %s8862_s14, %s8857_s10 }
  0x3b   : > { %p8860_p5 = pnand %p8859_p0, %p8858_p13 }
  0x3c   : > { %p8865_p6 = por %p8864_p2, %p8863_p1 }
  0x3d   : > { %p8861_p10 = pneg %p8860_p5 }
  0x3f   : > { %p8866_p12 = pnand %p8865_p6, %p8861_p10 }
  0x41   : > { %8869 = shalt.err (!%p8866_p12)
}
  0x42   : > { %s8870_s26 = scalar_lea.vmem %s9121_s7, 4096  ;;  %s8991_s28 = smov [#allocation2]  }
  0x43   : > { %p8871_p3 = scmp.ne.s32.totalorder %s9121_s7, %s8870_s26  ;;  %s8875_s29 = sshll.u32 %s8991_s28, 4  ;;  %s8876_s29 = int_to_ptr.vmem [resolvable:$false] %s8875_s29 }
  0x44   : > { %s8877_s30 = scalar_lea.vmem %s8876_s29, 8192  ;;  %p8878_p5 = scmp.lt.s32.totalorder %s9121_s7, %s8876_s29 }
  0x45   : > { %p8873_p9 = pnand %p8871_p3, %p8859_p0  ;;  %p8879_p7 = scmp.lt.s32.totalorder %s8877_s30, %s8870_s26 }
  0x47   : > { %p8874_p13 = pneg %p8873_p9  ;;  %p8880_p4 = por %p8879_p7, %p8878_p5 }
  0x49   : > { %p8881_p8 = pnand %p8880_p4, %p8874_p13 }
  0x4b   : > { %8884 = shalt.err (!%p8881_p8)
}
  0x4c   : > { %s8992_s6 = smov 128   ;;  %s8993_s10 = smov 8  }
  0x4d   : > { %8504 = dma.hbm_to_vmem [thread:$0]  (!%p9123_p11), %s9119_s5, 4096, %s9121_s7, %s9127_s9, %s8992_s6, %s8992_s6, %s8993_s10  }
  0x4e   : > { %p13550_p0 = scmp.ne.s32.totalorder %s13545_s23, 0 }
  0x50   : > { %213 = sbr.rel (%p13550_p0) target bundleno = 1529 (0x5f9), region = 32 }
  0x55   : > { %s9151_s11 = sand.u32 1, %s8975_s16   ;;  %p13551_p4 = scmp.ne.s32.totalorder %s13543_s21, 0 }
  0x56   : > { %s6729_s12 = sshll.u32 %s9151_s11, 8  ;;  %s216_s14 = scalar_lea.sflag [#allocation3], %s9151_s11 }
  0x57   : > { %s9157_s20 = scalar_lea.vmem [#allocation2], %s6729_s12 }
  0x58   : > { %8954 = dma.done.wait (%p13551_p4), %s216_s14, 4096  }
  0x59   : > { %8956 = vsyncadd (%p13551_p4), %s216_s14, 4294963200  ;;  %p13552_p8 = scmp.eq.s32.totalorder %s9045_s19, 0 }
  0x5b   : > { %8958 = dma.done.wait (%p13552_p8), [#allocation6], 18528   ;;  %p13553_p7 = pmov %p13552_p8 }
  0x5c   : > { %v8561_v0 = vld [vmem:[#allocation5 + $0x78] sm:$0xff]   ;;  %v8563_v2 = vld [vmem:[#allocation5 + $0x70] sm:$0xff]   ;;  %v8565_v4 = vld [vmem:[#allocation5 + $0x68] sm:$0xff]   ;;  %v292_v7 = vlaneseq  ;;  %vm8994_vm2 = vmmov 1   ;;  %v13556_v22 = vmov 0  ;;  %s6733_s21 = sshll.u32 %s9151_s11, 3 }
  0x5d   : > { %8960 = vsyncadd (%p13553_p7), [#allocation6], 4294948768  ;;  %v8562_v1 = vld [vmem:[#allocation5 + $0x38] sm:$0xff]   ;;  %7616 = vmatprep.subr.bf16.mxu0 %v8561_v0  ;;  %v8564_v3 = vld [vmem:[#allocation5 + $0x30] sm:$0xff]   ;;  %s7177_s23 = sshll.u32 %s9045_s19, 7  ;;  %s256_s5 = scalar_lea.vmem [#allocation9], %s6733_s21 }
  0x5e   : > { %7664 = vmatprep.subr.bf16.mxu1 %v8562_v1  ;;  %7617 = vmatpush3.bf16.msra.mxu0 %v8561_v0  ;;  %v8566_v5 = vld [vmem:[#allocation5 + $0x28] sm:$0xff]   ;;  %v8567_v6 = vld [vmem:[#allocation5 + $0x60] sm:$0xff]   ;;  %v8569_v9 = vld [vmem:[#allocation5 + $0x58] sm:$0xff]   ;;  %v9167_v10 = vshrl.u32 %v292_v7, 7  ;;  %s6598_s7 = sshll.u32 %s256_s5, 4  ;;  %s13100_s27 = scalar_lea.hbm %s13389_s4, %s7177_s23  ;;  %s13102_s7 = int_to_ptr.vmem [resolvable:$true] %s6598_s7 }
  0x5f   : > { %7665 = vmatpush3.bf16.msra.mxu1 %v8562_v1  ;;  %7618 = vmatprep.subr.bf16.mxu0 %v8563_v2  ;;  %v8568_v8 = vld [vmem:[#allocation5 + $0x20] sm:$0xff]   ;;  %v8570_v11 = vld [vmem:[#allocation5 + $0x18] sm:$0xff]   ;;  %v8571_v12 = vld [vmem:[#allocation5 + $0x50] sm:$0xff]   ;;  %s6568_s26 = scalar_lea.sflag [#allocation10], %s9151_s11  ;;  %s8885_s28 = scalar_lea.vmem %s13102_s7, 128 }
  0x60   : > { %7666 = vmatprep.subr.bf16.mxu1 %v8564_v3  ;;  %13554 = vst [vmem:[#allocation15_spill] sm:$0xff] %v9167_v10  ;;  %v9170_v13 = vld [vmem:[%s9157_s20] sm:$0xff]  ;;  %v9173_v14 = vld [vmem:[%s9157_s20 + $0x8] sm:$0xff]  ;;  %v9176_v15 = vld [vmem:[%s9157_s20 + $0xf8] sm:$0xff]  ;;  %vm297_vm0 = vcmp.ge.s32.totalorder %v9167_v10, 1  ;;  %vm337_vm1 = vcmp.lt.s32.totalorder %v9167_v10, 1  ;;  %p8886_p11 = scmp.ne.s32.totalorder %s13102_s7, %s8885_s28 }
  0x61   : > { %v8572_v16 = vld [vmem:[#allocation5 + $0x10] sm:$0xff]   ;;  %v9182_v17 = vpack.c.bf16 %v9173_v14, %v9170_v13  ;;  %v305_v18 = vrot.slane %v9170_v13, 7  ;;  %v306_v19 = vrot.slane %v9173_v14, 7  ;;  %v13394_v20 = vrot.slane %v9176_v15, 7  ;;  %vm9191_vm3 = vmpackc.low %vm8994_vm2, %vm297_vm0  ;;  %v8573_v23 = vld [vmem:[#allocation5 + $0x48] sm:$0xff]   ;;  %p14138_p10 = scmp.ne.s32.totalorder %s13548_s25, 0 }
  0x62   : > { %7619 = vmatpush3.bf16.msra.mxu0 %v8563_v2  ;;  %v13557_v22 = vsel %vm9191_vm3, 4294967295, %v13556_v22  ;;  %v8574_v25 = vld [vmem:[#allocation5 + $0x8] sm:$0xff]   ;;  %v9200_v27 = vld [vmem:[%s9157_s20 + $0x10] sm:$0xff]  ;;  %v9203_v28 = vld [vmem:[%s9157_s20 + $0x18] sm:$0xff]  ;;  %v9247_v52 = vadd.s32 24, %v9167_v10  ;;  %vm434_vm4 = vcmp.lt.s32.totalorder %v9167_v10, 7 }
  0x63   : > { %7667 = vmatpush3.bf16.msra.mxu1 %v8564_v3  ;;  %7620 = vmatprep.subr.bf16.mxu0 %v8565_v4  ;;  %13555 = vst [vmem:[#allocation16_spill] sm:$0xff] %v9182_v17  ;;  %v368_v21 = vsel %vm337_vm1, %v305_v18, %v306_v19  ;;  %13558 = vst [vmem:[#allocation17_spill] sm:$0xff] %v13557_v22  ;;  %v369_v24 = vsel %vm337_vm1, %v13394_v20, %v305_v18  ;;  %v9206_v29 = vld [vmem:[%s9157_s20 + $0x20] sm:$0xff]  ;;  %v9209_v30 = vld [vmem:[%s9157_s20 + $0x28] sm:$0xff]  ;;  %v307_v33 = vrot.slane %v9200_v27, 7  ;;  %p8887_p1 = pnand %p8886_p11, %p14138_p10  ;;  %s8995_s29 = smov [#allocation9]  }
  0x64   : > { %7668 = vmatprep.subr.bf16.mxu1 %v8566_v5  ;;  %7632 = vmatprep.mubr.bf16.mxu0 %v9182_v17  ;;  %v6751_v26 = vpack.c.bf16 %v368_v21, %v369_v24  ;;  %v8575_v31 = vld [vmem:[#allocation5 + $0x40] sm:$0xff]   ;;  %v308_v34 = vrot.slane %v9203_v28, 7  ;;  %v309_v35 = vrot.slane %v9206_v29, 7  ;;  %v310_v36 = vrot.slane %v9209_v30, 7  ;;  %v8577_v39 = vld [vmem:[#allocation5 + $0xb8] sm:$0xff]   ;;  %v9226_v42 = vld [vmem:[%s9157_s20 + $0x30] sm:$0xff] }
  0x65   : > { %v8576_v32 = vld [vmem:[#allocation5] sm:$0xff]   ;;  %v367_v38 = vsel %vm337_vm1, %v306_v19, %v307_v33  ;;  %v9229_v43 = vld [vmem:[%s9157_s20 + $0x38] sm:$0xff]  ;;  %v9236_v45 = vpack.c.bf16 %v9203_v28, %v9200_v27  ;;  %v9239_v46 = vld [vmem:[%s9157_s20 + $0x48] sm:$0xff]  ;;  %13560 = vst [vmem:[#allocation19_spill] sm:$0xff] %v9247_v52  ;;  %v9251_v53 = vpack.c.bf16 %v9209_v30, %v9206_v29  ;;  %v311_v55 = vrot.slane %v9226_v42, 7  ;;  %p8888_p2 = pneg %p8887_p1  ;;  %s8889_s30 = sshll.u32 %s8995_s29, 4  ;;  %s8890_s30 = int_to_ptr.vmem [resolvable:$false] %s8889_s30 }
  0x66   : > { %7621 = vmatpush3.bf16.msra.mxu0 %v8565_v4  ;;  %7680 = vmatprep.mubr.msk.bf16.mxu1 %vm9191_vm3, %v6751_v26  ;;  %v366_v37 = vsel %vm337_vm1, %v307_v33, %v308_v34  ;;  %v364_v40 = vsel %vm337_vm1, %v309_v35, %v310_v36  ;;  %v365_v41 = vsel %vm337_vm1, %v308_v34, %v309_v35  ;;  %v9232_v44 = vld [vmem:[%s9157_s20 + $0x40] sm:$0xff]  ;;  %v8578_v48 = vld [vmem:[#allocation5 + $0xb0] sm:$0xff]   ;;  %v312_v56 = vrot.slane %v9229_v43, 7  ;;  %v9256_v57 = vld [vmem:[%s9157_s20 + $0x58] sm:$0xff]  ;;  %s8891_s6 = scalar_lea.vmem %s8890_s30, 256  ;;  %p8892_p6 = scmp.lt.s32.totalorder %s13102_s7, %s8890_s30 }
  0x67   : > { %7669 = vmatpush3.bf16.msra.mxu1 %v8566_v5  ;;  %7622 = vmatprep.subr.bf16.mxu0 %v8567_v6  ;;  %13559 = vst [vmem:[#allocation18_spill] sm:$0xff] %v9236_v45  ;;  %v500_v47 = vpack.c.bf16 %v366_v37, %v367_v38  ;;  %v9242_v49 = vld [vmem:[%s9157_s20 + $0x50] sm:$0xff]  ;;  %13561 = vst [vmem:[#allocation20_spill] sm:$0xff] %v9251_v53  ;;  %v6754_v54 = vpack.c.bf16 %v364_v40, %v365_v41  ;;  %v9259_v58 = vld [vmem:[%s9157_s20 + $0x60] sm:$0xff]  ;;  %v313_v59 = vrot.slane %v9232_v44, 7  ;;  %p8893_p12 = scmp.lt.s32.totalorder %s8891_s6, %s8885_s28 }
  0x68   : > { %7670 = vmatprep.subr.bf16.mxu1 %v8568_v8  ;;  %v314_v60 = vrot.slane %v9239_v46, 7  ;;  %v9264_v61 = vld [vmem:[%s9157_s20 + $0x68] sm:$0xff]  ;;  %v9267_v62 = vld [vmem:[%s9157_s20 + $0x70] sm:$0xff]  ;;  %v315_v63 = vrot.slane %v9242_v49, 7  ;;  %v9272_v1 = vld [vmem:[%s9157_s20 + $0x78] sm:$0xff]  ;;  %v316_v4 = vrot.slane %v9256_v57, 7  ;;  %v363_v7 = vsel %vm337_vm1, %v310_v36, %v311_v55 }
  0x69   : > { %v8579_v0 = vld [vmem:[#allocation5 + $0xa8] sm:$0xff]   ;;  %v9275_v2 = vld [vmem:[%s9157_s20 + $0x80] sm:$0xff]  ;;  %v9297_v18 = vld [vmem:[%s9157_s20 + $0x90] sm:$0xff]  ;;  %v9301_v19 = vpack.c.bf16 %v9229_v43, %v9226_v42  ;;  %v320_v21 = vrot.slane %v9272_v1, 7  ;;  %v9312_v26 = vpack.c.bf16 %v9239_v46, %v9232_v44  ;;  %vm304_vm5 = vcmp.lt.s32.totalorder %v9247_v52, 31  ;;  %p8894_p3 = por %p8893_p12, %p8892_p6 }
  0x6a   : > { %7623 = vmatpush3.bf16.msra.mxu0 %v8567_v6  ;;  %v9280_v5 = vld [vmem:[%s9157_s20 + $0x88] sm:$0xff]  ;;  %v362_v6 = vsel %vm337_vm1, %v311_v55, %v312_v56  ;;  %v9308_v24 = vld [vmem:[%s9157_s20 + $0xa0] sm:$0xff]  ;;  %v9320_v36 = vld [vmem:[%s9157_s20 + $0xb0] sm:$0xff]  ;;  %v323_v38 = vrot.slane %v9297_v18, 7 }
  0x6b   : > { %7671 = vmatpush3.bf16.msra.mxu1 %v8568_v8  ;;  %7624 = vmatprep.subr.bf16.mxu0 %v8569_v9  ;;  %v317_v8 = vrot.slane %v9259_v58, 7  ;;  %13562 = vst [vmem:[#allocation21_spill] sm:$0xff] %v9301_v19  ;;  %13563 = vst [vmem:[#allocation22_spill] sm:$0xff] %v9312_v26  ;;  %v9316_v33 = vld [vmem:[%s9157_s20 + $0xa8] sm:$0xff]  ;;  %v322_v35 = vrot.slane %v9280_v5, 7  ;;  %v9323_v37 = vld [vmem:[%s9157_s20 + $0xb8] sm:$0xff]  ;;  %p8895_p9 = pnand %p8894_p3, %p8888_p2 }
  0x6c   : > { %7672 = vmatprep.subr.bf16.mxu1 %v8570_v11  ;;  %v8581_v41 = vld [vmem:[#allocation5 + $0x98] sm:$0xff]   ;;  %v9367_v50 = vld [vmem:[%s9157_s20 + $0xf0] sm:$0xff]  ;;  %vm9566_vm6 = vmpackc.low %vm304_vm5, %vm8994_vm2  ;;  %vm6550_vm5 = vcmask 1043459  }
  0x6d   : > { %v9822_v10 = vld [vmem:[#allocation7] ss:$0 sm:$0xff] }
  0x6e   : > { %7625 = vmatpush3.bf16.msra.mxu0 %v8569_v9  ;;  %v318_v9 = vrot.slane %v9264_v61, 7 }
  0x6f   : > { %7673 = vmatpush3.bf16.msra.mxu1 %v8570_v11  ;;  %7626 = vmatprep.subr.bf16.mxu0 %v8571_v12  ;;  %v360_v11 = vsel %vm337_vm1, %v313_v59, %v314_v60 }
  0x70   : > { %7674 = vmatprep.subr.bf16.mxu1 %v8572_v16 }
  0x72   : > { %7627 = vmatpush3.bf16.msra.mxu0 %v8571_v12  ;;  %v361_v12 = vsel %vm337_vm1, %v312_v56, %v313_v59  ;;  %v9341_v56 = vld [vmem:[%s9157_s20 + $0xc8] sm:$0xff]  ;;  %v9344_v59 = vld [vmem:[%s9157_s20 + $0xd0] sm:$0xff] }
  0x73   : > { %7675 = vmatpush3.bf16.msra.mxu1 %v8572_v16  ;;  %7628 = vmatprep.subr.bf16.mxu0 %v8573_v23  ;;  %v319_v16 = vrot.slane %v9267_v62, 7  ;;  %v6757_v34 = vpack.c.bf16 %v360_v11, %v361_v12  ;;  %v357_v11 = vsel %vm337_vm1, %v316_v4, %v317_v8 }
  0x74   : > { %7676 = vmatprep.subr.bf16.mxu1 %v8574_v25 }
  0x75   : > { %v354_v20 = vsel %vm337_vm1, %v319_v16, %v320_v21  ;;  %v355_v12 = vsel %vm337_vm1, %v318_v9, %v319_v16 }
  0x76   : > { %7629 = vmatpush3.bf16.msra.mxu0 %v8573_v23  ;;  %v9305_v23 = vld [vmem:[%s9157_s20 + $0x98] sm:$0xff] }
  0x77   : > { %7677 = vmatpush3.bf16.msra.mxu1 %v8574_v25  ;;  %7630 = vmatprep.subr.bf16.mxu0 %v8575_v31  ;;  %v502_v25 = vpack.c.bf16 %v362_v6, %v363_v7  ;;  %v324_v40 = vrot.slane %v9305_v23, 7  ;;  %v9347_v6 = vld [vmem:[%s9157_s20 + $0xd8] sm:$0xff]  ;;  %v356_v7 = vsel %vm337_vm1, %v317_v8, %v318_v9  ;;  %v8582_v8 = vld [vmem:[#allocation5 + $0x90] sm:$0xff]   ;;  %v9401_v9 = vpack.c.bf16 %v9272_v1, %v9267_v62 }
  0x78   : > { %7678 = vmatprep.subr.bf16.mxu1 %v8576_v32  ;;  %v6760_v3 = vpack.c.bf16 %v356_v7, %v357_v11  ;;  %v411_v11 = vrot.slane %v9239_v46, 1 }
  0x79   : > { %13566 = vst [vmem:[#allocation25_spill] sm:$0xff] %v9401_v9 }
  0x7a   : > { %7631 = vmatpush3.bf16.msra.mxu0 %v8575_v31  ;;  %v8580_v31 = vld [vmem:[#allocation5 + $0xa0] sm:$0xff]  }
  0x7b   : > { %7679 = vmatpush3.bf16.msra.mxu1 %v8576_v32  ;;  %7712 = vmatprep.subr.bf16.mxu0 %v8577_v39  ;;  %v321_v32 = vrot.slane %v9275_v2, 7 }
  0x7d   : > { %7633 = vmatmul.mubr.bf16.vlgmr.msra.gmra.mxu0 %v9236_v45  ;;  %v352_v16 = vsel %vm337_vm1, %v321_v32, %v322_v35 }
  0x7e   : > { %7681 = vmatmul.mubr.bf16.vlgmr.msra.gmra.mxu1 %v500_v47  ;;  %7713 = vmatpush3.bf16.msra.mxu0 %v8577_v39  ;;  %v9327_v39 = vld [vmem:[%s9157_s20 + $0xc0] sm:$0xff] }
  0x7f   : > { %7636 = vmatprep.mubr.bf16.mxu0 %v9251_v53  ;;  %7684 = vmatprep.mubr.msk.bf16.mxu1 %vm9191_vm3, %v6754_v54  ;;  %v359_v54 = vsel %vm337_vm1, %v314_v60, %v315_v63 }
  0x80   : > { %7714 = vmatprep.subr.bf16.mxu0 %v8578_v48 }
  0x82   : > { %7715 = vmatpush3.bf16.msra.mxu0 %v8578_v48  ;;  %v358_v48 = vsel %vm337_vm1, %v315_v63, %v316_v4  ;;  %v9356_v63 = vld [vmem:[%s9157_s20 + $0xe0] sm:$0xff]  ;;  %v9371_v4 = vpack.c.bf16 %v9264_v61, %v9259_v58 }
  0x83   : > { %7716 = vmatprep.subr.bf16.mxu0 %v8579_v0  ;;  %v504_v51 = vpack.c.bf16 %v358_v48, %v359_v54  ;;  %v8583_v54 = vld [vmem:[#allocation5 + $0x88] sm:$0xff]  }
  0x84   : > { %13565 = vst [vmem:[#allocation24_spill] sm:$0xff] %v9371_v4 }
  0x85   : > { %7637 = vmatmul.mubr.bf16.gmra.mxu0 %v9301_v19 }
  0x86   : > { %7685 = vmatmul.mubr.bf16.gmra.mxu1 %v502_v25  ;;  %7640 = vmatprep.mubr.bf16.mxu0 %v9312_v26  ;;  %v9363_v25 = vpack.c.bf16 %v9256_v57, %v9242_v49 }
  0x87   : > { %7688 = vmatprep.mubr.msk.bf16.mxu1 %vm9191_vm3, %v6757_v34  ;;  %7717 = vmatpush3.bf16.msra.mxu0 %v8579_v0  ;;  %v9359_v0 = vld [vmem:[%s9157_s20 + $0xe8] sm:$0xff]  ;;  %v9525_v34 = vpack.c.bf16 %v9347_v6, %v9344_v59 }
  0x88   : > { %7718 = vmatprep.subr.bf16.mxu0 %v8580_v31  ;;  %13564 = vst [vmem:[#allocation23_spill] sm:$0xff] %v9363_v25 }
  0x89   : > { %13590 = vst [vmem:[#allocation31_spill] sm:$0xff] %v9525_v34 }
  0x8b   : > { %7719 = vmatpush3.bf16.msra.mxu0 %v8580_v31  ;;  %v353_v31 = vsel %vm337_vm1, %v320_v21, %v321_v32  ;;  %v9405_v21 = vpack.c.bf16 %v9280_v5, %v9275_v2  ;;  %v506_v32 = vpack.c.bf16 %v354_v20, %v355_v12  ;;  %v13569_v20 = vrot.slane %v9308_v24, 7 }
  0x8c   : > { %7720 = vmatprep.subr.bf16.mxu0 %v8581_v41  ;;  %v6763_v7 = vpack.c.bf16 %v352_v16, %v353_v31 }
  0x8d   : > { %7641 = vmatmul.mubr.bf16.gmra.mxu0 %v9363_v25  ;;  %13567 = vst [vmem:[#allocation26_spill] sm:$0xff] %v9405_v21  ;;  %v13570_v60 = vmov %v13569_v20 }
  0x8e   : > { %7689 = vmatmul.mubr.bf16.gmra.mxu1 %v504_v51  ;;  %7644 = vmatprep.mubr.bf16.mxu0 %v9371_v4  ;;  %v349_v55 = vsel %vm337_vm1, %v324_v40, %v13570_v60  ;;  %v13574_v60 = vrot.slane %v9320_v36, 7  ;;  %v13599_v51 = vrot.slane %v9170_v13, 1 }
  0x8f   : > { %7692 = vmatprep.mubr.msk.bf16.mxu1 %vm9191_vm3, %v6760_v3  ;;  %7721 = vmatpush3.bf16.msra.mxu0 %v8581_v41  ;;  %v412_v3 = vrot.slane %v9242_v49, 1  ;;  %v8584_v41 = vld [vmem:[#allocation5 + $0x80] sm:$0xff]   ;;  %v13624_v49 = vrot.slane %v9275_v2, 1 }
  0x90   : > { %7722 = vmatprep.subr.bf16.mxu0 %v8582_v8 }
  0x93   : > { %7723 = vmatpush3.bf16.msra.mxu0 %v8582_v8  ;;  %v350_v8 = vsel %vm337_vm1, %v323_v38, %v324_v40  ;;  %v13573_v40 = vrot.slane %v9323_v37, 7 }
  0x94   : > { %7724 = vmatprep.subr.bf16.mxu0 %v8583_v54 }
  0x95   : > { %7645 = vmatmul.mubr.bf16.gmra.mxu0 %v9401_v9 }
  0x96   : > { %7693 = vmatmul.mubr.bf16.gmra.mxu1 %v506_v32  ;;  %7648 = vmatprep.mubr.bf16.mxu0 %v9405_v21  ;;  %v351_v32 = vsel %vm337_vm1, %v322_v35, %v323_v38  ;;  %v9451_v35 = vpack.c.bf16 %v9305_v23, %v9297_v18 }
  0x97   : > { %7696 = vmatprep.mubr.msk.bf16.mxu1 %vm9191_vm3, %v6763_v7  ;;  %7725 = vmatpush3.bf16.msra.mxu0 %v8583_v54  ;;  %v13568_v7 = vrot.slane %v9316_v33, 7  ;;  %v508_v38 = vpack.c.bf16 %v350_v8, %v351_v32  ;;  %v9455_v54 = vpack.c.bf16 %v9316_v33, %v9308_v24  ;;  %v13575_v8 = vmov %v13574_v60 }
  0x98   : > { %7726 = vmatprep.subr.bf16.mxu0 %v8584_v41  ;;  %13571 = vst [vmem:[#allocation27_spill] sm:$0xff] %v9451_v35  ;;  %v13578_v32 = vrot.slane %v9327_v39, 7 }
  0x99   : > { %v348_v12 = vsel %vm337_vm1, %v13569_v20, %v13568_v7  ;;  %13572 = vst [vmem:[#allocation28_spill] sm:$0xff] %v9455_v54  ;;  %v346_v20 = vsel %vm337_vm1, %v13574_v60, %v13573_v40  ;;  %v9487_v60 = vpack.c.bf16 %v9323_v37, %v9320_v36 }
  0x9a   : > { %v6766_v16 = vpack.c.bf16 %v348_v12, %v349_v55  ;;  %v13576_v55 = vmov %v13568_v7  ;;  %v13577_v12 = vrot.slane %v9341_v56, 7  ;;  %v13579_v7 = vmov %v13578_v32 }
  0x9b   : > { %7727 = vmatpush3.bf16.msra.mxu0 %v8584_v41  ;;  %v347_v41 = vsel %vm337_vm1, %v13576_v55, %v13575_v8  ;;  %13581 = vst [vmem:[#allocation29_spill] sm:$0xff] %v9487_v60  ;;  %v9491_v8 = vpack.c.bf16 %v9341_v56, %v9327_v39 }
  0x9c   : > { %v510_v31 = vpack.c.bf16 %v346_v20, %v347_v41 }
  0x9d   : > { %7649 = vmatmul.mubr.bf16.gmra.mxu0 %v9451_v35  ;;  %13582 = vst [vmem:[#allocation30_spill] sm:$0xff] %v9491_v8 }
  0x9e   : > { %7697 = vmatmul.mubr.bf16.gmra.mxu1 %v508_v38  ;;  %7652 = vmatprep.mubr.bf16.mxu0 %v9455_v54  ;;  %v13580_v38 = vmov %v13573_v40 }
  0x9f   : > { %7700 = vmatprep.mubr.msk.bf16.mxu1 %vm9191_vm3, %v6766_v16  ;;  %v344_v16 = vsel %vm337_vm1, %v13578_v32, %v13577_v12  ;;  %v345_v40 = vsel %vm337_vm1, %v13580_v38, %v13579_v7  ;;  %v13583_v12 = vrot.slane %v9347_v6, 7  ;;  %v13584_v32 = vrot.slane %v9344_v59, 7 }
  0xa0   : > { %v6769_v55 = vpack.c.bf16 %v344_v16, %v345_v40  ;;  %v13586_v16 = vrot.slane %v9341_v56, 7  ;;  %v13588_v38 = vrot.slane %v9356_v63, 7 }
  0xa1   : > { %v342_v20 = vsel %vm337_vm1, %v13584_v32, %v13583_v12  ;;  %v13585_v41 = vmov %v13584_v32 }
  0xa2   : > { %v343_v7 = vsel %vm337_vm1, %v13586_v16, %v13585_v41  ;;  %v9529_v16 = vpack.c.bf16 %v9359_v0, %v9356_v63 }
  0xa3   : > { %v512_v41 = vpack.c.bf16 %v342_v20, %v343_v7 }
  0xa4   : > { %13591 = vst [vmem:[#allocation32_spill] sm:$0xff] %v9529_v16 }
  0xa5   : > { %7653 = vmatmul.mubr.bf16.gmra.mxu0 %v9487_v60 }
  0xa6   : > { %7701 = vmatmul.mubr.bf16.gmra.mxu1 %v510_v31  ;;  %7656 = vmatprep.mubr.bf16.mxu0 %v9491_v8  ;;  %v13587_v31 = vrot.slane %v9359_v0, 7 }
  0xa7   : > { %7704 = vmatprep.mubr.msk.bf16.mxu1 %vm9191_vm3, %v6769_v55  ;;  %v13589_v55 = vmov %v13588_v38 }
  0xa8   : > { %v340_v40 = vsel %vm337_vm1, %v13588_v38, %v13587_v31  ;;  %v341_v32 = vsel %vm337_vm1, %v13583_v12, %v13589_v55  ;;  %v13592_v31 = vrot.slane %v9176_v15, 7  ;;  %v13593_v38 = vrot.slane %v9367_v50, 7 }
  0xa9   : > { %v6772_v48 = vpack.c.bf16 %v340_v40, %v341_v32  ;;  %v13595_v55 = vrot.slane %v9359_v0, 7  ;;  %v13596_v12 = vrot.slane %v9200_v27, 1  ;;  %v13597_v32 = vrot.slane %v9173_v14, 1 }
  0xaa   : > { %v338_v20 = vsel %vm337_vm1, %v13593_v38, %v13592_v31  ;;  %v13594_v7 = vmov %v13593_v38  ;;  %v9561_v38 = vpack.c.bf16 %v9176_v15, %v9367_v50  ;;  %v13604_v14 = vrot.slane %v9206_v29, 1 }
  0xab   : > { %v339_v40 = vsel %vm337_vm1, %v13595_v55, %v13594_v7  ;;  %v13601_v55 = vmov 0 }
  0xac   : > { %13600 = vst [vmem:[#allocation33_spill] sm:$0xff] %v9561_v38  ;;  %v514_v47 = vpack.c.bf16 %v338_v20, %v339_v40  ;;  %v13602_v55 = vsel %vm9566_vm6, 4294967295, %v13601_v55  ;;  %v13607_v40 = vmov %v13596_v12 }
  0xad   : > { %7657 = vmatmul.mubr.bf16.gmra.mxu0 %v9525_v34  ;;  %13603 = vst [vmem:[#allocation34_spill] sm:$0xff] %v13602_v55 }
  0xae   : > { %7705 = vmatmul.mubr.bf16.gmra.mxu1 %v512_v41  ;;  %7660 = vmatprep.mubr.bf16.mxu0 %v9529_v16  ;;  %v13598_v41 = vmov %v13597_v32 }
  0xaf   : > { %7708 = vmatprep.mubr.msk.bf16.mxu1 %vm9191_vm3, %v6772_v48  ;;  %v464_v48 = vsel %vm434_vm4, %v13597_v32, %v13596_v12  ;;  %v465_v31 = vsel %vm434_vm4, %v13599_v51, %v13598_v41  ;;  %v13605_v51 = vrot.slane %v9203_v28, 1  ;;  %v13608_v32 = vrot.slane %v9226_v42, 1 }
  0xb0   : > { %v982_v7 = vpack.c.bf16 %v464_v48, %v465_v31  ;;  %v13609_v48 = vrot.slane %v9209_v30, 1  ;;  %v13611_v31 = vmov %v13604_v14  ;;  %v13617_v42 = vrot.slane %v9259_v58, 1 }
  0xb1   : > { %v462_v15 = vsel %vm434_vm4, %v13605_v51, %v13604_v14  ;;  %v13606_v20 = vmov %v13605_v51  ;;  %v13613_v51 = vrot.slane %v9229_v43, 1  ;;  %v13615_v29 = vmov %v13608_v32 }
  0xb2   : > { %v463_v12 = vsel %vm434_vm4, %v13607_v40, %v13606_v20  ;;  %v13610_v41 = vmov %v13609_v48 }
  0xb3   : > { %v461_v28 = vsel %vm434_vm4, %v13611_v31, %v13610_v41  ;;  %v6783_v14 = vpack.c.bf16 %v462_v15, %v463_v12  ;;  %v13614_v30 = vmov %v13613_v51  ;;  %v456_v15 = vsel %vm434_vm4, %v411_v11, %v412_v3 }
  0xb4   : > { %v459_v40 = vsel %vm434_vm4, %v13615_v29, %v13614_v30  ;;  %v13621_v31 = vrot.slane %v9264_v61, 1  ;;  %v13628_v29 = vrot.slane %v9297_v18, 1  ;;  %v425_v18 = vrot.slane %v9323_v37, 1 }
  0xb5   : > { %7661 = vmatmul.mubr.bf16.gmra.mxu0 %v9561_v38 }
  0xb6   : > { %7709 = vmatmul.mubr.bf16.gmra.mxu1 %v514_v47  ;;  %7728 = vmatprep.mubr.bf16.mxu0 %v982_v7  ;;  %v460_v47 = vsel %vm434_vm4, %v13609_v48, %v13608_v32  ;;  %v13612_v7 = vrot.slane %v9232_v44, 1  ;;  %v13635_v2 = vmov %v13628_v29 }
  0xb7   : > { %v984_v27 = vpack.c.bf16 %v460_v47, %v461_v28  ;;  %v13618_v47 = vrot.slane %v9256_v57, 1 }
  0xb8   : > { %v458_v20 = vsel %vm434_vm4, %v13613_v51, %v13612_v7  ;;  %v13616_v12 = vmov %v13612_v7 }
  0xb9   : > { %v457_v32 = vsel %vm434_vm4, %v13616_v12, %v411_v11  ;;  %v6786_v43 = vpack.c.bf16 %v458_v20, %v459_v40  ;;  %v454_v41 = vsel %vm434_vm4, %v13618_v47, %v13617_v42  ;;  %v13619_v46 = vmov %v13618_v47 }
  0xba   : > { %v986_v48 = vpack.c.bf16 %v456_v15, %v457_v32  ;;  %v455_v44 = vsel %vm434_vm4, %v412_v3, %v13619_v46  ;;  %v13620_v11 = vrot.slane %v9267_v62, 1  ;;  %v13625_v3 = vrot.slane %v9272_v1, 1 }
  0xbb   : > { %v6789_v57 = vpack.c.bf16 %v454_v41, %v455_v44  ;;  %v13629_v40 = vrot.slane %v9280_v5, 1  ;;  %v13631_v32 = vmov %v13624_v49  ;;  %v13632_v62 = vrot.slane %v9308_v24, 1 }
  0xbc   : > { %v452_v28 = vsel %vm434_vm4, %v13621_v31, %v13620_v11  ;;  %v450_v20 = vsel %vm434_vm4, %v13625_v3, %v13624_v49  ;;  %v13626_v61 = vmov %v13625_v3  ;;  %v13627_v58 = vmov %v13620_v11 }
  0xbd   : > { %7729 = vmatmul.mubr.msk.bf16.vlgmr.msra.gmra.mxu0 %vm9566_vm6, %v6783_v14  ;;  %v13622_v14 = vmov %v13621_v31  ;;  %v451_v30 = vsel %vm434_vm4, %v13627_v58, %v13626_v61  ;;  %v448_v15 = vsel %vm434_vm4, %v13629_v40, %v13628_v29  ;;  %v13630_v12 = vmov %v13629_v40  ;;  %v8705_v40 = vld [vmem:[%s9157_s20 + $0xf8] sm:$0xff] }
  0xbe   : > { %7732 = vmatprep.mubr.bf16.mxu0 %v984_v27  ;;  %v13623_v27 = vmov %v13617_v42  ;;  %v6792_v1 = vpack.c.bf16 %v450_v20, %v451_v30  ;;  %v13633_v42 = vrot.slane %v9305_v23, 1  ;;  %v13636_v46 = vrot.slane %v9320_v36, 1 }
  0xbf   : > { %v453_v7 = vsel %vm434_vm4, %v13623_v27, %v13622_v14  ;;  %v13637_v44 = vrot.slane %v9316_v33, 1  ;;  %v429_v3 = vrot.slane %v9347_v6, 1  ;;  %v430_v20 = vrot.slane %v9356_v63, 1 }
  0xc0   : > { %v988_v51 = vpack.c.bf16 %v452_v28, %v453_v7  ;;  %v446_v47 = vsel %vm434_vm4, %v13633_v42, %v13632_v62  ;;  %v13634_v5 = vmov %v13633_v42  ;;  %v13639_v28 = vmov %v13632_v62  ;;  %v8587_v62 = vld [vmem:[#allocation5 + $0x128] sm:$0xff]   ;;  %v8588_v42 = vld [vmem:[#allocation5 + $0x120] sm:$0xff]  }
  0xc1   : > { %v447_v41 = vsel %vm434_vm4, %v13635_v2, %v13634_v5  ;;  %v444_v11 = vsel %vm434_vm4, %v13637_v44, %v13636_v46  ;;  %v13638_v31 = vmov %v13637_v44  ;;  %v426_v7 = vrot.slane %v9327_v39, 1  ;;  %v8591_v5 = vld [vmem:[#allocation5 + $0x108] sm:$0xff]   ;;  %v8593_v2 = vld [vmem:[#allocation5 + $0x100] sm:$0xff]  }
  0xc2   : > { %v445_v14 = vsel %vm434_vm4, %v13639_v28, %v13638_v31  ;;  %v6795_v23 = vpack.c.bf16 %v446_v47, %v447_v41  ;;  %v13640_v33 = vmov %v13636_v46  ;;  %v431_v61 = vrot.slane %v9359_v0, 1  ;;  %v8589_v47 = vld [vmem:[#allocation5 + $0x118] sm:$0xff]   ;;  %v8594_v46 = vld [vmem:[#allocation5 + $0xf0] sm:$0xff]   ;;  %v8595_v44 = vld [vmem:[#allocation5 + $0xe8] sm:$0xff]  }
  0xc3   : > { %v992_v27 = vpack.c.bf16 %v444_v11, %v445_v14  ;;  %v442_v24 = vsel %vm434_vm4, %v425_v18, %v426_v7  ;;  %v443_v49 = vsel %vm434_vm4, %v13640_v33, %v425_v18  ;;  %v432_v36 = vrot.slane %v9367_v50, 1  ;;  %v8592_v41 = vld [vmem:[#allocation5 + $0xf8] sm:$0xff]   ;;  %v8596_v11 = vld [vmem:[#allocation5 + $0xe0] sm:$0xff]   ;;  %v8599_v14 = vld [vmem:[#allocation5 + $0xd0] sm:$0xff]  }
  0xc4   : > { %v438_v58 = vsel %vm434_vm4, %v429_v3, %v430_v20  ;;  %v437_v6 = vsel %vm434_vm4, %v430_v20, %v431_v61  ;;  %v433_v50 = vrot.slane %v8705_v40, 1  ;;  %7808 = vmatprep.subr.bf16.mxu0 %v8592_v41  ;;  %v8597_v31 = vld [vmem:[#allocation5 + $0xd8] sm:$0xff]  }
  0xc5   : > { %7733 = vmatmul.mubr.msk.bf16.gmra.mxu0 %vm9566_vm6, %v6786_v43  ;;  %v449_v43 = vsel %vm434_vm4, %v13631_v32, %v13630_v12  ;;  %v436_v29 = vsel %vm434_vm4, %v431_v61, %v432_v36  ;;  %v13641_v32 = vrot.slane %v9170_v13, 1  ;;  %v8590_v13 = vld [vmem:[#allocation5 + $0x110] sm:$0xff]   ;;  %v9740_v28 = vld [vmem:[#allocation5 + $0x178] sm:$0xff]  }
  0xc6   : > { %7736 = vmatprep.mubr.bf16.mxu0 %v986_v48  ;;  %v990_v48 = vpack.c.bf16 %v448_v15, %v449_v43  ;;  %v996_v0 = vpack.c.bf16 %v436_v29, %v437_v6  ;;  %v8585_v15 = vld [vmem:[#allocation5 + $0x138] sm:$0xff]   ;;  %v435_v12 = vsel %vm434_vm4, %v432_v36, %v433_v50  ;;  %7809 = vmatpush3.bf16.msra.mxu0 %v8592_v41 }
  0xc7   : > { %7760 = vmatprep.subr.bf16.mxu1 %v8585_v15  ;;  %v466_v43 = vsel %vm434_vm4, %v433_v50, %v13641_v32  ;;  %7810 = vmatprep.subr.bf16.mxu0 %v8594_v46 }
  0xc8   : > { %7761 = vmatpush3.bf16.msra.mxu1 %v8585_v15 }
  0xca   : > { %7811 = vmatpush3.bf16.msra.mxu0 %v8594_v46 }
  0xcb   : > { %7812 = vmatprep.subr.bf16.mxu0 %v8595_v44 }
  0xcd   : > { %7737 = vmatmul.mubr.msk.bf16.gmra.mxu0 %vm9566_vm6, %v6789_v57  ;;  %v427_v57 = vrot.slane %v9341_v56, 1  ;;  %v6798_v56 = vpack.c.bf16 %v442_v24, %v443_v49 }
  0xce   : > { %7740 = vmatprep.mubr.bf16.mxu0 %v988_v51  ;;  %v428_v51 = vrot.slane %v9344_v59, 1  ;;  %7813 = vmatpush3.bf16.msra.mxu0 %v8595_v44 }
  0xcf   : > { %v441_v39 = vsel %vm434_vm4, %v426_v7, %v427_v57  ;;  %7814 = vmatprep.subr.bf16.mxu0 %v8596_v11 }
  0xd0   : > { %v440_v37 = vsel %vm434_vm4, %v427_v57, %v428_v51  ;;  %v439_v30 = vsel %vm434_vm4, %v428_v51, %v429_v3  ;;  %v8605_v57 = vld [vmem:[#allocation5 + $0xc0] sm:$0xff]  }
  0xd1   : > { %v994_v59 = vpack.c.bf16 %v440_v37, %v441_v39  ;;  %v6801_v63 = vpack.c.bf16 %v438_v58, %v439_v30  ;;  %v9743_v37 = vld [vmem:[#allocation5 + $0x1f8] sm:$0xff]  }
  0xd2   : > { %7815 = vmatpush3.bf16.msra.mxu0 %v8596_v11  ;;  %13642 = vst [vmem:[#allocation35_spill] sm:$0xff] %v9743_v37 }
  0xd3   : > { %7816 = vmatprep.subr.bf16.mxu0 %v8597_v31 }
  0xd5   : > { %7741 = vmatmul.mubr.msk.bf16.gmra.mxu0 %vm9566_vm6, %v6792_v1  ;;  %v8586_v1 = vld [vmem:[#allocation5 + $0x130] sm:$0xff]  }
  0xd6   : > { %7744 = vmatprep.mubr.bf16.mxu0 %v990_v48  ;;  %7762 = vmatprep.subr.bf16.mxu1 %v8586_v1  ;;  %v6804_v48 = vpack.c.bf16 %v466_v43, %v435_v12 }
  0xd7   : > { %7763 = vmatpush3.bf16.msra.mxu1 %v8586_v1  ;;  %7817 = vmatpush3.bf16.msra.mxu0 %v8597_v31 }
  0xd8   : > { %7764 = vmatprep.subr.bf16.mxu1 %v8587_v62  ;;  %7818 = vmatprep.subr.bf16.mxu0 %v8599_v14 }
  0xdb   : > { %7765 = vmatpush3.bf16.msra.mxu1 %v8587_v62  ;;  %7819 = vmatpush3.bf16.msra.mxu0 %v8599_v14 }
  0xdc   : > { %7766 = vmatprep.subr.bf16.mxu1 %v8588_v42 }
  0xdd   : > { %7745 = vmatmul.mubr.msk.bf16.gmra.mxu0 %vm9566_vm6, %v6795_v23  ;;  %v8602_v23 = vld [vmem:[#allocation5 + $0xc8] sm:$0xff]  }
  0xde   : > { %7748 = vmatprep.mubr.bf16.mxu0 %v992_v27  ;;  %7820 = vmatprep.subr.bf16.mxu0 %v8602_v23 }
  0xdf   : > { %7767 = vmatpush3.bf16.msra.mxu1 %v8588_v42  ;;  %7821 = vmatpush3.bf16.msra.mxu0 %v8602_v23 }
  0xe0   : > { %7768 = vmatprep.subr.bf16.mxu1 %v8589_v47  ;;  %7822 = vmatprep.subr.bf16.mxu0 %v8605_v57 }
  0xe3   : > { %7769 = vmatpush3.bf16.msra.mxu1 %v8589_v47  ;;  %7823 = vmatpush3.bf16.msra.mxu0 %v8605_v57 }
  0xe4   : > { %7770 = vmatprep.subr.bf16.mxu1 %v8590_v13  ;;  %7904 = vmatprep.subr.bf16.mxu0 %v9743_v37 }
  0xe5   : > { %7749 = vmatmul.mubr.msk.bf16.gmra.mxu0 %vm9566_vm6, %v6798_v56 }
  0xe6   : > { %7752 = vmatprep.mubr.bf16.mxu0 %v994_v59 }
  0xe7   : > { %7771 = vmatpush3.bf16.msra.mxu1 %v8590_v13 }
  0xe8   : > { %7772 = vmatprep.subr.bf16.mxu1 %v8591_v5 }
  0xeb   : > { %7773 = vmatpush3.bf16.msra.mxu1 %v8591_v5 }
  0xec   : > { %7774 = vmatprep.subr.bf16.mxu1 %v8593_v2 }
  0xed   : > { %7753 = vmatmul.mubr.msk.bf16.gmra.mxu0 %vm9566_vm6, %v6801_v63 }
  0xee   : > { %7756 = vmatprep.mubr.bf16.mxu0 %v996_v0 }
  0xef   : > { %7775 = vmatpush3.bf16.msra.mxu1 %v8593_v2 }
  0xf0   : > { %7856 = vmatprep.subr.bf16.mxu1 %v9740_v28 }
  0xf5   : > { %7757 = vmatmul.mubr.msk.bf16.gmra.mxu0 %vm9566_vm6, %v6804_v48 }
 0x13d   : > { %v7634_v27 = vpop.f32.mrf.mxu0 }
 0x13e   : > { %v7682_v18 = vpop.f32.mrf.mxu1 }
 0x13f   : > { %v646_v7 = vpop.f32.mrf.mxu0  ;;  %v864_v26 = vadd.f32 %v7682_v18, %v7634_v27 }
 0x140   : > { %v855_v51 = vpop.f32.mrf.mxu1 }
 0x141   : > { %v7635_v24 = vpop.f32.mrf.mxu0  ;;  %v856_v4 = vadd.f32 %v855_v51, %v646_v7 }
 0x142   : > { %v7683_v33 = vpop.f32.mrf.mxu1 }
 0x143   : > { %v649_v49 = vpop.f32.mrf.mxu0  ;;  %v867_v25 = vadd.f32 %v7683_v33, %v7635_v24 }
 0x144   : > { %v858_v56 = vpop.f32.mrf.mxu1 }
 0x145   : > { %v9745_v39 = vpop.f32.mrf.mxu0  ;;  %v859_v53 = vadd.f32 %v858_v56, %v649_v49  ;;  %v8601_v56 = vld [vmem:[#allocation5 + $0x168] sm:$0xff]  }
 0x146   : > { %v9748_v20 = vpop.f32.mrf.mxu1 }
 0x147   : > { %v662_v59 = vpop.f32.mrf.mxu0 }
 0x148   : > { %v871_v58 = vpop.f32.mrf.mxu1 }
 0x149   : > { %v7639_v3 = vpop.f32.mrf.mxu0 }
 0x14a   : > { %v7687_v6 = vpop.f32.mrf.mxu1 }
 0x14b   : > { %v9750_v61 = vpop.f32.mrf.mxu0 }
 0x14c   : > { %v874_v40 = vpop.f32.mrf.mxu1 }
 0x14d   : > { %v9752_v36 = vpop.f32.mrf.mxu0 }
 0x14e   : > { %v9766_v12 = vpop.f32.mrf.mxu1 }
 0x14f   : > { %v9754_v30 = vpop.f32.mrf.mxu0 }
 0x150   : > { %v9772_v1 = vpop.f32.mrf.mxu1 }
 0x151   : > { %v9756_v29 = vpop.f32.mrf.mxu0 }
 0x152   : > { %v9778_v42 = vpop.f32.mrf.mxu1 }
 0x153   : > { %v9758_v63 = vpop.f32.mrf.mxu0 }
 0x154   : > { %v9784_v5 = vpop.f32.mrf.mxu1 }
 0x155   : > { %v9760_v0 = vpop.f32.mrf.mxu0 }
 0x156   : > { %v9790_v46 = vpop.f32.mrf.mxu1 }
 0x157   : > { %v9762_v50 = vpop.f32.mrf.mxu0 }
 0x158   : > { %v9796_v31 = vpop.f32.mrf.mxu1 }
 0x159   : > { %v9764_v15 = vpop.f32.mrf.mxu0 }
 0x15a   : > { %v9802_v57 = vpop.f32.mrf.mxu1 }
 0x15b   : > { %v9768_v32 = vpop.f32.mrf.mxu0 }
 0x15c   : > { %v9808_v16 = vpop.f32.mrf.mxu1 }
 0x15d   : > { %v9770_v43 = vpop.f32.mrf.mxu0 }
 0x15e   : > { %v9814_v60 = vpop.f32.mrf.mxu1 }
 0x15f   : > { %v9774_v48 = vpop.f32.mrf.mxu0 }
 0x160   : > { %v9818_v21 = vpop.f32.mrf.mxu1 }
 0x161   : > { %v9776_v62 = vpop.f32.mrf.mxu0 }
 0x162   : > { %v9820_v55 = vpop.f32.mrf.mxu1 }
 0x163   : > { %v9780_v47 = vpop.f32.mrf.mxu0 }
 0x164   : > { %v9833_v18 = vpop.f32.mrf.mxu1 }
 0x165   : > { %v9782_v13 = vpop.f32.mrf.mxu0 }
 0x166   : > { %v9845_v51 = vpop.f32.mrf.mxu1 }
 0x167   : > { %v9786_v2 = vpop.f32.mrf.mxu0 }
 0x169   : > { %v9788_v41 = vpop.f32.mrf.mxu0 }
 0x16b   : > { %v9792_v44 = vpop.f32.mrf.mxu0 }
 0x16d   : > { %v9794_v11 = vpop.f32.mrf.mxu0 }
 0x16f   : > { %v9798_v14 = vpop.f32.mrf.mxu0 }
 0x171   : > { %v9800_v23 = vpop.f32.mrf.mxu0 }
 0x173   : > { %v9804_v52 = vpop.f32.mrf.mxu0 }
 0x175   : > { %v9806_v38 = vpop.f32.mrf.mxu0 }
 0x176   : > { %13643 = vst [vmem:[#allocation36_spill] sm:$0xff] %v9806_v38 }
 0x177   : > { %v9810_v34 = vpop.f32.mrf.mxu0 }
 0x178   : > { %13644 = vst [vmem:[#allocation37_spill] sm:$0xff] %v9810_v34 }
 0x179   : > { %v9812_v8 = vpop.f32.mrf.mxu0 }
 0x17a   : > { %13645 = vst [vmem:[#allocation38_spill] sm:$0xff] %v9812_v8 }
 0x17b   : > { %v9816_v54 = vpop.f32.mrf.mxu0 }
 0x17c   : > { %13646 = vst [vmem:[#allocation39_spill] sm:$0xff] %v9816_v54 }
 0x17d   : > { %v7730_v35 = vpop.f32.mrf.mxu0 }
 0x17e   : > { %v1226_v37 = vadd.f32 %v7730_v35, %v864_v26  ;;  %v875_v35 = vadd.f32 %v874_v40, %v9750_v61  ;;  %v896_v40 = vadd.f32 %v9766_v12, %v9752_v36 }
 0x17f   : > { %v1097_v9 = vpop.f32.mrf.mxu0 }
 0x180   : > { %v1224_v45 = vadd.f32 %v1097_v9, %v856_v4  ;;  %v883_v4 = vadd.f32 %v7687_v6, %v7639_v3  ;;  %v8600_v9 = vld [vmem:[#allocation5 + $0x170] sm:$0xff]  }
 0x181   : > { %v7731_v19 = vpop.f32.mrf.mxu0 }
 0x182   : > { %v1227_v17 = vadd.f32 %v7731_v19, %v867_v25  ;;  %v9828_v34 = vadd.f32 %v9822_v10, %v1224_v45  ;;  %v9836_v19 = vadd.f32 %v9822_v10, %v1226_v37  ;;  %v872_v25 = vadd.f32 %v871_v58, %v662_v59 }
 0x183   : > { %v1100_v22 = vpop.f32.mrf.mxu0  ;;  %v899_v58 = vadd.f32 %v9778_v42, %v9756_v29 }
 0x184   : > { %v1225_v38 = vadd.f32 %v1100_v22, %v859_v53  ;;  %v9825_v54 = vadd.f32 %v9822_v10, %v1227_v17  ;;  %13648 = vst [vmem:[#allocation41_spill] sm:$0xff] %v9828_v34  ;;  %v880_v17 = vadd.f32 %v9748_v20, %v9745_v39  ;;  %v9857_v20 = vpop.f32.mrf.mxu1 }
 0x185   : > { %v7734_v8 = vpop.f32.mrf.mxu0 }
 0x186   : > { %13647 = vst [vmem:[#allocation40_spill] sm:$0xff] %v9825_v54  ;;  %v9831_v27 = vadd.f32 %v9822_v10, %v1225_v38  ;;  %v1553_v45 = vpack.c.bf16 %v9825_v54, %v9836_v19  ;;  %v1230_v24 = vadd.f32 %v7734_v8, %v880_v17  ;;  %v9874_v29 = vpop.f32.mrf.mxu1 }
 0x187   : > { %v1113_v26 = vpop.f32.mrf.mxu0 }
 0x188   : > { %13649 = vst [vmem:[#allocation42_spill] sm:$0xff] %v9831_v27  ;;  %v1552_v22 = vpack.c.bf16 %v9831_v27, %v9828_v34  ;;  %v1228_v38 = vadd.f32 %v1113_v26, %v872_v25  ;;  %v9860_v8 = vadd.f32 %v9822_v10, %v1230_v24  ;;  %v915_v24 = vadd.f32 %v9802_v57, %v9764_v15 }
 0x189   : > { %v7735_v53 = vpop.f32.mrf.mxu0 }
 0x18a   : > { %v1231_v7 = vadd.f32 %v7735_v53, %v883_v4  ;;  %7776 = vmatprep.mubr.bf16.mxu1 %v1552_v22  ;;  %v9852_v59 = vadd.f32 %v9822_v10, %v1228_v38  ;;  %13653 = vst [vmem:[#allocation46_spill] sm:$0xff] %v9860_v8  ;;  %v8603_v4 = vld [vmem:[#allocation5 + $0x160] sm:$0xff]   ;;  %v891_v22 = vadd.f32 %v9784_v5, %v9758_v63  ;;  %v8604_v53 = vld [vmem:[#allocation5 + $0x158] sm:$0xff]   ;;  %v9885_v5 = vpop.f32.mrf.mxu1 }
 0x18b   : > { %v1116_v33 = vpop.f32.mrf.mxu0  ;;  %7777 = vmatmul.mubr.bf16.vlgmr.msra.gmra.mxu1 %v1553_v45 }
 0x18c   : > { %v1229_v49 = vadd.f32 %v1116_v33, %v875_v35  ;;  %7857 = vmatpush3.bf16.msra.mxu1 %v9740_v28  ;;  %v9849_v37 = vadd.f32 %v9822_v10, %v1231_v7  ;;  %13651 = vst [vmem:[#allocation44_spill] sm:$0xff] %v9852_v59  ;;  %v888_v28 = vadd.f32 %v9772_v1, %v9754_v30  ;;  %v9902_v15 = vpop.f32.mrf.mxu1 }
 0x18d   : > { %v7738_v39 = vpop.f32.mrf.mxu0  ;;  %7858 = vmatprep.subr.bf16.mxu1 %v8600_v9  ;;  %v904_v7 = vadd.f32 %v9796_v31, %v9762_v50 }
 0x18e   : > { %13650 = vst [vmem:[#allocation43_spill] sm:$0xff] %v9849_v37  ;;  %v9855_v3 = vadd.f32 %v9822_v10, %v1229_v49  ;;  %v1555_v25 = vpack.c.bf16 %v9849_v37, %v9860_v8  ;;  %v1234_v42 = vadd.f32 %v7738_v39, %v896_v40  ;;  %v912_v49 = vadd.f32 %v9790_v46, %v9760_v0  ;;  %v8607_v40 = vld [vmem:[#allocation5 + $0x148] sm:$0xff]  }
 0x18f   : > { %v1129_v61 = vpop.f32.mrf.mxu0 }
 0x190   : > { %13652 = vst [vmem:[#allocation45_spill] sm:$0xff] %v9855_v3  ;;  %v1554_v6 = vpack.c.bf16 %v9855_v3, %v9852_v59  ;;  %7859 = vmatpush3.bf16.msra.mxu1 %v8600_v9  ;;  %v1232_v30 = vadd.f32 %v1129_v61, %v888_v28  ;;  %v9888_v35 = vadd.f32 %v9822_v10, %v1234_v42  ;;  %v8606_v61 = vld [vmem:[#allocation5 + $0x150] sm:$0xff]  }
 0x191   : > { %v7739_v26 = vpop.f32.mrf.mxu0  ;;  %7860 = vmatprep.subr.bf16.mxu1 %v8601_v56  ;;  %v907_v28 = vadd.f32 %v9808_v16, %v9768_v32  ;;  %v951_v32 = vpop.f32.mrf.mxu1  ;;  %v928_v42 = vadd.f32 %v9814_v60, %v9770_v43 }
 0x192   : > { %v1235_v1 = vadd.f32 %v7739_v26, %v899_v58  ;;  %7780 = vmatprep.mubr.bf16.mxu1 %v1554_v6  ;;  %v9880_v9 = vadd.f32 %v9822_v10, %v1232_v30  ;;  %13657 = vst [vmem:[#allocation50_spill] sm:$0xff] %v9888_v35  ;;  %v931_v30 = vadd.f32 %v9820_v55, %v9776_v62 }
 0x193   : > { %v1132_v17 = vpop.f32.mrf.mxu0  ;;  %7781 = vmatmul.mubr.bf16.gmra.mxu1 %v1555_v25  ;;  %v7707_v55 = vpop.f32.mrf.mxu1 }
 0x194   : > { %v1233_v45 = vadd.f32 %v1132_v17, %v891_v22  ;;  %7861 = vmatpush3.bf16.msra.mxu1 %v8601_v56  ;;  %v9877_v36 = vadd.f32 %v9822_v10, %v1235_v1  ;;  %13655 = vst [vmem:[#allocation48_spill] sm:$0xff] %v9880_v9  ;;  %v920_v22 = vadd.f32 %v9818_v21, %v9774_v48 }
 0x195   : > { %v7742_v12 = vpop.f32.mrf.mxu0  ;;  %7862 = vmatprep.subr.bf16.mxu1 %v8603_v4 }
 0x196   : > { %13654 = vst [vmem:[#allocation47_spill] sm:$0xff] %v9877_v36  ;;  %v9883_v63 = vadd.f32 %v9822_v10, %v1233_v45  ;;  %v1557_v56 = vpack.c.bf16 %v9877_v36, %v9888_v35  ;;  %v1238_v57 = vadd.f32 %v7742_v12, %v912_v49  ;;  %v8609_v12 = vld [vmem:[#allocation5 + $0x140] sm:$0xff]  }
 0x197   : > { %v1145_v38 = vpop.f32.mrf.mxu0 }
 0x198   : > { %13656 = vst [vmem:[#allocation49_spill] sm:$0xff] %v9883_v63  ;;  %v1556_v33 = vpack.c.bf16 %v9883_v63, %v9880_v9  ;;  %7863 = vmatpush3.bf16.msra.mxu1 %v8603_v4  ;;  %v1236_v50 = vadd.f32 %v1145_v38, %v904_v7  ;;  %v9914_v25 = vadd.f32 %v9822_v10, %v1238_v57 }
 0x199   : > { %v7743_v39 = vpop.f32.mrf.mxu0  ;;  %7864 = vmatprep.subr.bf16.mxu1 %v8604_v53 }
 0x19a   : > { %v1239_v31 = vadd.f32 %v7743_v39, %v915_v24  ;;  %7784 = vmatprep.mubr.bf16.mxu1 %v1556_v33  ;;  %v9908_v26 = vadd.f32 %v9822_v10, %v1236_v50  ;;  %13661 = vst [vmem:[#allocation54_spill] sm:$0xff] %v9914_v25  ;;  %v9931_v24 = vld [vmem:[#allocation5 + $0x1b8] sm:$0xff]   ;;  %v944_v50 = vadd.f32 %v9845_v51, %v9782_v13 }
 0x19b   : > { %v1148_v58 = vpop.f32.mrf.mxu0  ;;  %7785 = vmatmul.mubr.bf16.gmra.mxu1 %v1557_v56  ;;  %v936_v56 = vadd.f32 %v9857_v20, %v9786_v2 }
 0x19c   : > { %v1237_v6 = vadd.f32 %v1148_v58, %v907_v28  ;;  %7865 = vmatpush3.bf16.msra.mxu1 %v8604_v53  ;;  %v9905_v0 = vadd.f32 %v9822_v10, %v1239_v31  ;;  %13659 = vst [vmem:[#allocation52_spill] sm:$0xff] %v9908_v26  ;;  %v923_v53 = vadd.f32 %v9833_v18, %v9780_v47  ;;  %v954_v18 = vpop.f32.mrf.mxu1 }
 0x19d   : > { %v7746_v46 = vpop.f32.mrf.mxu0  ;;  %7866 = vmatprep.subr.bf16.mxu1 %v8606_v61  ;;  %v939_v58 = vadd.f32 %v9885_v5, %v9792_v44 }
 0x19e   : > { %13658 = vst [vmem:[#allocation51_spill] sm:$0xff] %v9905_v0  ;;  %v9911_v16 = vadd.f32 %v9822_v10, %v1237_v6  ;;  %v1559_v45 = vpack.c.bf16 %v9905_v0, %v9914_v25  ;;  %v1242_v62 = vadd.f32 %v7746_v46, %v928_v42 }
 0x19f   : > { %v1161_v4 = vpop.f32.mrf.mxu0 }
 0x1a0   : > { %13660 = vst [vmem:[#allocation53_spill] sm:$0xff] %v9911_v16  ;;  %v1558_v1 = vpack.c.bf16 %v9911_v16, %v9908_v26  ;;  %7867 = vmatpush3.bf16.msra.mxu1 %v8606_v61  ;;  %v1240_v21 = vadd.f32 %v1161_v4, %v920_v22  ;;  %v9940_v49 = vadd.f32 %v9822_v10, %v1242_v62 }
 0x1a1   : > { %v7747_v17 = vpop.f32.mrf.mxu0  ;;  %7868 = vmatprep.subr.bf16.mxu1 %v8607_v40  ;;  %v947_v61 = vadd.f32 %v9874_v29, %v9788_v41  ;;  %v7710_v41 = vpop.f32.mrf.mxu1 }
 0x1a2   : > { %v1243_v48 = vadd.f32 %v7747_v17, %v931_v30  ;;  %7788 = vmatprep.mubr.bf16.mxu1 %v1558_v1  ;;  %v9934_v33 = vadd.f32 %v9822_v10, %v1240_v21  ;;  %13665 = vst [vmem:[#allocation58_spill] sm:$0xff] %v9940_v49  ;;  %v952_v30 = vadd.f32 %v951_v32, %v9798_v14 }
 0x1a3   : > { %v1164_v38 = vpop.f32.mrf.mxu0  ;;  %7789 = vmatmul.mubr.bf16.gmra.mxu1 %v1559_v45  ;;  %v967_v22 = vpop.f32.mrf.mxu1  ;;  %v963_v1 = vadd.f32 %v7707_v55, %v9800_v23  ;;  %v960_v17 = vadd.f32 %v9902_v15, %v9794_v11 }
 0x1a4   : > { %v1241_v7 = vadd.f32 %v1164_v38, %v923_v53  ;;  %7869 = vmatpush3.bf16.msra.mxu1 %v8607_v40  ;;  %v9929_v60 = vadd.f32 %v9822_v10, %v1243_v48  ;;  %13663 = vst [vmem:[#allocation56_spill] sm:$0xff] %v9934_v33  ;;  %v955_v53 = vadd.f32 %v954_v18, %v9804_v52  ;;  %v13674_v18 = vld [vmem:[#allocation37_spill] sm:$0xff] }
 0x1a5   : > { %v7750_v43 = vpop.f32.mrf.mxu0  ;;  %7870 = vmatprep.subr.bf16.mxu1 %v8609_v12  ;;  %v7711_v62 = vpop.f32.mrf.mxu1 }
 0x1a6   : > { %13662 = vst [vmem:[#allocation55_spill] sm:$0xff] %v9929_v60  ;;  %v9937_v47 = vadd.f32 %v9822_v10, %v1241_v7  ;;  %v1561_v57 = vpack.c.bf16 %v9929_v60, %v9940_v49  ;;  %v1246_v29 = vadd.f32 %v7750_v43, %v944_v50  ;;  %v13676_v50 = vld [vmem:[#allocation36_spill] sm:$0xff] }
 0x1a7   : > { %v1177_v39 = vpop.f32.mrf.mxu0  ;;  %v970_v7 = vpop.f32.mrf.mxu1 }
 0x1a8   : > { %13664 = vst [vmem:[#allocation57_spill] sm:$0xff] %v9937_v47  ;;  %v1560_v28 = vpack.c.bf16 %v9937_v47, %v9934_v33  ;;  %7871 = vmatpush3.bf16.msra.mxu1 %v8609_v12  ;;  %v1244_v2 = vadd.f32 %v1177_v39, %v936_v56  ;;  %v9965_v44 = vadd.f32 %v9822_v10, %v1246_v29  ;;  %v13675_v56 = vld [vmem:[#allocation38_spill] sm:$0xff] }
 0x1a9   : > { %v7751_v31 = vpop.f32.mrf.mxu0  ;;  %7952 = vmatprep.subr.bf16.mxu1 %v9931_v24  ;;  %v968_v39 = vadd.f32 %v967_v22, %v13674_v18 }
 0x1aa   : > { %v1247_v20 = vadd.f32 %v7751_v31, %v947_v61  ;;  %7792 = vmatprep.mubr.bf16.mxu1 %v1560_v28  ;;  %v9959_v51 = vadd.f32 %v9822_v10, %v1244_v2  ;;  %13669 = vst [vmem:[#allocation62_spill] sm:$0xff] %v9965_v44  ;;  %v979_v61 = vadd.f32 %v7711_v62, %v13675_v56  ;;  %v13677_v2 = vld [vmem:[#allocation39_spill] sm:$0xff] }
 0x1ab   : > { %v1180_v6 = vpop.f32.mrf.mxu0  ;;  %7793 = vmatmul.mubr.bf16.gmra.mxu1 %v1561_v57  ;;  %v976_v31 = vadd.f32 %v7710_v41, %v13676_v50  ;;  %v1332_v41 = vrot.slane %v9855_v3, 7 }
 0x1ac   : > { %v1245_v46 = vadd.f32 %v1180_v6, %v939_v58  ;;  %v9956_v40 = vadd.f32 %v9822_v10, %v1247_v20  ;;  %13667 = vst [vmem:[#allocation60_spill] sm:$0xff] %v9959_v51  ;;  %v971_v20 = vadd.f32 %v970_v7, %v13677_v2 }
 0x1ad   : > { %v7754_v13 = vpop.f32.mrf.mxu0 }
 0x1ae   : > { %13666 = vst [vmem:[#allocation59_spill] sm:$0xff] %v9956_v40  ;;  %v9962_v4 = vadd.f32 %v9822_v10, %v1245_v46  ;;  %v1563_v12 = vpack.c.bf16 %v9956_v40, %v9965_v44  ;;  %v1250_v38 = vadd.f32 %v7754_v13, %v960_v17  ;;  %v1328_v46 = vrot.slane %v9831_v27, 7 }
 0x1af   : > { %v1193_v5 = vpop.f32.mrf.mxu0  ;;  %v1327_v17 = vrot.slane %v9828_v34, 7 }
 0x1b0   : > { %13668 = vst [vmem:[#allocation61_spill] sm:$0xff] %v9962_v4  ;;  %v1562_v42 = vpack.c.bf16 %v9962_v4, %v9959_v51  ;;  %v1248_v21 = vadd.f32 %v1193_v5, %v952_v30  ;;  %v9986_v52 = vadd.f32 %v9822_v10, %v1250_v38  ;;  %v1424_v5 = vrot.slane %v9831_v27, 1  ;;  %v10345_v27 = vld [vmem:[%s9157_s20 + $0x68] sm:$0xff] }
 0x1b1   : > { %v7755_v45 = vpop.f32.mrf.mxu0  ;;  %v1329_v30 = vrot.slane %v9836_v19, 7 }
 0x1b2   : > { %v1251_v48 = vadd.f32 %v7755_v45, %v963_v1  ;;  %7796 = vmatprep.mubr.bf16.mxu1 %v1562_v42  ;;  %v9980_v11 = vadd.f32 %v9822_v10, %v1248_v21  ;;  %13673 = vst [vmem:[#allocation66_spill] sm:$0xff] %v9986_v52  ;;  %v1330_v45 = vrot.slane %v9825_v54, 7  ;;  %v1331_v21 = vrot.slane %v9852_v59, 7 }
 0x1b3   : > { %v1196_v14 = vpop.f32.mrf.mxu0  ;;  %7797 = vmatmul.mubr.bf16.gmra.mxu1 %v1563_v12  ;;  %v1423_v12 = vrot.slane %v9828_v34, 1 }
 0x1b4   : > { %v1249_v23 = vadd.f32 %v1196_v14, %v955_v53  ;;  %v9977_v32 = vadd.f32 %v9822_v10, %v1251_v48  ;;  %13671 = vst [vmem:[#allocation64_spill] sm:$0xff] %v9980_v11  ;;  %v1425_v53 = vrot.slane %v9836_v19, 1  ;;  %v1385_v56 = vsel %vm337_vm1, %v1331_v21, %v1332_v41 }
 0x1b5   : > { %v7758_v55 = vpop.f32.mrf.mxu0  ;;  %v1387_v50 = vsel %vm337_vm1, %v1329_v30, %v1330_v45  ;;  %v1386_v2 = vsel %vm337_vm1, %v1330_v45, %v1331_v21  ;;  %v1335_v21 = vrot.slane %v9880_v9, 7 }
 0x1b6   : > { %13670 = vst [vmem:[#allocation63_spill] sm:$0xff] %v9977_v32  ;;  %v9983_v15 = vadd.f32 %v9822_v10, %v1249_v23  ;;  %v1565_v58 = vpack.c.bf16 %v9977_v32, %v9986_v52  ;;  %v1254_v13 = vadd.f32 %v7758_v55, %v976_v31  ;;  %v13682_v23 = vld [vmem:[#allocation15_spill] sm:$0xff]  ;;  %v1388_v55 = vsel %vm337_vm1, %v1328_v46, %v1329_v30 }
 0x1b7   : > { %v1209_v43 = vpop.f32.mrf.mxu0  ;;  %v1484_v7 = vsel %vm434_vm4, %v1424_v5, %v1425_v53  ;;  %v1427_v31 = vrot.slane %v9852_v59, 1  ;;  %v1333_v30 = vrot.slane %v9860_v8, 7  ;;  %vm2389_vm7 = vcmp.lt.s32.totalorder %v13682_v23, 2  ;;  %v10401_v59 = vld [vmem:[%s9157_s20 + $0xa8] sm:$0xff] }
 0x1b8   : > { %13672 = vst [vmem:[#allocation65_spill] sm:$0xff] %v9983_v15  ;;  %v1564_v28 = vpack.c.bf16 %v9983_v15, %v9980_v11  ;;  %v1252_v29 = vadd.f32 %v1209_v43, %v968_v39  ;;  %v10016_v14 = vadd.f32 %v9822_v10, %v1254_v13  ;;  %v1485_v43 = vsel %vm434_vm4, %v1423_v12, %v1424_v5  ;;  %v13684_v5 = vld [vmem:[#allocation35_spill] sm:$0xff] }
 0x1b9   : > { %v7759_v57 = vpop.f32.mrf.mxu0  ;;  %v1389_v39 = vsel %vm337_vm1, %v1327_v17, %v1328_v46  ;;  %v1428_v46 = vrot.slane %v9855_v3, 1  ;;  %v1426_v13 = vrot.slane %v9825_v54, 1  ;;  %vm2349_vm8 = vcmp.ge.s32.totalorder %v13682_v23, 2  ;;  %v10337_v3 = vld [vmem:[%s9157_s20 + $0x58] sm:$0xff] }
 0x1ba   : > { %v1255_v6 = vadd.f32 %v7759_v57, %v979_v61  ;;  %7800 = vmatprep.mubr.bf16.mxu1 %v1564_v28  ;;  %v10009_v48 = vadd.f32 %v9822_v10, %v1252_v29  ;;  %13681 = vst [vmem:[#allocation39_spill] sm:$0xff] %v10016_v14  ;;  %v1520_v57 = vpack.c.bf16 %v1387_v50, %v1388_v55  ;;  %v8611_v55 = vld [vmem:[#allocation5 + $0x1e8] sm:$0xff]   ;;  %vm10277_vm9 = vmpackc.low %vm8994_vm2, %vm2349_vm8  ;;  %v10421_v54 = vld [vmem:[%s9157_s20 + $0xb8] sm:$0xff]  ;;  %vm2486_vm10 = vcmp.lt.s32.totalorder %v13682_v23, 6 }
 0x1bb   : > { %v1212_v22 = vpop.f32.mrf.mxu0  ;;  %7801 = vmatmul.mubr.bf16.gmra.mxu1 %v1565_v58  ;;  %v2003_v58 = vpack.c.bf16 %v1484_v7, %v1485_v43  ;;  %v1482_v45 = vsel %vm434_vm4, %v1426_v13, %v1427_v31  ;;  %v1384_v7 = vsel %vm337_vm1, %v1332_v41, %v1333_v30  ;;  %v2380_v34 = vrot.slane %v10421_v54, 6 }
 0x1bc   : > { %v10001_v1 = vadd.f32 %v9822_v10, %v1255_v6  ;;  %v1253_v42 = vadd.f32 %v1212_v22, %v971_v20  ;;  %13679 = vst [vmem:[#allocation38_spill] sm:$0xff] %v10009_v48  ;;  %v8610_v20 = vld [vmem:[#allocation5 + $0x1f0] sm:$0xff]   ;;  %v6827_v6 = vpack.c.bf16 %v1385_v56, %v1386_v2  ;;  %v1336_v22 = vrot.slane %v9883_v63, 7 }
 0x1bd   : > { %v1432_v2 = vrot.slane %v9883_v63, 1  ;;  %vm6556_vm8 = vcmask 1046534  }
 0x1be   : > { %13678 = vst [vmem:[#allocation37_spill] sm:$0xff] %v10001_v1  ;;  %v1358_v62 = vrot.slane %v10001_v1, 7  ;;  %v10013_v38 = vadd.f32 %v9822_v10, %v1253_v42  ;;  %v1567_v61 = vpack.c.bf16 %v10001_v1, %v10016_v14  ;;  %v1334_v42 = vrot.slane %v9849_v37, 7 }
 0x1c0   : > { %13680 = vst [vmem:[#allocation36_spill] sm:$0xff] %v10013_v38  ;;  %v1566_v18 = vpack.c.bf16 %v10013_v38, %v10009_v48  ;;  %v1390_v10 = vsel %vm337_vm1, %v1358_v62, %v1327_v17  ;;  %v1429_v17 = vrot.slane %v9860_v8, 1  ;;  %v10417_v8 = vld [vmem:[%s9157_s20 + $0xb0] sm:$0xff] }
 0x1c1   : > { %v6824_v28 = vpack.c.bf16 %v1389_v39, %v1390_v10  ;;  %v1483_v39 = vsel %vm434_vm4, %v1425_v53, %v1426_v13  ;;  %v1381_v10 = vsel %vm337_vm1, %v1335_v21, %v1336_v22  ;;  %v1337_v13 = vrot.slane %v9888_v35, 7 }
 0x1c2   : > { %7804 = vmatprep.mubr.bf16.mxu1 %v1566_v18  ;;  %v1480_v43 = vsel %vm434_vm4, %v1428_v46, %v1429_v17  ;;  %v1481_v18 = vsel %vm434_vm4, %v1427_v31, %v1428_v46  ;;  %v6856_v56 = vpack.c.bf16 %v1482_v45, %v1483_v39  ;;  %v8612_v31 = vld [vmem:[#allocation5 + $0x1e0] sm:$0xff]   ;;  %v1430_v46 = vrot.slane %v9849_v37, 1 }
 0x1c3   : > { %7805 = vmatmul.mubr.bf16.gmra.mxu1 %v1567_v61  ;;  %7824 = vmatprep.mubr.msk.bf16.mxu0 %vm9191_vm3, %v6824_v28  ;;  %v1383_v61 = vsel %vm337_vm1, %v1333_v30, %v1334_v42  ;;  %v1431_v28 = vrot.slane %v9880_v9, 1  ;;  %v2005_v50 = vpack.c.bf16 %v1480_v43, %v1481_v18  ;;  %v1433_v30 = vrot.slane %v9888_v35, 1  ;;  %v10393_v35 = vld [vmem:[%s9157_s20 + $0x98] sm:$0xff] }
 0x1c4   : > { %7825 = vmatmul.mubr.bf16.vlgmr.msra.gmra.mxu0 %v1520_v57  ;;  %7872 = vmatprep.mubr.bf16.mxu1 %v2003_v58  ;;  %v1522_v41 = vpack.c.bf16 %v1383_v61, %v1384_v7  ;;  %v1382_v57 = vsel %vm337_vm1, %v1334_v42, %v1335_v21  ;;  %v1339_v42 = vrot.slane %v9908_v26, 7  ;;  %v8613_v21 = vld [vmem:[#allocation5 + $0x1d8] sm:$0xff]   ;;  %v1380_v7 = vsel %vm337_vm1, %v1336_v22, %v1337_v13 }
 0x1c5   : > { %7828 = vmatprep.mubr.msk.bf16.mxu0 %vm9191_vm3, %v6827_v6  ;;  %7905 = vmatpush3.bf16.msra.mxu0 %v13684_v5  ;;  %v6830_v53 = vpack.c.bf16 %v1381_v10, %v1382_v57  ;;  %v8616_v6 = vld [vmem:[#allocation5 + $0x1b0] sm:$0xff]   ;;  %v1338_v5 = vrot.slane %v9877_v36, 7  ;;  %v1478_v45 = vsel %vm434_vm4, %v1430_v46, %v1431_v28  ;;  %v1476_v43 = vsel %vm434_vm4, %v1432_v2, %v1433_v30 }
 0x1c6   : > { %7906 = vmatprep.subr.bf16.mxu0 %v8610_v20  ;;  %v1477_v18 = vsel %vm434_vm4, %v1431_v28, %v1432_v2  ;;  %v1479_v39 = vsel %vm434_vm4, %v1429_v17, %v1430_v46  ;;  %v1435_v22 = vrot.slane %v9908_v26, 1  ;;  %v1436_v57 = vrot.slane %v9911_v16, 1 }
 0x1c7   : > { %v1378_v28 = vsel %vm337_vm1, %v1338_v5, %v1339_v42  ;;  %v1344_v2 = vrot.slane %v9937_v47, 7  ;;  %v1341_v46 = vrot.slane %v9914_v25, 7 }
 0x1c9   : > { %7907 = vmatpush3.bf16.msra.mxu0 %v8610_v20  ;;  %v1340_v20 = vrot.slane %v9911_v16, 7  ;;  %v10333_v16 = vld [vmem:[%s9157_s20 + $0x50] sm:$0xff] }
 0x1ca   : > { %7908 = vmatprep.subr.bf16.mxu0 %v8611_v55  ;;  %v2367_v63 = vrot.slane %v10333_v16, 6 }
 0x1cb   : > { %7873 = vmatmul.mubr.msk.bf16.vlgmr.msra.gmra.mxu1 %vm9566_vm6, %v6856_v56  ;;  %v1377_v10 = vsel %vm337_vm1, %v1339_v42, %v1340_v20  ;;  %v6859_v56 = vpack.c.bf16 %v1478_v45, %v1479_v39  ;;  %v8618_v45 = vld [vmem:[#allocation5 + $0x1c8] sm:$0xff]   ;;  %v8620_v39 = vld [vmem:[#allocation5 + $0x198] sm:$0xff]  }
 0x1cc   : > { %7829 = vmatmul.mubr.bf16.gmra.mxu0 %v1522_v41  ;;  %7876 = vmatprep.mubr.bf16.mxu1 %v2005_v50  ;;  %v2007_v41 = vpack.c.bf16 %v1476_v43, %v1477_v18  ;;  %v8615_v50 = vld [vmem:[#allocation5 + $0x1d0] sm:$0xff]   ;;  %v6833_v17 = vpack.c.bf16 %v1377_v10, %v1378_v28  ;;  %v1473_v18 = vsel %vm434_vm4, %v1435_v22, %v1436_v57  ;;  %v1440_v28 = vrot.slane %v9937_v47, 1 }
 0x1cd   : > { %7832 = vmatprep.mubr.msk.bf16.mxu0 %vm9191_vm3, %v6830_v53  ;;  %7909 = vmatpush3.bf16.msra.mxu0 %v8611_v55  ;;  %v8617_v55 = vld [vmem:[#allocation5 + $0x1a8] sm:$0xff]   ;;  %v8619_v53 = vld [vmem:[#allocation5 + $0x1a0] sm:$0xff]  }
 0x1ce   : > { %7910 = vmatprep.subr.bf16.mxu0 %v8612_v31  ;;  %7953 = vmatpush3.bf16.msra.mxu1 %v9931_v24  ;;  %v1379_v24 = vsel %vm337_vm1, %v1337_v13, %v1338_v5  ;;  %v1437_v13 = vrot.slane %v9914_v25, 1  ;;  %v1343_v5 = vrot.slane %v9934_v33, 7  ;;  %v10373_v25 = vld [vmem:[%s9157_s20 + $0x88] sm:$0xff] }
 0x1cf   : > { %7954 = vmatprep.subr.bf16.mxu1 %v8616_v6  ;;  %v1524_v61 = vpack.c.bf16 %v1379_v24, %v1380_v7  ;;  %v1376_v7 = vsel %vm337_vm1, %v1340_v20, %v1341_v46  ;;  %v1439_v20 = vrot.slane %v9934_v33, 1 }
 0x1d0   : > { %v1472_v43 = vsel %vm434_vm4, %v1436_v57, %v1437_v13  ;;  %v1373_v10 = vsel %vm337_vm1, %v1343_v5, %v1344_v2  ;;  %v1348_v57 = vrot.slane %v9962_v4, 7 }
 0x1d1   : > { %7911 = vmatpush3.bf16.msra.mxu0 %v8612_v31  ;;  %v1434_v31 = vrot.slane %v9877_v36, 1 }
 0x1d2   : > { %7912 = vmatprep.subr.bf16.mxu0 %v8613_v21  ;;  %7955 = vmatpush3.bf16.msra.mxu1 %v8616_v6  ;;  %v1342_v6 = vrot.slane %v9905_v0, 7 }
 0x1d3   : > { %7877 = vmatmul.mubr.msk.bf16.gmra.mxu1 %vm9566_vm6, %v6859_v56  ;;  %7956 = vmatprep.subr.bf16.mxu1 %v8617_v55  ;;  %v1474_v42 = vsel %vm434_vm4, %v1434_v31, %v1435_v22 }
 0x1d4   : > { %7833 = vmatmul.mubr.bf16.gmra.mxu0 %v1524_v61  ;;  %7880 = vmatprep.mubr.bf16.mxu1 %v2007_v41  ;;  %v2009_v61 = vpack.c.bf16 %v1472_v43, %v1473_v18  ;;  %v1374_v22 = vsel %vm337_vm1, %v1342_v6, %v1343_v5  ;;  %v8621_v41 = vld [vmem:[#allocation5 + $0x1c0] sm:$0xff]   ;;  %v1469_v18 = vsel %vm434_vm4, %v1439_v20, %v1440_v28 }
 0x1d5   : > { %7836 = vmatprep.mubr.msk.bf16.mxu0 %vm9191_vm3, %v6833_v17  ;;  %7913 = vmatpush3.bf16.msra.mxu0 %v8613_v21  ;;  %v1475_v21 = vsel %vm434_vm4, %v1433_v30, %v1434_v31  ;;  %v6836_v30 = vpack.c.bf16 %v1373_v10, %v1374_v22  ;;  %v8622_v17 = vld [vmem:[#allocation5 + $0x190] sm:$0xff]   ;;  %v1346_v31 = vrot.slane %v9929_v60, 7  ;;  %v8625_v22 = vld [vmem:[#allocation5 + $0x180] sm:$0xff]  }
 0x1d6   : > { %7914 = vmatprep.subr.bf16.mxu0 %v8615_v50  ;;  %7957 = vmatpush3.bf16.msra.mxu1 %v8617_v55  ;;  %v6862_v56 = vpack.c.bf16 %v1474_v42, %v1475_v21  ;;  %v1375_v55 = vsel %vm337_vm1, %v1341_v46, %v1342_v6  ;;  %v1441_v46 = vrot.slane %v9940_v49, 1  ;;  %v1347_v6 = vrot.slane %v9959_v51, 7  ;;  %v10142_v42 = vld [vmem:[#allocation5 + $0x238] sm:$0xff]  }
 0x1d7   : > { %7958 = vmatprep.subr.bf16.mxu1 %v8619_v53  ;;  %v1526_v24 = vpack.c.bf16 %v1375_v55, %v1376_v7 }
 0x1d8   : > { %v1468_v43 = vsel %vm434_vm4, %v1440_v28, %v1441_v46  ;;  %v1369_v10 = vsel %vm337_vm1, %v1347_v6, %v1348_v57  ;;  %v1349_v28 = vrot.slane %v9965_v44, 7 }
 0x1d9   : > { %7915 = vmatpush3.bf16.msra.mxu0 %v8615_v50  ;;  %v1438_v50 = vrot.slane %v9905_v0, 1  ;;  %v10365_v0 = vld [vmem:[%s9157_s20 + $0x78] sm:$0xff] }
 0x1da   : > { %7916 = vmatprep.subr.bf16.mxu0 %v8618_v45  ;;  %7959 = vmatpush3.bf16.msra.mxu1 %v8619_v53  ;;  %v1345_v53 = vrot.slane %v9940_v49, 7 }
 0x1db   : > { %7881 = vmatmul.mubr.msk.bf16.gmra.mxu1 %vm9566_vm6, %v6862_v56  ;;  %7960 = vmatprep.subr.bf16.mxu1 %v8620_v39  ;;  %v1470_v5 = vsel %vm434_vm4, %v1438_v50, %v1439_v20  ;;  %v1471_v21 = vsel %vm434_vm4, %v1437_v13, %v1438_v50  ;;  %v1370_v20 = vsel %vm337_vm1, %v1346_v31, %v1347_v6  ;;  %v1445_v50 = vrot.slane %v9965_v44, 1 }
 0x1dc   : > { %7837 = vmatmul.mubr.bf16.gmra.mxu0 %v1526_v24  ;;  %7884 = vmatprep.mubr.bf16.mxu1 %v2009_v61  ;;  %v1372_v7 = vsel %vm337_vm1, %v1344_v2, %v1345_v53  ;;  %v1371_v56 = vsel %vm337_vm1, %v1345_v53, %v1346_v31  ;;  %v1443_v2 = vrot.slane %v9959_v51, 1  ;;  %v2011_v24 = vpack.c.bf16 %v1468_v43, %v1469_v18 }
 0x1dd   : > { %7840 = vmatprep.mubr.msk.bf16.mxu0 %vm9191_vm3, %v6836_v30  ;;  %7917 = vmatpush3.bf16.msra.mxu0 %v8618_v45  ;;  %v8623_v45 = vld [vmem:[#allocation5 + $0x188] sm:$0xff]   ;;  %v1528_v55 = vpack.c.bf16 %v1371_v56, %v1372_v7  ;;  %v6839_v13 = vpack.c.bf16 %v1369_v10, %v1370_v20  ;;  %v1444_v61 = vrot.slane %v9962_v4, 1  ;;  %v1352_v30 = vrot.slane %v9983_v15, 7  ;;  %v10361_v4 = vld [vmem:[%s9157_s20 + $0x70] sm:$0xff] }
 0x1de   : > { %7918 = vmatprep.subr.bf16.mxu0 %v8621_v41  ;;  %7961 = vmatpush3.bf16.msra.mxu1 %v8620_v39  ;;  %v6865_v39 = vpack.c.bf16 %v1470_v5, %v1471_v21  ;;  %v1351_v53 = vrot.slane %v9980_v11, 7  ;;  %v1368_v6 = vsel %vm337_vm1, %v1348_v57, %v1349_v28  ;;  %v1447_v10 = vrot.slane %v9980_v11, 1 }
 0x1df   : > { %7962 = vmatprep.subr.bf16.mxu1 %v8622_v17  ;;  %v1464_v5 = vsel %vm434_vm4, %v1444_v61, %v1445_v50  ;;  %v1465_v7 = vsel %vm434_vm4, %v1443_v2, %v1444_v61  ;;  %v1353_v20 = vrot.slane %v9986_v52, 7  ;;  %v1449_v61 = vrot.slane %v9986_v52, 1 }
 0x1e0   : > { %v1365_v18 = vsel %vm337_vm1, %v1351_v53, %v1352_v30  ;;  %v2371_v47 = vrot.slane %v10361_v4, 6 }
 0x1e1   : > { %7919 = vmatpush3.bf16.msra.mxu0 %v8621_v41  ;;  %v1442_v41 = vrot.slane %v9929_v60, 1 }
 0x1e2   : > { %7963 = vmatpush3.bf16.msra.mxu1 %v8622_v17  ;;  %8000 = vmatprep.subr.bf16.mxu0 %v10142_v42  ;;  %v1350_v17 = vrot.slane %v9956_v40, 7 }
 0x1e3   : > { %7885 = vmatmul.mubr.msk.bf16.gmra.mxu1 %vm9566_vm6, %v6865_v39  ;;  %7964 = vmatprep.subr.bf16.mxu1 %v8623_v45  ;;  %v1466_v31 = vsel %vm434_vm4, %v1442_v41, %v1443_v2  ;;  %v1467_v43 = vsel %vm434_vm4, %v1441_v46, %v1442_v41  ;;  %v2013_v39 = vpack.c.bf16 %v1464_v5, %v1465_v7  ;;  %v1448_v46 = vrot.slane %v9983_v15, 1 }
 0x1e4   : > { %7841 = vmatmul.mubr.bf16.gmra.mxu0 %v1528_v55  ;;  %7888 = vmatprep.mubr.bf16.mxu1 %v2011_v24  ;;  %v6868_v21 = vpack.c.bf16 %v1466_v31, %v1467_v43  ;;  %v1366_v56 = vsel %vm337_vm1, %v1350_v17, %v1351_v53  ;;  %v1446_v55 = vrot.slane %v9956_v40, 1  ;;  %v1356_v24 = vrot.slane %v10013_v38, 7 }
 0x1e5   : > { %7844 = vmatprep.mubr.msk.bf16.mxu0 %vm9191_vm3, %v6839_v13  ;;  %v6842_v2 = vpack.c.bf16 %v1365_v18, %v1366_v56  ;;  %v1354_v13 = vrot.slane %v9977_v32, 7  ;;  %v1461_v53 = vsel %vm434_vm4, %v1447_v10, %v1448_v46  ;;  %v1451_v43 = vrot.slane %v10009_v48, 1 }
 0x1e6   : > { %7965 = vmatpush3.bf16.msra.mxu1 %v8623_v45  ;;  %v1367_v45 = vsel %vm337_vm1, %v1349_v28, %v1350_v17  ;;  %v1462_v41 = vsel %vm434_vm4, %v1446_v55, %v1447_v10  ;;  %v1364_v28 = vsel %vm337_vm1, %v1352_v30, %v1353_v20  ;;  %v1460_v17 = vsel %vm434_vm4, %v1448_v46, %v1449_v61 }
 0x1e7   : > { %7966 = vmatprep.subr.bf16.mxu1 %v8625_v22  ;;  %v1530_v57 = vpack.c.bf16 %v1367_v45, %v1368_v6  ;;  %v1463_v31 = vsel %vm434_vm4, %v1445_v50, %v1446_v55  ;;  %v1363_v7 = vsel %vm337_vm1, %v1353_v20, %v1354_v13  ;;  %v2015_v30 = vpack.c.bf16 %v1460_v17, %v1461_v53  ;;  %v10235_v20 = vld [vmem:[%s9157_s20] sm:$0xff]  ;;  %v10247_v17 = vld [vmem:[%s9157_s20 + $0xf8] sm:$0xff] }
 0x1e8   : > { %v6871_v5 = vpack.c.bf16 %v1462_v41, %v1463_v31  ;;  %v1532_v18 = vpack.c.bf16 %v1363_v7, %v1364_v28  ;;  %v1452_v50 = vrot.slane %v10013_v38, 1  ;;  %v1450_v10 = vrot.slane %v9977_v32, 1  ;;  %v8631_v38 = vld [vmem:[#allocation5 + $0x208] sm:$0xff]  }
 0x1e9   : > { %v13436_v53 = vrot.slane %v10247_v17, 6 }
 0x1ea   : > { %7967 = vmatpush3.bf16.msra.mxu1 %v8625_v22  ;;  %v1355_v22 = vrot.slane %v10009_v48, 7  ;;  %v1458_v56 = vsel %vm434_vm4, %v1450_v10, %v1451_v43  ;;  %v1457_v55 = vsel %vm434_vm4, %v1451_v43, %v1452_v50  ;;  %v1459_v29 = vsel %vm434_vm4, %v1449_v61, %v1450_v10 }
 0x1eb   : > { %7889 = vmatmul.mubr.msk.bf16.gmra.mxu1 %vm9566_vm6, %v6868_v21  ;;  %v1454_v61 = vrot.slane %v10001_v1, 1 }
 0x1ec   : > { %7845 = vmatmul.mubr.bf16.gmra.mxu0 %v1530_v57  ;;  %7892 = vmatprep.mubr.bf16.mxu1 %v2013_v39  ;;  %v1361_v6 = vsel %vm337_vm1, %v1355_v22, %v1356_v24  ;;  %v1362_v21 = vsel %vm337_vm1, %v1354_v13, %v1355_v22  ;;  %v1357_v57 = vrot.slane %v10016_v14, 7  ;;  %v1453_v39 = vrot.slane %v10016_v14, 1 }
 0x1ed   : > { %7848 = vmatprep.mubr.msk.bf16.mxu0 %vm9191_vm3, %v6842_v2  ;;  %v6845_v45 = vpack.c.bf16 %v1361_v6, %v1362_v21  ;;  %v2357_v13 = vrot.slane %v10235_v20, 6  ;;  %v6874_v22 = vpack.c.bf16 %v1458_v56, %v1459_v29  ;;  %v10269_v21 = vld [vmem:[%s9157_s20 + $0x10] sm:$0xff]  ;;  %v10282_v56 = vld [vmem:[%s9157_s20 + $0x20] sm:$0xff] }
 0x1ee   : > { %v1360_v2 = vsel %vm337_vm1, %v1356_v24, %v1357_v57  ;;  %v1456_v46 = vsel %vm434_vm4, %v1452_v50, %v1453_v39  ;;  %v1359_v41 = vsel %vm337_vm1, %v1357_v57, %v1358_v62  ;;  %v10243_v24 = vld [vmem:[%s9157_s20 + $0x8] sm:$0xff]  ;;  %v13686_v62 = vld [vmem:[#allocation16_spill] sm:$0xff]  ;;  %v1455_v43 = vsel %vm434_vm4, %v1453_v39, %v1454_v61 }
 0x1ef   : > { %v2358_v28 = vrot.slane %v10243_v24, 6  ;;  %v1534_v31 = vpack.c.bf16 %v1359_v41, %v1360_v2  ;;  %v2017_v6 = vpack.c.bf16 %v1456_v46, %v1457_v55  ;;  %v2421_v7 = vsel %vm2389_vm7, %v13436_v53, %v2357_v13  ;;  %v10273_v50 = vld [vmem:[%s9157_s20 + $0x18] sm:$0xff]  ;;  %v10286_v2 = vld [vmem:[%s9157_s20 + $0x28] sm:$0xff]  ;;  %v8626_v55 = vld [vmem:[#allocation5 + $0x230] sm:$0xff]  }
 0x1f0   : > { %v2360_v10 = vrot.slane %v10273_v50, 6  ;;  %v13687_v39 = vmov 0  ;;  %v2362_v46 = vrot.slane %v10286_v2, 6  ;;  %v13690_v29 = vld [vmem:[#allocation18_spill] sm:$0xff]  ;;  %v13691_v41 = vld [vmem:[#allocation20_spill] sm:$0xff] }
 0x1f1   : > { %v13688_v39 = vsel %vm10277_vm9, 4294967295, %v13687_v39 }
 0x1f2   : > { %13689 = vst [vmem:[#allocation17_spill] sm:$0xff] %v13688_v39 }
 0x1f3   : > { %7893 = vmatmul.mubr.msk.bf16.gmra.mxu1 %vm9566_vm6, %v6871_v5  ;;  %v2420_v5 = vsel %vm2389_vm7, %v2357_v13, %v2358_v28 }
 0x1f4   : > { %7849 = vmatmul.mubr.bf16.gmra.mxu0 %v1532_v18  ;;  %7896 = vmatprep.mubr.bf16.mxu1 %v2015_v30  ;;  %v1486_v18 = vsel %vm434_vm4, %v1454_v61, %v1423_v12  ;;  %v6897_v30 = vpack.c.bf16 %v2420_v5, %v2421_v7  ;;  %v2361_v12 = vrot.slane %v10282_v56, 6  ;;  %v10305_v7 = vld [vmem:[%s9157_s20 + $0x30] sm:$0xff]  ;;  %vm6548_vm4 = vcmask 1042434  }
 0x1f5   : > { %7852 = vmatprep.mubr.msk.bf16.mxu0 %vm9191_vm3, %v6845_v45  ;;  %v2359_v45 = vrot.slane %v10269_v21, 6  ;;  %v6877_v57 = vpack.c.bf16 %v1486_v18, %v1455_v43  ;;  %v2363_v43 = vrot.slane %v10305_v7, 6  ;;  %v10313_v18 = vld [vmem:[%s9157_s20 + $0x40] sm:$0xff] }
 0x1f6   : > { %v2416_v58 = vsel %vm2389_vm7, %v2361_v12, %v2362_v46  ;;  %v2417_v61 = vsel %vm2389_vm7, %v2360_v10, %v2361_v12  ;;  %v13692_v12 = vld [vmem:[#allocation21_spill] sm:$0xff] }
 0x1f7   : > { %v2418_v13 = vsel %vm2389_vm7, %v2359_v45, %v2360_v10  ;;  %v6900_v5 = vpack.c.bf16 %v2416_v58, %v2417_v61 }
 0x1fb   : > { %7897 = vmatmul.mubr.msk.bf16.gmra.mxu1 %vm9566_vm6, %v6874_v22  ;;  %v2419_v22 = vsel %vm2389_vm7, %v2358_v28, %v2359_v45  ;;  %v10309_v28 = vld [vmem:[%s9157_s20 + $0x38] sm:$0xff]  ;;  %v10317_v45 = vld [vmem:[%s9157_s20 + $0x48] sm:$0xff] }
 0x1fc   : > { %7853 = vmatmul.mubr.bf16.gmra.mxu0 %v1534_v31  ;;  %7900 = vmatprep.mubr.bf16.mxu1 %v2017_v6  ;;  %v8627_v31 = vld [vmem:[#allocation5 + $0x228] sm:$0xff]   ;;  %v2552_v6 = vpack.c.bf16 %v2418_v13, %v2419_v22  ;;  %v2366_v10 = vrot.slane %v10317_v45, 6  ;;  %v2415_v13 = vsel %vm2389_vm7, %v2362_v46, %v2363_v43  ;;  %v2368_v46 = vrot.slane %v10337_v3, 6 }
 0x1fd   : > { %7920 = vmatprep.mubr.bf16.mxu0 %v13686_v62  ;;  %v13693_v22 = vld [vmem:[#allocation22_spill] sm:$0xff]  ;;  %v13705_v62 = vld [vmem:[#allocation33_spill] sm:$0xff] }
 0x203   : > { %7901 = vmatmul.mubr.msk.bf16.gmra.mxu1 %vm9566_vm6, %v6877_v57  ;;  %v8628_v57 = vld [vmem:[#allocation5 + $0x220] sm:$0xff]   ;;  %vm6552_vm6 = vcmask 1044484  }
 0x204   : > { %7921 = vmatmul.mubr.bf16.vlgmr.msra.gmra.mxu0 %v13690_v29  ;;  %7968 = vmatprep.mubr.msk.bf16.mxu1 %vm10277_vm9, %v6897_v30  ;;  %v2365_v30 = vrot.slane %v10313_v18, 6 }
 0x205   : > { %8001 = vmatpush3.bf16.msra.mxu0 %v10142_v42  ;;  %7924 = vmatprep.mubr.bf16.mxu0 %v13691_v41  ;;  %v2364_v42 = vrot.slane %v10309_v28, 6  ;;  %v10483_v41 = vld [vmem:[%s9157_s20 + $0xf0] sm:$0xff] }
 0x206   : > { %8002 = vmatprep.subr.bf16.mxu0 %v8626_v55  ;;  %v2412_v58 = vsel %vm2389_vm7, %v2365_v30, %v2366_v10 }
 0x207   : > { %v2413_v61 = vsel %vm2389_vm7, %v2364_v42, %v2365_v30  ;;  %v8630_v30 = vld [vmem:[#allocation5 + $0x210] sm:$0xff]  }
 0x208   : > { %v6903_v53 = vpack.c.bf16 %v2412_v58, %v2413_v61  ;;  %v13695_v58 = vld [vmem:[#allocation24_spill] sm:$0xff] }
 0x209   : > { %8003 = vmatpush3.bf16.msra.mxu0 %v8626_v55  ;;  %v2414_v55 = vsel %vm2389_vm7, %v2363_v43, %v2364_v42  ;;  %v2370_v42 = vrot.slane %v10345_v27, 6 }
 0x20a   : > { %8004 = vmatprep.subr.bf16.mxu0 %v8627_v31 }
 0x20b   : > { %7969 = vmatmul.mubr.bf16.vlgmr.msra.gmra.mxu1 %v2552_v6  ;;  %v8629_v6 = vld [vmem:[#allocation5 + $0x218] sm:$0xff]  }
 0x20c   : > { %7925 = vmatmul.mubr.bf16.gmra.mxu0 %v13692_v12  ;;  %7972 = vmatprep.mubr.msk.bf16.mxu1 %vm10277_vm9, %v6900_v5  ;;  %v2554_v5 = vpack.c.bf16 %v2414_v55, %v2415_v13  ;;  %v13694_v55 = vld [vmem:[#allocation23_spill] sm:$0xff]  ;;  %v2411_v13 = vsel %vm2389_vm7, %v2366_v10, %v2367_v63  ;;  %v10369_v10 = vld [vmem:[%s9157_s20 + $0x80] sm:$0xff] }
 0x20d   : > { %7928 = vmatprep.mubr.bf16.mxu0 %v13693_v22  ;;  %8005 = vmatpush3.bf16.msra.mxu0 %v8627_v31  ;;  %v10341_v31 = vld [vmem:[%s9157_s20 + $0x60] sm:$0xff]  ;;  %v2373_v26 = vrot.slane %v10369_v10, 6 }
 0x20e   : > { %8006 = vmatprep.subr.bf16.mxu0 %v8628_v57  ;;  %v2369_v43 = vrot.slane %v10341_v31, 6 }
 0x210   : > { %v2408_v61 = vsel %vm2389_vm7, %v2369_v43, %v2370_v42 }
 0x211   : > { %8007 = vmatpush3.bf16.msra.mxu0 %v8628_v57  ;;  %v2410_v57 = vsel %vm2389_vm7, %v2367_v63, %v2368_v46  ;;  %v2372_v63 = vrot.slane %v10365_v0, 6 }
 0x212   : > { %8008 = vmatprep.subr.bf16.mxu0 %v8629_v6  ;;  %v2556_v15 = vpack.c.bf16 %v2410_v57, %v2411_v13  ;;  %v2407_v13 = vsel %vm2389_vm7, %v2370_v42, %v2371_v47  ;;  %v10397_v42 = vld [vmem:[%s9157_s20 + $0xa0] sm:$0xff] }
 0x213   : > { %7973 = vmatmul.mubr.bf16.gmra.mxu1 %v2554_v5  ;;  %v2409_v5 = vsel %vm2389_vm7, %v2368_v46, %v2369_v43  ;;  %v8632_v46 = vld [vmem:[#allocation5 + $0x200] sm:$0xff]   ;;  %v2406_v57 = vsel %vm2389_vm7, %v2371_v47, %v2372_v63  ;;  %v2376_v47 = vrot.slane %v10393_v35, 6  ;;  %v2377_v37 = vrot.slane %v10397_v42, 6 }
 0x214   : > { %7929 = vmatmul.mubr.bf16.gmra.mxu0 %v13694_v55  ;;  %7976 = vmatprep.mubr.msk.bf16.mxu1 %vm10277_vm9, %v6903_v53  ;;  %v6906_v53 = vpack.c.bf16 %v2408_v61, %v2409_v5  ;;  %v13696_v43 = vld [vmem:[#allocation25_spill] sm:$0xff]  ;;  %v13697_v61 = vld [vmem:[#allocation26_spill] sm:$0xff]  ;;  %v2558_v5 = vpack.c.bf16 %v2406_v57, %v2407_v13  ;;  %v13699_v13 = vld [vmem:[#allocation28_spill] sm:$0xff] }
 0x215   : > { %7932 = vmatprep.mubr.bf16.mxu0 %v13695_v58  ;;  %8009 = vmatpush3.bf16.msra.mxu0 %v8629_v6  ;;  %v2374_v6 = vrot.slane %v10373_v25, 6  ;;  %v10453_v55 = vld [vmem:[%s9157_s20 + $0xe0] sm:$0xff] }
 0x216   : > { %8010 = vmatprep.subr.bf16.mxu0 %v8630_v30 }
 0x219   : > { %8011 = vmatpush3.bf16.msra.mxu0 %v8630_v30  ;;  %v2404_v30 = vsel %vm2389_vm7, %v2373_v26, %v2374_v6 }
 0x21a   : > { %8012 = vmatprep.subr.bf16.mxu0 %v8631_v38 }
 0x21b   : > { %7977 = vmatmul.mubr.bf16.gmra.mxu1 %v2556_v15  ;;  %v2405_v15 = vsel %vm2389_vm7, %v2372_v63, %v2373_v26  ;;  %v2378_v26 = vrot.slane %v10401_v59, 6 }
 0x21c   : > { %7933 = vmatmul.mubr.bf16.gmra.mxu0 %v13696_v43  ;;  %7980 = vmatprep.mubr.msk.bf16.mxu1 %vm10277_vm9, %v6906_v53  ;;  %v6909_v36 = vpack.c.bf16 %v2404_v30, %v2405_v15  ;;  %v10389_v53 = vld [vmem:[%s9157_s20 + $0x90] sm:$0xff]  ;;  %v10449_v43 = vld [vmem:[%s9157_s20 + $0xd8] sm:$0xff] }
 0x21d   : > { %7936 = vmatprep.mubr.bf16.mxu0 %v13697_v61  ;;  %8013 = vmatpush3.bf16.msra.mxu0 %v8631_v38  ;;  %v2375_v9 = vrot.slane %v10389_v53, 6  ;;  %v13698_v38 = vld [vmem:[#allocation27_spill] sm:$0xff]  ;;  %v2400_v30 = vsel %vm2389_vm7, %v2377_v37, %v2378_v26  ;;  %v2384_v58 = vrot.slane %v10449_v43, 6 }
 0x21e   : > { %8014 = vmatprep.subr.bf16.mxu0 %v8632_v46 }
 0x21f   : > { %v2402_v63 = vsel %vm2389_vm7, %v2375_v9, %v2376_v47  ;;  %v2403_v57 = vsel %vm2389_vm7, %v2374_v6, %v2375_v9  ;;  %v10425_v9 = vld [vmem:[%s9157_s20 + $0xc0] sm:$0xff] }
 0x220   : > { %v2560_v15 = vpack.c.bf16 %v2402_v63, %v2403_v57  ;;  %v2381_v6 = vrot.slane %v10425_v9, 6 }
 0x221   : > { %8015 = vmatpush3.bf16.msra.mxu0 %v8632_v46  ;;  %v2401_v46 = vsel %vm2389_vm7, %v2376_v47, %v2377_v37  ;;  %v13700_v47 = vld [vmem:[#allocation29_spill] sm:$0xff] }
 0x223   : > { %7981 = vmatmul.mubr.bf16.gmra.mxu1 %v2558_v5  ;;  %v6912_v5 = vpack.c.bf16 %v2400_v30, %v2401_v46  ;;  %v13701_v30 = vld [vmem:[#allocation30_spill] sm:$0xff] }
 0x224   : > { %7937 = vmatmul.mubr.bf16.gmra.mxu0 %v13698_v38  ;;  %7984 = vmatprep.mubr.msk.bf16.mxu1 %vm10277_vm9, %v6909_v36  ;;  %v2379_v36 = vrot.slane %v10417_v8, 6 }
 0x225   : > { %7940 = vmatprep.mubr.bf16.mxu0 %v13699_v13  ;;  %v10429_v13 = vld [vmem:[%s9157_s20 + $0xc8] sm:$0xff] }
 0x226   : > { %v2382_v37 = vrot.slane %v10429_v13, 6  ;;  %v2398_v63 = vsel %vm2389_vm7, %v2379_v36, %v2380_v34  ;;  %v2399_v57 = vsel %vm2389_vm7, %v2378_v26, %v2379_v36  ;;  %v2385_v26 = vrot.slane %v10453_v55, 6  ;;  %v10457_v36 = vld [vmem:[%s9157_s20 + $0xe8] sm:$0xff] }
 0x227   : > { %v2562_v38 = vpack.c.bf16 %v2398_v63, %v2399_v57  ;;  %v2456_v63 = vrot.slane %v10269_v21, 2  ;;  %v13702_v57 = vld [vmem:[#allocation31_spill] sm:$0xff] }
 0x228   : > { %v2396_v46 = vsel %vm2389_vm7, %v2381_v6, %v2382_v37  ;;  %v2393_v21 = vsel %vm2389_vm7, %v2384_v58, %v2385_v26 }
 0x22b   : > { %7985 = vmatmul.mubr.bf16.gmra.mxu1 %v2560_v15  ;;  %v2397_v15 = vsel %vm2389_vm7, %v2380_v34, %v2381_v6  ;;  %v2455_v6 = vrot.slane %v10243_v24, 2  ;;  %v13703_v34 = vld [vmem:[#allocation32_spill] sm:$0xff] }
 0x22c   : > { %7941 = vmatmul.mubr.bf16.gmra.mxu0 %v13700_v47  ;;  %7988 = vmatprep.mubr.msk.bf16.mxu1 %vm10277_vm9, %v6912_v5  ;;  %v6915_v61 = vpack.c.bf16 %v2396_v46, %v2397_v15  ;;  %v10445_v47 = vld [vmem:[%s9157_s20 + $0xd0] sm:$0xff] }
 0x22d   : > { %7944 = vmatprep.mubr.bf16.mxu0 %v13701_v30  ;;  %v2383_v5 = vrot.slane %v10445_v47, 6  ;;  %v2386_v30 = vrot.slane %v10457_v36, 6 }
 0x22f   : > { %v2394_v46 = vsel %vm2389_vm7, %v2383_v5, %v2384_v58  ;;  %v2395_v15 = vsel %vm2389_vm7, %v2382_v37, %v2383_v5  ;;  %v2392_v24 = vsel %vm2389_vm7, %v2385_v26, %v2386_v30  ;;  %v2387_v37 = vrot.slane %v10483_v41, 6 }
 0x230   : > { %v2564_v22 = vpack.c.bf16 %v2394_v46, %v2395_v15  ;;  %v6918_v12 = vpack.c.bf16 %v2392_v24, %v2393_v21  ;;  %v2457_v5 = vrot.slane %v10273_v50, 2  ;;  %v2459_v58 = vrot.slane %v10286_v2, 2 }
 0x231   : > { %v2460_v26 = vrot.slane %v10305_v7, 2  ;;  %v2391_v50 = vsel %vm2389_vm7, %v2386_v30, %v2387_v37  ;;  %v13707_v7 = vld [vmem:[#allocation19_spill] sm:$0xff]  ;;  %v13708_v30 = vmov 0  ;;  %v2461_v21 = vrot.slane %v10309_v28, 2 }
 0x232   : > { %v2515_v2 = vsel %vm2486_vm10, %v2456_v63, %v2457_v5  ;;  %vm2356_vm11 = vcmp.lt.s32.totalorder %v13707_v7, 30 }
 0x233   : > { %7989 = vmatmul.mubr.bf16.gmra.mxu1 %v2562_v38  ;;  %v2516_v38 = vsel %vm2486_vm10, %v2455_v6, %v2456_v63  ;;  %vm10509_vm12 = vmpackc.low %vm2356_vm11, %vm8994_vm2  ;;  %v2463_v63 = vrot.slane %v10317_v45, 2 }
 0x234   : > { %7945 = vmatmul.mubr.bf16.gmra.mxu0 %v13702_v57  ;;  %7992 = vmatprep.mubr.msk.bf16.mxu1 %vm10277_vm9, %v6915_v61  ;;  %v13704_v57 = vrot.slane %v10235_v20, 2  ;;  %v13709_v30 = vsel %vm10509_vm12, 4294967295, %v13708_v30 }
 0x235   : > { %7948 = vmatprep.mubr.bf16.mxu0 %v13703_v34  ;;  %v2458_v34 = vrot.slane %v10282_v56, 2  ;;  %13710 = vst [vmem:[#allocation35_spill] sm:$0xff] %v13709_v30 }
 0x236   : > { %v2517_v61 = vsel %vm2486_vm10, %v13704_v57, %v2455_v6  ;;  %v13706_v6 = vrot.slane %v10247_v17, 6 }
 0x237   : > { %v3019_v29 = vpack.c.bf16 %v2516_v38, %v2517_v61  ;;  %v2514_v56 = vsel %vm2486_vm10, %v2457_v5, %v2458_v34  ;;  %v2464_v38 = vrot.slane %v10333_v16, 2  ;;  %v2511_v61 = vsel %vm2486_vm10, %v2460_v26, %v2461_v21 }
 0x238   : > { %v2390_v57 = vsel %vm2389_vm7, %v2387_v37, %v13706_v6  ;;  %v6929_v15 = vpack.c.bf16 %v2514_v56, %v2515_v2  ;;  %v2465_v16 = vrot.slane %v10337_v3, 2  ;;  %v2466_v5 = vrot.slane %v10341_v31, 2 }
 0x239   : > { %v2566_v46 = vpack.c.bf16 %v2390_v57, %v2391_v50  ;;  %v2508_v28 = vsel %vm2486_vm10, %v2463_v63, %v2464_v38  ;;  %v2468_v6 = vrot.slane %v10361_v4, 2 }
 0x23a   : > { %v2506_v50 = vsel %vm2486_vm10, %v2465_v16, %v2466_v5  ;;  %v2507_v3 = vsel %vm2486_vm10, %v2464_v38, %v2465_v16 }
 0x23b   : > { %7993 = vmatmul.mubr.bf16.gmra.mxu1 %v2564_v22  ;;  %v2513_v22 = vsel %vm2486_vm10, %v2458_v34, %v2459_v58  ;;  %v6935_v56 = vpack.c.bf16 %v2506_v50, %v2507_v3 }
 0x23c   : > { %7949 = vmatmul.mubr.bf16.gmra.mxu0 %v13705_v62  ;;  %7996 = vmatprep.mubr.msk.bf16.mxu1 %vm10277_vm9, %v6918_v12  ;;  %v2512_v12 = vsel %vm2486_vm10, %v2459_v58, %v2460_v26  ;;  %v2467_v58 = vrot.slane %v10345_v27, 2 }
 0x23d   : > { %8016 = vmatprep.mubr.bf16.mxu0 %v3019_v29  ;;  %v3021_v24 = vpack.c.bf16 %v2512_v12, %v2513_v22  ;;  %v2462_v29 = vrot.slane %v10313_v18, 2  ;;  %v2469_v22 = vrot.slane %v10365_v0, 2 }
 0x23e   : > { %v2504_v31 = vsel %vm2486_vm10, %v2467_v58, %v2468_v6  ;;  %v2505_v27 = vsel %vm2486_vm10, %v2466_v5, %v2467_v58 }
 0x23f   : > { %v2510_v34 = vsel %vm2486_vm10, %v2461_v21, %v2462_v29  ;;  %v2509_v18 = vsel %vm2486_vm10, %v2462_v29, %v2463_v63  ;;  %v3025_v12 = vpack.c.bf16 %v2504_v31, %v2505_v27  ;;  %v2503_v0 = vsel %vm2486_vm10, %v2468_v6, %v2469_v22 }
 0x240   : > { %v6932_v45 = vpack.c.bf16 %v2510_v34, %v2511_v61  ;;  %v3023_v37 = vpack.c.bf16 %v2508_v28, %v2509_v18  ;;  %v2473_v28 = vrot.slane %v10393_v35, 2  ;;  %v2474_v18 = vrot.slane %v10397_v42, 2 }
 0x241   : > { %v2477_v31 = vrot.slane %v10421_v54, 2  ;;  %v2478_v27 = vrot.slane %v10425_v9, 2 }
 0x242   : > { %v2498_v58 = vsel %vm2486_vm10, %v2473_v28, %v2474_v18 }
 0x243   : > { %7997 = vmatmul.mubr.bf16.gmra.mxu1 %v2566_v46  ;;  %v2470_v46 = vrot.slane %v10369_v10, 2 }
 0x244   : > { %8017 = vmatmul.mubr.msk.bf16.vlgmr.msra.gmra.mxu0 %vm10509_vm12, %v6929_v15  ;;  %v2471_v15 = vrot.slane %v10373_v25, 2 }
 0x245   : > { %8020 = vmatprep.mubr.bf16.mxu0 %v3021_v24  ;;  %v2472_v24 = vrot.slane %v10389_v53, 2  ;;  %v2502_v63 = vsel %vm2486_vm10, %v2469_v22, %v2470_v46 }
 0x246   : > { %v2501_v25 = vsel %vm2486_vm10, %v2470_v46, %v2471_v15  ;;  %v6938_v38 = vpack.c.bf16 %v2502_v63, %v2503_v0 }
 0x247   : > { %v2500_v10 = vsel %vm2486_vm10, %v2471_v15, %v2472_v24  ;;  %v2499_v35 = vsel %vm2486_vm10, %v2472_v24, %v2473_v28  ;;  %v2494_v15 = vsel %vm2486_vm10, %v2477_v31, %v2478_v27 }
 0x248   : > { %v3027_v61 = vpack.c.bf16 %v2500_v10, %v2501_v25  ;;  %v6941_v6 = vpack.c.bf16 %v2498_v58, %v2499_v35  ;;  %v2481_v10 = vrot.slane %v10449_v43, 2  ;;  %v2482_v25 = vrot.slane %v10453_v55, 2 }
 0x24b   : > { %v10531_v57 = vpop.f32.mrf.mxu1 }
 0x24c   : > { %8021 = vmatmul.mubr.msk.bf16.gmra.mxu0 %vm10509_vm12, %v6932_v45  ;;  %v2475_v45 = vrot.slane %v10401_v59, 2 }
 0x24d   : > { %v10535_v26 = vpop.f32.mrf.mxu1  ;;  %8024 = vmatprep.mubr.bf16.mxu0 %v3023_v37  ;;  %v2476_v37 = vrot.slane %v10417_v8, 2 }
 0x24e   : > { %v2497_v59 = vsel %vm2486_vm10, %v2474_v18, %v2475_v45 }
 0x24f   : > { %v10545_v4 = vpop.f32.mrf.mxu1  ;;  %v2496_v42 = vsel %vm2486_vm10, %v2475_v45, %v2476_v37  ;;  %v2495_v54 = vsel %vm2486_vm10, %v2476_v37, %v2477_v31  ;;  %v2490_v45 = vsel %vm2486_vm10, %v2481_v10, %v2482_v25 }
 0x250   : > { %v3029_v3 = vpack.c.bf16 %v2496_v42, %v2497_v59  ;;  %v6944_v24 = vpack.c.bf16 %v2494_v15, %v2495_v54  ;;  %v2485_v42 = vrot.slane %v10247_v17, 2  ;;  %v8633_v59 = vld [vmem:[#allocation5 + $0x2b8] sm:$0xff]   ;;  %v8634_v17 = vld [vmem:[#allocation5 + $0x2b0] sm:$0xff]  }
 0x251   : > { %v10547_v2 = vpop.f32.mrf.mxu1  ;;  %8048 = vmatprep.subr.bf16.mxu1 %v8633_v59 }
 0x252   : > { %13711 = vst [vmem:[#allocation34_spill] sm:$0xff] %v10547_v2  ;;  %8049 = vmatpush3.bf16.msra.mxu1 %v8633_v59 }
 0x253   : > { %v10553_v21 = vpop.f32.mrf.mxu1  ;;  %8050 = vmatprep.subr.bf16.mxu1 %v8634_v17 }
 0x254   : > { %8025 = vmatmul.mubr.msk.bf16.gmra.mxu0 %vm10509_vm12, %v6935_v56  ;;  %v2479_v56 = vrot.slane %v10429_v13, 2 }
 0x255   : > { %v10557_v29 = vpop.f32.mrf.mxu1  ;;  %8028 = vmatprep.mubr.bf16.mxu0 %v3025_v12  ;;  %v2480_v12 = vrot.slane %v10445_v47, 2 }
 0x256   : > { %v2493_v13 = vsel %vm2486_vm10, %v2478_v27, %v2479_v56  ;;  %v13716_v27 = vrot.slane %v10235_v20, 2  ;;  %8051 = vmatpush3.bf16.msra.mxu1 %v8634_v17 }
 0x257   : > { %v10567_v53 = vpop.f32.mrf.mxu1  ;;  %v2492_v9 = vsel %vm2486_vm10, %v2479_v56, %v2480_v12  ;;  %v2491_v43 = vsel %vm2486_vm10, %v2480_v12, %v2481_v10 }
 0x258   : > { %v3031_v0 = vpack.c.bf16 %v2492_v9, %v2493_v13  ;;  %v6947_v37 = vpack.c.bf16 %v2490_v45, %v2491_v43  ;;  %v2518_v56 = vsel %vm2486_vm10, %v2485_v42, %v13716_v27  ;;  %v8635_v9 = vld [vmem:[#allocation5 + $0x2a8] sm:$0xff]  }
 0x259   : > { %v10569_v34 = vpop.f32.mrf.mxu1  ;;  %8052 = vmatprep.subr.bf16.mxu1 %v8635_v9 }
 0x25a   : > { %13712 = vst [vmem:[#allocation67_spill] sm:$0xff] %v10569_v34  ;;  %8053 = vmatpush3.bf16.msra.mxu1 %v8635_v9 }
 0x25b   : > { %v10575_v16 = vpop.f32.mrf.mxu1 }
 0x25c   : > { %8029 = vmatmul.mubr.msk.bf16.gmra.mxu0 %vm10509_vm12, %v6938_v38  ;;  %v2483_v38 = vrot.slane %v10457_v36, 2 }
 0x25d   : > { %v10579_v5 = vpop.f32.mrf.mxu1  ;;  %8032 = vmatprep.mubr.bf16.mxu0 %v3027_v61  ;;  %v2484_v61 = vrot.slane %v10483_v41, 2 }
 0x25e   : > { %v2489_v41 = vsel %vm2486_vm10, %v2482_v25, %v2483_v38  ;;  %v8637_v25 = vld [vmem:[#allocation5 + $0x298] sm:$0xff]  }
 0x25f   : > { %v10589_v8 = vpop.f32.mrf.mxu1  ;;  %v2488_v55 = vsel %vm2486_vm10, %v2483_v38, %v2484_v61  ;;  %v2487_v31 = vsel %vm2486_vm10, %v2484_v61, %v2485_v42 }
 0x260   : > { %v3033_v35 = vpack.c.bf16 %v2488_v55, %v2489_v41  ;;  %v6950_v15 = vpack.c.bf16 %v2518_v56, %v2487_v31 }
 0x261   : > { %v10591_v50 = vpop.f32.mrf.mxu1 }
 0x262   : > { %13713 = vst [vmem:[#allocation68_spill] sm:$0xff] %v10591_v50 }
 0x263   : > { %v10597_v22 = vpop.f32.mrf.mxu1 }
 0x264   : > { %8033 = vmatmul.mubr.msk.bf16.gmra.mxu0 %vm10509_vm12, %v6941_v6 }
 0x265   : > { %v10601_v46 = vpop.f32.mrf.mxu1  ;;  %8036 = vmatprep.mubr.bf16.mxu0 %v3029_v3 }
 0x267   : > { %v10611_v47 = vpop.f32.mrf.mxu1 }
 0x269   : > { %v10613_v63 = vpop.f32.mrf.mxu1 }
 0x26a   : > { %13714 = vst [vmem:[#allocation69_spill] sm:$0xff] %v10613_v63 }
 0x26b   : > { %v10619_v28 = vpop.f32.mrf.mxu1 }
 0x26c   : > { %8037 = vmatmul.mubr.msk.bf16.gmra.mxu0 %vm10509_vm12, %v6944_v24  ;;  %v8636_v24 = vld [vmem:[#allocation5 + $0x2a0] sm:$0xff]  }
 0x26d   : > { %v10623_v18 = vpop.f32.mrf.mxu1  ;;  %8040 = vmatprep.mubr.bf16.mxu0 %v3031_v0  ;;  %8054 = vmatprep.subr.bf16.mxu1 %v8636_v24 }
 0x26e   : > { %8055 = vmatpush3.bf16.msra.mxu1 %v8636_v24 }
 0x26f   : > { %v10633_v36 = vpop.f32.mrf.mxu1  ;;  %8056 = vmatprep.subr.bf16.mxu1 %v8637_v25 }
 0x271   : > { %v10635_v58 = vpop.f32.mrf.mxu1 }
 0x272   : > { %13715 = vst [vmem:[#allocation70_spill] sm:$0xff] %v10635_v58  ;;  %8057 = vmatpush3.bf16.msra.mxu1 %v8637_v25 }
 0x273   : > { %v10638_v6 = vpop.f32.mrf.mxu1 }
 0x274   : > { %8041 = vmatmul.mubr.msk.bf16.gmra.mxu0 %vm10509_vm12, %v6947_v37 }
 0x275   : > { %v10642_v3 = vpop.f32.mrf.mxu1  ;;  %8044 = vmatprep.mubr.bf16.mxu0 %v3033_v35  ;;  %v8638_v35 = vld [vmem:[#allocation5 + $0x290] sm:$0xff]  }
 0x276   : > { %8058 = vmatprep.subr.bf16.mxu1 %v8638_v35 }
 0x277   : > { %v10650_v12 = vpop.f32.mrf.mxu1  ;;  %8059 = vmatpush3.bf16.msra.mxu1 %v8638_v35 }
 0x279   : > { %v10652_v54 = vpop.f32.mrf.mxu1 }
 0x27a   : > { %13717 = vst [vmem:[#allocation71_spill] sm:$0xff] %v10652_v54 }
 0x27b   : > { %v10654_v13 = vpop.f32.mrf.mxu1 }
 0x27c   : > { %8045 = vmatmul.mubr.msk.bf16.gmra.mxu0 %vm10509_vm12, %v6950_v15 }
 0x27d   : > { %v10658_v20 = vpop.f32.mrf.mxu1 }
 0x27f   : > { %v10660_v0 = vpop.f32.mrf.mxu1 }
 0x281   : > { %v10662_v10 = vpop.f32.mrf.mxu1 }
 0x282   : > { %13718 = vst [vmem:[#allocation72_spill] sm:$0xff] %v10662_v10 }
 0x283   : > { %v10664_v38 = vpop.f32.mrf.mxu1 }
 0x284   : > { %v7826_v61 = vpop.f32.mrf.mxu0 }
 0x285   : > { %v1885_v45 = vadd.f32 %v7826_v61, %v10531_v57  ;;  %v10667_v43 = vpop.f32.mrf.mxu1  ;;  %v8639_v57 = vld [vmem:[#allocation5 + $0x288] sm:$0xff]  }
 0x286   : > { %v1876_v55 = vpop.f32.mrf.mxu0  ;;  %8060 = vmatprep.subr.bf16.mxu1 %v8639_v57 }
 0x287   : > { %v1877_v41 = vadd.f32 %v1876_v55, %v10535_v26  ;;  %v10670_v37 = vpop.f32.mrf.mxu1  ;;  %8061 = vmatpush3.bf16.msra.mxu1 %v8639_v57  ;;  %v8641_v55 = vld [vmem:[#allocation5 + $0x280] sm:$0xff]  }
 0x288   : > { %v7827_v42 = vpop.f32.mrf.mxu0  ;;  %8062 = vmatprep.subr.bf16.mxu1 %v8641_v55 }
 0x289   : > { %v1888_v59 = vadd.f32 %v7827_v42, %v10545_v4  ;;  %v10673_v31 = vpop.f32.mrf.mxu1 }
 0x28a   : > { %13719 = vst [vmem:[#allocation73_spill] sm:$0xff] %v10673_v31  ;;  %v10675_v27 = vpop.f32.mrf.mxu0 }
 0x28b   : > { %13720 = vst [vmem:[#allocation74_spill] sm:$0xff] %v10675_v27  ;;  %v7874_v56 = vpop.f32.mrf.mxu1  ;;  %8063 = vmatpush3.bf16.msra.mxu1 %v8641_v55 }
 0x28c   : > { %v10677_v17 = vadd.f32 %v7874_v56, %v1885_v45  ;;  %v7830_v15 = vpop.f32.mrf.mxu0 }
 0x28d   : > { %v1901_v9 = vadd.f32 %v7830_v15, %v10553_v21  ;;  %v2118_v26 = vpop.f32.mrf.mxu1  ;;  %v8640_v21 = vld [vmem:[#allocation5 + $0x278] sm:$0xff]  }
 0x28e   : > { %v10680_v24 = vadd.f32 %v2118_v26, %v1877_v41  ;;  %v1892_v25 = vpop.f32.mrf.mxu0  ;;  %8096 = vmatprep.subr.bf16.mxu0 %v8640_v21 }
 0x28f   : > { %v1893_v4 = vadd.f32 %v1892_v25, %v10557_v29  ;;  %v7875_v61 = vpop.f32.mrf.mxu1  ;;  %8097 = vmatpush3.bf16.msra.mxu0 %v8640_v21 }
 0x290   : > { %13721 = vst [vmem:[#allocation75_spill] sm:$0xff] %v10680_v24  ;;  %v10683_v42 = vadd.f32 %v7875_v61, %v1888_v59  ;;  %v7831_v35 = vpop.f32.mrf.mxu0 }
 0x291   : > { %v1904_v63 = vadd.f32 %v7831_v35, %v10567_v53  ;;  %v10686_v45 = vpop.f32.mrf.mxu1  ;;  %v8642_v35 = vld [vmem:[#allocation5 + $0x270] sm:$0xff]  }
 0x292   : > { %13722 = vst [vmem:[#allocation76_spill] sm:$0xff] %v10683_v42  ;;  %13723 = vst [vmem:[#allocation77_spill] sm:$0xff] %v10686_v45  ;;  %v10688_v56 = vpop.f32.mrf.mxu0  ;;  %8098 = vmatprep.subr.bf16.mxu0 %v8642_v35 }
 0x293   : > { %13724 = vst [vmem:[#allocation78_spill] sm:$0xff] %v10688_v56  ;;  %v7878_v41 = vpop.f32.mrf.mxu1  ;;  %8099 = vmatpush3.bf16.msra.mxu0 %v8642_v35 }
 0x294   : > { %v10690_v15 = vadd.f32 %v7878_v41, %v1901_v9  ;;  %v7834_v57 = vpop.f32.mrf.mxu0 }
 0x295   : > { %v1917_v29 = vadd.f32 %v7834_v57, %v10575_v16  ;;  %v2134_v26 = vpop.f32.mrf.mxu1 }
 0x296   : > { %13725 = vst [vmem:[#allocation79_spill] sm:$0xff] %v10690_v15  ;;  %v10693_v59 = vadd.f32 %v2134_v26, %v1893_v4  ;;  %v1908_v25 = vpop.f32.mrf.mxu0 }
 0x297   : > { %v1909_v53 = vadd.f32 %v1908_v25, %v10579_v5  ;;  %v7879_v61 = vpop.f32.mrf.mxu1 }
 0x298   : > { %13726 = vst [vmem:[#allocation80_spill] sm:$0xff] %v10693_v59  ;;  %v10696_v50 = vadd.f32 %v7879_v61, %v1904_v63  ;;  %v7835_v56 = vpop.f32.mrf.mxu0 }
 0x299   : > { %v1920_v55 = vadd.f32 %v7835_v56, %v10589_v8  ;;  %v10699_v9 = vpop.f32.mrf.mxu1  ;;  %v8643_v8 = vld [vmem:[#allocation5 + $0x268] sm:$0xff]  }
 0x29a   : > { %13727 = vst [vmem:[#allocation81_spill] sm:$0xff] %v10696_v50  ;;  %13728 = vst [vmem:[#allocation82_spill] sm:$0xff] %v10699_v9  ;;  %v10701_v41 = vpop.f32.mrf.mxu0  ;;  %8100 = vmatprep.subr.bf16.mxu0 %v8643_v8 }
 0x29b   : > { %13729 = vst [vmem:[#allocation83_spill] sm:$0xff] %v10701_v41  ;;  %v7882_v16 = vpop.f32.mrf.mxu1  ;;  %8101 = vmatpush3.bf16.msra.mxu0 %v8643_v8 }
 0x29c   : > { %v10703_v21 = vadd.f32 %v7882_v16, %v1917_v29  ;;  %v7838_v4 = vpop.f32.mrf.mxu0 }
 0x29d   : > { %v1933_v57 = vadd.f32 %v7838_v4, %v10597_v22  ;;  %v2150_v5 = vpop.f32.mrf.mxu1 }
 0x29e   : > { %13730 = vst [vmem:[#allocation84_spill] sm:$0xff] %v10703_v21  ;;  %v10706_v26 = vadd.f32 %v2150_v5, %v1909_v53  ;;  %v1924_v63 = vpop.f32.mrf.mxu0 }
 0x29f   : > { %v1925_v25 = vadd.f32 %v1924_v63, %v10601_v46  ;;  %v7883_v61 = vpop.f32.mrf.mxu1 }
 0x2a0   : > { %13731 = vst [vmem:[#allocation85_spill] sm:$0xff] %v10706_v26  ;;  %v10709_v56 = vadd.f32 %v7883_v61, %v1920_v55  ;;  %v7839_v9 = vpop.f32.mrf.mxu0 }
 0x2a1   : > { %v1936_v41 = vadd.f32 %v7839_v9, %v10611_v47  ;;  %v10712_v35 = vpop.f32.mrf.mxu1  ;;  %v8644_v47 = vld [vmem:[#allocation5 + $0x260] sm:$0xff]  }
 0x2a2   : > { %13732 = vst [vmem:[#allocation86_spill] sm:$0xff] %v10709_v56  ;;  %13733 = vst [vmem:[#allocation87_spill] sm:$0xff] %v10712_v35  ;;  %v10714_v29 = vpop.f32.mrf.mxu0  ;;  %8102 = vmatprep.subr.bf16.mxu0 %v8644_v47 }
 0x2a3   : > { %13734 = vst [vmem:[#allocation88_spill] sm:$0xff] %v10714_v29  ;;  %v7886_v22 = vpop.f32.mrf.mxu1  ;;  %8103 = vmatpush3.bf16.msra.mxu0 %v8644_v47 }
 0x2a4   : > { %v10716_v16 = vadd.f32 %v7886_v22, %v1933_v57  ;;  %v7842_v53 = vpop.f32.mrf.mxu0 }
 0x2a5   : > { %v1949_v4 = vadd.f32 %v7842_v53, %v10619_v28  ;;  %v2166_v46 = vpop.f32.mrf.mxu1 }
 0x2a6   : > { %13735 = vst [vmem:[#allocation89_spill] sm:$0xff] %v10716_v16  ;;  %v10719_v5 = vadd.f32 %v2166_v46, %v1925_v25  ;;  %v1940_v55 = vpop.f32.mrf.mxu0 }
 0x2a7   : > { %v1941_v63 = vadd.f32 %v1940_v55, %v10623_v18  ;;  %v7887_v61 = vpop.f32.mrf.mxu1 }
 0x2a8   : > { %13736 = vst [vmem:[#allocation90_spill] sm:$0xff] %v10719_v5  ;;  %v10722_v9 = vadd.f32 %v7887_v61, %v1936_v41  ;;  %v7843_v35 = vpop.f32.mrf.mxu0 }
 0x2a9   : > { %v1952_v29 = vadd.f32 %v7843_v35, %v10633_v36  ;;  %v10725_v8 = vpop.f32.mrf.mxu1  ;;  %v8645_v36 = vld [vmem:[#allocation5 + $0x258] sm:$0xff]  }
 0x2aa   : > { %13737 = vst [vmem:[#allocation91_spill] sm:$0xff] %v10722_v9  ;;  %13738 = vst [vmem:[#allocation92_spill] sm:$0xff] %v10725_v8  ;;  %v10727_v57 = vpop.f32.mrf.mxu0  ;;  %8104 = vmatprep.subr.bf16.mxu0 %v8645_v36 }
 0x2ab   : > { %13739 = vst [vmem:[#allocation93_spill] sm:$0xff] %v10727_v57  ;;  %v7890_v28 = vpop.f32.mrf.mxu1  ;;  %8105 = vmatpush3.bf16.msra.mxu0 %v8645_v36 }
 0x2ac   : > { %v10729_v22 = vadd.f32 %v7890_v28, %v1949_v4  ;;  %v7846_v25 = vpop.f32.mrf.mxu0  ;;  %v10742_v28 = vld [vmem:[#allocation5 + $0x2f8] sm:$0xff]  }
 0x2ad   : > { %v1965_v53 = vadd.f32 %v7846_v25, %v10638_v6  ;;  %v2182_v18 = vpop.f32.mrf.mxu1  ;;  %8144 = vmatprep.subr.bf16.mxu1 %v10742_v28 }
 0x2ae   : > { %13740 = vst [vmem:[#allocation94_spill] sm:$0xff] %v10729_v22  ;;  %v10732_v46 = vadd.f32 %v2182_v18, %v1941_v63  ;;  %v1956_v41 = vpop.f32.mrf.mxu0 }
 0x2af   : > { %v1957_v55 = vadd.f32 %v1956_v41, %v10642_v3  ;;  %v7891_v61 = vpop.f32.mrf.mxu1 }
 0x2b0   : > { %13741 = vst [vmem:[#allocation95_spill] sm:$0xff] %v10732_v46  ;;  %v10735_v35 = vadd.f32 %v7891_v61, %v1952_v29  ;;  %v7847_v8 = vpop.f32.mrf.mxu0  ;;  %v8647_v61 = vld [vmem:[#allocation5 + $0x250] sm:$0xff]  }
 0x2b1   : > { %v1968_v34 = vadd.f32 %v7847_v8, %v10650_v12  ;;  %v10738_v47 = vpop.f32.mrf.mxu1  ;;  %8106 = vmatprep.subr.bf16.mxu0 %v8647_v61 }
 0x2b2   : > { %13742 = vst [vmem:[#allocation96_spill] sm:$0xff] %v10735_v35  ;;  %13743 = vst [vmem:[#allocation97_spill] sm:$0xff] %v10738_v47  ;;  %v10740_v4 = vpop.f32.mrf.mxu0  ;;  %8107 = vmatpush3.bf16.msra.mxu0 %v8647_v61 }
 0x2b3   : > { %13744 = vst [vmem:[#allocation98_spill] sm:$0xff] %v10740_v4  ;;  %v7894_v6 = vpop.f32.mrf.mxu1 }
 0x2b4   : > { %v10744_v63 = vadd.f32 %v7894_v6, %v1965_v53  ;;  %v7850_v25 = vpop.f32.mrf.mxu0 }
 0x2b5   : > { %v1981_v3 = vadd.f32 %v7850_v25, %v10654_v13  ;;  %v2198_v18 = vpop.f32.mrf.mxu1 }
 0x2b6   : > { %13745 = vst [vmem:[#allocation99_spill] sm:$0xff] %v10744_v63  ;;  %v10748_v29 = vadd.f32 %v2198_v18, %v1957_v55  ;;  %v1972_v12 = vpop.f32.mrf.mxu0 }
 0x2b7   : > { %v1973_v8 = vadd.f32 %v1972_v12, %v10658_v20  ;;  %v7895_v41 = vpop.f32.mrf.mxu1 }
 0x2b8   : > { %13746 = vst [vmem:[#allocation100_spill] sm:$0xff] %v10748_v29  ;;  %v10751_v45 = vadd.f32 %v7895_v41, %v1968_v34  ;;  %v7851_v36 = vpop.f32.mrf.mxu0  ;;  %v10878_v29 = vld [vmem:[#allocation7 + $0x1] ss:$0 sm:$0xff] }
 0x2b9   : > { %v1984_v27 = vadd.f32 %v7851_v36, %v10660_v0  ;;  %v10754_v53 = vpop.f32.mrf.mxu1  ;;  %v8650_v0 = vld [vmem:[#allocation5 + $0x248] sm:$0xff]   ;;  %13766 = vst [vmem:[#allocation120_spill] sm:$0xff] %v10878_v29  ;;  %v2287_v22 = vadd.f32 %v10878_v29, %v10677_v17 }
 0x2ba   : > { %13747 = vst [vmem:[#allocation101_spill] sm:$0xff] %v10751_v45  ;;  %13748 = vst [vmem:[#allocation102_spill] sm:$0xff] %v10754_v53  ;;  %v10756_v6 = vpop.f32.mrf.mxu0  ;;  %8108 = vmatprep.subr.bf16.mxu0 %v8650_v0 }
 0x2bb   : > { %13749 = vst [vmem:[#allocation103_spill] sm:$0xff] %v10756_v6  ;;  %v7898_v13 = vpop.f32.mrf.mxu1  ;;  %8109 = vmatpush3.bf16.msra.mxu0 %v8650_v0 }
 0x2bc   : > { %v10758_v25 = vadd.f32 %v7898_v13, %v1981_v3  ;;  %v7854_v55 = vpop.f32.mrf.mxu0 }
 0x2bd   : > { %v1997_v18 = vadd.f32 %v7854_v55, %v10664_v38  ;;  %v2214_v20 = vpop.f32.mrf.mxu1 }
 0x2be   : > { %13750 = vst [vmem:[#allocation104_spill] sm:$0xff] %v10758_v25  ;;  %v10761_v12 = vadd.f32 %v2214_v20, %v1973_v8  ;;  %v1988_v34 = vpop.f32.mrf.mxu0 }
 0x2bf   : > { %v1989_v41 = vadd.f32 %v1988_v34, %v10667_v43  ;;  %v7899_v2 = vpop.f32.mrf.mxu1 }
 0x2c0   : > { %13751 = vst [vmem:[#allocation105_spill] sm:$0xff] %v10761_v12  ;;  %v10764_v36 = vadd.f32 %v7899_v2, %v1984_v27  ;;  %v7855_v31 = vpop.f32.mrf.mxu0  ;;  %v8653_v27 = vld [vmem:[#allocation5 + $0x240] sm:$0xff]  }
 0x2c1   : > { %v2000_v6 = vadd.f32 %v7855_v31, %v10670_v37  ;;  %v10767_v61 = vpop.f32.mrf.mxu1  ;;  %8110 = vmatprep.subr.bf16.mxu0 %v8653_v27 }
 0x2c2   : > { %13752 = vst [vmem:[#allocation106_spill] sm:$0xff] %v10764_v36  ;;  %13753 = vst [vmem:[#allocation107_spill] sm:$0xff] %v10767_v61  ;;  %v10769_v3 = vpop.f32.mrf.mxu0  ;;  %8111 = vmatpush3.bf16.msra.mxu0 %v8653_v27 }
 0x2c3   : > { %13754 = vst [vmem:[#allocation108_spill] sm:$0xff] %v10769_v3  ;;  %v7902_v38 = vpop.f32.mrf.mxu1 }
 0x2c4   : > { %v10771_v13 = vadd.f32 %v7902_v38, %v1997_v18  ;;  %v10773_v8 = vpop.f32.mrf.mxu0  ;;  %v10787_v38 = vld [vmem:[#allocation5 + $0x378] sm:$0xff]  }
 0x2c5   : > { %v2230_v55 = vpop.f32.mrf.mxu1  ;;  %13759 = vst [vmem:[#allocation113_spill] sm:$0xff] %v10787_v38  ;;  %8192 = vmatprep.subr.bf16.mxu0 %v10787_v38  ;;  %v10887_v38 = vld [vmem:[#allocation7 + $0x2] ss:$0 sm:$0xff] }
 0x2c6   : > { %13755 = vst [vmem:[#allocation109_spill] sm:$0xff] %v10771_v13  ;;  %v10775_v43 = vadd.f32 %v2230_v55, %v1989_v41  ;;  %v10777_v20 = vpop.f32.mrf.mxu0 }
 0x2c7   : > { %v7903_v2 = vpop.f32.mrf.mxu1 }
 0x2c8   : > { %13756 = vst [vmem:[#allocation110_spill] sm:$0xff] %v10775_v43  ;;  %v10779_v34 = vadd.f32 %v7903_v2, %v2000_v6  ;;  %v10781_v37 = vpop.f32.mrf.mxu0 }
 0x2c9   : > { %v10783_v31 = vpop.f32.mrf.mxu1 }
 0x2ca   : > { %13757 = vst [vmem:[#allocation111_spill] sm:$0xff] %v10779_v34  ;;  %13758 = vst [vmem:[#allocation112_spill] sm:$0xff] %v10783_v31  ;;  %v10785_v0 = vpop.f32.mrf.mxu0 }
 0x2cb   : > { %v7970_v18 = vpop.f32.mrf.mxu1 }
 0x2cc   : > { %v10789_v3 = vpop.f32.mrf.mxu0  ;;  %v2901_v46 = vadd.f32 %v7970_v18, %v10773_v8 }
 0x2cd   : > { %v2892_v41 = vpop.f32.mrf.mxu1 }
 0x2ce   : > { %v10792_v55 = vpop.f32.mrf.mxu0 }
 0x2cf   : > { %v7971_v6 = vpop.f32.mrf.mxu1 }
 0x2d0   : > { %v10794_v2 = vpop.f32.mrf.mxu0 }
 0x2d1   : > { %v2895_v61 = vpop.f32.mrf.mxu1 }
 0x2d2   : > { %v10796_v10 = vpop.f32.mrf.mxu0  ;;  %v2896_v18 = vadd.f32 %v2895_v61, %v10785_v0 }
 0x2d3   : > { %v10798_v31 = vpop.f32.mrf.mxu1 }
 0x2d4   : > { %v10800_v53 = vpop.f32.mrf.mxu0 }
 0x2d5   : > { %v10802_v27 = vpop.f32.mrf.mxu1 }
 0x2d6   : > { %v10804_v4 = vpop.f32.mrf.mxu0 }
 0x2d7   : > { %v10806_v54 = vpop.f32.mrf.mxu1 }
 0x2d8   : > { %v10808_v47 = vpop.f32.mrf.mxu0 }
 0x2d9   : > { %v10810_v57 = vpop.f32.mrf.mxu1 }
 0x2da   : > { %v10812_v58 = vpop.f32.mrf.mxu0  ;;  %v2912_v0 = vadd.f32 %v10810_v57, %v10796_v10 }
 0x2db   : > { %v10814_v9 = vpop.f32.mrf.mxu1 }
 0x2dc   : > { %v10816_v5 = vpop.f32.mrf.mxu0 }
 0x2dd   : > { %v10818_v16 = vpop.f32.mrf.mxu1 }
 0x2de   : > { %v10820_v56 = vpop.f32.mrf.mxu0 }
 0x2df   : > { %v10822_v26 = vpop.f32.mrf.mxu1 }
 0x2e0   : > { %v10824_v21 = vpop.f32.mrf.mxu0 }
 0x2e1   : > { %v10826_v50 = vpop.f32.mrf.mxu1 }
 0x2e2   : > { %v10828_v59 = vpop.f32.mrf.mxu0 }
 0x2e3   : > { %v10830_v15 = vpop.f32.mrf.mxu1 }
 0x2e4   : > { %v10832_v42 = vpop.f32.mrf.mxu0 }
 0x2e5   : > { %v10834_v24 = vpop.f32.mrf.mxu1 }
 0x2e6   : > { %v10836_v7 = vpop.f32.mrf.mxu0 }
 0x2e7   : > { %v10838_v62 = vpop.f32.mrf.mxu1 }
 0x2e8   : > { %v10840_v1 = vpop.f32.mrf.mxu0 }
 0x2e9   : > { %v10842_v48 = vpop.f32.mrf.mxu1 }
 0x2ea   : > { %v10844_v14 = vpop.f32.mrf.mxu0 }
 0x2eb   : > { %v10848_v11 = vpop.f32.mrf.mxu1 }
 0x2ec   : > { %v10846_v32 = vpop.f32.mrf.mxu0 }
 0x2ed   : > { %v10854_v34 = vpop.f32.mrf.mxu1 }
 0x2ee   : > { %v10850_v52 = vpop.f32.mrf.mxu0 }
 0x2ef   : > { %v10860_v36 = vpop.f32.mrf.mxu1 }
 0x2f0   : > { %v10852_v40 = vpop.f32.mrf.mxu0 }
 0x2f1   : > { %v10866_v51 = vpop.f32.mrf.mxu1 }
 0x2f2   : > { %v10856_v43 = vpop.f32.mrf.mxu0 }
 0x2f3   : > { %v10872_v60 = vpop.f32.mrf.mxu1 }
 0x2f4   : > { %v10858_v13 = vpop.f32.mrf.mxu0 }
 0x2f5   : > { %v10880_v63 = vpop.f32.mrf.mxu1 }
 0x2f6   : > { %v10862_v12 = vpop.f32.mrf.mxu0 }
 0x2f7   : > { %13760 = vst [vmem:[#allocation114_spill] sm:$0xff] %v10862_v12  ;;  %v10889_v39 = vpop.f32.mrf.mxu1 }
 0x2f8   : > { %v10864_v25 = vpop.f32.mrf.mxu0 }
 0x2f9   : > { %13761 = vst [vmem:[#allocation115_spill] sm:$0xff] %v10864_v25  ;;  %v10898_v17 = vpop.f32.mrf.mxu1 }
 0x2fa   : > { %v10868_v44 = vpop.f32.mrf.mxu0 }
 0x2fb   : > { %13762 = vst [vmem:[#allocation116_spill] sm:$0xff] %v10868_v44 }
 0x2fc   : > { %v10870_v45 = vpop.f32.mrf.mxu0 }
 0x2fd   : > { %13763 = vst [vmem:[#allocation117_spill] sm:$0xff] %v10870_v45  ;;  %v2904_v45 = vadd.f32 %v7971_v6, %v10781_v37 }
 0x2fe   : > { %v10874_v33 = vpop.f32.mrf.mxu0 }
 0x2ff   : > { %13764 = vst [vmem:[#allocation118_spill] sm:$0xff] %v10874_v33 }
 0x300   : > { %v10876_v49 = vpop.f32.mrf.mxu0 }
 0x301   : > { %13765 = vst [vmem:[#allocation119_spill] sm:$0xff] %v10876_v49  ;;  %v2893_v49 = vadd.f32 %v2892_v41, %v10777_v20 }
 0x302   : > { %v10882_v35 = vpop.f32.mrf.mxu0 }
 0x303   : > { %13767 = vst [vmem:[#allocation121_spill] sm:$0xff] %v10882_v35  ;;  %v2319_v35 = vadd.f32 %v2287_v22, %v9836_v19 }
 0x304   : > { %v8018_v30 = vpop.f32.mrf.mxu0 }
 0x305   : > { %v3263_v23 = vadd.f32 %v8018_v30, %v2901_v46 }
 0x306   : > { %v3134_v33 = vpop.f32.mrf.mxu0 }
 0x307   : > { %v10894_v44 = vadd.f32 %v10887_v38, %v3263_v23  ;;  %v3261_v29 = vadd.f32 %v3134_v33, %v2893_v49  ;;  %v10906_v23 = vpop.f32.mrf.mxu1  ;;  %v2909_v33 = vadd.f32 %v10802_v27, %v10792_v55  ;;  %v2920_v49 = vadd.f32 %v10806_v54, %v10794_v2 }
 0x308   : > { %v8019_v8 = vpop.f32.mrf.mxu0 }
 0x309   : > { %v3264_v25 = vadd.f32 %v8019_v8, %v2904_v45  ;;  %v10901_v30 = vadd.f32 %v10894_v44, %v2319_v35  ;;  %v10909_v19 = vadd.f32 %v10887_v38, %v3261_v29  ;;  %v2917_v35 = vadd.f32 %v10798_v31, %v10789_v3  ;;  %v10926_v41 = vpop.f32.mrf.mxu1  ;;  %v8649_v8 = vld [vmem:[#allocation5 + $0x2e8] sm:$0xff]  }
 0x30a   : > { %v3137_v12 = vpop.f32.mrf.mxu0 }
 0x30b   : > { %13768 = vst [vmem:[#allocation122_spill] sm:$0xff] %v10901_v30  ;;  %v3262_v46 = vadd.f32 %v3137_v12, %v2896_v18  ;;  %v10904_v20 = vadd.f32 %v10887_v38, %v3264_v25  ;;  %13770 = vst [vmem:[#allocation124_spill] sm:$0xff] %v10909_v19  ;;  %v8648_v12 = vld [vmem:[#allocation5 + $0x2f0] sm:$0xff]   ;;  %v10932_v18 = vpop.f32.mrf.mxu1 }
 0x30c   : > { %v8022_v37 = vpop.f32.mrf.mxu0 }
 0x30d   : > { %13769 = vst [vmem:[#allocation123_spill] sm:$0xff] %v10904_v20  ;;  %v10912_v22 = vadd.f32 %v10887_v38, %v3262_v46  ;;  %v3591_v29 = vpack.c.bf16 %v10904_v20, %v10894_v44  ;;  %v3267_v54 = vadd.f32 %v8022_v37, %v2917_v35 }
 0x30e   : > { %v3150_v61 = vpop.f32.mrf.mxu0 }
 0x30f   : > { %13771 = vst [vmem:[#allocation125_spill] sm:$0xff] %v10912_v22  ;;  %v3590_v45 = vpack.c.bf16 %v10912_v22, %v10909_v19  ;;  %v3265_v55 = vadd.f32 %v3150_v61, %v2909_v33  ;;  %v10941_v46 = vadd.f32 %v10887_v38, %v3267_v54  ;;  %v2936_v61 = vadd.f32 %v10822_v26, %v10808_v47 }
 0x310   : > { %v8023_v25 = vpop.f32.mrf.mxu0 }
 0x311   : > { %v3268_v6 = vadd.f32 %v8023_v25, %v2920_v49  ;;  %8064 = vmatprep.mubr.bf16.mxu1 %v3590_v45  ;;  %v10935_v10 = vadd.f32 %v10887_v38, %v3265_v55  ;;  %13774 = vst [vmem:[#allocation128_spill] sm:$0xff] %v10941_v46  ;;  %v2933_v49 = vadd.f32 %v10814_v9, %v10800_v53  ;;  %v8652_v55 = vld [vmem:[#allocation5 + $0x2d8] sm:$0xff]  }
 0x312   : > { %v3153_v2 = vpop.f32.mrf.mxu0  ;;  %8065 = vmatmul.mubr.bf16.vlgmr.msra.gmra.mxu1 %v3591_v29  ;;  %v8651_v29 = vld [vmem:[#allocation5 + $0x2e0] sm:$0xff]   ;;  %v2928_v25 = vadd.f32 %v10826_v50, %v10812_v58 }
 0x313   : > { %v3266_v27 = vadd.f32 %v3153_v2, %v2912_v0  ;;  %8145 = vmatpush3.bf16.msra.mxu1 %v10742_v28  ;;  %v10930_v3 = vadd.f32 %v10887_v38, %v3268_v6  ;;  %13772 = vst [vmem:[#allocation126_spill] sm:$0xff] %v10935_v10  ;;  %v2925_v28 = vadd.f32 %v10818_v16, %v10804_v4  ;;  %v10955_v16 = vpop.f32.mrf.mxu1 }
 0x314   : > { %v8026_v31 = vpop.f32.mrf.mxu0  ;;  %8146 = vmatprep.subr.bf16.mxu1 %v8648_v12 }
 0x315   : > { %v10938_v57 = vadd.f32 %v10887_v38, %v3266_v27  ;;  %v3593_v35 = vpack.c.bf16 %v10930_v3, %v10941_v46  ;;  %v3271_v47 = vadd.f32 %v8026_v31, %v2933_v49  ;;  %v7998_v6 = vpop.f32.mrf.mxu1  ;;  %v2941_v27 = vadd.f32 %v10834_v24, %v10820_v56 }
 0x316   : > { %v3166_v37 = vpop.f32.mrf.mxu0  ;;  %v2952_v31 = vadd.f32 %v10838_v62, %v10824_v21  ;;  %v2944_v49 = vadd.f32 %v10842_v48, %v10828_v59  ;;  %v2957_v48 = vadd.f32 %v10854_v34, %v10836_v7  ;;  %v2968_v59 = vadd.f32 %v10860_v36, %v10840_v1 }
 0x317   : > { %13773 = vst [vmem:[#allocation127_spill] sm:$0xff] %v10938_v57  ;;  %v3592_v33 = vpack.c.bf16 %v10938_v57, %v10935_v10  ;;  %8147 = vmatpush3.bf16.msra.mxu1 %v8648_v12  ;;  %v3269_v4 = vadd.f32 %v3166_v37, %v2925_v28  ;;  %v10967_v58 = vadd.f32 %v10887_v38, %v3271_v47  ;;  %v3004_v24 = vpop.f32.mrf.mxu1 }
 0x318   : > { %v8027_v45 = vpop.f32.mrf.mxu0  ;;  %8148 = vmatprep.subr.bf16.mxu1 %v8649_v8  ;;  %v2949_v37 = vadd.f32 %v10830_v15, %v10816_v5  ;;  %v2965_v15 = vadd.f32 %v10848_v11, %v10832_v42  ;;  %v2960_v11 = vadd.f32 %v10866_v51, %v10844_v14  ;;  %v2981_v42 = vadd.f32 %v10872_v60, %v10846_v32  ;;  %v13780_v32 = vld [vmem:[#allocation114_spill] sm:$0xff] }
 0x319   : > { %v3272_v26 = vadd.f32 %v8027_v45, %v2936_v61  ;;  %8068 = vmatprep.mubr.bf16.mxu1 %v3592_v33  ;;  %v10961_v54 = vadd.f32 %v10887_v38, %v3269_v4  ;;  %v8654_v33 = vld [vmem:[#allocation5 + $0x2d0] sm:$0xff]   ;;  %v7999_v4 = vpop.f32.mrf.mxu1  ;;  %v2973_v1 = vadd.f32 %v10880_v63, %v10850_v52  ;;  %v2984_v36 = vadd.f32 %v10889_v39, %v10852_v40  ;;  %v8657_v39 = vld [vmem:[#allocation5 + $0x2c0] sm:$0xff]  }
 0x31a   : > { %v3169_v0 = vpop.f32.mrf.mxu0  ;;  %8069 = vmatmul.mubr.bf16.gmra.mxu1 %v3593_v35  ;;  %v11011_v51 = vadd.f32 %v10898_v17, %v10856_v43  ;;  %v11015_v60 = vadd.f32 %v10906_v23, %v10858_v13  ;;  %v11019_v14 = vadd.f32 %v10926_v41, %v13780_v32  ;;  %v13781_v63 = vld [vmem:[#allocation115_spill] sm:$0xff]  ;;  %v13782_v43 = vld [vmem:[#allocation116_spill] sm:$0xff]  ;;  %v13783_v13 = vld [vmem:[#allocation117_spill] sm:$0xff] }
 0x31b   : > { %v3270_v12 = vadd.f32 %v3169_v0, %v2928_v25  ;;  %8149 = vmatpush3.bf16.msra.mxu1 %v8649_v8  ;;  %v10958_v9 = vadd.f32 %v10887_v38, %v3272_v26  ;;  %v8655_v25 = vld [vmem:[#allocation5 + $0x2c8] sm:$0xff]   ;;  %v11029_v17 = vadd.f32 %v10955_v16, %v13782_v43  ;;  %v11032_v23 = vadd.f32 %v7998_v6, %v13783_v13  ;;  %v13788_v43 = vld [vmem:[#allocation15_spill] sm:$0xff] }
 0x31c   : > { %v8030_v53 = vpop.f32.mrf.mxu0  ;;  %8150 = vmatprep.subr.bf16.mxu1 %v8651_v29  ;;  %vm4427_vm13 = vcmp.lt.s32.totalorder %v13788_v43, 3  ;;  %vm4387_vm14 = vcmp.ge.s32.totalorder %v13788_v43, 3  ;;  %vm4524_vm0 = vcmp.lt.s32.totalorder %v13788_v43, 5 }
 0x31d   : > { %13775 = vst [vmem:[#allocation129_spill] sm:$0xff] %v10958_v9  ;;  %v10964_v50 = vadd.f32 %v10887_v38, %v3270_v12  ;;  %v3595_v61 = vpack.c.bf16 %v10958_v9, %v10967_v58  ;;  %v3275_v62 = vadd.f32 %v8030_v53, %v2949_v37  ;;  %v13785_v37 = vld [vmem:[#allocation119_spill] sm:$0xff]  ;;  %vm11626_vm15 = vmpackc.low %vm8994_vm2, %vm4387_vm14 }
 0x31e   : > { %v3182_v2 = vpop.f32.mrf.mxu0 }
 0x31f   : > { %13776 = vst [vmem:[#allocation130_spill] sm:$0xff] %v10964_v50  ;;  %v3594_v8 = vpack.c.bf16 %v10964_v50, %v10961_v54  ;;  %8151 = vmatpush3.bf16.msra.mxu1 %v8651_v29  ;;  %v3273_v56 = vadd.f32 %v3182_v2, %v2941_v27  ;;  %v11001_v0 = vadd.f32 %v10887_v38, %v3275_v62  ;;  %v3007_v2 = vpop.f32.mrf.mxu1  ;;  %v3367_v27 = vrot.slane %v10894_v44, 6 }
 0x320   : > { %v8031_v28 = vpop.f32.mrf.mxu0  ;;  %8152 = vmatprep.subr.bf16.mxu1 %v8652_v55 }
 0x321   : > { %v3276_v45 = vadd.f32 %v8031_v28, %v2952_v31  ;;  %8072 = vmatprep.mubr.bf16.mxu1 %v3594_v8  ;;  %v10991_v26 = vadd.f32 %v10887_v38, %v3273_v56  ;;  %13779 = vst [vmem:[#allocation133_spill] sm:$0xff] %v11001_v0  ;;  %v13784_v31 = vld [vmem:[#allocation118_spill] sm:$0xff]  ;;  %v11039_v28 = vadd.f32 %v7999_v4, %v13785_v37  ;;  %v13478_v56 = vrot.slane %v10904_v20, 6 }
 0x322   : > { %v3185_v21 = vpop.f32.mrf.mxu0  ;;  %8073 = vmatmul.mubr.bf16.gmra.mxu1 %v3595_v61  ;;  %v11036_v8 = vadd.f32 %v3004_v24, %v13784_v31  ;;  %v13479_v24 = vrot.slane %v10909_v19, 6  ;;  %v3366_v4 = vrot.slane %v10912_v22, 6 }
 0x323   : > { %v3274_v35 = vadd.f32 %v3185_v21, %v2944_v49  ;;  %8153 = vmatpush3.bf16.msra.mxu1 %v8652_v55  ;;  %v10984_v5 = vadd.f32 %v10887_v38, %v3276_v45  ;;  %13777 = vst [vmem:[#allocation131_spill] sm:$0xff] %v10991_v26  ;;  %v11025_v55 = vadd.f32 %v10932_v18, %v13781_v63  ;;  %v13786_v45 = vld [vmem:[#allocation121_spill] sm:$0xff] }
 0x324   : > { %v8034_v29 = vpop.f32.mrf.mxu0  ;;  %8154 = vmatprep.subr.bf16.mxu1 %v8654_v33  ;;  %v11054_v62 = vadd.f32 %v3007_v2, %v13786_v45 }
 0x325   : > { %v10994_v47 = vadd.f32 %v10887_v38, %v3274_v35  ;;  %v3279_v7 = vadd.f32 %v8034_v29, %v2965_v15  ;;  %v3597_v40 = vpack.c.bf16 %v10984_v5, %v11001_v0  ;;  %v11057_v15 = vld [vmem:[#allocation5 + $0x338] sm:$0xff]  }
 0x326   : > { %v3198_v34 = vpop.f32.mrf.mxu0 }
 0x327   : > { %13778 = vst [vmem:[#allocation132_spill] sm:$0xff] %v10994_v47  ;;  %v3277_v12 = vadd.f32 %v3198_v34, %v2957_v48  ;;  %v3596_v53 = vpack.c.bf16 %v10994_v47, %v10991_v26  ;;  %8155 = vmatpush3.bf16.msra.mxu1 %v8654_v33  ;;  %v11042_v18 = vadd.f32 %v10887_v38, %v3279_v7 }
 0x328   : > { %v8035_v52 = vpop.f32.mrf.mxu0  ;;  %8156 = vmatprep.subr.bf16.mxu1 %v8655_v25 }
 0x329   : > { %v3280_v41 = vadd.f32 %v8035_v52, %v2968_v59  ;;  %8076 = vmatprep.mubr.bf16.mxu1 %v3596_v53  ;;  %v11045_v16 = vadd.f32 %v10887_v38, %v3277_v12  ;;  %v3479_v12 = vrot.slane %v11042_v18, 2 }
 0x32a   : > { %v3201_v61 = vpop.f32.mrf.mxu0  ;;  %8077 = vmatmul.mubr.bf16.gmra.mxu1 %v3597_v40 }
 0x32b   : > { %v11048_v6 = vadd.f32 %v10887_v38, %v3280_v41  ;;  %v3278_v33 = vadd.f32 %v3201_v61, %v2960_v11  ;;  %8157 = vmatpush3.bf16.msra.mxu1 %v8655_v25  ;;  %v3383_v11 = vrot.slane %v11042_v18, 6  ;;  %v13476_v53 = vrot.slane %v11045_v16, 2 }
 0x32c   : > { %v8038_v21 = vpop.f32.mrf.mxu0  ;;  %8158 = vmatprep.subr.bf16.mxu1 %v8657_v39  ;;  %v11098_v61 = vsel %vm2389_vm7, %v3366_v4, %v3367_v27 }
 0x32d   : > { %v3384_v29 = vrot.slane %v11048_v6, 6  ;;  %v3480_v48 = vrot.slane %v11048_v6, 2  ;;  %v11062_v25 = vadd.f32 %v10887_v38, %v3278_v33  ;;  %v3283_v59 = vadd.f32 %v8038_v21, %v2981_v42 }
 0x32e   : > { %v3214_v7 = vpop.f32.mrf.mxu0  ;;  %v3599_v34 = vpack.c.bf16 %v11048_v6, %v11042_v18 }
 0x32f   : > { %13787 = vst [vmem:[#allocation114_spill] sm:$0xff] %v11062_v25  ;;  %v13477_v32 = vrot.slane %v11062_v25, 6  ;;  %v3281_v52 = vadd.f32 %v3214_v7, %v2973_v1  ;;  %v3598_v40 = vpack.c.bf16 %v11062_v25, %v11045_v16  ;;  %8159 = vmatpush3.bf16.msra.mxu1 %v8657_v39  ;;  %v11074_v42 = vadd.f32 %v10887_v38, %v3283_v59 }
 0x330   : > { %v8039_v63 = vpop.f32.mrf.mxu0  ;;  %v11078_v13 = vsel %vm2389_vm7, %v3383_v11, %v3384_v29  ;;  %v3478_v2 = vrot.slane %v11062_v25, 2  ;;  %v11083_v41 = vsel %vm2486_vm10, %v3479_v12, %v3480_v48  ;;  %8240 = vmatprep.subr.bf16.mxu1 %v11057_v15  ;;  %v11090_v1 = vsel %vm2389_vm7, %v3367_v27, %v13478_v56 }
 0x331   : > { %13789 = vst [vmem:[#allocation115_spill] sm:$0xff] %v11083_v41  ;;  %v11093_v39 = vadd.f32 %v10887_v38, %v3281_v52  ;;  %v3284_v31 = vadd.f32 %v8039_v63, %v2984_v36  ;;  %8080 = vmatprep.mubr.bf16.mxu1 %v3598_v40  ;;  %v11104_v45 = vsel %vm2389_vm7, %v13477_v32, %v3383_v11  ;;  %v3483_v40 = vrot.slane %v11074_v42, 2 }
 0x332   : > { %v3217_v33 = vpop.f32.mrf.mxu0  ;;  %8081 = vmatmul.mubr.bf16.gmra.mxu1 %v3599_v34  ;;  %v11108_v21 = vsel %vm2486_vm10, %v3478_v2, %v3479_v12  ;;  %v11114_v36 = vsel %vm2486_vm10, %v13476_v53, %v3478_v2  ;;  %v3387_v34 = vrot.slane %v11074_v42, 6  ;;  %v11127_v12 = vsel %vm2389_vm7, %v13479_v24, %v3366_v4 }
 0x333   : > { %v3385_v27 = vrot.slane %v11093_v39, 6  ;;  %v3481_v59 = vrot.slane %v11093_v39, 2  ;;  %v11119_v7 = vadd.f32 %v10887_v38, %v3284_v31  ;;  %v3282_v11 = vadd.f32 %v3217_v33, %v11011_v51 }
 0x334   : > { %v8042_v52 = vpop.f32.mrf.mxu0 }
 0x335   : > { %v3388_v2 = vrot.slane %v11119_v7, 6  ;;  %v3484_v31 = vrot.slane %v11119_v7, 2  ;;  %v11136_v51 = vadd.f32 %v10887_v38, %v3282_v11  ;;  %v3287_v33 = vadd.f32 %v8042_v52, %v11015_v60 }
 0x336   : > { %v3230_v53 = vpop.f32.mrf.mxu0  ;;  %v3601_v4 = vpack.c.bf16 %v11119_v7, %v11074_v42  ;;  %v11143_v32 = vsel %vm2389_vm7, %v3384_v29, %v3385_v27  ;;  %v11147_v63 = vsel %vm2486_vm10, %v3480_v48, %v3481_v59 }
 0x337   : > { %13790 = vst [vmem:[#allocation116_spill] sm:$0xff] %v11136_v51  ;;  %13791 = vst [vmem:[#allocation117_spill] sm:$0xff] %v11147_v63  ;;  %v3386_v56 = vrot.slane %v11136_v51, 6  ;;  %v11152_v11 = vadd.f32 %v10887_v38, %v3287_v33  ;;  %v3285_v60 = vadd.f32 %v3230_v53, %v11019_v14  ;;  %v3600_v52 = vpack.c.bf16 %v11136_v51, %v11093_v39 }
 0x338   : > { %v8043_v24 = vpop.f32.mrf.mxu0  ;;  %v11161_v48 = vsel %vm2389_vm7, %v3387_v34, %v3388_v2  ;;  %v3482_v35 = vrot.slane %v11136_v51, 2  ;;  %v11166_v37 = vsel %vm2486_vm10, %v3483_v40, %v3484_v31  ;;  %v13797_v51 = vrot.slane %v10894_v44, 2 }
 0x339   : > { %13792 = vst [vmem:[#allocation118_spill] sm:$0xff] %v11161_v48  ;;  %13793 = vst [vmem:[#allocation119_spill] sm:$0xff] %v11166_v37  ;;  %v11171_v53 = vadd.f32 %v10887_v38, %v3285_v60  ;;  %v3288_v33 = vadd.f32 %v8043_v24, %v11025_v55  ;;  %8084 = vmatprep.mubr.bf16.mxu1 %v3600_v52  ;;  %v11176_v29 = vsel %vm2389_vm7, %v3385_v27, %v3386_v56 }
 0x33a   : > { %v3233_v49 = vpop.f32.mrf.mxu0  ;;  %8085 = vmatmul.mubr.bf16.gmra.mxu1 %v3601_v4  ;;  %v11182_v30 = vsel %vm2389_vm7, %v3386_v56, %v3387_v34  ;;  %v11186_v60 = vsel %vm2486_vm10, %v3482_v35, %v3483_v40  ;;  %v11190_v55 = vsel %vm2486_vm10, %v3481_v59, %v3482_v35  ;;  %v3391_v56 = vrot.slane %v11152_v11, 6 }
 0x33b   : > { %13794 = vst [vmem:[#allocation121_spill] sm:$0xff] %v11182_v30  ;;  %13795 = vst [vmem:[#allocation134_spill] sm:$0xff] %v11186_v60  ;;  %v3389_v24 = vrot.slane %v11171_v53, 6  ;;  %v3485_v27 = vrot.slane %v11171_v53, 2  ;;  %v11195_v4 = vadd.f32 %v10887_v38, %v3288_v33  ;;  %v3286_v52 = vadd.f32 %v3233_v49, %v11029_v17 }
 0x33c   : > { %13796 = vst [vmem:[#allocation135_spill] sm:$0xff] %v11190_v55  ;;  %v8046_v34 = vpop.f32.mrf.mxu0  ;;  %v13798_v40 = vrot.slane %v10912_v22, 2  ;;  %v3487_v59 = vrot.slane %v11152_v11, 2 }
 0x33d   : > { %v3392_v14 = vrot.slane %v11195_v4, 6  ;;  %v3488_v17 = vrot.slane %v11195_v4, 2  ;;  %v11214_v49 = vadd.f32 %v10887_v38, %v3286_v52  ;;  %v3291_v41 = vadd.f32 %v8046_v34, %v11032_v23 }
 0x33e   : > { %v11205_v35 = vsel %vm2486_vm10, %v13798_v40, %v13797_v51  ;;  %v3246_v63 = vpop.f32.mrf.mxu0  ;;  %v3603_v51 = vpack.c.bf16 %v11195_v4, %v11152_v11  ;;  %v11221_v40 = vsel %vm2389_vm7, %v3388_v2, %v3389_v24  ;;  %v11225_v33 = vsel %vm2486_vm10, %v3484_v31, %v3485_v27 }
 0x33f   : > { %13799 = vst [vmem:[#allocation136_spill] sm:$0xff] %v11214_v49  ;;  %13800 = vst [vmem:[#allocation137_spill] sm:$0xff] %v11225_v33  ;;  %v3390_v52 = vrot.slane %v11214_v49, 6  ;;  %v3289_v23 = vadd.f32 %v3246_v63, %v11036_v8  ;;  %v3602_v34 = vpack.c.bf16 %v11214_v49, %v11171_v53  ;;  %v11237_v30 = vsel %vm2389_vm7, %v3391_v56, %v3392_v14 }
 0x340   : > { %v8047_v60 = vpop.f32.mrf.mxu0  ;;  %13801 = vst [vmem:[#allocation138_spill] sm:$0xff] %v11237_v30  ;;  %v3486_v31 = vrot.slane %v11214_v49, 2  ;;  %v11242_v55 = vsel %vm2486_vm10, %v3487_v59, %v3488_v17  ;;  %v11245_v48 = vadd.f32 %v10887_v38, %v3291_v41  ;;  %v13812_v30 = vrot.slane %v10904_v20, 6 }
 0x341   : > { %13802 = vst [vmem:[#allocation139_spill] sm:$0xff] %v11242_v55  ;;  %v11248_v8 = vadd.f32 %v10887_v38, %v3289_v23  ;;  %v3292_v63 = vadd.f32 %v8047_v60, %v11039_v28  ;;  %8088 = vmatprep.mubr.bf16.mxu1 %v3602_v34  ;;  %v11253_v2 = vsel %vm2389_vm7, %v3389_v24, %v3390_v52 }
 0x342   : > { %v3249_v37 = vpop.f32.mrf.mxu0  ;;  %8089 = vmatmul.mubr.bf16.gmra.mxu1 %v3603_v51  ;;  %v11259_v33 = vsel %vm2389_vm7, %v3390_v52, %v3391_v56  ;;  %v11263_v41 = vsel %vm2486_vm10, %v3486_v31, %v3487_v59  ;;  %v11267_v28 = vsel %vm2486_vm10, %v3485_v27, %v3486_v31  ;;  %v3369_v56 = vrot.slane %v10935_v10, 6 }
 0x343   : > { %13803 = vst [vmem:[#allocation140_spill] sm:$0xff] %v11259_v33  ;;  %13804 = vst [vmem:[#allocation141_spill] sm:$0xff] %v11263_v41  ;;  %v3393_v60 = vrot.slane %v11248_v8, 6  ;;  %v3489_v24 = vrot.slane %v11248_v8, 2  ;;  %v11272_v51 = vadd.f32 %v10887_v38, %v3292_v63  ;;  %v3290_v23 = vadd.f32 %v3249_v37, %v11054_v62 }
 0x344   : > { %13805 = vst [vmem:[#allocation142_spill] sm:$0xff] %v11267_v28  ;;  %v13806_v52 = vrot.slane %v10912_v22, 2  ;;  %v13807_v59 = vrot.slane %v10909_v19, 2  ;;  %v3465_v63 = vrot.slane %v10935_v10, 2  ;;  %v13809_v22 = vrot.slane %v10938_v57, 6 }
 0x345   : > { %v3492_v62 = vrot.slane %v11272_v51, 2  ;;  %v11290_v37 = vadd.f32 %v10887_v38, %v3290_v23  ;;  %v11302_v31 = vsel %vm2486_vm10, %v3488_v17, %v3489_v24  ;;  %v3491_v27 = vrot.slane %v11245_v48, 2 }
 0x346   : > { %v3523_v34 = vsel %vm2486_vm10, %v13807_v59, %v13806_v52  ;;  %v3423_v52 = vsel %vm2389_vm7, %v3369_v56, %v13809_v22  ;;  %v11298_v59 = vsel %vm2389_vm7, %v3392_v14, %v3393_v60  ;;  %v13810_v23 = vrot.slane %v10909_v19, 6 }
 0x347   : > { %13808 = vst [vmem:[#allocation143_spill] sm:$0xff] %v11290_v37  ;;  %v3604_v38 = vpack.c.bf16 %v11290_v37, %v11248_v8  ;;  %v13811_v10 = vrot.slane %v11272_v51, 6  ;;  %v3605_v17 = vpack.c.bf16 %v11272_v51, %v11245_v48  ;;  %v3490_v49 = vrot.slane %v11290_v37, 2 }
 0x348   : > { %v11322_v41 = vsel %vm2486_vm10, %v3491_v27, %v3492_v62  ;;  %v4041_v33 = vpack.c.bf16 %v11205_v35, %v3523_v34  ;;  %v13813_v14 = vrot.slane %v11290_v37, 6 }
 0x349   : > { %v3428_v22 = vsel %vm2389_vm7, %v13811_v10, %v13810_v23  ;;  %8092 = vmatprep.mubr.bf16.mxu1 %v3604_v38  ;;  %v3424_v10 = vsel %vm2389_vm7, %v13812_v30, %v3369_v56  ;;  %v8658_v23 = vld [vmem:[#allocation5 + $0x370] sm:$0xff]   ;;  %v3466_v30 = vrot.slane %v10938_v57, 2  ;;  %v3464_v38 = vrot.slane %v10904_v20, 2 }
 0x34a   : > { %v6970_v28 = vpack.c.bf16 %v11127_v12, %v3428_v22  ;;  %v11333_v12 = vsel %vm2389_vm7, %v3393_v60, %v13813_v14  ;;  %v13814_v22 = vrot.slane %v10909_v19, 2  ;;  %8093 = vmatmul.mubr.bf16.gmra.mxu1 %v3605_v17  ;;  %v6973_v34 = vpack.c.bf16 %v3423_v52, %v3424_v10  ;;  %v13817_v10 = vld [vmem:[#allocation113_spill] sm:$0xff] }
 0x34b   : > { %v11348_v60 = vsel %vm2486_vm10, %v3490_v49, %v3491_v27  ;;  %v3374_v14 = vrot.slane %v10964_v50, 6  ;;  %8160 = vmatprep.mubr.bf16.mxu1 %v4041_v33  ;;  %v3371_v17 = vrot.slane %v10941_v46, 6  ;;  %v3372_v27 = vrot.slane %v10930_v3, 6 }
 0x34c   : > { %v11339_v55 = vsel %vm2486_vm10, %v3492_v62, %v13814_v22  ;;  %8112 = vmatprep.mubr.msk.bf16.mxu0 %vm10277_vm9, %v6970_v28  ;;  %v13816_v62 = vpack.c.bf16 %v11090_v1, %v11098_v61  ;;  %v11357_v28 = vsel %vm2486_vm10, %v3489_v24, %v3490_v49  ;;  %v3467_v1 = vrot.slane %v10941_v46, 2  ;;  %v8659_v24 = vld [vmem:[#allocation5 + $0x368] sm:$0xff]  }
 0x34d   : > { %v3520_v33 = vsel %vm2486_vm10, %v3464_v38, %v3465_v63  ;;  %v3373_v49 = vrot.slane %v10961_v54, 6  ;;  %v13818_v22 = vrot.slane %v10938_v57, 6  ;;  %v13819_v52 = vrot.slane %v10894_v44, 2  ;;  %v8660_v44 = vld [vmem:[#allocation5 + $0x360] sm:$0xff]  }
 0x34e   : > { %8113 = vmatmul.mubr.bf16.vlgmr.msra.gmra.mxu0 %v13816_v62  ;;  %v3421_v57 = vsel %vm2389_vm7, %v3371_v17, %v3372_v27 }
 0x34f   : > { %8116 = vmatprep.mubr.msk.bf16.mxu0 %vm10277_vm9, %v6973_v34  ;;  %8193 = vmatpush3.bf16.msra.mxu0 %v13817_v10  ;;  %v3422_v62 = vsel %vm2389_vm7, %v13818_v22, %v3371_v17  ;;  %v3518_v34 = vsel %vm2486_vm10, %v3466_v30, %v3467_v1  ;;  %v3519_v10 = vsel %vm2486_vm10, %v3465_v63, %v3466_v30  ;;  %v3469_v22 = vrot.slane %v10961_v54, 2 }
 0x350   : > { %8194 = vmatprep.subr.bf16.mxu0 %v8658_v23  ;;  %v3521_v61 = vsel %vm2486_vm10, %v13819_v52, %v3464_v38  ;;  %v3419_v56 = vsel %vm2389_vm7, %v3373_v49, %v3374_v14  ;;  %v3560_v20 = vpack.c.bf16 %v3421_v57, %v3422_v62  ;;  %v4043_v19 = vpack.c.bf16 %v3518_v34, %v3519_v10 }
 0x351   : > { %v7002_v46 = vpack.c.bf16 %v3520_v33, %v3521_v61  ;;  %v3420_v63 = vsel %vm2389_vm7, %v3372_v27, %v3373_v49  ;;  %v3470_v52 = vrot.slane %v10964_v50, 2  ;;  %v8664_v61 = vld [vmem:[#allocation5 + $0x330] sm:$0xff]   ;;  %v3468_v33 = vrot.slane %v10930_v3, 2  ;;  %v8661_v49 = vld [vmem:[#allocation5 + $0x358] sm:$0xff]  }
 0x352   : > { %v6976_v38 = vpack.c.bf16 %v3419_v56, %v3420_v63  ;;  %v3375_v57 = vrot.slane %v10967_v58, 6  ;;  %v3376_v17 = vrot.slane %v10958_v9, 6  ;;  %v3471_v27 = vrot.slane %v10967_v58, 2 }
 0x353   : > { %8195 = vmatpush3.bf16.msra.mxu0 %v8658_v23  ;;  %8161 = vmatmul.mubr.msk.bf16.vlgmr.msra.gmra.mxu1 %vm10509_vm12, %v7002_v46  ;;  %v3378_v23 = vrot.slane %v10994_v47, 6  ;;  %v3377_v46 = vrot.slane %v10991_v26, 6  ;;  %v3516_v56 = vsel %vm2486_vm10, %v3468_v33, %v3469_v22  ;;  %v3515_v62 = vsel %vm2486_vm10, %v3469_v22, %v3470_v52 }
 0x354   : > { %8196 = vmatprep.subr.bf16.mxu0 %v8659_v24  ;;  %8164 = vmatprep.mubr.bf16.mxu1 %v4043_v19  ;;  %v3514_v19 = vsel %vm2486_vm10, %v3470_v52, %v3471_v27  ;;  %v3517_v34 = vsel %vm2486_vm10, %v3467_v1, %v3468_v33  ;;  %v8663_v52 = vld [vmem:[#allocation5 + $0x350] sm:$0xff]   ;;  %v3474_v33 = vrot.slane %v10994_v47, 2  ;;  %v13825_v47 = vld [vmem:[#allocation96_spill] sm:$0xff] }
 0x355   : > { %8241 = vmatpush3.bf16.msra.mxu1 %v11057_v15  ;;  %v3415_v10 = vsel %vm2389_vm7, %v3377_v46, %v3378_v23  ;;  %v7005_v63 = vpack.c.bf16 %v3516_v56, %v3517_v34  ;;  %v3417_v15 = vsel %vm2389_vm7, %v3375_v57, %v3376_v17  ;;  %v4045_v50 = vpack.c.bf16 %v3514_v19, %v3515_v62  ;;  %v8667_v56 = vld [vmem:[#allocation5 + $0x320] sm:$0xff]   ;;  %v8666_v19 = vld [vmem:[#allocation5 + $0x348] sm:$0xff]  }
 0x356   : > { %8117 = vmatmul.mubr.bf16.gmra.mxu0 %v3560_v20  ;;  %v3418_v20 = vsel %vm2389_vm7, %v3374_v14, %v3375_v57  ;;  %8242 = vmatprep.subr.bf16.mxu1 %v8664_v61  ;;  %v3473_v14 = vrot.slane %v10991_v26, 2  ;;  %v3416_v22 = vsel %vm2389_vm7, %v3376_v17, %v3377_v46  ;;  %v3379_v57 = vrot.slane %v11001_v0, 6 }
 0x357   : > { %8120 = vmatprep.mubr.msk.bf16.mxu0 %vm10277_vm9, %v6976_v38  ;;  %8197 = vmatpush3.bf16.msra.mxu0 %v8659_v24  ;;  %v8665_v24 = vld [vmem:[#allocation5 + $0x328] sm:$0xff]   ;;  %v3562_v38 = vpack.c.bf16 %v3417_v15, %v3418_v20  ;;  %v6979_v1 = vpack.c.bf16 %v3415_v10, %v3416_v22  ;;  %v3380_v20 = vrot.slane %v10984_v5, 6  ;;  %v3381_v17 = vrot.slane %v11045_v16, 6  ;;  %v8668_v10 = vld [vmem:[#allocation5 + $0x318] sm:$0xff]  }
 0x358   : > { %8198 = vmatprep.subr.bf16.mxu0 %v8660_v44  ;;  %v3511_v34 = vsel %vm2486_vm10, %v3473_v14, %v3474_v33  ;;  %v13823_v22 = vrot.slane %v11062_v25, 6 }
 0x359   : > { %8243 = vmatpush3.bf16.msra.mxu1 %v8664_v61  ;;  %v3475_v61 = vrot.slane %v11001_v0, 2 }
 0x35a   : > { %8244 = vmatprep.subr.bf16.mxu1 %v8665_v24 }
 0x35b   : > { %8199 = vmatpush3.bf16.msra.mxu0 %v8660_v44  ;;  %8165 = vmatmul.mubr.msk.bf16.gmra.mxu1 %vm10509_vm12, %v7005_v63  ;;  %v3472_v44 = vrot.slane %v10958_v9, 2  ;;  %v3510_v62 = vsel %vm2486_vm10, %v3474_v33, %v3475_v61  ;;  %v13822_v63 = vld [vmem:[#allocation120_spill] sm:$0xff]  ;;  %v3413_v33 = vsel %vm2389_vm7, %v3379_v57, %v3380_v20 }
 0x35c   : > { %8200 = vmatprep.subr.bf16.mxu0 %v8661_v49  ;;  %8168 = vmatprep.mubr.bf16.mxu1 %v4045_v50  ;;  %v3414_v50 = vsel %vm2389_vm7, %v3378_v23, %v3379_v57  ;;  %v13824_v23 = vld [vmem:[#allocation95_spill] sm:$0xff]  ;;  %v2304_v26 = vadd.f32 %v13822_v63, %v13825_v47  ;;  %v4047_v0 = vpack.c.bf16 %v3510_v62, %v3511_v34  ;;  %v3476_v57 = vrot.slane %v10984_v5, 2  ;;  %v13831_v34 = vld [vmem:[#allocation101_spill] sm:$0xff] }
 0x35d   : > { %v3512_v46 = vsel %vm2486_vm10, %v3472_v44, %v3473_v14  ;;  %8245 = vmatpush3.bf16.msra.mxu1 %v8665_v24  ;;  %v3411_v24 = vsel %vm2389_vm7, %v3381_v17, %v13823_v22  ;;  %v13826_v22 = vld [vmem:[#allocation99_spill] sm:$0xff] }
 0x35e   : > { %8121 = vmatmul.mubr.bf16.gmra.mxu0 %v3562_v38  ;;  %8246 = vmatprep.subr.bf16.mxu1 %v8667_v56  ;;  %v3513_v38 = vsel %vm2486_vm10, %v3471_v27, %v3472_v44  ;;  %v3412_v27 = vsel %vm2389_vm7, %v3380_v20, %v3381_v17  ;;  %v8669_v44 = vld [vmem:[#allocation5 + $0x340] sm:$0xff]   ;;  %v2307_v25 = vadd.f32 %v13822_v63, %v13826_v22  ;;  %v13828_v20 = vld [vmem:[#allocation58_spill] sm:$0xff] }
 0x35f   : > { %8124 = vmatprep.mubr.msk.bf16.mxu0 %vm10277_vm9, %v6979_v1  ;;  %8201 = vmatpush3.bf16.msra.mxu0 %v8661_v49  ;;  %v13821_v49 = vld [vmem:[#allocation94_spill] sm:$0xff]  ;;  %v2301_v1 = vadd.f32 %v13822_v63, %v13824_v23  ;;  %v7008_v14 = vpack.c.bf16 %v3512_v46, %v3513_v38  ;;  %v13827_v23 = vld [vmem:[#allocation100_spill] sm:$0xff]  ;;  %v6982_v47 = vpack.c.bf16 %v3411_v24, %v3412_v27  ;;  %v13832_v24 = vrot.slane %v11045_v16, 2 }
 0x360   : > { %8202 = vmatprep.subr.bf16.mxu0 %v8663_v52  ;;  %v2303_v15 = vadd.f32 %v13822_v63, %v13821_v49  ;;  %v3564_v49 = vpack.c.bf16 %v3413_v33, %v3414_v50  ;;  %v2305_v9 = vadd.f32 %v13822_v63, %v13827_v23  ;;  %v13830_v50 = vld [vmem:[#allocation55_spill] sm:$0xff]  ;;  %v2308_v38 = vadd.f32 %v13822_v63, %v13831_v34  ;;  %v13834_v33 = vld [vmem:[#allocation60_spill] sm:$0xff]  ;;  %v8671_v23 = vld [vmem:[#allocation5 + $0x308] sm:$0xff]  }
 0x361   : > { %8247 = vmatpush3.bf16.msra.mxu1 %v8667_v56  ;;  %v13829_v56 = vld [vmem:[#allocation56_spill] sm:$0xff]  ;;  %v2336_v62 = vadd.f32 %v2304_v26, %v13830_v50  ;;  %v13836_v26 = vld [vmem:[#allocation105_spill] sm:$0xff]  ;;  %v13839_v50 = vld [vmem:[#allocation110_spill] sm:$0xff] }
 0x362   : > { %8248 = vmatprep.subr.bf16.mxu1 %v8668_v10  ;;  %v2335_v17 = vadd.f32 %v2303_v15, %v13828_v20  ;;  %v2333_v46 = vadd.f32 %v2301_v1, %v13829_v56  ;;  %v13833_v15 = vld [vmem:[#allocation62_spill] sm:$0xff]  ;;  %v13835_v27 = vld [vmem:[#allocation104_spill] sm:$0xff]  ;;  %v2309_v22 = vadd.f32 %v13822_v63, %v13836_v26  ;;  %v13838_v56 = vld [vmem:[#allocation109_spill] sm:$0xff]  ;;  %v2313_v34 = vadd.f32 %v13822_v63, %v13839_v50 }
 0x363   : > { %8203 = vmatpush3.bf16.msra.mxu0 %v8663_v52  ;;  %8169 = vmatmul.mubr.msk.bf16.gmra.mxu1 %vm10509_vm12, %v7008_v14  ;;  %v8670_v52 = vld [vmem:[#allocation5 + $0x310] sm:$0xff]   ;;  %v3508_v14 = vsel %vm2486_vm10, %v3476_v57, %v13832_v24  ;;  %v2339_v1 = vadd.f32 %v2307_v25, %v13833_v15 }
 0x364   : > { %8204 = vmatprep.subr.bf16.mxu0 %v8666_v19  ;;  %8172 = vmatprep.mubr.bf16.mxu1 %v4047_v0  ;;  %v11472_v0 = vld [vmem:[#allocation5 + $0x3b8] sm:$0xff]  }
 0x365   : > { %8249 = vmatpush3.bf16.msra.mxu1 %v8668_v10  ;;  %v2315_v10 = vadd.f32 %v13822_v63, %v13838_v56  ;;  %v13840_v25 = vld [vmem:[#allocation111_spill] sm:$0xff]  ;;  %v11499_v56 = vadd.f32 %v11048_v6, %v2336_v62  ;;  %v13845_v6 = vpack.c.bf16 %v11078_v13, %v11104_v45  ;;  %v13846_v62 = vpack.c.bf16 %v11108_v21, %v11114_v36 }
 0x366   : > { %8125 = vmatmul.mubr.bf16.gmra.mxu0 %v3564_v49  ;;  %v2337_v49 = vadd.f32 %v2305_v9, %v13834_v33  ;;  %8250 = vmatprep.subr.bf16.mxu1 %v8670_v52  ;;  %v3509_v9 = vsel %vm2486_vm10, %v3475_v61, %v3476_v57  ;;  %v2316_v24 = vadd.f32 %v13822_v63, %v13840_v25  ;;  %v13841_v26 = vld [vmem:[#allocation59_spill] sm:$0xff]  ;;  %v13842_v61 = vld [vmem:[#allocation66_spill] sm:$0xff] }
 0x367   : > { %8128 = vmatprep.mubr.msk.bf16.mxu0 %vm10277_vm9, %v6982_v47  ;;  %8205 = vmatpush3.bf16.msra.mxu0 %v8666_v19  ;;  %v2311_v19 = vadd.f32 %v13822_v63, %v13835_v27  ;;  %v13837_v47 = vld [vmem:[#allocation106_spill] sm:$0xff]  ;;  %v7011_v15 = vpack.c.bf16 %v3508_v14, %v3509_v9  ;;  %v11491_v33 = vadd.f32 %v11042_v18, %v2335_v17  ;;  %v13844_v17 = vld [vmem:[#allocation63_spill] sm:$0xff]  ;;  %v13864_v9 = vld [vmem:[#allocation137_spill] sm:$0xff] }
 0x368   : > { %8206 = vmatprep.subr.bf16.mxu0 %v8669_v44  ;;  %v2312_v20 = vadd.f32 %v13822_v63, %v13837_v47  ;;  %v11494_v27 = vadd.f32 %v11045_v16, %v2333_v46  ;;  %v2340_v47 = vadd.f32 %v2308_v38, %v13841_v26  ;;  %v8673_v63 = vld [vmem:[#allocation5 + $0x300] sm:$0xff]   ;;  %v11505_v18 = vadd.f32 %v11074_v42, %v2339_v1  ;;  %v13847_v42 = vld [vmem:[#allocation39_spill] sm:$0xff]  ;;  %v13848_v1 = vld [vmem:[#allocation38_spill] sm:$0xff] }
 0x369   : > { %8251 = vmatpush3.bf16.msra.mxu1 %v8670_v52  ;;  %v2343_v57 = vadd.f32 %v2311_v19, %v13842_v61  ;;  %v11508_v16 = vadd.f32 %v11093_v39, %v2337_v49  ;;  %v2347_v14 = vadd.f32 %v2315_v10, %v13847_v42  ;;  %v2345_v39 = vadd.f32 %v2313_v34, %v13848_v1  ;;  %v13849_v49 = vld [vmem:[#allocation37_spill] sm:$0xff]  ;;  %v13860_v10 = vld [vmem:[#allocation134_spill] sm:$0xff]  ;;  %v13861_v50 = vld [vmem:[#allocation135_spill] sm:$0xff] }
 0x36a   : > { %8252 = vmatprep.subr.bf16.mxu1 %v8671_v23  ;;  %v2344_v46 = vadd.f32 %v2312_v20, %v13844_v17  ;;  %v11519_v38 = vadd.f32 %v11119_v7, %v2340_v47  ;;  %v2348_v19 = vadd.f32 %v2316_v24, %v13849_v49  ;;  %v13863_v34 = vpack.c.bf16 %v11253_v2, %v11221_v40  ;;  %v13865_v25 = vld [vmem:[#allocation119_spill] sm:$0xff]  ;;  %v13868_v26 = vld [vmem:[#allocation140_spill] sm:$0xff]  ;;  %v13870_v61 = vld [vmem:[#allocation141_spill] sm:$0xff] }
 0x36b   : > { %8207 = vmatpush3.bf16.msra.mxu0 %v8669_v44  ;;  %8173 = vmatmul.mubr.msk.bf16.gmra.mxu1 %vm10509_vm12, %v7011_v15  ;;  %v13843_v44 = vld [vmem:[#allocation64_spill] sm:$0xff]  ;;  %v11530_v13 = vadd.f32 %v11152_v11, %v2343_v57  ;;  %v11539_v36 = vadd.f32 %v11245_v48, %v2347_v14  ;;  %v13854_v11 = vld [vmem:[#allocation117_spill] sm:$0xff]  ;;  %v13866_v24 = vpack.c.bf16 %v13864_v9, %v13865_v25  ;;  %v13867_v15 = vld [vmem:[#allocation138_spill] sm:$0xff]  ;;  %v13874_v2 = vrot.slane %v11290_v37, 6 }
 0x36c   : > { %8288 = vmatprep.subr.bf16.mxu0 %v11472_v0  ;;  %v2341_v52 = vadd.f32 %v2309_v22, %v13843_v44  ;;  %8176 = vmatprep.mubr.bf16.mxu1 %v13846_v62  ;;  %v13850_v22 = vpack.c.bf16 %v11176_v29, %v11143_v32  ;;  %v11536_v21 = vadd.f32 %v11195_v4, %v2344_v46  ;;  %v13855_v29 = vld [vmem:[#allocation115_spill] sm:$0xff]  ;;  %v13857_v4 = vld [vmem:[#allocation118_spill] sm:$0xff]  ;;  %v3395_v44 = vrot.slane %v11245_v48, 6 }
 0x36d   : > { %8253 = vmatpush3.bf16.msra.mxu1 %v8671_v23  ;;  %13851 = vst [vmem:[#allocation17_spill] sm:$0xff] %v11539_v36  ;;  %v11542_v32 = vadd.f32 %v11248_v8, %v2345_v39  ;;  %v11545_v7 = vadd.f32 %v11272_v51, %v2348_v19  ;;  %v13858_v23 = vld [vmem:[#allocation121_spill] sm:$0xff]  ;;  %v13862_v8 = vpack.c.bf16 %v13860_v10, %v13861_v50  ;;  %v13871_v57 = vld [vmem:[#allocation142_spill] sm:$0xff]  ;;  %v13875_v17 = vrot.slane %v11272_v51, 6  ;;  %v13876_v42 = vld [vmem:[#allocation139_spill] sm:$0xff] }
 0x36e   : > { %8129 = vmatmul.mubr.bf16.gmra.mxu0 %v13845_v6  ;;  %v11533_v45 = vadd.f32 %v11171_v53, %v2341_v52  ;;  %8254 = vmatprep.subr.bf16.mxu1 %v8673_v63  ;;  %v13856_v53 = vpack.c.bf16 %v13854_v11, %v13855_v29  ;;  %v13859_v20 = vpack.c.bf16 %v13857_v4, %v13858_v23  ;;  %v11589_v6 = vld [vmem:[%s9157_s20] sm:$0xff]  ;;  %v11593_v62 = vld [vmem:[%s9157_s20 + $0x8] sm:$0xff]  ;;  %v11622_v29 = vld [vmem:[%s9157_s20 + $0x18] sm:$0xff] }
 0x36f   : > { %8132 = vmatprep.mubr.msk.bf16.mxu0 %vm10277_vm9, %v13850_v22  ;;  %13852 = vst [vmem:[#allocation113_spill] sm:$0xff] %v11542_v32  ;;  %13853 = vst [vmem:[#allocation35_spill] sm:$0xff] %v11545_v7  ;;  %v13869_v47 = vpack.c.bf16 %v13867_v15, %v13868_v26  ;;  %v13873_v40 = vpack.c.bf16 %v11333_v12, %v11298_v59  ;;  %v3398_v52 = vsel %vm2389_vm7, %v13874_v2, %v3395_v44  ;;  %v11597_v12 = vld [vmem:[%s9157_s20 + $0xf8] sm:$0xff]  ;;  %v11635_v23 = vld [vmem:[%s9157_s20 + $0x28] sm:$0xff] }
 0x370   : > { %v3397_v46 = vsel %vm2389_vm7, %v3395_v44, %v13875_v17  ;;  %v4395_v48 = vrot.slane %v11589_v6, 5  ;;  %v4396_v59 = vrot.slane %v11593_v62, 5  ;;  %v13507_v35 = vrot.slane %v11597_v12, 5  ;;  %v13879_v39 = vld [vmem:[#allocation16_spill] sm:$0xff]  ;;  %v8674_v10 = vld [vmem:[#allocation5 + $0x3b0] sm:$0xff]   ;;  %v8675_v25 = vld [vmem:[#allocation5 + $0x3a8] sm:$0xff]  }
 0x371   : > { %8255 = vmatpush3.bf16.msra.mxu1 %v8673_v63  ;;  %v13872_v63 = vpack.c.bf16 %v13870_v61, %v13871_v57  ;;  %v3572_v51 = vpack.c.bf16 %v3397_v46, %v3398_v52  ;;  %v13877_v14 = vpack.c.bf16 %v11302_v31, %v13876_v42  ;;  %v13878_v1 = vpack.c.bf16 %v11348_v60, %v11357_v28  ;;  %v11618_v31 = vld [vmem:[%s9157_s20 + $0x10] sm:$0xff]  ;;  %v11661_v61 = vld [vmem:[%s9157_s20 + $0x38] sm:$0xff]  ;;  %v11665_v57 = vld [vmem:[%s9157_s20 + $0x40] sm:$0xff] }
 0x372   : > { %v4458_v49 = vsel %vm4427_vm13, %v4395_v48, %v4396_v59  ;;  %v4459_v19 = vsel %vm4427_vm13, %v13507_v35, %v4395_v48  ;;  %v4397_v22 = vrot.slane %v11618_v31, 5  ;;  %v4398_v60 = vrot.slane %v11622_v29, 5  ;;  %v11657_v26 = vld [vmem:[%s9157_s20 + $0x30] sm:$0xff]  ;;  %v11669_v44 = vld [vmem:[%s9157_s20 + $0x48] sm:$0xff]  ;;  %v8676_v2 = vld [vmem:[#allocation5 + $0x3a0] sm:$0xff]  }
 0x373   : > { %8177 = vmatmul.mubr.msk.bf16.gmra.mxu1 %vm10509_vm12, %v13856_v53  ;;  %v7043_v11 = vpack.c.bf16 %v4458_v49, %v4459_v19  ;;  %v13880_v28 = vmov 0  ;;  %v11631_v53 = vld [vmem:[%s9157_s20 + $0x20] sm:$0xff]  ;;  %v13883_v50 = vpack.c.bf16 %v11339_v55, %v11322_v41  ;;  %v13887_v48 = vld [vmem:[#allocation22_spill] sm:$0xff]  ;;  %v8677_v42 = vld [vmem:[#allocation5 + $0x398] sm:$0xff]   ;;  %vm6554_vm7 = vcmask 1045509  }
 0x374   : > { %8180 = vmatprep.mubr.bf16.mxu1 %v13862_v8  ;;  %v13881_v28 = vsel %vm11626_vm15, 4294967295, %v13880_v28  ;;  %v4399_v4 = vrot.slane %v11631_v53, 5  ;;  %v13884_v8 = vld [vmem:[#allocation18_spill] sm:$0xff]  ;;  %v4456_v9 = vsel %vm4427_vm13, %v4397_v22, %v4398_v60  ;;  %v13885_v55 = vld [vmem:[#allocation20_spill] sm:$0xff]  ;;  %v13886_v52 = vld [vmem:[#allocation21_spill] sm:$0xff] }
 0x375   : > { %13882 = vst [vmem:[#allocation94_spill] sm:$0xff] %v13881_v28  ;;  %v11689_v19 = vld [vmem:[%s9157_s20 + $0x58] sm:$0xff]  ;;  %v11835_v7 = vld [vmem:[%s9157_s20 + $0xf0] sm:$0xff]  ;;  %v13898_v36 = vld [vmem:[#allocation33_spill] sm:$0xff] }
 0x376   : > { %8133 = vmatmul.mubr.bf16.gmra.mxu0 %v13859_v20  ;;  %v4400_v20 = vrot.slane %v11635_v23, 5  ;;  %v4455_v30 = vsel %vm4427_vm13, %v4398_v60, %v4399_v4  ;;  %v13897_v35 = vld [vmem:[#allocation32_spill] sm:$0xff] }
 0x377   : > { %8136 = vmatprep.mubr.msk.bf16.mxu0 %vm10277_vm9, %v13863_v34  ;;  %v4457_v34 = vsel %vm4427_vm13, %v4396_v59, %v4397_v22  ;;  %v4406_v22 = vrot.slane %v11689_v19, 5 }
 0x378   : > { %v4454_v41 = vsel %vm4427_vm13, %v4399_v4, %v4400_v20  ;;  %v11697_v4 = vld [vmem:[%s9157_s20 + $0x68] sm:$0xff] }
 0x379   : > { %v7046_v15 = vpack.c.bf16 %v4454_v41, %v4455_v30  ;;  %v8679_v30 = vld [vmem:[#allocation5 + $0x388] sm:$0xff]  }
 0x37b   : > { %8181 = vmatmul.mubr.msk.bf16.gmra.mxu1 %vm10509_vm12, %v13866_v24  ;;  %v4590_v24 = vpack.c.bf16 %v4456_v9, %v4457_v34  ;;  %v13889_v9 = vld [vmem:[#allocation24_spill] sm:$0xff] }
 0x37c   : > { %8184 = vmatprep.mubr.bf16.mxu1 %v13872_v63  ;;  %v4403_v63 = vrot.slane %v11665_v57, 5 }
 0x37e   : > { %8137 = vmatmul.mubr.bf16.gmra.mxu0 %v13869_v47  ;;  %v4401_v47 = vrot.slane %v11657_v26, 5 }
 0x37f   : > { %8140 = vmatprep.mubr.msk.bf16.mxu0 %vm10277_vm9, %v13873_v40  ;;  %v4404_v40 = vrot.slane %v11669_v44, 5  ;;  %vm6558_vm9 = vcmask 1047559  }
 0x380   : > { %v4453_v46 = vsel %vm4427_vm13, %v4400_v20, %v4401_v47  ;;  %v4408_v20 = vrot.slane %v11697_v4, 5 }
 0x381   : > { %v4450_v59 = vsel %vm4427_vm13, %v4403_v63, %v4404_v40 }
 0x383   : > { %8185 = vmatmul.mubr.msk.bf16.gmra.mxu1 %vm10509_vm12, %v13877_v14 }
 0x384   : > { %8188 = vmatprep.mubr.bf16.mxu1 %v13878_v1 }
 0x386   : > { %8141 = vmatmul.mubr.bf16.gmra.mxu0 %v3572_v51 }
 0x387   : > { %8208 = vmatprep.mubr.bf16.mxu0 %v13879_v39  ;;  %v11685_v39 = vld [vmem:[%s9157_s20 + $0x50] sm:$0xff] }
 0x388   : > { %v4405_v49 = vrot.slane %v11685_v39, 5 }
 0x38a   : > { %v4449_v34 = vsel %vm4427_vm13, %v4404_v40, %v4405_v49  ;;  %v11721_v40 = vld [vmem:[%s9157_s20 + $0x80] sm:$0xff] }
 0x38b   : > { %8189 = vmatmul.mubr.msk.bf16.gmra.mxu1 %vm10509_vm12, %v13883_v50  ;;  %v13888_v50 = vld [vmem:[#allocation23_spill] sm:$0xff] }
 0x38c   : > { %8256 = vmatprep.mubr.msk.bf16.mxu1 %vm11626_vm15, %v7043_v11  ;;  %v11693_v11 = vld [vmem:[%s9157_s20 + $0x60] sm:$0xff] }
 0x38d   : > { %v4407_v60 = vrot.slane %v11693_v11, 5 }
 0x38e   : > { %8209 = vmatmul.mubr.bf16.vlgmr.msra.gmra.mxu0 %v13884_v8  ;;  %v4448_v8 = vsel %vm4427_vm13, %v4405_v49, %v4406_v22 }
 0x38f   : > { %8289 = vmatpush3.bf16.msra.mxu0 %v11472_v0  ;;  %8212 = vmatprep.mubr.bf16.mxu0 %v13885_v55  ;;  %v4402_v0 = vrot.slane %v11661_v61, 5  ;;  %v4446_v55 = vsel %vm4427_vm13, %v4407_v60, %v4408_v20  ;;  %v4447_v41 = vsel %vm4427_vm13, %v4406_v22, %v4407_v60  ;;  %v11741_v60 = vld [vmem:[%s9157_s20 + $0x90] sm:$0xff] }
 0x390   : > { %8290 = vmatprep.subr.bf16.mxu0 %v8674_v10 }
 0x391   : > { %v4452_v17 = vsel %vm4427_vm13, %v4401_v47, %v4402_v0  ;;  %v4451_v51 = vsel %vm4427_vm13, %v4402_v0, %v4403_v63  ;;  %v11717_v0 = vld [vmem:[%s9157_s20 + $0x78] sm:$0xff] }
 0x392   : > { %v4592_v14 = vpack.c.bf16 %v4452_v17, %v4453_v46  ;;  %v7049_v1 = vpack.c.bf16 %v4450_v59, %v4451_v51  ;;  %v4410_v63 = vrot.slane %v11717_v0, 5  ;;  %v8680_v46 = vld [vmem:[#allocation5 + $0x380] sm:$0xff]  }
 0x393   : > { %8291 = vmatpush3.bf16.msra.mxu0 %v8674_v10  ;;  %8257 = vmatmul.mubr.bf16.vlgmr.msra.gmra.mxu1 %v4590_v24  ;;  %v8678_v10 = vld [vmem:[#allocation5 + $0x390] sm:$0xff]   ;;  %v7052_v24 = vpack.c.bf16 %v4446_v55, %v4447_v41 }
 0x394   : > { %8292 = vmatprep.subr.bf16.mxu0 %v8675_v25  ;;  %8260 = vmatprep.mubr.msk.bf16.mxu1 %vm11626_vm15, %v7046_v15  ;;  %v11713_v15 = vld [vmem:[%s9157_s20 + $0x70] sm:$0xff] }
 0x395   : > { %v4409_v47 = vrot.slane %v11713_v15, 5  ;;  %v13892_v41 = vld [vmem:[#allocation27_spill] sm:$0xff] }
 0x396   : > { %8213 = vmatmul.mubr.bf16.gmra.mxu0 %v13886_v52  ;;  %v11725_v52 = vld [vmem:[%s9157_s20 + $0x88] sm:$0xff] }
 0x397   : > { %8216 = vmatprep.mubr.bf16.mxu0 %v13887_v48  ;;  %8293 = vmatpush3.bf16.msra.mxu0 %v8675_v25  ;;  %v4594_v25 = vpack.c.bf16 %v4448_v8, %v4449_v34  ;;  %v4412_v17 = vrot.slane %v11725_v52, 5  ;;  %v13890_v48 = vld [vmem:[#allocation25_spill] sm:$0xff]  ;;  %v4444_v59 = vsel %vm4427_vm13, %v4409_v47, %v4410_v63  ;;  %v4445_v51 = vsel %vm4427_vm13, %v4408_v20, %v4409_v47 }
 0x398   : > { %8294 = vmatprep.subr.bf16.mxu0 %v8676_v2  ;;  %v4596_v49 = vpack.c.bf16 %v4444_v59, %v4445_v51  ;;  %v11749_v8 = vld [vmem:[%s9157_s20 + $0xa0] sm:$0xff]  ;;  %v11773_v51 = vld [vmem:[%s9157_s20 + $0xb8] sm:$0xff] }
 0x399   : > { %v4415_v34 = vrot.slane %v11749_v8, 5 }
 0x39b   : > { %8295 = vmatpush3.bf16.msra.mxu0 %v8676_v2  ;;  %8261 = vmatmul.mubr.bf16.gmra.mxu1 %v4592_v14  ;;  %v4411_v2 = vrot.slane %v11721_v40, 5 }
 0x39c   : > { %8296 = vmatprep.subr.bf16.mxu0 %v8677_v42  ;;  %8264 = vmatprep.mubr.msk.bf16.mxu1 %vm11626_vm15, %v7049_v1 }
 0x39d   : > { %v4442_v14 = vsel %vm4427_vm13, %v4411_v2, %v4412_v17  ;;  %v4443_v1 = vsel %vm4427_vm13, %v4410_v63, %v4411_v2 }
 0x39e   : > { %8217 = vmatmul.mubr.bf16.gmra.mxu0 %v13888_v50  ;;  %v7055_v22 = vpack.c.bf16 %v4442_v14, %v4443_v1  ;;  %v11745_v50 = vld [vmem:[%s9157_s20 + $0x98] sm:$0xff]  ;;  %v11781_v1 = vld [vmem:[%s9157_s20 + $0xc8] sm:$0xff] }
 0x39f   : > { %8220 = vmatprep.mubr.bf16.mxu0 %v13889_v9  ;;  %8297 = vmatpush3.bf16.msra.mxu0 %v8677_v42  ;;  %v13891_v42 = vld [vmem:[#allocation26_spill] sm:$0xff]  ;;  %v4414_v20 = vrot.slane %v11745_v50, 5 }
 0x3a0   : > { %8298 = vmatprep.subr.bf16.mxu0 %v8678_v10  ;;  %v11753_v9 = vld [vmem:[%s9157_s20 + $0xa8] sm:$0xff] }
 0x3a1   : > { %v4416_v55 = vrot.slane %v11753_v9, 5  ;;  %v4439_v63 = vsel %vm4427_vm13, %v4414_v20, %v4415_v34 }
 0x3a3   : > { %8299 = vmatpush3.bf16.msra.mxu0 %v8678_v10  ;;  %8265 = vmatmul.mubr.bf16.gmra.mxu1 %v4594_v25  ;;  %v4413_v10 = vrot.slane %v11741_v60, 5  ;;  %v4438_v47 = vsel %vm4427_vm13, %v4415_v34, %v4416_v55  ;;  %v13895_v34 = vld [vmem:[#allocation30_spill] sm:$0xff] }
 0x3a4   : > { %8300 = vmatprep.subr.bf16.mxu0 %v8679_v30  ;;  %8268 = vmatprep.mubr.msk.bf16.mxu1 %vm11626_vm15, %v7052_v24  ;;  %v13893_v24 = vld [vmem:[#allocation28_spill] sm:$0xff] }
 0x3a5   : > { %v4441_v25 = vsel %vm4427_vm13, %v4412_v17, %v4413_v10  ;;  %v11777_v17 = vld [vmem:[%s9157_s20 + $0xc0] sm:$0xff] }
 0x3a6   : > { %8221 = vmatmul.mubr.bf16.gmra.mxu0 %v13890_v48  ;;  %v11769_v48 = vld [vmem:[%s9157_s20 + $0xb0] sm:$0xff]  ;;  %v4419_v14 = vrot.slane %v11777_v17, 5 }
 0x3a7   : > { %8224 = vmatprep.mubr.bf16.mxu0 %v13891_v42  ;;  %8301 = vmatpush3.bf16.msra.mxu0 %v8679_v30  ;;  %v4440_v30 = vsel %vm4427_vm13, %v4413_v10, %v4414_v20  ;;  %v4417_v59 = vrot.slane %v11769_v48, 5  ;;  %v4418_v42 = vrot.slane %v11773_v51, 5 }
 0x3a8   : > { %8302 = vmatprep.subr.bf16.mxu0 %v8680_v46  ;;  %v4598_v2 = vpack.c.bf16 %v4440_v30, %v4441_v25 }
 0x3a9   : > { %v4436_v10 = vsel %vm4427_vm13, %v4417_v59, %v4418_v42  ;;  %v4437_v20 = vsel %vm4427_vm13, %v4416_v55, %v4417_v59  ;;  %v4435_v30 = vsel %vm4427_vm13, %v4418_v42, %v4419_v14  ;;  %v11809_v59 = vld [vmem:[%s9157_s20 + $0xe8] sm:$0xff]  ;;  %v4492_v42 = vrot.slane %v11589_v6, 3 }
 0x3aa   : > { %v4600_v25 = vpack.c.bf16 %v4436_v10, %v4437_v20  ;;  %v4494_v10 = vrot.slane %v11618_v31, 3  ;;  %v13896_v20 = vld [vmem:[#allocation31_spill] sm:$0xff] }
 0x3ab   : > { %8303 = vmatpush3.bf16.msra.mxu0 %v8680_v46  ;;  %8269 = vmatmul.mubr.bf16.gmra.mxu1 %v4596_v49  ;;  %v7058_v46 = vpack.c.bf16 %v4438_v47, %v4439_v63  ;;  %v4420_v49 = vrot.slane %v11781_v1, 5  ;;  %v11797_v47 = vld [vmem:[%s9157_s20 + $0xd0] sm:$0xff] }
 0x3ac   : > { %8272 = vmatprep.mubr.msk.bf16.mxu1 %vm11626_vm15, %v7055_v22  ;;  %v13894_v22 = vld [vmem:[#allocation29_spill] sm:$0xff]  ;;  %v4421_v63 = vrot.slane %v11797_v47, 5 }
 0x3ae   : > { %8225 = vmatmul.mubr.bf16.gmra.mxu0 %v13892_v41  ;;  %v4434_v41 = vsel %vm4427_vm13, %v4419_v14, %v4420_v49  ;;  %v4493_v14 = vrot.slane %v11593_v62, 3 }
 0x3af   : > { %8228 = vmatprep.mubr.bf16.mxu0 %v13893_v24  ;;  %v7061_v24 = vpack.c.bf16 %v4434_v41, %v4435_v30  ;;  %v4433_v30 = vsel %vm4427_vm13, %v4420_v49, %v4421_v63  ;;  %v4495_v49 = vrot.slane %v11622_v29, 3 }
 0x3b3   : > { %8273 = vmatmul.mubr.bf16.gmra.mxu1 %v4598_v2  ;;  %v11801_v2 = vld [vmem:[%s9157_s20 + $0xd8] sm:$0xff] }
 0x3b4   : > { %8276 = vmatprep.mubr.msk.bf16.mxu1 %vm11626_vm15, %v7058_v46  ;;  %v4422_v46 = vrot.slane %v11801_v2, 5 }
 0x3b6   : > { %8229 = vmatmul.mubr.bf16.gmra.mxu0 %v13894_v22  ;;  %v11805_v22 = vld [vmem:[%s9157_s20 + $0xe0] sm:$0xff]  ;;  %v4432_v41 = vsel %vm4427_vm13, %v4421_v63, %v4422_v46  ;;  %v4496_v63 = vrot.slane %v11631_v53, 3 }
 0x3b7   : > { %8232 = vmatprep.mubr.bf16.mxu0 %v13895_v34  ;;  %v4423_v55 = vrot.slane %v11805_v22, 5  ;;  %v4424_v34 = vrot.slane %v11809_v59, 5 }
 0x3b8   : > { %v4552_v53 = vsel %vm4524_vm0, %v4495_v49, %v4496_v63 }
 0x3b9   : > { %v4430_v62 = vsel %vm4427_vm13, %v4423_v55, %v4424_v34  ;;  %v4431_v31 = vsel %vm4427_vm13, %v4422_v46, %v4423_v55  ;;  %v4497_v46 = vrot.slane %v11635_v23, 3  ;;  %v4498_v55 = vrot.slane %v11657_v26, 3  ;;  %v13900_v26 = vld [vmem:[#allocation19_spill] sm:$0xff] }
 0x3ba   : > { %v7064_v37 = vpack.c.bf16 %v4430_v62, %v4431_v31  ;;  %v4553_v23 = vsel %vm4524_vm0, %v4494_v10, %v4495_v49  ;;  %vm4394_vm1 = vcmp.lt.s32.totalorder %v13900_v26, 29 }
 0x3bb   : > { %8277 = vmatmul.mubr.bf16.gmra.mxu1 %v4600_v25  ;;  %v4554_v25 = vsel %vm4524_vm0, %v4493_v14, %v4494_v10  ;;  %v7075_v62 = vpack.c.bf16 %v4552_v53, %v4553_v23  ;;  %vm11861_vm3 = vmpackc.low %vm4394_vm1, %vm8994_vm2  ;;  %v4501_v10 = vrot.slane %v11669_v44, 3  ;;  %vm6546_vm2 = vcmask 1041409  }
 0x3bc   : > { %8280 = vmatprep.mubr.msk.bf16.mxu1 %vm11626_vm15, %v7061_v24  ;;  %v4555_v24 = vsel %vm4524_vm0, %v4492_v42, %v4493_v14  ;;  %v13899_v14 = vrot.slane %v11597_v12, 5 }
 0x3bd   : > { %v5057_v32 = vpack.c.bf16 %v4554_v25, %v4555_v24  ;;  %v4499_v25 = vrot.slane %v11661_v61, 3  ;;  %v4502_v24 = vrot.slane %v11685_v39, 3  ;;  %v4503_v39 = vrot.slane %v11689_v19, 3 }
 0x3be   : > { %8233 = vmatmul.mubr.bf16.gmra.mxu0 %v13896_v20  ;;  %v4602_v20 = vpack.c.bf16 %v4432_v41, %v4433_v30 }
 0x3bf   : > { %8236 = vmatprep.mubr.bf16.mxu0 %v13897_v35  ;;  %v4425_v35 = vrot.slane %v11835_v7, 5  ;;  %v4546_v61 = vsel %vm4524_vm0, %v4501_v10, %v4502_v24  ;;  %v4545_v19 = vsel %vm4524_vm0, %v4502_v24, %v4503_v39 }
 0x3c1   : > { %v4428_v41 = vsel %vm4427_vm13, %v4425_v35, %v13899_v14  ;;  %v4429_v29 = vsel %vm4427_vm13, %v4424_v34, %v4425_v35  ;;  %v13901_v34 = vmov 0  ;;  %v4549_v35 = vsel %vm4524_vm0, %v4498_v55, %v4499_v25 }
 0x3c2   : > { %v4604_v30 = vpack.c.bf16 %v4428_v41, %v4429_v29  ;;  %v13902_v34 = vsel %vm11861_vm3, 4294967295, %v13901_v34  ;;  %v4506_v14 = vrot.slane %v11713_v15, 3 }
 0x3c3   : > { %8281 = vmatmul.mubr.bf16.gmra.mxu1 %v4602_v20  ;;  %13903 = vst [vmem:[#allocation120_spill] sm:$0xff] %v13902_v34  ;;  %v13914_v34 = vld [vmem:[#allocation122_spill] sm:$0xff] }
 0x3c4   : > { %8284 = vmatprep.mubr.msk.bf16.mxu1 %vm11626_vm15, %v7064_v37  ;;  %v4550_v37 = vsel %vm4524_vm0, %v4497_v46, %v4498_v55 }
 0x3c6   : > { %8237 = vmatmul.mubr.bf16.gmra.mxu0 %v13898_v36  ;;  %v4551_v36 = vsel %vm4524_vm0, %v4496_v63, %v4497_v46  ;;  %v4504_v63 = vrot.slane %v11693_v11, 3  ;;  %v4505_v46 = vrot.slane %v11697_v4, 3 }
 0x3c7   : > { %8304 = vmatprep.mubr.bf16.mxu0 %v5057_v32  ;;  %v5059_v31 = vpack.c.bf16 %v4550_v37, %v4551_v36  ;;  %v4500_v32 = vrot.slane %v11665_v57, 3  ;;  %v4507_v37 = vrot.slane %v11717_v0, 3  ;;  %v4508_v36 = vrot.slane %v11721_v40, 3 }
 0x3c8   : > { %v4544_v29 = vsel %vm4524_vm0, %v4503_v39, %v4504_v63  ;;  %v4542_v11 = vsel %vm4524_vm0, %v4505_v46, %v4506_v14  ;;  %v4543_v4 = vsel %vm4524_vm0, %v4504_v63, %v4505_v46  ;;  %v8682_v39 = vld [vmem:[#allocation5 + $0x430] sm:$0xff]  }
 0x3c9   : > { %v4548_v20 = vsel %vm4524_vm0, %v4499_v25, %v4500_v32  ;;  %v4547_v57 = vsel %vm4524_vm0, %v4500_v32, %v4501_v10  ;;  %v7081_v53 = vpack.c.bf16 %v4544_v29, %v4545_v19  ;;  %v5063_v26 = vpack.c.bf16 %v4542_v11, %v4543_v4 }
 0x3ca   : > { %v7078_v44 = vpack.c.bf16 %v4548_v20, %v4549_v35  ;;  %v5061_v49 = vpack.c.bf16 %v4546_v61, %v4547_v57  ;;  %v4540_v10 = vsel %vm4524_vm0, %v4507_v37, %v4508_v36  ;;  %v4541_v0 = vsel %vm4524_vm0, %v4506_v14, %v4507_v37 }
 0x3cb   : > { %8285 = vmatmul.mubr.bf16.gmra.mxu1 %v4604_v30  ;;  %v4509_v30 = vrot.slane %v11725_v52, 3  ;;  %v7084_v24 = vpack.c.bf16 %v4540_v10, %v4541_v0  ;;  %v4511_v61 = vrot.slane %v11745_v50, 3  ;;  %v4512_v57 = vrot.slane %v11749_v8, 3 }
 0x3cc   : > { %v4515_v4 = vrot.slane %v11773_v51, 3  ;;  %v4518_v37 = vrot.slane %v11797_v47, 3 }
 0x3cd   : > { %v4539_v52 = vsel %vm4524_vm0, %v4508_v36, %v4509_v30  ;;  %v4536_v14 = vsel %vm4524_vm0, %v4511_v61, %v4512_v57  ;;  %v8683_v36 = vld [vmem:[#allocation5 + $0x428] sm:$0xff]  }
 0x3ce   : > { %8305 = vmatmul.mubr.msk.bf16.vlgmr.msra.gmra.mxu0 %vm11861_vm3, %v7075_v62  ;;  %v4510_v62 = vrot.slane %v11741_v60, 3 }
 0x3cf   : > { %8308 = vmatprep.mubr.bf16.mxu0 %v5059_v31  ;;  %v8681_v31 = vld [vmem:[#allocation5 + $0x438] sm:$0xff]  }
 0x3d0   : > { %8336 = vmatprep.subr.bf16.mxu1 %v8681_v31  ;;  %v4538_v40 = vsel %vm4524_vm0, %v4509_v30, %v4510_v62  ;;  %v4537_v50 = vsel %vm4524_vm0, %v4510_v62, %v4511_v61  ;;  %v4522_v61 = vrot.slane %v11835_v7, 3 }
 0x3d1   : > { %8337 = vmatpush3.bf16.msra.mxu1 %v8681_v31  ;;  %v5065_v35 = vpack.c.bf16 %v4538_v40, %v4539_v52  ;;  %v7087_v29 = vpack.c.bf16 %v4536_v14, %v4537_v50  ;;  %v4519_v52 = vrot.slane %v11801_v2, 3 }
 0x3d2   : > { %v11883_v41 = vpop.f32.mrf.mxu1  ;;  %8338 = vmatprep.subr.bf16.mxu1 %v8682_v39 }
 0x3d3   : > { %v4529_v2 = vsel %vm4524_vm0, %v4518_v37, %v4519_v52 }
 0x3d4   : > { %v11887_v55 = vpop.f32.mrf.mxu1 }
 0x3d5   : > { %8339 = vmatpush3.bf16.msra.mxu1 %v8682_v39 }
 0x3d6   : > { %8309 = vmatmul.mubr.msk.bf16.gmra.mxu0 %vm11861_vm3, %v7078_v44  ;;  %v11897_v15 = vpop.f32.mrf.mxu1  ;;  %v4513_v44 = vrot.slane %v11753_v9, 3  ;;  %8340 = vmatprep.subr.bf16.mxu1 %v8683_v36 }
 0x3d7   : > { %8312 = vmatprep.mubr.bf16.mxu0 %v5061_v49  ;;  %v4514_v49 = vrot.slane %v11769_v48, 3 }
 0x3d8   : > { %v11899_v23 = vpop.f32.mrf.mxu1  ;;  %v4535_v9 = vsel %vm4524_vm0, %v4512_v57, %v4513_v44  ;;  %v8684_v57 = vld [vmem:[#allocation5 + $0x420] sm:$0xff]  }
 0x3d9   : > { %13904 = vst [vmem:[#allocation95_spill] sm:$0xff] %v11899_v23  ;;  %v4534_v8 = vsel %vm4524_vm0, %v4513_v44, %v4514_v49  ;;  %v4533_v51 = vsel %vm4524_vm0, %v4514_v49, %v4515_v4  ;;  %8341 = vmatpush3.bf16.msra.mxu1 %v8683_v36 }
 0x3da   : > { %v11905_v25 = vpop.f32.mrf.mxu1  ;;  %v5067_v11 = vpack.c.bf16 %v4534_v8, %v4535_v9  ;;  %8342 = vmatprep.subr.bf16.mxu1 %v8684_v57  ;;  %v4523_v9 = vrot.slane %v11597_v12, 3 }
 0x3dc   : > { %v11909_v32 = vpop.f32.mrf.mxu1 }
 0x3dd   : > { %8343 = vmatpush3.bf16.msra.mxu1 %v8684_v57 }
 0x3de   : > { %8313 = vmatmul.mubr.msk.bf16.gmra.mxu0 %vm11861_vm3, %v7081_v53  ;;  %v11919_v60 = vpop.f32.mrf.mxu1  ;;  %v4516_v53 = vrot.slane %v11777_v17, 3 }
 0x3df   : > { %8316 = vmatprep.mubr.bf16.mxu0 %v5063_v26  ;;  %v4517_v26 = vrot.slane %v11781_v1, 3 }
 0x3e0   : > { %v11921_v20 = vpop.f32.mrf.mxu1  ;;  %v4532_v31 = vsel %vm4524_vm0, %v4515_v4, %v4516_v53 }
 0x3e1   : > { %13905 = vst [vmem:[#allocation96_spill] sm:$0xff] %v11921_v20  ;;  %v4530_v17 = vsel %vm4524_vm0, %v4517_v26, %v4518_v37  ;;  %v4531_v1 = vsel %vm4524_vm0, %v4516_v53, %v4517_v26  ;;  %v7090_v10 = vpack.c.bf16 %v4532_v31, %v4533_v51  ;;  %v4525_v53 = vsel %vm4524_vm0, %v4522_v61, %v4523_v9  ;;  %v8686_v31 = vld [vmem:[#allocation5 + $0x410] sm:$0xff]  }
 0x3e2   : > { %v11927_v63 = vpop.f32.mrf.mxu1  ;;  %v5069_v40 = vpack.c.bf16 %v4530_v17, %v4531_v1  ;;  %v4556_v26 = vsel %vm4524_vm0, %v4523_v9, %v4492_v42  ;;  %v8687_v42 = vld [vmem:[#allocation5 + $0x408] sm:$0xff]   ;;  %v13913_v20 = vld [vmem:[#allocation79_spill] sm:$0xff] }
 0x3e3   : > { %v7096_v37 = vpack.c.bf16 %v4556_v26, %v4525_v53  ;;  %v12035_v26 = vld [vmem:[#allocation7 + $0x3] ss:$0 sm:$0xff] }
 0x3e4   : > { %v11931_v46 = vpop.f32.mrf.mxu1 }
 0x3e6   : > { %8317 = vmatmul.mubr.msk.bf16.gmra.mxu0 %vm11861_vm3, %v7084_v24  ;;  %v11941_v48 = vpop.f32.mrf.mxu1  ;;  %v4520_v24 = vrot.slane %v11805_v22, 3 }
 0x3e7   : > { %8320 = vmatprep.mubr.bf16.mxu0 %v5065_v35  ;;  %v4521_v35 = vrot.slane %v11809_v59, 3 }
 0x3e8   : > { %v11943_v19 = vpop.f32.mrf.mxu1  ;;  %v4528_v39 = vsel %vm4524_vm0, %v4519_v52, %v4520_v24 }
 0x3e9   : > { %13906 = vst [vmem:[#allocation99_spill] sm:$0xff] %v11943_v19  ;;  %v4526_v7 = vsel %vm4524_vm0, %v4521_v35, %v4522_v61  ;;  %v4527_v22 = vsel %vm4524_vm0, %v4520_v24, %v4521_v35  ;;  %v7093_v14 = vpack.c.bf16 %v4528_v39, %v4529_v2 }
 0x3ea   : > { %v11949_v30 = vpop.f32.mrf.mxu1  ;;  %v5071_v8 = vpack.c.bf16 %v4526_v7, %v4527_v22  ;;  %v12027_v22 = vld [vmem:[#allocation7 + $0x1] ss:$0 sm:$0xff] }
 0x3ec   : > { %v11953_v62 = vpop.f32.mrf.mxu1 }
 0x3ee   : > { %8321 = vmatmul.mubr.msk.bf16.gmra.mxu0 %vm11861_vm3, %v7087_v29  ;;  %v11963_v47 = vpop.f32.mrf.mxu1  ;;  %v8685_v29 = vld [vmem:[#allocation5 + $0x418] sm:$0xff]  }
 0x3ef   : > { %8324 = vmatprep.mubr.bf16.mxu0 %v5067_v11  ;;  %8344 = vmatprep.subr.bf16.mxu1 %v8685_v29 }
 0x3f0   : > { %v11965_v0 = vpop.f32.mrf.mxu1  ;;  %8345 = vmatpush3.bf16.msra.mxu1 %v8685_v29 }
 0x3f1   : > { %13907 = vst [vmem:[#allocation100_spill] sm:$0xff] %v11965_v0  ;;  %8346 = vmatprep.subr.bf16.mxu1 %v8686_v31 }
 0x3f2   : > { %v11971_v44 = vpop.f32.mrf.mxu1 }
 0x3f4   : > { %v11975_v49 = vpop.f32.mrf.mxu1  ;;  %8347 = vmatpush3.bf16.msra.mxu1 %v8686_v31 }
 0x3f5   : > { %8348 = vmatprep.subr.bf16.mxu1 %v8687_v42 }
 0x3f6   : > { %8325 = vmatmul.mubr.msk.bf16.gmra.mxu0 %vm11861_vm3, %v7090_v10  ;;  %v11985_v59 = vpop.f32.mrf.mxu1 }
 0x3f7   : > { %8328 = vmatprep.mubr.bf16.mxu0 %v5069_v40 }
 0x3f8   : > { %v11987_v50 = vpop.f32.mrf.mxu1  ;;  %8349 = vmatpush3.bf16.msra.mxu1 %v8687_v42  ;;  %v13911_v42 = vld [vmem:[#allocation41_spill] sm:$0xff] }
 0x3fa   : > { %v11990_v11 = vpop.f32.mrf.mxu1 }
 0x3fc   : > { %v11994_v4 = vpop.f32.mrf.mxu1 }
 0x3fe   : > { %8329 = vmatmul.mubr.msk.bf16.gmra.mxu0 %vm11861_vm3, %v7093_v14  ;;  %v12002_v12 = vpop.f32.mrf.mxu1  ;;  %v13908_v14 = vld [vmem:[#allocation75_spill] sm:$0xff] }
 0x3ff   : > { %8332 = vmatprep.mubr.bf16.mxu0 %v5071_v8  ;;  %v2285_v8 = vadd.f32 %v12027_v22, %v13908_v14  ;;  %v13912_v14 = vld [vmem:[#allocation40_spill] sm:$0xff] }
 0x400   : > { %v12004_v36 = vpop.f32.mrf.mxu1 }
 0x402   : > { %v12006_v51 = vpop.f32.mrf.mxu1 }
 0x404   : > { %v12010_v17 = vpop.f32.mrf.mxu1 }
 0x406   : > { %8333 = vmatmul.mubr.msk.bf16.gmra.mxu0 %vm11861_vm3, %v7096_v37  ;;  %v12012_v6 = vpop.f32.mrf.mxu1 }
 0x408   : > { %v12014_v1 = vpop.f32.mrf.mxu1 }
 0x40a   : > { %v12016_v10 = vpop.f32.mrf.mxu1 }
 0x40c   : > { %v12019_v24 = vpop.f32.mrf.mxu1 }
 0x40e   : > { %v8114_v40 = vpop.f32.mrf.mxu0  ;;  %v12022_v57 = vpop.f32.mrf.mxu1 }
 0x40f   : > { %v3923_v52 = vadd.f32 %v8114_v40, %v11883_v41  ;;  %v13910_v41 = vld [vmem:[#allocation76_spill] sm:$0xff]  ;;  %v2317_v40 = vadd.f32 %v2285_v8, %v13911_v42 }
 0x410   : > { %v3914_v35 = vpop.f32.mrf.mxu0  ;;  %v12025_v7 = vpop.f32.mrf.mxu1  ;;  %v2288_v29 = vadd.f32 %v12027_v22, %v13910_v41 }
 0x411   : > { %v3915_v61 = vadd.f32 %v3914_v35, %v11887_v55 }
 0x412   : > { %v8115_v39 = vpop.f32.mrf.mxu0  ;;  %v2320_v19 = vadd.f32 %v2288_v29, %v13912_v14  ;;  %v13918_v29 = vld [vmem:[#allocation80_spill] sm:$0xff]  ;;  %v13922_v14 = vld [vmem:[#allocation81_spill] sm:$0xff] }
 0x413   : > { %v3926_v2 = vadd.f32 %v8115_v39, %v11897_v15  ;;  %v8162_v53 = vpop.f32.mrf.mxu1 }
 0x414   : > { %v12031_v9 = vpop.f32.mrf.mxu0  ;;  %v4285_v55 = vadd.f32 %v8162_v53, %v3923_v52  ;;  %v13916_v53 = vld [vmem:[#allocation124_spill] sm:$0xff] }
 0x415   : > { %13909 = vst [vmem:[#allocation58_spill] sm:$0xff] %v12031_v9  ;;  %v4156_v15 = vpop.f32.mrf.mxu1  ;;  %v2291_v9 = vadd.f32 %v12027_v22, %v13913_v20 }
 0x416   : > { %v8118_v37 = vpop.f32.mrf.mxu0  ;;  %v4325_v35 = vadd.f32 %v12035_v26, %v4285_v55  ;;  %v4283_v39 = vadd.f32 %v4156_v15, %v3915_v61  ;;  %v2289_v15 = vadd.f32 %v12027_v22, %v13918_v29 }
 0x417   : > { %v3939_v31 = vadd.f32 %v8118_v37, %v11905_v25  ;;  %v8163_v23 = vpop.f32.mrf.mxu1  ;;  %v3333_v25 = vadd.f32 %v13916_v53, %v2317_v40  ;;  %v8688_v40 = vld [vmem:[#allocation5 + $0x400] sm:$0xff]  }
 0x418   : > { %v3930_v0 = vpop.f32.mrf.mxu0  ;;  %v12045_v52 = vadd.f32 %v4325_v35, %v13914_v34  ;;  %v4323_v37 = vadd.f32 %v12035_v26, %v4283_v39  ;;  %v4286_v8 = vadd.f32 %v8163_v23, %v3926_v2  ;;  %v2292_v23 = vadd.f32 %v12027_v22, %v13922_v14  ;;  %v13923_v39 = vld [vmem:[#allocation46_spill] sm:$0xff]  ;;  %8350 = vmatprep.subr.bf16.mxu1 %v8688_v40 }
 0x419   : > { %v3931_v41 = vadd.f32 %v3930_v0, %v11909_v32  ;;  %v12050_v55 = vpop.f32.mrf.mxu1  ;;  %v13920_v32 = vld [vmem:[#allocation123_spill] sm:$0xff]  ;;  %8351 = vmatpush3.bf16.msra.mxu1 %v8688_v40 }
 0x41a   : > { %13915 = vst [vmem:[#allocation56_spill] sm:$0xff] %v12045_v52  ;;  %v8119_v42 = vpop.f32.mrf.mxu0  ;;  %13917 = vst [vmem:[#allocation55_spill] sm:$0xff] %v12050_v55  ;;  %v12054_v20 = vadd.f32 %v4323_v37, %v3333_v25  ;;  %v3336_v0 = vadd.f32 %v13920_v32, %v2320_v19  ;;  %v4326_v34 = vadd.f32 %v12035_v26, %v4286_v8  ;;  %v8689_v19 = vld [vmem:[#allocation5 + $0x3f8] sm:$0xff]  }
 0x41b   : > { %v3942_v61 = vadd.f32 %v8119_v42, %v11919_v60  ;;  %v8166_v2 = vpop.f32.mrf.mxu1  ;;  %v2323_v60 = vadd.f32 %v2291_v9, %v13923_v39  ;;  %v13925_v8 = vld [vmem:[#allocation44_spill] sm:$0xff]  ;;  %8384 = vmatprep.subr.bf16.mxu0 %v8689_v19 }
 0x41c   : > { %13919 = vst [vmem:[#allocation101_spill] sm:$0xff] %v12054_v20  ;;  %v12058_v35 = vpop.f32.mrf.mxu0  ;;  %v12063_v53 = vadd.f32 %v4326_v34, %v3336_v0  ;;  %v4289_v42 = vadd.f32 %v8166_v2, %v3939_v31  ;;  %v2321_v29 = vadd.f32 %v2289_v15, %v13925_v8  ;;  %v13926_v32 = vld [vmem:[#allocation128_spill] sm:$0xff]  ;;  %v13927_v20 = vld [vmem:[#allocation43_spill] sm:$0xff]  ;;  %v13931_v15 = vld [vmem:[#allocation126_spill] sm:$0xff]  ;;  %8385 = vmatpush3.bf16.msra.mxu0 %v8689_v19 }
 0x41d   : > { %13921 = vst [vmem:[#allocation62_spill] sm:$0xff] %v12058_v35  ;;  %v4172_v37 = vpop.f32.mrf.mxu1  ;;  %v3339_v35 = vadd.f32 %v13926_v32, %v2323_v60  ;;  %v2324_v9 = vadd.f32 %v2292_v23, %v13927_v20  ;;  %v13928_v0 = vld [vmem:[#allocation84_spill] sm:$0xff] }
 0x41e   : > { %13924 = vst [vmem:[#allocation60_spill] sm:$0xff] %v12063_v53  ;;  %v8122_v55 = vpop.f32.mrf.mxu0  ;;  %v4329_v28 = vadd.f32 %v12035_v26, %v4289_v42  ;;  %v4287_v14 = vadd.f32 %v4172_v37, %v3931_v41  ;;  %v2295_v31 = vadd.f32 %v12027_v22, %v13928_v0  ;;  %v3337_v40 = vadd.f32 %v13931_v15, %v2321_v29 }
 0x41f   : > { %v3955_v25 = vadd.f32 %v8122_v55, %v11927_v63  ;;  %v8167_v2 = vpop.f32.mrf.mxu1  ;;  %v12073_v63 = vld [vmem:[#allocation5 + $0x478] sm:$0xff]  }
 0x420   : > { %v3946_v43 = vpop.f32.mrf.mxu0  ;;  %13929 = vst [vmem:[#allocation104_spill] sm:$0xff] %v12073_v63  ;;  %v12075_v55 = vadd.f32 %v4329_v28, %v3339_v35  ;;  %v4327_v39 = vadd.f32 %v12035_v26, %v4287_v14  ;;  %v4290_v60 = vadd.f32 %v8167_v2, %v3942_v61  ;;  %8432 = vmatprep.subr.bf16.mxu1 %v12073_v63  ;;  %v13936_v61 = vld [vmem:[#allocation86_spill] sm:$0xff] }
 0x421   : > { %v3947_v34 = vadd.f32 %v3946_v43, %v11931_v46  ;;  %v12080_v23 = vpop.f32.mrf.mxu1  ;;  %v13933_v43 = vld [vmem:[#allocation85_spill] sm:$0xff]  ;;  %v3340_v28 = vadd.f32 %v10930_v3, %v2324_v9  ;;  %v2296_v19 = vadd.f32 %v12027_v22, %v13936_v61  ;;  %v13940_v61 = vld [vmem:[#allocation47_spill] sm:$0xff] }
 0x422   : > { %13930 = vst [vmem:[#allocation105_spill] sm:$0xff] %v12075_v55  ;;  %v8123_v41 = vpop.f32.mrf.mxu0  ;;  %13932 = vst [vmem:[#allocation106_spill] sm:$0xff] %v12080_v23  ;;  %v2293_v46 = vadd.f32 %v12027_v22, %v13933_v43  ;;  %v12085_v42 = vadd.f32 %v4327_v39, %v3337_v40  ;;  %v4330_v35 = vadd.f32 %v12035_v26, %v4290_v60  ;;  %v8691_v40 = vld [vmem:[#allocation5 + $0x3f0] sm:$0xff]   ;;  %v13939_v39 = vld [vmem:[#allocation48_spill] sm:$0xff] }
 0x423   : > { %v3958_v20 = vadd.f32 %v8123_v41, %v11941_v48  ;;  %v8170_v8 = vpop.f32.mrf.mxu1  ;;  %v13937_v48 = vld [vmem:[#allocation50_spill] sm:$0xff]  ;;  %v13941_v23 = vld [vmem:[#allocation89_spill] sm:$0xff]  ;;  %8386 = vmatprep.subr.bf16.mxu0 %v8691_v40 }
 0x424   : > { %13934 = vst [vmem:[#allocation109_spill] sm:$0xff] %v12085_v42  ;;  %v12089_v37 = vpop.f32.mrf.mxu0  ;;  %v2327_v29 = vadd.f32 %v2295_v31, %v13937_v48  ;;  %v12094_v32 = vadd.f32 %v4330_v35, %v3340_v28  ;;  %v4293_v14 = vadd.f32 %v8170_v8, %v3955_v25  ;;  %v2325_v3 = vadd.f32 %v2293_v46, %v13939_v39 }
 0x425   : > { %13935 = vst [vmem:[#allocation110_spill] sm:$0xff] %v12089_v37  ;;  %v4188_v15 = vpop.f32.mrf.mxu1  ;;  %v2328_v37 = vadd.f32 %v2296_v19, %v13940_v61  ;;  %v2299_v31 = vadd.f32 %v12027_v22, %v13941_v23  ;;  %8387 = vmatpush3.bf16.msra.mxu0 %v8691_v40  ;;  %v13944_v19 = vld [vmem:[#allocation90_spill] sm:$0xff] }
 0x426   : > { %13938 = vst [vmem:[#allocation111_spill] sm:$0xff] %v12094_v32  ;;  %v8126_v0 = vpop.f32.mrf.mxu0  ;;  %v3343_v9 = vadd.f32 %v10967_v58, %v2327_v29  ;;  %v4333_v60 = vadd.f32 %v12035_v26, %v4293_v14  ;;  %v4291_v41 = vadd.f32 %v4188_v15, %v3947_v34  ;;  %v3341_v35 = vadd.f32 %v10961_v54, %v2325_v3  ;;  %v13948_v54 = vld [vmem:[#allocation91_spill] sm:$0xff]  ;;  %v13949_v40 = vld [vmem:[#allocation54_spill] sm:$0xff] }
 0x427   : > { %v3971_v2 = vadd.f32 %v8126_v0, %v11949_v30  ;;  %v8171_v28 = vpop.f32.mrf.mxu1  ;;  %v2297_v23 = vadd.f32 %v12027_v22, %v13944_v19  ;;  %v2331_v3 = vadd.f32 %v2299_v31, %v13949_v40  ;;  %v8693_v61 = vld [vmem:[#allocation5 + $0x3e8] sm:$0xff]  }
 0x428   : > { %v3962_v43 = vpop.f32.mrf.mxu0  ;;  %v12104_v30 = vadd.f32 %v4333_v60, %v3343_v9  ;;  %v4331_v46 = vadd.f32 %v12035_v26, %v4291_v41  ;;  %v4294_v58 = vadd.f32 %v8171_v28, %v3958_v20  ;;  %v2300_v20 = vadd.f32 %v12027_v22, %v13948_v54  ;;  %v13951_v28 = vld [vmem:[#allocation52_spill] sm:$0xff]  ;;  %v13955_v31 = vld [vmem:[#allocation93_spill] sm:$0xff]  ;;  %8388 = vmatprep.subr.bf16.mxu0 %v8693_v61 }
 0x429   : > { %v3963_v25 = vadd.f32 %v3962_v43, %v11953_v62  ;;  %v12109_v48 = vpop.f32.mrf.mxu1  ;;  %v13946_v62 = vld [vmem:[#allocation129_spill] sm:$0xff]  ;;  %8389 = vmatpush3.bf16.msra.mxu0 %v8693_v61 }
 0x42a   : > { %13942 = vst [vmem:[#allocation59_spill] sm:$0xff] %v12104_v30  ;;  %v8127_v8 = vpop.f32.mrf.mxu0  ;;  %13943 = vst [vmem:[#allocation66_spill] sm:$0xff] %v12109_v48  ;;  %v12113_v29 = vadd.f32 %v4331_v46, %v3341_v35  ;;  %v3344_v14 = vadd.f32 %v13946_v62, %v2328_v37  ;;  %v4334_v0 = vadd.f32 %v12035_v26, %v4294_v58  ;;  %v13952_v35 = vld [vmem:[#allocation133_spill] sm:$0xff]  ;;  %v13953_v62 = vld [vmem:[#allocation51_spill] sm:$0xff] }
 0x42b   : > { %v3974_v34 = vadd.f32 %v8127_v8, %v11963_v47  ;;  %v8174_v39 = vpop.f32.mrf.mxu1  ;;  %v2329_v37 = vadd.f32 %v2297_v23, %v13951_v28  ;;  %v3347_v46 = vadd.f32 %v13952_v35, %v2331_v3  ;;  %v2332_v54 = vadd.f32 %v2300_v20, %v13953_v62 }
 0x42c   : > { %13945 = vst [vmem:[#allocation64_spill] sm:$0xff] %v12113_v29  ;;  %v12117_v15 = vpop.f32.mrf.mxu0  ;;  %v12122_v47 = vadd.f32 %v4334_v0, %v3344_v14  ;;  %v4297_v9 = vadd.f32 %v8174_v39, %v3971_v2  ;;  %v13957_v39 = vld [vmem:[#allocation131_spill] sm:$0xff] }
 0x42d   : > { %13947 = vst [vmem:[#allocation63_spill] sm:$0xff] %v12117_v15  ;;  %v4204_v43 = vpop.f32.mrf.mxu1  ;;  %v13954_v15 = vld [vmem:[#allocation70_spill] sm:$0xff]  ;;  %v3345_v40 = vadd.f32 %v13957_v39, %v2329_v37 }
 0x42e   : > { %13950 = vst [vmem:[#allocation39_spill] sm:$0xff] %v12122_v47  ;;  %v8130_v60 = vpop.f32.mrf.mxu0  ;;  %v4337_v58 = vadd.f32 %v12035_v26, %v4297_v9  ;;  %v4295_v8 = vadd.f32 %v4204_v43, %v3963_v25  ;;  %v1944_v14 = vadd.f32 %v13955_v31, %v13954_v15  ;;  %v13958_v25 = vld [vmem:[#allocation97_spill] sm:$0xff] }
 0x42f   : > { %v3987_v41 = vadd.f32 %v8130_v60, %v11971_v44  ;;  %v8175_v0 = vpop.f32.mrf.mxu1 }
 0x430   : > { %v3978_v19 = vpop.f32.mrf.mxu0  ;;  %v12132_v44 = vadd.f32 %v4337_v58, %v3347_v46  ;;  %v4335_v23 = vadd.f32 %v12035_v26, %v4295_v8  ;;  %v4298_v3 = vadd.f32 %v8175_v0, %v3974_v34  ;;  %v2262_v9 = vadd.f32 %v13958_v25, %v1944_v14  ;;  %v13962_v0 = vld [vmem:[#allocation71_spill] sm:$0xff]  ;;  %v13965_v25 = vld [vmem:[#allocation57_spill] sm:$0xff] }
 0x431   : > { %v3979_v2 = vadd.f32 %v3978_v19, %v11975_v49  ;;  %v12138_v43 = vpop.f32.mrf.mxu1  ;;  %v3348_v49 = vadd.f32 %v10984_v5, %v2332_v54  ;;  %v13963_v5 = vld [vmem:[#allocation98_spill] sm:$0xff] }
 0x432   : > { %13956 = vst [vmem:[#allocation38_spill] sm:$0xff] %v12132_v44  ;;  %v8131_v60 = vpop.f32.mrf.mxu0  ;;  %13959 = vst [vmem:[#allocation37_spill] sm:$0xff] %v12138_v43  ;;  %v12140_v15 = vadd.f32 %v4335_v23, %v3345_v40  ;;  %v4338_v28 = vadd.f32 %v12035_v26, %v4298_v3  ;;  %v2302_v61 = vadd.f32 %v12027_v22, %v2262_v9 }
 0x433   : > { %v3990_v20 = vadd.f32 %v8131_v60, %v11985_v59  ;;  %v8178_v46 = vpop.f32.mrf.mxu1  ;;  %v8695_v59 = vld [vmem:[#allocation5 + $0x3e0] sm:$0xff]   ;;  %v1960_v54 = vadd.f32 %v13963_v5, %v13962_v0 }
 0x434   : > { %13960 = vst [vmem:[#allocation117_spill] sm:$0xff] %v12140_v15  ;;  %v3981_v35 = vpop.f32.mrf.mxu0  ;;  %v12144_v37 = vadd.f32 %v4338_v28, %v3348_v49  ;;  %v4301_v58 = vadd.f32 %v8178_v46, %v3987_v41  ;;  %8390 = vmatprep.subr.bf16.mxu0 %v8695_v59  ;;  %v13966_v28 = vld [vmem:[#allocation102_spill] sm:$0xff] }
 0x435   : > { %v4220_v19 = vpop.f32.mrf.mxu1  ;;  %v3982_v41 = vadd.f32 %v3981_v35, %v11987_v50  ;;  %8391 = vmatpush3.bf16.msra.mxu0 %v8695_v59  ;;  %v2266_v46 = vadd.f32 %v13966_v28, %v1960_v54  ;;  %v13974_v28 = vld [vmem:[#allocation107_spill] sm:$0xff] }
 0x436   : > { %13961 = vst [vmem:[#allocation115_spill] sm:$0xff] %v12144_v37  ;;  %v8134_v34 = vpop.f32.mrf.mxu0  ;;  %v4341_v62 = vadd.f32 %v12035_v26, %v4301_v58  ;;  %v4299_v31 = vadd.f32 %v4220_v19, %v3979_v2  ;;  %v2334_v2 = vadd.f32 %v2302_v61, %v13965_v25 }
 0x437   : > { %v4003_v8 = vadd.f32 %v8134_v34, %v11990_v11  ;;  %v8179_v40 = vpop.f32.mrf.mxu1 }
 0x438   : > { %v3994_v14 = vpop.f32.mrf.mxu0  ;;  %v12154_v23 = vadd.f32 %v4341_v62, %v11491_v33  ;;  %v4339_v11 = vadd.f32 %v12035_v26, %v4299_v31  ;;  %v4302_v3 = vadd.f32 %v8179_v40, %v3990_v20  ;;  %v13969_v20 = vld [vmem:[#allocation114_spill] sm:$0xff] }
 0x439   : > { %v3995_v39 = vadd.f32 %v3994_v14, %v11994_v4  ;;  %v4223_v49 = vpop.f32.mrf.mxu1  ;;  %v3350_v19 = vadd.f32 %v13969_v20, %v2334_v2  ;;  %v8697_v14 = vld [vmem:[#allocation5 + $0x3d8] sm:$0xff]  }
 0x43a   : > { %13964 = vst [vmem:[#allocation118_spill] sm:$0xff] %v12154_v23  ;;  %v8135_v60 = vpop.f32.mrf.mxu0  ;;  %v12161_v4 = vadd.f32 %v4339_v11, %v11494_v27  ;;  %v4342_v50 = vadd.f32 %v12035_v26, %v4302_v3  ;;  %v4300_v35 = vadd.f32 %v4223_v49, %v3982_v41  ;;  %v2306_v27 = vadd.f32 %v12027_v22, %v2266_v46  ;;  %v13972_v41 = vld [vmem:[#allocation103_spill] sm:$0xff] }
 0x43b   : > { %v4006_v9 = vadd.f32 %v8135_v60, %v12002_v12  ;;  %v8182_v58 = vpop.f32.mrf.mxu1  ;;  %8392 = vmatprep.subr.bf16.mxu0 %v8697_v14 }
 0x43c   : > { %13967 = vst [vmem:[#allocation121_spill] sm:$0xff] %v12161_v4  ;;  %v3997_v33 = vpop.f32.mrf.mxu0  ;;  %v12165_v34 = vadd.f32 %v4342_v50, %v11499_v56  ;;  %v4340_v61 = vadd.f32 %v12035_v26, %v4300_v35  ;;  %v4305_v59 = vadd.f32 %v8182_v58, %v4003_v8  ;;  %v13971_v56 = vld [vmem:[#allocation72_spill] sm:$0xff]  ;;  %8393 = vmatpush3.bf16.msra.mxu0 %v8697_v14  ;;  %v13975_v35 = vld [vmem:[#allocation61_spill] sm:$0xff] }
 0x43d   : > { %v4236_v31 = vpop.f32.mrf.mxu1  ;;  %v1976_v11 = vadd.f32 %v13972_v41, %v13971_v56  ;;  %v3998_v8 = vadd.f32 %v3997_v33, %v12004_v36  ;;  %v2338_v58 = vadd.f32 %v2306_v27, %v13975_v35  ;;  %v8699_v27 = vld [vmem:[#allocation5 + $0x3d0] sm:$0xff]   ;;  %v13981_v41 = vld [vmem:[#allocation108_spill] sm:$0xff] }
 0x43e   : > { %13968 = vst [vmem:[#allocation134_spill] sm:$0xff] %v12165_v34  ;;  %v8138_v12 = vpop.f32.mrf.mxu0  ;;  %v12171_v0 = vadd.f32 %v4340_v61, %v3350_v19  ;;  %v4345_v5 = vadd.f32 %v12035_v26, %v4305_v59  ;;  %v4303_v54 = vadd.f32 %v4236_v31, %v3995_v39  ;;  %8394 = vmatprep.subr.bf16.mxu0 %v8699_v27  ;;  %v13984_v35 = vld [vmem:[#allocation112_spill] sm:$0xff] }
 0x43f   : > { %v4019_v62 = vadd.f32 %v8138_v12, %v12006_v51  ;;  %v8183_v60 = vpop.f32.mrf.mxu1  ;;  %v2270_v39 = vadd.f32 %v13974_v28, %v1976_v11  ;;  %v13983_v28 = vld [vmem:[#allocation65_spill] sm:$0xff] }
 0x440   : > { %13970 = vst [vmem:[#allocation135_spill] sm:$0xff] %v12171_v0  ;;  %v4010_v40 = vpop.f32.mrf.mxu0  ;;  %v12179_v51 = vadd.f32 %v4345_v5, %v11505_v18  ;;  %v4343_v25 = vadd.f32 %v12035_v26, %v4303_v54  ;;  %v4306_v2 = vadd.f32 %v8183_v60, %v4006_v9  ;;  %v13978_v9 = vld [vmem:[#allocation116_spill] sm:$0xff]  ;;  %8395 = vmatpush3.bf16.msra.mxu0 %v8699_v27 }
 0x441   : > { %v4011_v3 = vadd.f32 %v4010_v40, %v12010_v17  ;;  %v4239_v50 = vpop.f32.mrf.mxu1  ;;  %v3354_v61 = vadd.f32 %v13978_v9, %v2338_v58  ;;  %v2310_v31 = vadd.f32 %v12027_v22, %v2270_v39 }
 0x442   : > { %13973 = vst [vmem:[#allocation137_spill] sm:$0xff] %v12179_v51  ;;  %v8139_v49 = vpop.f32.mrf.mxu0  ;;  %v12186_v17 = vadd.f32 %v4343_v25, %v11508_v16  ;;  %v4346_v36 = vadd.f32 %v12035_v26, %v4306_v2  ;;  %v4304_v33 = vadd.f32 %v4239_v50, %v3998_v8 }
 0x443   : > { %v4022_v46 = vadd.f32 %v8139_v49, %v12012_v6  ;;  %v8186_v20 = vpop.f32.mrf.mxu1 }
 0x444   : > { %13976 = vst [vmem:[#allocation119_spill] sm:$0xff] %v12186_v17  ;;  %v4013_v18 = vpop.f32.mrf.mxu0  ;;  %v12190_v19 = vadd.f32 %v4346_v36, %v11519_v38  ;;  %v4344_v59 = vadd.f32 %v12035_v26, %v4304_v33  ;;  %v4309_v12 = vadd.f32 %v8186_v20, %v4019_v62  ;;  %v13980_v38 = vld [vmem:[#allocation73_spill] sm:$0xff] }
 0x445   : > { %v4252_v16 = vpop.f32.mrf.mxu1  ;;  %v1992_v11 = vadd.f32 %v13981_v41, %v13980_v38  ;;  %v4014_v62 = vadd.f32 %v4013_v18, %v12014_v1 }
 0x446   : > { %13977 = vst [vmem:[#allocation138_spill] sm:$0xff] %v12190_v19  ;;  %v8142_v6 = vpop.f32.mrf.mxu0  ;;  %v12196_v5 = vadd.f32 %v4344_v59, %v3354_v61  ;;  %v4349_v54 = vadd.f32 %v12035_v26, %v4309_v12  ;;  %v4307_v40 = vadd.f32 %v4252_v16, %v4011_v3  ;;  %v2342_v3 = vadd.f32 %v2310_v31, %v13983_v28  ;;  %v8701_v12 = vld [vmem:[#allocation5 + $0x3c8] sm:$0xff]  }
 0x447   : > { %v4035_v14 = vadd.f32 %v8142_v6, %v12016_v10  ;;  %v8187_v8 = vpop.f32.mrf.mxu1  ;;  %v2274_v58 = vadd.f32 %v13984_v35, %v1992_v11  ;;  %8396 = vmatprep.subr.bf16.mxu0 %v8701_v12 }
 0x448   : > { %13979 = vst [vmem:[#allocation140_spill] sm:$0xff] %v12196_v5  ;;  %v4026_v56 = vpop.f32.mrf.mxu0  ;;  %v12204_v25 = vadd.f32 %v4349_v54, %v11530_v13  ;;  %v4347_v10 = vadd.f32 %v12035_v26, %v4307_v40  ;;  %v4310_v2 = vadd.f32 %v8187_v8, %v4022_v46  ;;  %v13987_v46 = vld [vmem:[#allocation136_spill] sm:$0xff]  ;;  %8397 = vmatpush3.bf16.msra.mxu0 %v8701_v12 }
 0x449   : > { %v4027_v60 = vadd.f32 %v4026_v56, %v12019_v24  ;;  %v4255_v50 = vpop.f32.mrf.mxu1  ;;  %v3358_v20 = vadd.f32 %v13987_v46, %v2342_v3  ;;  %v8703_v54 = vld [vmem:[#allocation5 + $0x3c0] sm:$0xff]   ;;  %v13994_v3 = vld [vmem:[#allocation35_spill] sm:$0xff] }
 0x44a   : > { %13982 = vst [vmem:[#allocation141_spill] sm:$0xff] %v12204_v25  ;;  %v8143_v49 = vpop.f32.mrf.mxu0  ;;  %v12211_v24 = vadd.f32 %v4347_v10, %v11533_v45  ;;  %v4350_v1 = vadd.f32 %v12035_v26, %v4310_v2  ;;  %v4308_v36 = vadd.f32 %v4255_v50, %v4014_v62  ;;  %v2314_v45 = vadd.f32 %v12027_v22, %v2274_v58  ;;  %v13989_v56 = vld [vmem:[#allocation17_spill] sm:$0xff]  ;;  %v13991_v8 = vld [vmem:[#allocation36_spill] sm:$0xff] }
 0x44b   : > { %v4038_v39 = vadd.f32 %v8143_v49, %v12022_v57  ;;  %v8190_v33 = vpop.f32.mrf.mxu1  ;;  %8398 = vmatprep.subr.bf16.mxu0 %v8703_v54  ;;  %v13992_v62 = vld [vmem:[#allocation113_spill] sm:$0xff] }
 0x44c   : > { %13985 = vst [vmem:[#allocation142_spill] sm:$0xff] %v12211_v24  ;;  %v4029_v13 = vpop.f32.mrf.mxu0  ;;  %v12215_v18 = vadd.f32 %v4350_v1, %v11536_v21  ;;  %v4348_v9 = vadd.f32 %v12035_v26, %v4308_v36  ;;  %v4313_v61 = vadd.f32 %v8190_v33, %v4035_v14  ;;  %8399 = vmatpush3.bf16.msra.mxu0 %v8703_v54 }
 0x44d   : > { %v4268_v59 = vpop.f32.mrf.mxu1  ;;  %v4030_v40 = vadd.f32 %v4029_v13, %v12025_v7 }
 0x44e   : > { %13986 = vst [vmem:[#allocation139_spill] sm:$0xff] %v12215_v18  ;;  %v12219_v57 = vpop.f32.mrf.mxu0  ;;  %v12222_v6 = vadd.f32 %v4348_v9, %v3358_v20  ;;  %v4353_v31 = vadd.f32 %v12035_v26, %v4313_v61  ;;  %v4311_v16 = vadd.f32 %v4268_v59, %v4027_v60  ;;  %v2346_v60 = vadd.f32 %v2314_v45, %v13991_v8 }
 0x44f   : > { %v8191_v21 = vpop.f32.mrf.mxu1 }
 0x450   : > { %13988 = vst [vmem:[#allocation16_spill] sm:$0xff] %v12222_v6  ;;  %v12225_v27 = vpop.f32.mrf.mxu0  ;;  %v12229_v14 = vadd.f32 %v4353_v31, %v13989_v56  ;;  %v4351_v38 = vadd.f32 %v12035_v26, %v4311_v16  ;;  %v4314_v41 = vadd.f32 %v8191_v21, %v4038_v39  ;;  %v13996_v39 = vld [vmem:[#allocation143_spill] sm:$0xff] }
 0x451   : > { %v4271_v22 = vpop.f32.mrf.mxu1  ;;  %v3362_v35 = vadd.f32 %v13996_v39, %v2346_v60 }
 0x452   : > { %13990 = vst [vmem:[#allocation18_spill] sm:$0xff] %v12229_v14  ;;  %v12232_v11 = vpop.f32.mrf.mxu0  ;;  %v12236_v10 = vadd.f32 %v4351_v38, %v13992_v62  ;;  %v4354_v2 = vadd.f32 %v12035_v26, %v4314_v41  ;;  %v4312_v49 = vadd.f32 %v4271_v22, %v4030_v40 }
 0x453   : > { %v8258_v28 = vpop.f32.mrf.mxu1 }
 0x454   : > { %13993 = vst [vmem:[#allocation20_spill] sm:$0xff] %v12236_v10  ;;  %v12239_v7 = vpop.f32.mrf.mxu0  ;;  %v12242_v50 = vadd.f32 %v4354_v2, %v13994_v3  ;;  %v4352_v58 = vadd.f32 %v12035_v26, %v4312_v49  ;;  %v4939_v32 = vadd.f32 %v8258_v28, %v12219_v57 }
 0x455   : > { %v4930_v36 = vpop.f32.mrf.mxu1 }
 0x456   : > { %13995 = vst [vmem:[#allocation21_spill] sm:$0xff] %v12242_v50  ;;  %v8214_v1 = vpop.f32.mrf.mxu0  ;;  %v12246_v13 = vadd.f32 %v4352_v58, %v3362_v35  ;;  %v4931_v42 = vadd.f32 %v4930_v36, %v12225_v27 }
 0x457   : > { %v8259_v46 = vpop.f32.mrf.mxu1 }
 0x458   : > { %13997 = vst [vmem:[#allocation22_spill] sm:$0xff] %v12246_v13  ;;  %v4737_v33 = vpop.f32.mrf.mxu0  ;;  %v4942_v55 = vadd.f32 %v8259_v46, %v12232_v11 }
 0x459   : > { %v4933_v9 = vpop.f32.mrf.mxu1 }
 0x45a   : > { %v8215_v20 = vpop.f32.mrf.mxu0  ;;  %v4934_v63 = vadd.f32 %v4933_v9, %v12239_v7 }
 0x45b   : > { %v8262_v59 = vpop.f32.mrf.mxu1 }
 0x45c   : > { %v4740_v61 = vpop.f32.mrf.mxu0  ;;  %v4955_v53 = vadd.f32 %v8262_v59, %v8214_v1 }
 0x45d   : > { %v4946_v45 = vpop.f32.mrf.mxu1 }
 0x45e   : > { %v8218_v12 = vpop.f32.mrf.mxu0 }
 0x45f   : > { %v8263_v16 = vpop.f32.mrf.mxu1 }
 0x460   : > { %v4753_v31 = vpop.f32.mrf.mxu0 }
 0x461   : > { %v4949_v40 = vpop.f32.mrf.mxu1 }
 0x462   : > { %v8219_v21 = vpop.f32.mrf.mxu0 }
 0x463   : > { %v8266_v38 = vpop.f32.mrf.mxu1 }
 0x464   : > { %v4756_v56 = vpop.f32.mrf.mxu0  ;;  %v12264_v57 = vadd.f32 %v8266_v38, %v8218_v12  ;;  %v14002_v38 = vld [vmem:[#allocation56_spill] sm:$0xff] }
 0x465   : > { %v4962_v41 = vpop.f32.mrf.mxu1 }
 0x466   : > { %v8222_v26 = vpop.f32.mrf.mxu0  ;;  %v12266_v27 = vadd.f32 %v4962_v41, %v4753_v31 }
 0x467   : > { %v8267_v22 = vpop.f32.mrf.mxu1 }
 0x468   : > { %v4769_v54 = vpop.f32.mrf.mxu0  ;;  %v12268_v36 = vadd.f32 %v8267_v22, %v8219_v21 }
 0x469   : > { %v4965_v60 = vpop.f32.mrf.mxu1 }
 0x46a   : > { %v8223_v8 = vpop.f32.mrf.mxu0  ;;  %v12270_v11 = vadd.f32 %v4965_v60, %v4756_v56 }
 0x46b   : > { %v8270_v2 = vpop.f32.mrf.mxu1 }
 0x46c   : > { %v4772_v62 = vpop.f32.mrf.mxu0  ;;  %v12272_v9 = vadd.f32 %v8270_v2, %v8222_v26 }
 0x46d   : > { %v4978_v3 = vpop.f32.mrf.mxu1 }
 0x46e   : > { %v8226_v49 = vpop.f32.mrf.mxu0  ;;  %v12274_v1 = vadd.f32 %v4978_v3, %v4769_v54 }
 0x46f   : > { %v8271_v35 = vpop.f32.mrf.mxu1 }
 0x470   : > { %v4785_v39 = vpop.f32.mrf.mxu0 }
 0x471   : > { %v4981_v43 = vpop.f32.mrf.mxu1 }
 0x472   : > { %v8227_v58 = vpop.f32.mrf.mxu0 }
 0x473   : > { %v8274_v13 = vpop.f32.mrf.mxu1 }
 0x474   : > { %v4788_v48 = vpop.f32.mrf.mxu0 }
 0x475   : > { %v4994_v10 = vpop.f32.mrf.mxu1 }
 0x476   : > { %v8230_v50 = vpop.f32.mrf.mxu0  ;;  %v12283_v59 = vadd.f32 %v4994_v10, %v4785_v39 }
 0x477   : > { %v8275_v6 = vpop.f32.mrf.mxu1 }
 0x478   : > { %v4801_v14 = vpop.f32.mrf.mxu0 }
 0x479   : > { %v4997_v24 = vpop.f32.mrf.mxu1 }
 0x47a   : > { %v8231_v18 = vpop.f32.mrf.mxu0  ;;  %v12287_v31 = vadd.f32 %v4997_v24, %v4788_v48 }
 0x47b   : > { %v8278_v5 = vpop.f32.mrf.mxu1 }
 0x47c   : > { %v4804_v25 = vpop.f32.mrf.mxu0 }
 0x47d   : > { %v5010_v17 = vpop.f32.mrf.mxu1 }
 0x47e   : > { %v8234_v19 = vpop.f32.mrf.mxu0 }
 0x47f   : > { %v8279_v0 = vpop.f32.mrf.mxu1 }
 0x480   : > { %v4817_v51 = vpop.f32.mrf.mxu0  ;;  %v12296_v56 = vadd.f32 %v8279_v0, %v8231_v18  ;;  %v14004_v0 = vld [vmem:[#allocation101_spill] sm:$0xff] }
 0x481   : > { %v5013_v4 = vpop.f32.mrf.mxu1 }
 0x482   : > { %v8235_v34 = vpop.f32.mrf.mxu0  ;;  %v12301_v26 = vadd.f32 %v5013_v4, %v4804_v25 }
 0x483   : > { %v8282_v15 = vpop.f32.mrf.mxu1 }
 0x484   : > { %v4820_v23 = vpop.f32.mrf.mxu0 }
 0x485   : > { %v5026_v29 = vpop.f32.mrf.mxu1 }
 0x486   : > { %v12248_v37 = vpop.f32.mrf.mxu0  ;;  %v12306_v41 = vadd.f32 %v5026_v29, %v4817_v51 }
 0x487   : > { %13998 = vst [vmem:[#allocation23_spill] sm:$0xff] %v12248_v37  ;;  %v12260_v37 = vld [vmem:[#allocation7 + $0x4] ss:$0 sm:$0xff]  ;;  %v8283_v46 = vpop.f32.mrf.mxu1 }
 0x488   : > { %v12250_v44 = vpop.f32.mrf.mxu0 }
 0x489   : > { %13999 = vst [vmem:[#allocation24_spill] sm:$0xff] %v12250_v44  ;;  %v4947_v44 = vadd.f32 %v4946_v45, %v4737_v33  ;;  %v12285_v45 = vadd.f32 %v8275_v6, %v8227_v58  ;;  %v12303_v6 = vadd.f32 %v8282_v15, %v8234_v19 }
 0x48a   : > { %v12252_v47 = vpop.f32.mrf.mxu0 }
 0x48b   : > { %14000 = vst [vmem:[#allocation25_spill] sm:$0xff] %v12252_v47  ;;  %v4958_v47 = vadd.f32 %v8263_v16, %v8215_v20 }
 0x48c   : > { %v12254_v30 = vpop.f32.mrf.mxu0 }
 0x48d   : > { %14001 = vst [vmem:[#allocation26_spill] sm:$0xff] %v12254_v30  ;;  %v12262_v30 = vadd.f32 %v4949_v40, %v4740_v61  ;;  %v12277_v61 = vadd.f32 %v8271_v35, %v8223_v8  ;;  %v12292_v40 = vadd.f32 %v8278_v5, %v8230_v50 }
 0x48e   : > { %v8306_v52 = vpop.f32.mrf.mxu0  ;;  %v14009_v58 = vld [vmem:[#allocation23_spill] sm:$0xff] }
 0x48f   : > { %v5301_v28 = vadd.f32 %v8306_v52, %v4939_v32  ;;  %v12279_v52 = vadd.f32 %v4981_v43, %v4772_v62  ;;  %v12281_v32 = vadd.f32 %v8274_v13, %v8226_v49  ;;  %v5029_v43 = vpop.f32.mrf.mxu1 }
 0x490   : > { %v5172_v7 = vpop.f32.mrf.mxu0  ;;  %v12317_v15 = vadd.f32 %v5029_v43, %v4820_v23 }
 0x491   : > { %v5341_v33 = vadd.f32 %v12260_v37, %v5301_v28  ;;  %v5299_v20 = vadd.f32 %v5172_v7, %v4931_v42  ;;  %v12294_v42 = vadd.f32 %v5010_v17, %v4801_v14  ;;  %v8286_v19 = vpop.f32.mrf.mxu1 }
 0x492   : > { %v8307_v12 = vpop.f32.mrf.mxu0  ;;  %v12339_v28 = vadd.f32 %v8286_v19, %v14009_v58  ;;  %v14011_v19 = vld [vmem:[#allocation105_spill] sm:$0xff] }
 0x493   : > { %v12290_v16 = vadd.f32 %v12260_v37, %v5299_v20  ;;  %v5302_v21 = vadd.f32 %v8307_v12, %v4942_v55  ;;  %v12299_v10 = vadd.f32 %v5341_v33, %v14002_v38  ;;  %v12308_v55 = vadd.f32 %v8283_v46, %v8235_v34  ;;  %v14006_v34 = vld [vmem:[#allocation60_spill] sm:$0xff] }
 0x494   : > { %v5175_v13 = vpop.f32.mrf.mxu0  ;;  %v5405_v17 = vrot.slane %v5341_v33, 5  ;;  %v5501_v51 = vrot.slane %v5341_v33, 3 }
 0x495   : > { %14003 = vst [vmem:[#allocation27_spill] sm:$0xff] %v12299_v10  ;;  %v5342_v48 = vadd.f32 %v12260_v37, %v5302_v21  ;;  %v5300_v24 = vadd.f32 %v5175_v13, %v4934_v63  ;;  %v12312_v18 = vadd.f32 %v12290_v16, %v14004_v0  ;;  %v13515_v3 = vrot.slane %v12290_v16, 3 }
 0x496   : > { %v8310_v5 = vpop.f32.mrf.mxu0 }
 0x497   : > { %14005 = vst [vmem:[#allocation28_spill] sm:$0xff] %v12312_v18  ;;  %v5406_v14 = vrot.slane %v5342_v48, 5  ;;  %v5502_v50 = vrot.slane %v5342_v48, 3  ;;  %v5629_v54 = vpack.c.bf16 %v5342_v48, %v5341_v33  ;;  %v12315_v4 = vadd.f32 %v12260_v37, %v5300_v24  ;;  %v14010_v24 = vld [vmem:[#allocation104_spill] sm:$0xff] }
 0x498   : > { %v5305_v63 = vadd.f32 %v8310_v5, %v4955_v53  ;;  %v5188_v29 = vpop.f32.mrf.mxu0  ;;  %v12320_v25 = vadd.f32 %v5342_v48, %v14006_v34  ;;  %v8692_v53 = vld [vmem:[#allocation5 + $0x470] sm:$0xff]   ;;  %v8694_v5 = vld [vmem:[#allocation5 + $0x468] sm:$0xff]   ;;  %v14018_v33 = vld [vmem:[#allocation24_spill] sm:$0xff] }
 0x499   : > { %v12324_v8 = vsel %vm4427_vm13, %v5405_v17, %v5406_v14  ;;  %v13516_v60 = vrot.slane %v12315_v4, 5  ;;  %v5303_v62 = vadd.f32 %v5188_v29, %v4947_v44  ;;  %v5628_v2 = vpack.c.bf16 %v12315_v4, %v12290_v16  ;;  %v14013_v29 = vld [vmem:[#allocation109_spill] sm:$0xff] }
 0x49a   : > { %14007 = vst [vmem:[#allocation29_spill] sm:$0xff] %v12320_v25  ;;  %v12330_v23 = vadd.f32 %v12260_v37, %v5305_v63  ;;  %v8311_v49 = vpop.f32.mrf.mxu0  ;;  %v5500_v39 = vrot.slane %v12315_v4, 3  ;;  %v12336_v35 = vsel %vm4524_vm0, %v5501_v51, %v5502_v50 }
 0x49b   : > { %v12345_v44 = vsel %vm4427_vm13, %v13516_v60, %v5405_v17  ;;  %v12348_v46 = vadd.f32 %v12260_v37, %v5303_v62  ;;  %v5306_v7 = vadd.f32 %v8311_v49, %v4958_v47  ;;  %8352 = vmatprep.mubr.bf16.mxu1 %v5628_v2 }
 0x49c   : > { %v5409_v20 = vrot.slane %v12330_v23, 5  ;;  %v5191_v12 = vpop.f32.mrf.mxu0  ;;  %8353 = vmatmul.mubr.bf16.vlgmr.msra.gmra.mxu1 %v5629_v54  ;;  %v12355_v21 = vsel %vm4524_vm0, %v5500_v39, %v5501_v51  ;;  %v12361_v43 = vsel %vm4524_vm0, %v13515_v3, %v5500_v39  ;;  %v5505_v54 = vrot.slane %v12330_v23, 3 }
 0x49d   : > { %v5407_v47 = vrot.slane %v12348_v46, 5  ;;  %v5503_v13 = vrot.slane %v12348_v46, 3  ;;  %v12366_v38 = vadd.f32 %v12260_v37, %v5306_v7  ;;  %v5304_v48 = vadd.f32 %v5191_v12, %v12262_v30  ;;  %8433 = vmatpush3.bf16.msra.mxu1 %v14010_v24  ;;  %v5042_v12 = vpop.f32.mrf.mxu1 }
 0x49e   : > { %v8314_v17 = vpop.f32.mrf.mxu0  ;;  %8434 = vmatprep.subr.bf16.mxu1 %v8692_v53  ;;  %v12375_v63 = vadd.f32 %v12330_v23, %v14011_v19  ;;  %v12379_v51 = vadd.f32 %v12348_v46, %v14013_v29  ;;  %v8696_v29 = vld [vmem:[#allocation5 + $0x460] sm:$0xff]   ;;  %v12430_v3 = vadd.f32 %v5042_v12, %v14018_v33 }
 0x49f   : > { %v12383_v30 = vsel %vm4524_vm0, %v5502_v50, %v5503_v13  ;;  %v5410_v34 = vrot.slane %v12366_v38, 5  ;;  %v5506_v62 = vrot.slane %v12366_v38, 3  ;;  %v12388_v2 = vadd.f32 %v12260_v37, %v5304_v48  ;;  %v8287_v18 = vpop.f32.mrf.mxu1 }
 0x4a0   : > { %14012 = vst [vmem:[#allocation30_spill] sm:$0xff] %v12375_v63  ;;  %14014 = vst [vmem:[#allocation31_spill] sm:$0xff] %v12379_v51  ;;  %v5309_v49 = vadd.f32 %v8314_v17, %v12264_v57  ;;  %v5204_v39 = vpop.f32.mrf.mxu0  ;;  %v5631_v58 = vpack.c.bf16 %v12366_v38, %v12330_v23  ;;  %v12397_v50 = vsel %vm4427_vm13, %v5406_v14, %v5407_v47 }
 0x4a1   : > { %14015 = vst [vmem:[#allocation32_spill] sm:$0xff] %v12388_v2  ;;  %v5408_v24 = vrot.slane %v12388_v2, 5  ;;  %v5307_v19 = vadd.f32 %v5204_v39, %v12266_v27  ;;  %v5630_v48 = vpack.c.bf16 %v12388_v2, %v12348_v46  ;;  %8435 = vmatpush3.bf16.msra.mxu1 %v8692_v53  ;;  %v12405_v57 = vsel %vm4427_vm13, %v5409_v20, %v5410_v34  ;;  %v14016_v27 = vld [vmem:[#allocation111_spill] sm:$0xff] }
 0x4a2   : > { %v5349_v23 = vadd.f32 %v12260_v37, %v5309_v49  ;;  %v8315_v17 = vpop.f32.mrf.mxu0  ;;  %8436 = vmatprep.subr.bf16.mxu1 %v8694_v5  ;;  %v5504_v14 = vrot.slane %v12388_v2, 3  ;;  %v12411_v7 = vsel %vm4524_vm0, %v5505_v54, %v5506_v62  ;;  %v12415_v39 = vadd.f32 %v12366_v38, %v14016_v27  ;;  %v14019_v27 = vld [vmem:[#allocation59_spill] sm:$0xff] }
 0x4a3   : > { %v12418_v53 = vadd.f32 %v12260_v37, %v5307_v19  ;;  %v5310_v46 = vadd.f32 %v8315_v17, %v12268_v36  ;;  %8356 = vmatprep.mubr.bf16.mxu1 %v5630_v48  ;;  %v12423_v49 = vsel %vm4427_vm13, %v5407_v47, %v5408_v24  ;;  %v12427_v0 = vsel %vm4427_vm13, %v5408_v24, %v5409_v20  ;;  %v8698_v48 = vld [vmem:[#allocation5 + $0x458] sm:$0xff]  }
 0x4a4   : > { %14017 = vst [vmem:[#allocation33_spill] sm:$0xff] %v12415_v39  ;;  %v5207_v60 = vpop.f32.mrf.mxu0  ;;  %8357 = vmatmul.mubr.bf16.gmra.mxu1 %v5631_v58  ;;  %v12438_v19 = vsel %vm4524_vm0, %v5504_v14, %v5505_v54  ;;  %v5413_v58 = vrot.slane %v5349_v23, 5  ;;  %v12448_v17 = vsel %vm4524_vm0, %v5503_v13, %v5504_v14  ;;  %v5509_v54 = vrot.slane %v5349_v23, 3  ;;  %v8700_v13 = vld [vmem:[#allocation5 + $0x450] sm:$0xff]  }
 0x4a5   : > { %v5411_v47 = vrot.slane %v12418_v53, 5  ;;  %v5507_v20 = vrot.slane %v12418_v53, 3  ;;  %v12443_v24 = vadd.f32 %v12260_v37, %v5310_v46  ;;  %v5308_v33 = vadd.f32 %v5207_v60, %v12270_v11  ;;  %8437 = vmatpush3.bf16.msra.mxu1 %v8694_v5 }
 0x4a6   : > { %v8318_v12 = vpop.f32.mrf.mxu0  ;;  %8438 = vmatprep.subr.bf16.mxu1 %v8696_v29  ;;  %v12451_v36 = vadd.f32 %v5349_v23, %v14019_v27 }
 0x4a7   : > { %v5414_v38 = vrot.slane %v12443_v24, 5  ;;  %v5510_v46 = vrot.slane %v12443_v24, 3  ;;  %v12456_v39 = vadd.f32 %v12260_v37, %v5308_v33  ;;  %v5313_v11 = vadd.f32 %v8318_v12, %v12272_v9 }
 0x4a8   : > { %14020 = vst [vmem:[#allocation19_spill] sm:$0xff] %v12451_v36  ;;  %v5220_v60 = vpop.f32.mrf.mxu0  ;;  %v5633_v5 = vpack.c.bf16 %v12443_v24, %v5349_v23  ;;  %v12464_v14 = vsel %vm4427_vm13, %v5410_v34, %v5411_v47  ;;  %v12468_v27 = vsel %vm4524_vm0, %v5506_v62, %v5507_v20 }
 0x4a9   : > { %14021 = vst [vmem:[#allocation75_spill] sm:$0xff] %v12456_v39  ;;  %v5412_v36 = vrot.slane %v12456_v39, 5  ;;  %v12472_v33 = vadd.f32 %v12260_v37, %v5313_v11  ;;  %v5311_v9 = vadd.f32 %v5220_v60, %v12274_v1  ;;  %v5632_v23 = vpack.c.bf16 %v12456_v39, %v12418_v53  ;;  %8439 = vmatpush3.bf16.msra.mxu1 %v8696_v29 }
 0x4aa   : > { %v8319_v12 = vpop.f32.mrf.mxu0  ;;  %8440 = vmatprep.subr.bf16.mxu1 %v8698_v48  ;;  %v12481_v62 = vsel %vm4427_vm13, %v5413_v58, %v5414_v38  ;;  %v5508_v2 = vrot.slane %v12456_v39, 3  ;;  %v12486_v11 = vsel %vm4524_vm0, %v5509_v54, %v5510_v46  ;;  %v14025_v39 = vld [vmem:[#allocation64_spill] sm:$0xff] }
 0x4ab   : > { %14022 = vst [vmem:[#allocation76_spill] sm:$0xff] %v12486_v11  ;;  %v5417_v1 = vrot.slane %v12472_v33, 5  ;;  %v12490_v29 = vadd.f32 %v12260_v37, %v5311_v9  ;;  %v5314_v60 = vadd.f32 %v8319_v12, %v12277_v61  ;;  %8360 = vmatprep.mubr.bf16.mxu1 %v5632_v23  ;;  %v12495_v34 = vsel %vm4427_vm13, %v5411_v47, %v5412_v36 }
 0x4ac   : > { %v5223_v51 = vpop.f32.mrf.mxu0  ;;  %8361 = vmatmul.mubr.bf16.gmra.mxu1 %v5633_v5  ;;  %v12501_v63 = vsel %vm4427_vm13, %v5412_v36, %v5413_v58  ;;  %v12505_v9 = vsel %vm4524_vm0, %v5508_v2, %v5509_v54  ;;  %v12509_v61 = vsel %vm4524_vm0, %v5507_v20, %v5508_v2  ;;  %v8702_v58 = vld [vmem:[#allocation5 + $0x448] sm:$0xff]   ;;  %v5513_v20 = vrot.slane %v12472_v33, 3 }
 0x4ad   : > { %14023 = vst [vmem:[#allocation41_spill] sm:$0xff] %v12505_v9  ;;  %14024 = vst [vmem:[#allocation40_spill] sm:$0xff] %v12509_v61  ;;  %v5415_v47 = vrot.slane %v12490_v29, 5  ;;  %v5511_v23 = vrot.slane %v12490_v29, 3  ;;  %v12514_v5 = vadd.f32 %v12260_v37, %v5314_v60  ;;  %v5312_v12 = vadd.f32 %v5223_v51, %v12279_v52  ;;  %8441 = vmatpush3.bf16.msra.mxu1 %v8698_v48  ;;  %v8704_v9 = vld [vmem:[#allocation5 + $0x440] sm:$0xff]  }
 0x4ae   : > { %v8322_v36 = vpop.f32.mrf.mxu0  ;;  %8442 = vmatprep.subr.bf16.mxu1 %v8700_v13  ;;  %v12524_v25 = vadd.f32 %v12418_v53, %v14025_v39  ;;  %v14029_v53 = vld [vmem:[#allocation39_spill] sm:$0xff] }
 0x4af   : > { %v5418_v60 = vrot.slane %v12514_v5, 5  ;;  %v5514_v52 = vrot.slane %v12514_v5, 3  ;;  %v12529_v51 = vadd.f32 %v12260_v37, %v5312_v12  ;;  %v5317_v48 = vadd.f32 %v8322_v36, %v12281_v32 }
 0x4b0   : > { %14026 = vst [vmem:[#allocation79_spill] sm:$0xff] %v12524_v25  ;;  %v5236_v54 = vpop.f32.mrf.mxu0  ;;  %v5635_v2 = vpack.c.bf16 %v12514_v5, %v12472_v33  ;;  %v12536_v10 = vsel %vm4427_vm13, %v5414_v38, %v5415_v47  ;;  %v12540_v39 = vsel %vm4524_vm0, %v5510_v46, %v5511_v23  ;;  %v12544_v25 = vadd.f32 %v12443_v24, %v14029_v53 }
 0x4b1   : > { %14027 = vst [vmem:[#allocation122_spill] sm:$0xff] %v12529_v51  ;;  %14028 = vst [vmem:[#allocation124_spill] sm:$0xff] %v12540_v39  ;;  %v5416_v12 = vrot.slane %v12529_v51, 5  ;;  %v12548_v32 = vadd.f32 %v12260_v37, %v5317_v48  ;;  %v5315_v36 = vadd.f32 %v5236_v54, %v12283_v59  ;;  %v5634_v61 = vpack.c.bf16 %v12529_v51, %v12490_v29  ;;  %v14032_v59 = vld [vmem:[#allocation25_spill] sm:$0xff] }
 0x4b2   : > { %14030 = vst [vmem:[#allocation80_spill] sm:$0xff] %v12544_v25  ;;  %8443 = vmatpush3.bf16.msra.mxu1 %v8700_v13  ;;  %v8323_v38 = vpop.f32.mrf.mxu0  ;;  %v12557_v24 = vsel %vm4427_vm13, %v5417_v1, %v5418_v60  ;;  %v5512_v53 = vrot.slane %v12529_v51, 3  ;;  %v12562_v48 = vsel %vm4524_vm0, %v5513_v20, %v5514_v52  ;;  %v12565_v54 = vadd.f32 %v8287_v18, %v14032_v59  ;;  %v14038_v51 = vld [vmem:[#allocation38_spill] sm:$0xff] }
 0x4b3   : > { %8444 = vmatprep.subr.bf16.mxu1 %v8702_v58  ;;  %14031 = vst [vmem:[#allocation123_spill] sm:$0xff] %v12562_v48  ;;  %v12568_v13 = vadd.f32 %v12260_v37, %v5315_v36  ;;  %v5318_v25 = vadd.f32 %v8323_v38, %v12285_v45  ;;  %8364 = vmatprep.mubr.bf16.mxu1 %v5634_v61  ;;  %v5517_v38 = vrot.slane %v12548_v32, 3 }
 0x4b4   : > { %v12573_v46 = vsel %vm4427_vm13, %v5415_v47, %v5416_v12  ;;  %v5239_v11 = vpop.f32.mrf.mxu0  ;;  %8365 = vmatmul.mubr.bf16.gmra.mxu1 %v5635_v2  ;;  %v12579_v39 = vsel %vm4427_vm13, %v5416_v12, %v5417_v1  ;;  %v12583_v18 = vsel %vm4524_vm0, %v5512_v53, %v5513_v20  ;;  %v12587_v45 = vsel %vm4524_vm0, %v5511_v23, %v5512_v53 }
 0x4b5   : > { %14033 = vst [vmem:[#allocation81_spill] sm:$0xff] %v12579_v39  ;;  %14034 = vst [vmem:[#allocation46_spill] sm:$0xff] %v12583_v18  ;;  %v5419_v61 = vrot.slane %v12568_v13, 5  ;;  %v5515_v47 = vrot.slane %v12568_v13, 3  ;;  %v12592_v2 = vadd.f32 %v12260_v37, %v5318_v25  ;;  %v5316_v36 = vadd.f32 %v5239_v11, %v12287_v31 }
 0x4b6   : > { %14035 = vst [vmem:[#allocation44_spill] sm:$0xff] %v12587_v45  ;;  %8445 = vmatpush3.bf16.msra.mxu1 %v8702_v58  ;;  %v5421_v1 = vrot.slane %v12548_v32, 5  ;;  %v8326_v12 = vpop.f32.mrf.mxu0  ;;  %v12619_v45 = vadd.f32 %v12472_v33, %v14038_v51 }
 0x4b7   : > { %8446 = vmatprep.subr.bf16.mxu1 %v8704_v9  ;;  %v5422_v53 = vrot.slane %v12592_v2, 5  ;;  %v5518_v25 = vrot.slane %v12592_v2, 3  ;;  %v12604_v59 = vadd.f32 %v12260_v37, %v5316_v36  ;;  %v5321_v31 = vadd.f32 %v8326_v12, %v12292_v40 }
 0x4b8   : > { %v5252_v11 = vpop.f32.mrf.mxu0  ;;  %v5637_v58 = vpack.c.bf16 %v12592_v2, %v12548_v32  ;;  %v12611_v20 = vsel %vm4427_vm13, %v5418_v60, %v5419_v61  ;;  %v12615_v23 = vsel %vm4524_vm0, %v5514_v52, %v5515_v47  ;;  %14039 = vst [vmem:[#allocation84_spill] sm:$0xff] %v12619_v45 }
 0x4b9   : > { %14036 = vst [vmem:[#allocation128_spill] sm:$0xff] %v12611_v20  ;;  %14037 = vst [vmem:[#allocation43_spill] sm:$0xff] %v12615_v23  ;;  %v5420_v36 = vrot.slane %v12604_v59, 5  ;;  %v12623_v40 = vadd.f32 %v12260_v37, %v5321_v31  ;;  %v5319_v12 = vadd.f32 %v5252_v11, %v12294_v42  ;;  %v5636_v18 = vpack.c.bf16 %v12604_v59, %v12568_v13 }
 0x4ba   : > { %8447 = vmatpush3.bf16.msra.mxu1 %v8704_v9  ;;  %v8327_v60 = vpop.f32.mrf.mxu0  ;;  %v12632_v39 = vsel %vm4427_vm13, %v5421_v1, %v5422_v53  ;;  %v5516_v33 = vrot.slane %v12604_v59, 3  ;;  %v12637_v51 = vsel %vm4524_vm0, %v5517_v38, %v5518_v25 }
 0x4bb   : > { %14040 = vst [vmem:[#allocation126_spill] sm:$0xff] %v12632_v39  ;;  %14041 = vst [vmem:[#allocation85_spill] sm:$0xff] %v12637_v51  ;;  %v5425_v42 = vrot.slane %v12623_v40, 5  ;;  %v12641_v31 = vadd.f32 %v12260_v37, %v5319_v12  ;;  %v5322_v9 = vadd.f32 %v8327_v60, %v12296_v56  ;;  %8368 = vmatprep.mubr.bf16.mxu1 %v5636_v18 }
 0x4bc   : > { %v12646_v11 = vsel %vm4427_vm13, %v5419_v61, %v5420_v36  ;;  %v5255_v52 = vpop.f32.mrf.mxu0  ;;  %8369 = vmatmul.mubr.bf16.gmra.mxu1 %v5637_v58  ;;  %v12652_v48 = vsel %vm4427_vm13, %v5420_v36, %v5421_v1  ;;  %v12656_v12 = vsel %vm4524_vm0, %v5516_v33, %v5517_v38  ;;  %v12660_v56 = vsel %vm4524_vm0, %v5515_v47, %v5516_v33  ;;  %v14045_v47 = vld [vmem:[#allocation117_spill] sm:$0xff] }
 0x4bd   : > { %14042 = vst [vmem:[#allocation86_spill] sm:$0xff] %v12652_v48  ;;  %14043 = vst [vmem:[#allocation50_spill] sm:$0xff] %v12656_v12  ;;  %v5423_v18 = vrot.slane %v12641_v31, 5  ;;  %v5519_v61 = vrot.slane %v12641_v31, 3  ;;  %v12665_v58 = vadd.f32 %v12260_v37, %v5322_v9  ;;  %v5320_v60 = vadd.f32 %v5255_v52, %v12301_v26  ;;  %v5045_v52 = vpop.f32.mrf.mxu1 }
 0x4be   : > { %14044 = vst [vmem:[#allocation48_spill] sm:$0xff] %v12660_v56  ;;  %v8330_v45 = vpop.f32.mrf.mxu0  ;;  %v5521_v36 = vrot.slane %v12623_v40, 3  ;;  %v12675_v33 = vadd.f32 %v12490_v29, %v14045_v47  ;;  %v14049_v47 = vld [vmem:[#allocation115_spill] sm:$0xff] }
 0x4bf   : > { %v5426_v23 = vrot.slane %v12665_v58, 5  ;;  %v5522_v9 = vrot.slane %v12665_v58, 3  ;;  %v12680_v20 = vadd.f32 %v12260_v37, %v5320_v60  ;;  %v5325_v26 = vadd.f32 %v8330_v45, %v12303_v6 }
 0x4c0   : > { %14046 = vst [vmem:[#allocation47_spill] sm:$0xff] %v12675_v33  ;;  %v5268_v1 = vpop.f32.mrf.mxu0  ;;  %v5639_v38 = vpack.c.bf16 %v12665_v58, %v12623_v40  ;;  %v12687_v56 = vsel %vm4427_vm13, %v5422_v53, %v5423_v18  ;;  %v12691_v29 = vsel %vm4524_vm0, %v5518_v25, %v5519_v61  ;;  %v12695_v33 = vadd.f32 %v12514_v5, %v14049_v47 }
 0x4c1   : > { %14047 = vst [vmem:[#allocation89_spill] sm:$0xff] %v12687_v56  ;;  %14048 = vst [vmem:[#allocation90_spill] sm:$0xff] %v12691_v29  ;;  %v5424_v60 = vrot.slane %v12680_v20, 5  ;;  %v12699_v6 = vadd.f32 %v12260_v37, %v5325_v26  ;;  %v5323_v45 = vadd.f32 %v5268_v1, %v12306_v41  ;;  %v5638_v12 = vpack.c.bf16 %v12680_v20, %v12641_v31  ;;  %v14053_v26 = vld [vmem:[#allocation26_spill] sm:$0xff] }
 0x4c2   : > { %14050 = vst [vmem:[#allocation129_spill] sm:$0xff] %v12695_v33  ;;  %v8331_v53 = vpop.f32.mrf.mxu0  ;;  %v12708_v25 = vsel %vm4427_vm13, %v5425_v42, %v5426_v23  ;;  %v5520_v5 = vrot.slane %v12680_v20, 3  ;;  %v12713_v47 = vsel %vm4524_vm0, %v5521_v36, %v5522_v9  ;;  %v5046_v33 = vadd.f32 %v5045_v52, %v14053_v26 }
 0x4c3   : > { %14051 = vst [vmem:[#allocation91_spill] sm:$0xff] %v12708_v25  ;;  %14052 = vst [vmem:[#allocation54_spill] sm:$0xff] %v12713_v47  ;;  %v12717_v41 = vadd.f32 %v12260_v37, %v5323_v45  ;;  %v5326_v1 = vadd.f32 %v8331_v53, %v12308_v55  ;;  %8372 = vmatprep.mubr.bf16.mxu1 %v5638_v12  ;;  %v12722_v48 = vsel %vm4427_vm13, %v5423_v18, %v5424_v60 }
 0x4c4   : > { %v5271_v51 = vpop.f32.mrf.mxu0  ;;  %8373 = vmatmul.mubr.bf16.gmra.mxu1 %v5639_v38  ;;  %v12728_v39 = vsel %vm4427_vm13, %v5424_v60, %v5425_v42  ;;  %v12732_v52 = vsel %vm4524_vm0, %v5520_v5, %v5521_v36  ;;  %v12736_v55 = vsel %vm4524_vm0, %v5519_v61, %v5520_v5  ;;  %v5429_v42 = vrot.slane %v12699_v6, 5 }
 0x4c5   : > { %14054 = vst [vmem:[#allocation52_spill] sm:$0xff] %v12728_v39  ;;  %14055 = vst [vmem:[#allocation133_spill] sm:$0xff] %v12732_v52  ;;  %v5427_v12 = vrot.slane %v12717_v41, 5  ;;  %v5523_v18 = vrot.slane %v12717_v41, 3  ;;  %v12741_v38 = vadd.f32 %v12260_v37, %v5326_v1  ;;  %v5324_v45 = vadd.f32 %v5271_v51, %v12317_v15 }
 0x4c6   : > { %14056 = vst [vmem:[#allocation51_spill] sm:$0xff] %v12736_v55  ;;  %v8334_v60 = vpop.f32.mrf.mxu0  ;;  %v5525_v61 = vrot.slane %v12699_v6, 3  ;;  %v14058_v55 = vld [vmem:[#allocation118_spill] sm:$0xff] }
 0x4c7   : > { %v5430_v5 = vrot.slane %v12741_v38, 5  ;;  %v5526_v26 = vrot.slane %v12741_v38, 3  ;;  %v12753_v1 = vadd.f32 %v12260_v37, %v5324_v45  ;;  %v5329_v15 = vadd.f32 %v8334_v60, %v12339_v28 }
 0x4c8   : > { %v5284_v51 = vpop.f32.mrf.mxu0  ;;  %v5641_v29 = vpack.c.bf16 %v12741_v38, %v12699_v6  ;;  %v12760_v36 = vsel %vm4427_vm13, %v5426_v23, %v5427_v12  ;;  %v12764_v53 = vsel %vm4524_vm0, %v5522_v9, %v5523_v18  ;;  %v12768_v52 = vadd.f32 %v12548_v32, %v14058_v55 }
 0x4c9   : > { %14057 = vst [vmem:[#allocation70_spill] sm:$0xff] %v12764_v53  ;;  %v5403_v45 = vrot.slane %v12290_v16, 5  ;;  %v5428_v28 = vrot.slane %v12753_v1, 5  ;;  %v5327_v60 = vadd.f32 %v5284_v51, %v12430_v3  ;;  %v5640_v39 = vpack.c.bf16 %v12753_v1, %v12717_v41  ;;  %v14061_v53 = vld [vmem:[#allocation121_spill] sm:$0xff] }
 0x4ca   : > { %14059 = vst [vmem:[#allocation93_spill] sm:$0xff] %v12768_v52  ;;  %v8335_v25 = vpop.f32.mrf.mxu0  ;;  %v12779_v9 = vsel %vm4427_vm13, %v5429_v42, %v5430_v5  ;;  %v5524_v32 = vrot.slane %v12753_v1, 3  ;;  %v12784_v55 = vsel %vm4524_vm0, %v5525_v61, %v5526_v26  ;;  %v12787_v52 = vadd.f32 %v12260_v37, %v5329_v15 }
 0x4cb   : > { %v5367_v3 = vadd.f32 %v12260_v37, %v5327_v60  ;;  %v5330_v51 = vadd.f32 %v8335_v25, %v12565_v54  ;;  %8376 = vmatprep.mubr.bf16.mxu1 %v5640_v39  ;;  %v12793_v23 = vsel %vm4427_vm13, %v5427_v12, %v5428_v28  ;;  %v12799_v56 = vsel %vm4427_vm13, %v5428_v28, %v5429_v42 }
 0x4cc   : > { %v5287_v47 = vpop.f32.mrf.mxu0  ;;  %8377 = vmatmul.mubr.bf16.gmra.mxu1 %v5641_v29  ;;  %v12803_v15 = vsel %vm4524_vm0, %v5524_v32, %v5525_v61  ;;  %v12807_v39 = vsel %vm4524_vm0, %v5523_v18, %v5524_v32  ;;  %v14060_v60 = vrot.slane %v12315_v4, 5  ;;  %v12822_v18 = vadd.f32 %v12568_v13, %v14061_v53  ;;  %v14063_v61 = vld [vmem:[#allocation134_spill] sm:$0xff]  ;;  %v14065_v53 = vld [vmem:[#allocation135_spill] sm:$0xff] }
 0x4cd   : > { %v5431_v54 = vrot.slane %v5367_v3, 5  ;;  %v5527_v25 = vrot.slane %v5367_v3, 3  ;;  %v12810_v12 = vadd.f32 %v12260_v37, %v5330_v51  ;;  %v5328_v29 = vadd.f32 %v5287_v47, %v5046_v33 }
 0x4ce   : > { %v5465_v42 = vsel %vm4427_vm13, %v5403_v45, %v14060_v60  ;;  %14062 = vst [vmem:[#allocation131_spill] sm:$0xff] %v12822_v18  ;;  %v5529_v47 = vrot.slane %v12787_v52, 3  ;;  %v12838_v13 = vadd.f32 %v12592_v2, %v14063_v61  ;;  %v12842_v32 = vadd.f32 %v12604_v59, %v14065_v53 }
 0x4cf   : > { %v5530_v51 = vrot.slane %v12810_v12, 3  ;;  %v12827_v33 = vadd.f32 %v12260_v37, %v5328_v29  ;;  %v5438_v60 = vsel %vm4427_vm13, %v5430_v5, %v5431_v54  ;;  %v12834_v28 = vsel %vm4524_vm0, %v5526_v26, %v5527_v25 }
 0x4d0   : > { %14064 = vst [vmem:[#allocation97_spill] sm:$0xff] %v12838_v13  ;;  %14066 = vst [vmem:[#allocation71_spill] sm:$0xff] %v12842_v32  ;;  %v14067_v18 = vrot.slane %v12810_v12, 5  ;;  %v7166_v26 = vpack.c.bf16 %v12834_v28, %v12784_v55  ;;  %v5643_v2 = vpack.c.bf16 %v12810_v12, %v12787_v52  ;;  %v14068_v32 = vrot.slane %v12290_v16, 3 }
 0x4d1   : > { %v5432_v37 = vrot.slane %v12827_v33, 5  ;;  %v5642_v29 = vpack.c.bf16 %v12827_v33, %v5367_v3  ;;  %v5528_v13 = vrot.slane %v12827_v33, 3  ;;  %v5531_v59 = vsel %vm4524_vm0, %v5529_v47, %v5530_v51 }
 0x4d2   : > { %v5466_v5 = vsel %vm4427_vm13, %v14067_v18, %v5403_v45  ;;  %v5562_v45 = vsel %vm4524_vm0, %v5530_v51, %v14068_v32  ;;  %v14069_v18 = vld [vmem:[#allocation137_spill] sm:$0xff]  ;;  %v14072_v16 = vpack.c.bf16 %v12355_v21, %v12361_v43  ;;  %v14073_v51 = vld [vmem:[#allocation119_spill] sm:$0xff]  ;;  %v14076_v21 = vld [vmem:[#allocation140_spill] sm:$0xff] }
 0x4d3   : > { %v7116_v61 = vpack.c.bf16 %v5465_v42, %v5466_v5  ;;  %8380 = vmatprep.mubr.bf16.mxu1 %v5642_v29  ;;  %v5437_v53 = vsel %vm4427_vm13, %v5431_v54, %v5432_v37  ;;  %v12865_v55 = vadd.f32 %v12623_v40, %v14069_v18  ;;  %v5532_v29 = vsel %vm4524_vm0, %v5528_v13, %v5529_v47 }
 0x4d4   : > { %8381 = vmatmul.mubr.bf16.gmra.mxu1 %v5643_v2  ;;  %v7137_v28 = vpack.c.bf16 %v5437_v53, %v5438_v60  ;;  %v14071_v54 = vpack.c.bf16 %v12324_v8, %v12345_v44  ;;  %v5533_v40 = vsel %vm4524_vm0, %v5527_v25, %v5528_v13  ;;  %v7169_v32 = vpack.c.bf16 %v5562_v45, %v5531_v59  ;;  %v14075_v44 = vld [vmem:[#allocation138_spill] sm:$0xff]  ;;  %v14077_v25 = vld [vmem:[#allocation141_spill] sm:$0xff]  ;;  %v14084_v53 = vld [vmem:[#allocation20_spill] sm:$0xff] }
 0x4d5   : > { %8400 = vmatprep.mubr.msk.bf16.mxu0 %vm11626_vm15, %v7116_v61  ;;  %8448 = vmatprep.mubr.bf16.mxu1 %v14072_v16  ;;  %v12881_v5 = vadd.f32 %v12641_v31, %v14073_v51  ;;  %v14074_v60 = vpack.c.bf16 %v12423_v49, %v12397_v50  ;;  %v6093_v8 = vpack.c.bf16 %v5532_v29, %v5533_v40  ;;  %v14078_v31 = vld [vmem:[#allocation142_spill] sm:$0xff]  ;;  %v14079_v50 = vld [vmem:[#allocation139_spill] sm:$0xff]  ;;  %v14080_v61 = vld [vmem:[#allocation16_spill] sm:$0xff] }
 0x4d6   : > { %8401 = vmatmul.mubr.bf16.vlgmr.msra.gmra.mxu0 %v14071_v54  ;;  %v12890_v47 = vadd.f32 %v12665_v58, %v14075_v44  ;;  %v12894_v43 = vadd.f32 %v12680_v20, %v14076_v21  ;;  %v12898_v13 = vadd.f32 %v12699_v6, %v14077_v25  ;;  %v12902_v2 = vadd.f32 %v12717_v41, %v14078_v31  ;;  %v14082_v59 = vld [vmem:[#allocation18_spill] sm:$0xff]  ;;  %v14086_v6 = vld [vmem:[#allocation21_spill] sm:$0xff]  ;;  %v14109_v51 = vld [vmem:[#allocation128_spill] sm:$0xff] }
 0x4d7   : > { %8404 = vmatprep.mubr.msk.bf16.mxu0 %vm11626_vm15, %v14074_v60  ;;  %v12906_v49 = vadd.f32 %v12741_v38, %v14079_v50  ;;  %v12910_v58 = vadd.f32 %v12753_v1, %v14080_v61  ;;  %v12914_v20 = vadd.f32 %v12787_v52, %v14082_v59  ;;  %v12917_v45 = vadd.f32 %v5367_v3, %v14084_v53  ;;  %v14088_v41 = vld [vmem:[#allocation22_spill] sm:$0xff]  ;;  %v14112_v60 = vld [vmem:[#allocation123_spill] sm:$0xff]  ;;  %v14118_v50 = vld [vmem:[#allocation48_spill] sm:$0xff] }
 0x4d8   : > { %v12921_v18 = vadd.f32 %v12810_v12, %v14086_v6  ;;  %v12925_v29 = vadd.f32 %v12827_v33, %v14088_v41  ;;  %v14090_v38 = vpack.c.bf16 %v12383_v30, %v12336_v35  ;;  %v14092_v54 = vpack.c.bf16 %v12405_v57, %v12427_v0  ;;  %v14097_v30 = vld [vmem:[#allocation41_spill] sm:$0xff]  ;;  %v14098_v57 = vld [vmem:[#allocation40_spill] sm:$0xff]  ;;  %v14114_v21 = vld [vmem:[#allocation126_spill] sm:$0xff] }
 0x4d9   : > { %14081 = vst [vmem:[#allocation98_spill] sm:$0xff] %v12910_v58  ;;  %14083 = vst [vmem:[#allocation57_spill] sm:$0xff] %v12914_v20  ;;  %v14093_v3 = vpack.c.bf16 %v12438_v19, %v12448_v17  ;;  %v14094_v16 = vpack.c.bf16 %v12495_v34, %v12464_v14  ;;  %v14095_v35 = vpack.c.bf16 %v12468_v27, %v12411_v7  ;;  %v14101_v14 = vld [vmem:[#allocation124_spill] sm:$0xff]  ;;  %v14104_v27 = vld [vmem:[#allocation81_spill] sm:$0xff] }
 0x4da   : > { %14085 = vst [vmem:[#allocation102_spill] sm:$0xff] %v12917_v45  ;;  %14087 = vst [vmem:[#allocation114_spill] sm:$0xff] %v12921_v18  ;;  %v14096_v0 = vpack.c.bf16 %v12481_v62, %v12501_v63  ;;  %v14099_v19 = vpack.c.bf16 %v14097_v30, %v14098_v57  ;;  %v14100_v17 = vpack.c.bf16 %v12573_v46, %v12536_v10  ;;  %v14102_v34 = vld [vmem:[#allocation76_spill] sm:$0xff]  ;;  %v14106_v62 = vld [vmem:[#allocation46_spill] sm:$0xff] }
 0x4db   : > { %14089 = vst [vmem:[#allocation72_spill] sm:$0xff] %v12925_v29  ;;  %v14103_v7 = vpack.c.bf16 %v14101_v14, %v14102_v34  ;;  %v14105_v63 = vpack.c.bf16 %v12557_v24, %v14104_v27  ;;  %v14107_v33 = vld [vmem:[#allocation44_spill] sm:$0xff]  ;;  %v14110_v10 = vpack.c.bf16 %v12646_v11, %v14109_v51  ;;  %v14111_v46 = vld [vmem:[#allocation43_spill] sm:$0xff]  ;;  %v14115_v25 = vld [vmem:[#allocation86_spill] sm:$0xff]  ;;  %v14136_v14 = vpack.c.bf16 %v12803_v15, %v12807_v39 }
 0x4dc   : > { %8449 = vmatmul.mubr.msk.bf16.vlgmr.msra.gmra.mxu1 %vm11861_vm3, %v14090_v38  ;;  %v14108_v40 = vpack.c.bf16 %v14106_v62, %v14107_v33  ;;  %v14113_v44 = vpack.c.bf16 %v14111_v46, %v14112_v60  ;;  %v14116_v24 = vpack.c.bf16 %v14114_v21, %v14115_v25  ;;  %v14117_v31 = vld [vmem:[#allocation50_spill] sm:$0xff]  ;;  %v14120_v59 = vld [vmem:[#allocation89_spill] sm:$0xff]  ;;  %v14125_v38 = vld [vmem:[#allocation91_spill] sm:$0xff]  ;;  %v14137_v34 = vrot.slane %v12810_v12, 5 }
 0x4dd   : > { %8452 = vmatprep.mubr.bf16.mxu1 %v14093_v3  ;;  %v14119_v61 = vpack.c.bf16 %v14117_v31, %v14118_v50  ;;  %v14121_v11 = vpack.c.bf16 %v12722_v48, %v14120_v59  ;;  %v14122_v53 = vld [vmem:[#allocation90_spill] sm:$0xff]  ;;  %v14123_v6 = vld [vmem:[#allocation85_spill] sm:$0xff]  ;;  %v14131_v48 = vpack.c.bf16 %v12793_v23, %v12760_v36  ;;  %v5433_v36 = vrot.slane %v12787_v52, 5 }
 0x4de   : > { %8405 = vmatmul.mubr.bf16.gmra.mxu0 %v14092_v54  ;;  %v14124_v41 = vpack.c.bf16 %v14122_v53, %v14123_v6  ;;  %v14126_v54 = vld [vmem:[#allocation52_spill] sm:$0xff]  ;;  %v14132_v30 = vld [vmem:[#allocation70_spill] sm:$0xff] }
 0x4df   : > { %8408 = vmatprep.mubr.msk.bf16.mxu0 %vm11626_vm15, %v14094_v16  ;;  %v14127_v3 = vpack.c.bf16 %v14125_v38, %v14126_v54  ;;  %v14128_v16 = vld [vmem:[#allocation133_spill] sm:$0xff]  ;;  %v14133_v57 = vld [vmem:[#allocation54_spill] sm:$0xff]  ;;  %v5436_v23 = vsel %vm4427_vm13, %v5432_v37, %v5433_v36  ;;  %v8790_v54 = vld [vmem:[%s9157_s20 + $0x38] sm:$0xff] }
 0x4e0   : > { %v8771_v15 = vld [vmem:[%s9157_s20] sm:$0xff]  ;;  %v8772_v39 = vld [vmem:[%s9157_s20 + $0x8] sm:$0xff] }
 0x4e1   : > { %v6457_v22 = vadd.f32 %v8772_v39, %v8771_v15  ;;  %v8773_v12 = vld [vmem:[%s9157_s20 + $0x20] sm:$0xff]  ;;  %v8774_v37 = vld [vmem:[%s9157_s20 + $0x28] sm:$0xff]  ;;  %v8797_v39 = vld [vmem:[%s9157_s20 + $0x58] sm:$0xff] }
 0x4e2   : > { %v8778_v62 = vld [vmem:[%s9157_s20 + $0x48] sm:$0xff]  ;;  %v8781_v46 = vld [vmem:[%s9157_s20 + $0x80] sm:$0xff] }
 0x4e3   : > { %v8780_v51 = vld [vmem:[%s9157_s20 + $0x68] sm:$0xff]  ;;  %v8783_v21 = vld [vmem:[%s9157_s20 + $0xa0] sm:$0xff] }
 0x4e4   : > { %8453 = vmatmul.mubr.msk.bf16.gmra.mxu1 %vm11861_vm3, %v14095_v35  ;;  %v14129_v35 = vld [vmem:[#allocation51_spill] sm:$0xff]  ;;  %v8782_v60 = vld [vmem:[%s9157_s20 + $0x88] sm:$0xff]  ;;  %v8785_v31 = vld [vmem:[%s9157_s20 + $0xc0] sm:$0xff] }
 0x4e5   : > { %8456 = vmatprep.mubr.bf16.mxu1 %v14099_v19  ;;  %v14134_v19 = vpack.c.bf16 %v14132_v30, %v14133_v57  ;;  %v8784_v25 = vld [vmem:[%s9157_s20 + $0xa8] sm:$0xff]  ;;  %v8787_v59 = vld [vmem:[%s9157_s20 + $0xe0] sm:$0xff]  ;;  %v8793_v30 = vld [vmem:[%s9157_s20 + $0x90] sm:$0xff] }
 0x4e6   : > { %8409 = vmatmul.mubr.bf16.gmra.mxu0 %v14096_v0  ;;  %v14130_v0 = vpack.c.bf16 %v14128_v16, %v14129_v35  ;;  %v8786_v50 = vld [vmem:[%s9157_s20 + $0xc8] sm:$0xff]  ;;  %v8791_v16 = vld [vmem:[%s9157_s20 + $0x50] sm:$0xff] }
 0x4e7   : > { %8412 = vmatprep.mubr.msk.bf16.mxu0 %vm11626_vm15, %v14100_v17  ;;  %v14135_v17 = vpack.c.bf16 %v12779_v9, %v12799_v56  ;;  %v5435_v56 = vsel %vm4427_vm13, %v5433_v36, %v14137_v34 }
 0x4e8   : > { %v5610_v9 = vpack.c.bf16 %v5435_v56, %v5436_v23  ;;  %v8796_v23 = vld [vmem:[%s9157_s20 + $0xf0] sm:$0xff] }
 0x4ec   : > { %8457 = vmatmul.mubr.msk.bf16.gmra.mxu1 %vm11861_vm3, %v14103_v7  ;;  %v8776_v7 = vld [vmem:[%s9157_s20 + $0x30] sm:$0xff] }
 0x4ed   : > { %8460 = vmatprep.mubr.bf16.mxu1 %v14108_v40  ;;  %v8779_v40 = vld [vmem:[%s9157_s20 + $0x60] sm:$0xff] }
 0x4ee   : > { %8413 = vmatmul.mubr.bf16.gmra.mxu0 %v14105_v63  ;;  %v8777_v63 = vld [vmem:[%s9157_s20 + $0x40] sm:$0xff] }
 0x4ef   : > { %8416 = vmatprep.mubr.msk.bf16.mxu0 %vm11626_vm15, %v14110_v10  ;;  %v6475_v33 = vadd.f32 %v8778_v62, %v8777_v63  ;;  %v6484_v10 = vadd.f32 %v8780_v51, %v8779_v40  ;;  %v8802_v62 = vld [vmem:[%s9157_s20 + $0xf8] sm:$0xff] }
 0x4f1   : > { %v6476_v35 = vadd.f32 %v8791_v16, %v6475_v33 }
 0x4f4   : > { %8461 = vmatmul.mubr.msk.bf16.gmra.mxu1 %vm11861_vm3, %v14113_v44  ;;  %v6493_v44 = vadd.f32 %v8782_v60, %v8781_v46 }
 0x4f5   : > { %8464 = vmatprep.mubr.bf16.mxu1 %v14119_v61  ;;  %v6511_v61 = vadd.f32 %v8786_v50, %v8785_v31 }
 0x4f6   : > { %8417 = vmatmul.mubr.bf16.gmra.mxu0 %v14116_v24  ;;  %v6502_v24 = vadd.f32 %v8784_v25, %v8783_v21  ;;  %v6494_v57 = vadd.f32 %v8793_v30, %v6493_v44 }
 0x4f7   : > { %8420 = vmatprep.mubr.msk.bf16.mxu0 %vm11626_vm15, %v14121_v11  ;;  %v8788_v11 = vld [vmem:[%s9157_s20 + $0xe8] sm:$0xff] }
 0x4f8   : > { %v6520_v53 = vadd.f32 %v8788_v11, %v8787_v59 }
 0x4fa   : > { %v6521_v34 = vadd.f32 %v8796_v23, %v6520_v53 }
 0x4fc   : > { %8465 = vmatmul.mubr.msk.bf16.gmra.mxu1 %vm11861_vm3, %v14124_v41  ;;  %v8789_v41 = vld [vmem:[%s9157_s20 + $0x18] sm:$0xff]  ;;  %v6522_v33 = vadd.f32 %v8802_v62, %v6521_v34 }
 0x4fd   : > { %8468 = vmatprep.mubr.bf16.mxu1 %v14130_v0  ;;  %v8792_v0 = vld [vmem:[%s9157_s20 + $0x70] sm:$0xff] }
 0x4fe   : > { %8421 = vmatmul.mubr.bf16.gmra.mxu0 %v14127_v3 }
 0x4ff   : > { %8424 = vmatprep.mubr.msk.bf16.mxu0 %vm11626_vm15, %v14131_v48  ;;  %v6485_v48 = vadd.f32 %v8792_v0, %v6484_v10 }
 0x504   : > { %8469 = vmatmul.mubr.msk.bf16.gmra.mxu1 %vm11861_vm3, %v14134_v19  ;;  %v8794_v19 = vld [vmem:[%s9157_s20 + $0xb0] sm:$0xff] }
 0x505   : > { %8472 = vmatprep.mubr.bf16.mxu1 %v14136_v14  ;;  %v8795_v14 = vld [vmem:[%s9157_s20 + $0xd0] sm:$0xff] }
 0x506   : > { %8425 = vmatmul.mubr.bf16.gmra.mxu0 %v14135_v17  ;;  %v6503_v17 = vadd.f32 %v8794_v19, %v6502_v24  ;;  %v6512_v36 = vadd.f32 %v8795_v14, %v6511_v61  ;;  %v6523_v24 = vrot.slane %v6522_v33, 4 }
 0x507   : > { %8428 = vmatprep.mubr.msk.bf16.mxu0 %vm11626_vm15, %v7137_v28 }
 0x508   : > { %v6524_v16 = vadd.f32 %v6523_v24, %v6522_v33 }
 0x50c   : > { %8473 = vmatmul.mubr.msk.bf16.gmra.mxu1 %vm11861_vm3, %v7166_v26  ;;  %v6466_v26 = vadd.f32 %v8774_v37, %v8773_v12  ;;  %v8798_v12 = vld [vmem:[%s9157_s20 + $0x78] sm:$0xff] }
 0x50d   : > { %8476 = vmatprep.mubr.bf16.mxu1 %v6093_v8  ;;  %v8775_v8 = vld [vmem:[%s9157_s20 + $0x10] sm:$0xff]  ;;  %v6486_v37 = vadd.f32 %v8798_v12, %v6485_v48 }
 0x50e   : > { %8429 = vmatmul.mubr.bf16.gmra.mxu0 %v5610_v9  ;;  %v6458_v1 = vadd.f32 %v8775_v8, %v6457_v22  ;;  %v6467_v27 = vadd.f32 %v8776_v7, %v6466_v26  ;;  %v6477_v22 = vadd.f32 %v8797_v39, %v6476_v35  ;;  %v8799_v26 = vld [vmem:[%s9157_s20 + $0x98] sm:$0xff] }
 0x50f   : > { %v6495_v8 = vadd.f32 %v8799_v26, %v6494_v57  ;;  %v6487_v60 = vrot.slane %v6486_v37, 4 }
 0x510   : > { %v6459_v38 = vadd.f32 %v8789_v41, %v6458_v1  ;;  %v6468_v3 = vadd.f32 %v8790_v54, %v6467_v27  ;;  %v8800_v1 = vld [vmem:[%s9157_s20 + $0xb8] sm:$0xff]  ;;  %v6478_v46 = vrot.slane %v6477_v22, 4 }
 0x511   : > { %v6504_v7 = vadd.f32 %v8800_v1, %v6503_v17  ;;  %v8801_v27 = vld [vmem:[%s9157_s20 + $0xd8] sm:$0xff]  ;;  %v6496_v44 = vrot.slane %v6495_v8, 4  ;;  %v6488_v11 = vadd.f32 %v6487_v60, %v6486_v37  ;;  %v6525_v17 = vrot.slane %v6524_v16, 2 }
 0x512   : > { %v6460_v9 = vrot.slane %v6459_v38, 4  ;;  %v6469_v15 = vrot.slane %v6468_v3, 4  ;;  %v6513_v63 = vadd.f32 %v8801_v27, %v6512_v36  ;;  %v6479_v59 = vadd.f32 %v6478_v46, %v6477_v22 }
 0x513   : > { %v6505_v21 = vrot.slane %v6504_v7, 4  ;;  %v6497_v53 = vadd.f32 %v6496_v44, %v6495_v8  ;;  %v6489_v48 = vrot.slane %v6488_v11, 2  ;;  %v6526_v12 = vadd.f32 %v6525_v17, %v6524_v16 }
 0x514   : > { %8477 = vmatmul.mubr.msk.bf16.gmra.mxu1 %vm11861_vm3, %v7169_v32  ;;  %v6461_v51 = vadd.f32 %v6460_v9, %v6459_v38  ;;  %v6470_v10 = vadd.f32 %v6469_v15, %v6468_v3  ;;  %v6514_v25 = vrot.slane %v6513_v63, 4  ;;  %v6480_v0 = vrot.slane %v6479_v59, 2 }
 0x515   : > { %v6506_v41 = vadd.f32 %v6505_v21, %v6504_v7  ;;  %v6498_v30 = vrot.slane %v6497_v53, 2  ;;  %v6490_v9 = vadd.f32 %v6489_v48, %v6488_v11  ;;  %v6527_v33 = vrot.slane %v6526_v12, 1 }
 0x516   : > { %v6462_v50 = vrot.slane %v6461_v51, 2  ;;  %v6471_v61 = vrot.slane %v6470_v10, 2  ;;  %v6515_v54 = vadd.f32 %v6514_v25, %v6513_v63  ;;  %v6481_v34 = vadd.f32 %v6480_v0, %v6479_v59 }
 0x517   : > { %v6507_v57 = vrot.slane %v6506_v41, 2  ;;  %v6499_v15 = vadd.f32 %v6498_v30, %v6497_v53  ;;  %v6491_v7 = vrot.slane %v6490_v9, 1 }
 0x518   : > { %v6463_v38 = vadd.f32 %v6462_v50, %v6461_v51  ;;  %v6472_v3 = vadd.f32 %v6471_v61, %v6470_v10  ;;  %v6516_v19 = vrot.slane %v6515_v54, 2  ;;  %v6482_v1 = vrot.slane %v6481_v34, 1 }
 0x519   : > { %v6508_v39 = vadd.f32 %v6507_v57, %v6506_v41  ;;  %v6500_v27 = vrot.slane %v6499_v15, 1  ;;  %v6492_v46 = vadd.f32 %v6491_v7, %v6490_v9  ;;  %v6528_v50 = vadd.f32 %v6527_v33, %v6526_v12 }
 0x51a   : > { %v6464_v36 = vrot.slane %v6463_v38, 1  ;;  %v6473_v23 = vrot.slane %v6472_v3, 1  ;;  %v6517_v22 = vadd.f32 %v6516_v19, %v6515_v54  ;;  %v6483_v10 = vadd.f32 %v6482_v1, %v6481_v34 }
 0x51b   : > { %v6509_v63 = vrot.slane %v6508_v39, 1  ;;  %v6501_v21 = vadd.f32 %v6500_v27, %v6499_v15  ;;  %v6533_v11 = vmul.f32 0.03125, %v6492_v46  ;;  %v6537_v48 = vmul.f32 0.03125, %v6528_v50 }
 0x51c   : > { %v6465_v26 = vadd.f32 %v6464_v36, %v6463_v38  ;;  %v6474_v8 = vadd.f32 %v6473_v23, %v6472_v3  ;;  %v6518_v62 = vrot.slane %v6517_v22, 1  ;;  %v6532_v59 = vmul.f32 0.03125, %v6483_v10 }
 0x51d   : > { %v6510_v25 = vadd.f32 %v6509_v63, %v6508_v39  ;;  %v6534_v53 = vmul.f32 0.03125, %v6501_v21 }
 0x51e   : > { %v6530_v60 = vmul.f32 0.03125, %v6465_v26  ;;  %v6531_v44 = vmul.f32 0.03125, %v6474_v8  ;;  %v6519_v24 = vadd.f32 %v6518_v62, %v6517_v22 }
 0x51f   : > { %v6535_v54 = vmul.f32 0.03125, %v6510_v25 }
 0x520   : > { %v6547_v16 = vsel %vm6546_vm2, %v6531_v44, %v6530_v60  ;;  %v6536_v38 = vmul.f32 0.03125, %v6519_v24 }
 0x521   : > { %v6549_v3 = vsel %vm6548_vm4, %v6532_v59, %v6547_v16 }
 0x522   : > { %v6551_v30 = vsel %vm6550_vm5, %v6533_v11, %v6549_v3 }
 0x523   : > { %v6553_v57 = vsel %vm6552_vm6, %v6534_v53, %v6551_v30 }
 0x524   : > { %v6555_v17 = vsel %vm6554_vm7, %v6535_v54, %v6553_v57 }
 0x525   : > { %v6557_v36 = vsel %vm6556_vm8, %v6536_v38, %v6555_v17 }
 0x526   : > { %v6559_v34 = vsel %vm6558_vm9, %v6537_v48, %v6557_v36 }
 0x527   : > { %6561 = vst [vmem:[%s256_s5] sm:$0xff] %v6559_v34 }
 0x55c   : > { %v13031_v52 = vpop.f32.mrf.mxu1 }
 0x55e   : > { %v13037_v42 = vpop.f32.mrf.mxu1 }
 0x560   : > { %v13039_v28 = vpop.f32.mrf.mxu1 }
 0x562   : > { %v13041_v32 = vpop.f32.mrf.mxu1 }
 0x564   : > { %v13057_v6 = vpop.f32.mrf.mxu1 }
 0x566   : > { %v13067_v56 = vpop.f32.mrf.mxu1 }
 0x568   : > { %v13075_v40 = vpop.f32.mrf.mxu1 }
 0x56a   : > { %v13077_v31 = vpop.f32.mrf.mxu1 }
 0x56c   : > { %v13079_v35 = vpop.f32.mrf.mxu1 }
 0x56e   : > { %v13081_v14 = vpop.f32.mrf.mxu1 }
 0x570   : > { %v13083_v37 = vpop.f32.mrf.mxu1 }
 0x572   : > { %v13085_v51 = vpop.f32.mrf.mxu1 }
 0x574   : > { %v13088_v61 = vpop.f32.mrf.mxu1 }
 0x576   : > { %v13090_v41 = vpop.f32.mrf.mxu1 }
 0x578   : > { %v13092_v0 = vpop.f32.mrf.mxu1 }
 0x57a   : > { %v13095_v19 = vpop.f32.mrf.mxu1 }
 0x57c   : > { %v13104_v23 = vpop.f32.mrf.mxu1 }
 0x57e   : > { %v13106_v9 = vpop.f32.mrf.mxu1 }
 0x57f   : > { %8898 = shalt.err (!%p8895_p9)
}
 0x580   : > { %s8899_s10 = scalar_lea.hbm %s13100_s27, 128  ;;  %s8903_s21 = scalar_lea.hbm %s13389_s4, 256 }
 0x581   : > { %p8900_p13 = scmp.ne.s32.totalorder %s13100_s27, %s8899_s10  ;;  %p8904_p4 = scmp.lt.s32.totalorder %s13100_s27, %s13389_s4 }
 0x582   : > { %p8905_p8 = scmp.lt.s32.totalorder %s8903_s21, %s8899_s10 }
 0x583   : > { %p8901_p5 = pnand %p8900_p13, %p14138_p10 }
 0x584   : > { %p8906_p7 = por %p8905_p8, %p8904_p4 }
 0x585   : > { %p8902_p0 = pneg %p8901_p5 }
 0x587   : > { %p8907_p11 = pnand %p8906_p7, %p8902_p0 }
 0x589   : > { %8910 = shalt.err (!%p8907_p11)
}
 0x58a   : > { %8491 = dma.vmem_to_hbm [thread:$0]  (%p14138_p10), %s13102_s7, 128, %s13100_s27, %s6568_s26   ;;  %v13129_v15 = vpop.f32.mrf.mxu1  ;;  %v14139_v62 = vld [vmem:[#allocation34_spill] sm:$0xff]  ;;  %v14141_v44 = vld [vmem:[#allocation77_spill] sm:$0xff]  ;;  %v14142_v50 = vld [vmem:[#allocation95_spill] sm:$0xff] }
 0x58b   : > { %v14140_v33 = vld [vmem:[#allocation74_spill] sm:$0xff]  ;;  %v13160_v16 = vld [vmem:[#allocation7 + $0x1] ss:$0 sm:$0xff]  ;;  %v14145_v3 = vld [vmem:[#allocation55_spill] sm:$0xff]  ;;  %s13189_s7 = scalar_lea.vmem [#allocation8], %s6729_s12  ;;  %s7183_s12 = sshll.u32 %s9045_s19, 12 }
 0x58c   : > { %v13131_v39 = vpop.f32.mrf.mxu1  ;;  %v1880_v10 = vadd.f32 %v14140_v33, %v14139_v62  ;;  %v14143_v59 = vld [vmem:[#allocation58_spill] sm:$0xff]  ;;  %v14147_v36 = vld [vmem:[#allocation67_spill] sm:$0xff]  ;;  %s6582_s8 = sshll.u32 %s13189_s7, 4  ;;  %s13337_s26 = scalar_lea.hbm %s13388_s3, %s7183_s12  ;;  %s13339_s8 = int_to_ptr.vmem [resolvable:$true] %s6582_s8 }
 0x58d   : > { %v3918_v11 = vadd.f32 %v14143_v59, %v14142_v50  ;;  %v14148_v34 = vld [vmem:[#allocation78_spill] sm:$0xff]  ;;  %s6563_s19 = scalar_lea.sflag [#allocation4], %s9151_s11  ;;  %s8911_s28 = scalar_lea.vmem %s13339_s8, 4096 }
 0x58e   : > { %v13133_v22 = vpop.f32.mrf.mxu1  ;;  %v2246_v21 = vadd.f32 %v14141_v44, %v1880_v10  ;;  %v1896_v62 = vadd.f32 %v14148_v34, %v14147_v36  ;;  %v13169_v10 = vld [vmem:[#allocation7 + $0x5] ss:$0 sm:$0xff]  ;;  %v14149_v29 = vld [vmem:[#allocation42_spill] sm:$0xff]  ;;  %p8912_p1 = scmp.ne.s32.totalorder %s13339_s8, %s8911_s28  ;;  %s8996_s29 = smov [#allocation8]  }
 0x58f   : > { %v4284_v48 = vadd.f32 %v14145_v3, %v3918_v11  ;;  %v13174_v11 = vld [vmem:[#allocation7 + $0x3] ss:$0 sm:$0xff]  ;;  %s8915_s30 = sshll.u32 %s8996_s29, 4  ;;  %s8916_s30 = int_to_ptr.vmem [resolvable:$false] %s8915_s30 }
 0x590   : > { %v13135_v12 = vpop.f32.mrf.mxu1  ;;  %v2286_v38 = vadd.f32 %v13160_v16, %v2246_v21  ;;  %v14150_v21 = vld [vmem:[#allocation82_spill] sm:$0xff]  ;;  %p8913_p2 = pnand %p8912_p1, %p14138_p10  ;;  %s8917_s6 = scalar_lea.vmem %s8916_s30, 8192 }
 0x591   : > { %v2250_v45 = vadd.f32 %v14150_v21, %v1896_v62  ;;  %v4324_v3 = vadd.f32 %v13174_v11, %v4284_v48  ;;  %v14154_v62 = vld [vmem:[#allocation27_spill] sm:$0xff]  ;;  %p8918_p12 = scmp.lt.s32.totalorder %s13339_s8, %s8916_s30  ;;  %p8919_p3 = scmp.lt.s32.totalorder %s8917_s6, %s8911_s28 }
 0x592   : > { %v13137_v26 = vpop.f32.mrf.mxu1  ;;  %v2318_v18 = vadd.f32 %v2286_v38, %v14149_v29  ;;  %p8914_p6 = pneg %p8913_p2 }
 0x593   : > { %p8920_p9 = por %p8919_p3, %p8918_p12 }
 0x594   : > { %v13139_v8 = vpop.f32.mrf.mxu1 }
 0x595   : > { %p8921_p13 = pnand %p8920_p9, %p8914_p6 }
 0x596   : > { %v13141_v1 = vpop.f32.mrf.mxu1  ;;  %v8402_v60 = vpop.f32.mrf.mxu0 }
 0x597   : > { %v5961_v57 = vadd.f32 %v8402_v60, %v13031_v52 }
 0x598   : > { %v13143_v7 = vpop.f32.mrf.mxu1  ;;  %v5952_v24 = vpop.f32.mrf.mxu0 }
 0x599   : > { %v5953_v44 = vadd.f32 %v5952_v24, %v13037_v42  ;;  %v14152_v24 = vld [vmem:[#allocation96_spill] sm:$0xff] }
 0x59a   : > { %v13145_v27 = vpop.f32.mrf.mxu1  ;;  %v8403_v54 = vpop.f32.mrf.mxu0 }
 0x59b   : > { %v5964_v60 = vadd.f32 %v8403_v54, %v13039_v28  ;;  %v2290_v28 = vadd.f32 %v13160_v16, %v2250_v45  ;;  %v14157_v45 = vld [vmem:[#allocation68_spill] sm:$0xff] }
 0x59c   : > { %v13147_v63 = vpop.f32.mrf.mxu1  ;;  %v5955_v17 = vpop.f32.mrf.mxu0 }
 0x59d   : > { %v5956_v38 = vadd.f32 %v5955_v17, %v13041_v32  ;;  %v14156_v32 = vld [vmem:[#allocation28_spill] sm:$0xff] }
 0x59e   : > { %v13151_v46 = vpop.f32.mrf.mxu1  ;;  %v8406_v59 = vpop.f32.mrf.mxu0 }
 0x5a0   : > { %v13154_v25 = vpop.f32.mrf.mxu1  ;;  %v5968_v20 = vpop.f32.mrf.mxu0 }
 0x5a2   : > { %v13158_v53 = vpop.f32.mrf.mxu1 }
 0x5a3   : > { %14144 = vst [vmem:[#allocation103_spill] sm:$0xff] %v13158_v53  ;;  %v8407_v53 = vpop.f32.mrf.mxu0 }
 0x5a4   : > { %v13164_v30 = vpop.f32.mrf.mxu1 }
 0x5a5   : > { %14146 = vst [vmem:[#allocation107_spill] sm:$0xff] %v13164_v30  ;;  %v14151_v30 = vld [vmem:[#allocation125_spill] sm:$0xff] }
 0x5a6   : > { %v8450_v33 = vpop.f32.mrf.mxu1  ;;  %v3334_v42 = vadd.f32 %v14151_v30, %v2318_v18  ;;  %v5977_v18 = vadd.f32 %v8406_v59, %v13057_v6 }
 0x5a7   : > { %v6323_v50 = vadd.f32 %v8450_v33, %v5961_v57  ;;  %v14153_v57 = vld [vmem:[#allocation62_spill] sm:$0xff] }
 0x5a8   : > { %v6194_v52 = vpop.f32.mrf.mxu1  ;;  %v3934_v33 = vadd.f32 %v14153_v57, %v14152_v24  ;;  %v4356_v54 = vadd.f32 %v4324_v3, %v3334_v42  ;;  %v14158_v3 = vld [vmem:[#allocation83_spill] sm:$0xff]  ;;  %v5969_v57 = vadd.f32 %v5968_v20, %v13067_v56 }
 0x5a9   : > { %v6363_v36 = vadd.f32 %v13169_v10, %v6323_v50  ;;  %v6321_v34 = vadd.f32 %v6194_v52, %v5953_v44  ;;  %v14155_v50 = vld [vmem:[#allocation106_spill] sm:$0xff] }
 0x5aa   : > { %v8451_v29 = vpop.f32.mrf.mxu1  ;;  %v4288_v44 = vadd.f32 %v14155_v50, %v3934_v33  ;;  %v5372_v42 = vadd.f32 %v12315_v4, %v4356_v54  ;;  %v14159_v33 = vld [vmem:[#allocation29_spill] sm:$0xff]  ;;  %v5980_v4 = vadd.f32 %v8407_v53, %v13075_v40 }
 0x5ab   : > { %v6395_v21 = vadd.f32 %v6363_v36, %v14154_v62  ;;  %v6361_v48 = vadd.f32 %v13169_v10, %v6321_v34  ;;  %v6324_v58 = vadd.f32 %v8451_v29, %v5964_v60  ;;  %v5971_v36 = vpop.f32.mrf.mxu0  ;;  %v1912_v34 = vadd.f32 %v14158_v3, %v14157_v45 }
 0x5ac   : > { %v6197_v52 = vpop.f32.mrf.mxu1  ;;  %v4328_v50 = vadd.f32 %v13174_v11, %v4288_v44  ;;  %v5972_v3 = vadd.f32 %v5971_v36, %v13077_v31  ;;  %v14165_v44 = vld [vmem:[#allocation30_spill] sm:$0xff] }
 0x5ad   : > { %6427 = vst [vmem:[%s13189_s7 + $0x10] sm:$0xff] %v6395_v21  ;;  %v6393_v30 = vadd.f32 %v6361_v48, %v14156_v32  ;;  %v6364_v17 = vadd.f32 %v13169_v10, %v6324_v58  ;;  %v6322_v60 = vadd.f32 %v6197_v52, %v5956_v38  ;;  %v8410_v62 = vpop.f32.mrf.mxu0  ;;  %v14160_v58 = vld [vmem:[#allocation45_spill] sm:$0xff]  ;;  %v14161_v38 = vld [vmem:[#allocation87_spill] sm:$0xff] }
 0x5ae   : > { %v8454_v24 = vpop.f32.mrf.mxu1  ;;  %v2322_v21 = vadd.f32 %v2290_v28, %v14160_v58  ;;  %v2254_v48 = vadd.f32 %v14161_v38, %v1912_v34  ;;  %v14167_v58 = vld [vmem:[#allocation31_spill] sm:$0xff] }
 0x5af   : > { %6425 = vst [vmem:[%s13189_s7] sm:$0xff] %v6393_v30  ;;  %v6396_v29 = vadd.f32 %v6364_v17, %v14159_v33  ;;  %v6362_v6 = vadd.f32 %v13169_v10, %v6322_v60  ;;  %v6327_v59 = vadd.f32 %v8454_v24, %v5977_v18  ;;  %v5984_v32 = vpop.f32.mrf.mxu0  ;;  %v14162_v30 = vld [vmem:[#allocation127_spill] sm:$0xff]  ;;  %v14164_v60 = vld [vmem:[#allocation110_spill] sm:$0xff] }
 0x5b0   : > { %v6210_v52 = vpop.f32.mrf.mxu1  ;;  %v3338_v17 = vadd.f32 %v14162_v30, %v2322_v21  ;;  %v14163_v18 = vld [vmem:[#allocation99_spill] sm:$0xff]  ;;  %v14166_v33 = vld [vmem:[#allocation66_spill] sm:$0xff]  ;;  %v14171_v30 = vld [vmem:[#allocation33_spill] sm:$0xff] }
 0x5b1   : > { %6428 = vst [vmem:[%s13189_s7 + $0x18] sm:$0xff] %v6396_v29  ;;  %v6394_v54 = vadd.f32 %v6362_v6, %v5372_v42  ;;  %v6367_v20 = vadd.f32 %v13169_v10, %v6327_v59  ;;  %v6325_v56 = vadd.f32 %v6210_v52, %v5969_v57  ;;  %v3950_v45 = vadd.f32 %v14164_v60, %v14163_v18  ;;  %v8411_v53 = vpop.f32.mrf.mxu0  ;;  %v14168_v52 = vld [vmem:[#allocation69_spill] sm:$0xff] }
 0x5b2   : > { %v8455_v28 = vpop.f32.mrf.mxu1  ;;  %v2294_v42 = vadd.f32 %v13160_v16, %v2254_v48  ;;  %v4360_v57 = vadd.f32 %v4328_v50, %v3338_v17  ;;  %v5993_v59 = vadd.f32 %v8410_v62, %v13079_v35  ;;  %v5985_v50 = vadd.f32 %v5984_v32, %v13081_v14  ;;  %v14172_v60 = vld [vmem:[#allocation49_spill] sm:$0xff] }
 0x5b3   : > { %6426 = vst [vmem:[%s13189_s7 + $0x8] sm:$0xff] %v6394_v54  ;;  %v6399_v34 = vadd.f32 %v6367_v20, %v14165_v44  ;;  %v6365_v24 = vadd.f32 %v13169_v10, %v6325_v56  ;;  %v6328_v40 = vadd.f32 %v8455_v28, %v5980_v4  ;;  %v4292_v29 = vadd.f32 %v14166_v33, %v3950_v45  ;;  %v5987_v38 = vpop.f32.mrf.mxu0  ;;  %v14169_v54 = vld [vmem:[#allocation88_spill] sm:$0xff]  ;;  %v14174_v33 = vld [vmem:[#allocation130_spill] sm:$0xff] }
 0x5b4   : > { %v6213_v6 = vpop.f32.mrf.mxu1  ;;  %v1928_v4 = vadd.f32 %v14169_v54, %v14168_v52  ;;  %v14170_v20 = vld [vmem:[#allocation32_spill] sm:$0xff]  ;;  %v2326_v45 = vadd.f32 %v2294_v42, %v14172_v60 }
 0x5b5   : > { %6431 = vst [vmem:[%s13189_s7 + $0x30] sm:$0xff] %v6399_v34  ;;  %v6397_v21 = vadd.f32 %v6365_v24, %v14167_v58  ;;  %v6368_v31 = vadd.f32 %v13169_v10, %v6328_v40  ;;  %v6326_v36 = vadd.f32 %v6213_v6, %v5972_v3  ;;  %v5376_v56 = vadd.f32 %v14170_v20, %v4360_v57  ;;  %v8414_v18 = vpop.f32.mrf.mxu0  ;;  %v14173_v28 = vld [vmem:[#allocation92_spill] sm:$0xff]  ;;  %v14176_v58 = vld [vmem:[#allocation63_spill] sm:$0xff]  ;;  %v14178_v20 = vld [vmem:[#allocation37_spill] sm:$0xff] }
 0x5b6   : > { %v8458_v48 = vpop.f32.mrf.mxu1  ;;  %v2258_v3 = vadd.f32 %v14173_v28, %v1928_v4  ;;  %v4332_v44 = vadd.f32 %v13174_v11, %v4292_v29  ;;  %v5996_v24 = vadd.f32 %v8411_v53, %v13083_v37  ;;  %v3342_v6 = vadd.f32 %v14174_v33, %v2326_v45  ;;  %v14177_v29 = vld [vmem:[#allocation19_spill] sm:$0xff]  ;;  %v14181_v28 = vld [vmem:[#allocation80_spill] sm:$0xff] }
 0x5b7   : > { %6429 = vst [vmem:[%s13189_s7 + $0x20] sm:$0xff] %v6397_v21  ;;  %v6400_v17 = vadd.f32 %v6368_v31, %v14171_v30  ;;  %v6366_v35 = vadd.f32 %v13169_v10, %v6326_v36  ;;  %v6331_v62 = vadd.f32 %v8458_v48, %v5993_v59  ;;  %v6000_v57 = vpop.f32.mrf.mxu0  ;;  %v14175_v59 = vld [vmem:[#allocation100_spill] sm:$0xff]  ;;  %v5988_v31 = vadd.f32 %v5987_v38, %v13085_v51  ;;  %v14179_v30 = vld [vmem:[#allocation79_spill] sm:$0xff] }
 0x5b8   : > { %v6226_v34 = vpop.f32.mrf.mxu1  ;;  %v3966_v21 = vadd.f32 %v14176_v58, %v14175_v59  ;;  %v2298_v54 = vadd.f32 %v13160_v16, %v2258_v3  ;;  %v4364_v4 = vadd.f32 %v4332_v44, %v3342_v6  ;;  %v6001_v16 = vadd.f32 %v6000_v57, %v13090_v41  ;;  %v14183_v59 = vld [vmem:[#allocation132_spill] sm:$0xff] }
 0x5b9   : > { %6432 = vst [vmem:[%s13189_s7 + $0x38] sm:$0xff] %v6400_v17  ;;  %v6398_v40 = vadd.f32 %v6366_v35, %v5376_v56  ;;  %v6371_v14 = vadd.f32 %v13169_v10, %v6331_v62  ;;  %v6329_v32 = vadd.f32 %v6226_v34, %v5985_v50  ;;  %v8415_v52 = vpop.f32.mrf.mxu0  ;;  %v6009_v50 = vadd.f32 %v8414_v18, %v13088_v61  ;;  %v14180_v62 = vld [vmem:[#allocation75_spill] sm:$0xff]  ;;  %v14182_v18 = vld [vmem:[#allocation53_spill] sm:$0xff] }
 0x5ba   : > { %v8459_v42 = vpop.f32.mrf.mxu1  ;;  %v4296_v56 = vadd.f32 %v14178_v20, %v3966_v21  ;;  %v5380_v60 = vadd.f32 %v14180_v62, %v4364_v4 }
 0x5bb   : > { %6430 = vst [vmem:[%s13189_s7 + $0x28] sm:$0xff] %v6398_v40  ;;  %v6403_v36 = vadd.f32 %v6371_v14, %v14177_v29  ;;  %v6369_v37 = vadd.f32 %v13169_v10, %v6329_v32  ;;  %v6332_v53 = vadd.f32 %v8459_v42, %v5996_v24  ;;  %v6003_v35 = vpop.f32.mrf.mxu0  ;;  %v2330_v24 = vadd.f32 %v2298_v54, %v14182_v18  ;;  %v14185_v54 = vld [vmem:[#allocation47_spill] sm:$0xff] }
 0x5bc   : > { %v6229_v48 = vpop.f32.mrf.mxu1  ;;  %v4336_v40 = vadd.f32 %v13174_v11, %v4296_v56  ;;  %v6012_v32 = vadd.f32 %v8415_v52, %v13092_v0  ;;  %v6004_v42 = vadd.f32 %v6003_v35, %v13095_v19 }
 0x5bd   : > { %6435 = vst [vmem:[%s13189_s7 + $0x50] sm:$0xff] %v6403_v36  ;;  %v6401_v17 = vadd.f32 %v6369_v37, %v14179_v30  ;;  %v6372_v51 = vadd.f32 %v13169_v10, %v6332_v53  ;;  %v6330_v38 = vadd.f32 %v6229_v48, %v5988_v31  ;;  %v8418_v61 = vpop.f32.mrf.mxu0  ;;  %v3346_v58 = vadd.f32 %v14183_v59, %v2330_v24  ;;  %v14184_v31 = vld [vmem:[#allocation84_spill] sm:$0xff] }
 0x5be   : > { %v8462_v45 = vpop.f32.mrf.mxu1  ;;  %v6025_v52 = vadd.f32 %v8418_v61, %v13104_v23  ;;  %v14188_v61 = vld [vmem:[#allocation93_spill] sm:$0xff] }
 0x5bf   : > { %6433 = vst [vmem:[%s13189_s7 + $0x40] sm:$0xff] %v6401_v17  ;;  %v6404_v3 = vadd.f32 %v6372_v51, %v14181_v28  ;;  %v6370_v44 = vadd.f32 %v13169_v10, %v6330_v38  ;;  %v6335_v34 = vadd.f32 %v8462_v45, %v6009_v50  ;;  %v6016_v57 = vpop.f32.mrf.mxu0  ;;  %v4368_v53 = vadd.f32 %v4336_v40, %v3346_v58  ;;  %v14186_v50 = vld [vmem:[#allocation122_spill] sm:$0xff]  ;;  %v14187_v51 = vld [vmem:[#allocation129_spill] sm:$0xff] }
 0x5c0   : > { %v6242_v14 = vpop.f32.mrf.mxu1  ;;  %v6017_v17 = vadd.f32 %v6016_v57, %v13106_v9 }
 0x5c1   : > { %6436 = vst [vmem:[%s13189_s7 + $0x58] sm:$0xff] %v6404_v3  ;;  %v6402_v33 = vadd.f32 %v6370_v44, %v5380_v60  ;;  %v6375_v6 = vadd.f32 %v13169_v10, %v6335_v34  ;;  %v6333_v41 = vadd.f32 %v6242_v14, %v6001_v16  ;;  %v8419_v37 = vpop.f32.mrf.mxu0  ;;  %v5384_v19 = vadd.f32 %v14186_v50, %v4368_v53 }
 0x5c2   : > { %v8463_v21 = vpop.f32.mrf.mxu1  ;;  %v6028_v45 = vadd.f32 %v8419_v37, %v13129_v15  ;;  %v14191_v37 = vld [vmem:[#allocation71_spill] sm:$0xff] }
 0x5c3   : > { %6434 = vst [vmem:[%s13189_s7 + $0x48] sm:$0xff] %v6402_v33  ;;  %v6407_v29 = vadd.f32 %v6375_v6, %v14184_v31  ;;  %v6373_v11 = vadd.f32 %v13169_v10, %v6333_v41  ;;  %v6336_v36 = vadd.f32 %v8463_v21, %v6012_v32  ;;  %v6019_v48 = vpop.f32.mrf.mxu0  ;;  %v14189_v33 = vld [vmem:[#allocation131_spill] sm:$0xff]  ;;  %v14190_v21 = vld [vmem:[#allocation97_spill] sm:$0xff] }
 0x5c4   : > { %v6245_v0 = vpop.f32.mrf.mxu1  ;;  %v6020_v9 = vadd.f32 %v6019_v48, %v13131_v39 }
 0x5c5   : > { %6439 = vst [vmem:[%s13189_s7 + $0x70] sm:$0xff] %v6407_v29  ;;  %v6405_v4 = vadd.f32 %v6373_v11, %v14185_v54  ;;  %v6376_v20 = vadd.f32 %v13169_v10, %v6336_v36  ;;  %v6334_v56 = vadd.f32 %v6245_v0, %v6004_v42  ;;  %v8422_v60 = vpop.f32.mrf.mxu0 }
 0x5c6   : > { %v8466_v30 = vpop.f32.mrf.mxu1  ;;  %v6041_v15 = vadd.f32 %v8422_v60, %v13133_v22 }
 0x5c7   : > { %6437 = vst [vmem:[%s13189_s7 + $0x60] sm:$0xff] %v6405_v4  ;;  %v6408_v38 = vadd.f32 %v6376_v20, %v14187_v51  ;;  %v6374_v35 = vadd.f32 %v13169_v10, %v6334_v56  ;;  %v6339_v62 = vadd.f32 %v8466_v30, %v6025_v52  ;;  %v6032_v44 = vpop.f32.mrf.mxu0 }
 0x5c8   : > { %v6258_v23 = vpop.f32.mrf.mxu1  ;;  %v6033_v39 = vadd.f32 %v6032_v44, %v13135_v12 }
 0x5c9   : > { %6440 = vst [vmem:[%s13189_s7 + $0x78] sm:$0xff] %v6408_v38  ;;  %v6406_v16 = vadd.f32 %v6374_v35, %v5384_v19  ;;  %v6379_v28 = vadd.f32 %v13169_v10, %v6339_v62  ;;  %v6337_v3 = vadd.f32 %v6258_v23, %v6017_v17  ;;  %v8423_v14 = vpop.f32.mrf.mxu0 }
 0x5ca   : > { %v8467_v34 = vpop.f32.mrf.mxu1  ;;  %v6044_v22 = vadd.f32 %v8423_v14, %v13137_v26 }
 0x5cb   : > { %6438 = vst [vmem:[%s13189_s7 + $0x68] sm:$0xff] %v6406_v16  ;;  %v6411_v18 = vadd.f32 %v6379_v28, %v14188_v61  ;;  %v6377_v24 = vadd.f32 %v13169_v10, %v6337_v3  ;;  %v6340_v40 = vadd.f32 %v8467_v34, %v6028_v45  ;;  %v6035_v59 = vpop.f32.mrf.mxu0 }
 0x5cc   : > { %v6261_v32 = vpop.f32.mrf.mxu1  ;;  %v6036_v12 = vadd.f32 %v6035_v59, %v13139_v8 }
 0x5cd   : > { %6443 = vst [vmem:[%s13189_s7 + $0x90] sm:$0xff] %v6411_v18  ;;  %v6409_v6 = vadd.f32 %v6377_v24, %v14189_v33  ;;  %v6380_v41 = vadd.f32 %v13169_v10, %v6340_v40  ;;  %v6338_v57 = vadd.f32 %v6261_v32, %v6020_v9  ;;  %v8426_v11 = vpop.f32.mrf.mxu0 }
 0x5ce   : > { %v8470_v58 = vpop.f32.mrf.mxu1  ;;  %v6057_v26 = vadd.f32 %v8426_v11, %v13141_v1 }
 0x5cf   : > { %6441 = vst [vmem:[%s13189_s7 + $0x80] sm:$0xff] %v6409_v6  ;;  %v6412_v42 = vadd.f32 %v6380_v41, %v14190_v21  ;;  %v6378_v31 = vadd.f32 %v13169_v10, %v6338_v57  ;;  %v6343_v29 = vadd.f32 %v8470_v58, %v6041_v15  ;;  %v6048_v54 = vpop.f32.mrf.mxu0  ;;  %v14193_v41 = vld [vmem:[#allocation98_spill] sm:$0xff]  ;;  %v14195_v21 = vld [vmem:[#allocation57_spill] sm:$0xff] }
 0x5d0   : > { %v6274_v36 = vpop.f32.mrf.mxu1 }
 0x5d1   : > { %6444 = vst [vmem:[%s13189_s7 + $0x98] sm:$0xff] %v6412_v42  ;;  %v6410_v53 = vadd.f32 %v6378_v31, %v14191_v37  ;;  %v6383_v0 = vadd.f32 %v13169_v10, %v6343_v29  ;;  %v6341_v52 = vadd.f32 %v6274_v36, %v6033_v39  ;;  %v8427_v50 = vpop.f32.mrf.mxu0  ;;  %v14196_v36 = vld [vmem:[#allocation102_spill] sm:$0xff] }
 0x5d2   : > { %v8471_v4 = vpop.f32.mrf.mxu1 }
 0x5d3   : > { %6442 = vst [vmem:[%s13189_s7 + $0x88] sm:$0xff] %v6410_v53  ;;  %v6415_v20 = vadd.f32 %v6383_v0, %v12865_v55  ;;  %v6381_v56 = vadd.f32 %v13169_v10, %v6341_v52  ;;  %v6344_v48 = vadd.f32 %v8471_v4, %v6044_v22  ;;  %v6051_v38 = vpop.f32.mrf.mxu0  ;;  %v6049_v55 = vadd.f32 %v6048_v54, %v13143_v7  ;;  %v14197_v0 = vld [vmem:[#allocation114_spill] sm:$0xff]  ;;  %v14198_v4 = vld [vmem:[#allocation72_spill] sm:$0xff] }
 0x5d4   : > { %v6277_v19 = vpop.f32.mrf.mxu1 }
 0x5d5   : > { %6447 = vst [vmem:[%s13189_s7 + $0xb0] sm:$0xff] %v6415_v20  ;;  %v6413_v30 = vadd.f32 %v6381_v56, %v12881_v5  ;;  %v6384_v17 = vadd.f32 %v13169_v10, %v6344_v48  ;;  %v6342_v51 = vadd.f32 %v6277_v19, %v6036_v12  ;;  %v8430_v23 = vpop.f32.mrf.mxu0  ;;  %v6060_v5 = vadd.f32 %v8427_v50, %v13145_v27 }
 0x5d6   : > { %v8474_v35 = vpop.f32.mrf.mxu1 }
 0x5d7   : > { %6445 = vst [vmem:[%s13189_s7 + $0xa0] sm:$0xff] %v6413_v30  ;;  %v6416_v8 = vadd.f32 %v6384_v17, %v12890_v47  ;;  %v6382_v62 = vadd.f32 %v13169_v10, %v6342_v51  ;;  %v6347_v60 = vadd.f32 %v8474_v35, %v6057_v26  ;;  %v6064_v3 = vpop.f32.mrf.mxu0  ;;  %v6052_v47 = vadd.f32 %v6051_v38, %v13147_v63 }
 0x5d8   : > { %v6290_v45 = vpop.f32.mrf.mxu1  ;;  %v6065_v63 = vadd.f32 %v6064_v3, %v13154_v25 }
 0x5d9   : > { %6448 = vst [vmem:[%s13189_s7 + $0xb8] sm:$0xff] %v6416_v8  ;;  %v6414_v1 = vadd.f32 %v6382_v62, %v12894_v43  ;;  %v6387_v16 = vadd.f32 %v13169_v10, %v6347_v60  ;;  %v6345_v28 = vadd.f32 %v6290_v45, %v6049_v55  ;;  %v8431_v61 = vpop.f32.mrf.mxu0  ;;  %v6073_v43 = vadd.f32 %v8430_v23, %v13151_v46  ;;  %v14192_v46 = vld [vmem:[#allocation103_spill] sm:$0xff] }
 0x5da   : > { %v8475_v44 = vpop.f32.mrf.mxu1 }
 0x5db   : > { %6446 = vst [vmem:[%s13189_s7 + $0xa8] sm:$0xff] %v6414_v1  ;;  %v6419_v7 = vadd.f32 %v6387_v16, %v12898_v13  ;;  %v6385_v34 = vadd.f32 %v13169_v10, %v6345_v28  ;;  %v6348_v9 = vadd.f32 %v8475_v44, %v6060_v5  ;;  %v6067_v33 = vpop.f32.mrf.mxu0 }
 0x5dc   : > { %v6293_v18 = vpop.f32.mrf.mxu1 }
 0x5dd   : > { %6451 = vst [vmem:[%s13189_s7 + $0xd0] sm:$0xff] %v6419_v7  ;;  %v6417_v27 = vadd.f32 %v6385_v34, %v12902_v2  ;;  %v6388_v24 = vadd.f32 %v13169_v10, %v6348_v9  ;;  %v6346_v40 = vadd.f32 %v6293_v18, %v6052_v47  ;;  %v6076_v2 = vadd.f32 %v8431_v61, %v14192_v46 }
 0x5de   : > { %v8478_v14 = vpop.f32.mrf.mxu1 }
 0x5df   : > { %6449 = vst [vmem:[%s13189_s7 + $0xc0] sm:$0xff] %v6417_v27  ;;  %v6420_v13 = vadd.f32 %v6388_v24, %v12906_v49  ;;  %v6386_v32 = vadd.f32 %v13169_v10, %v6346_v40  ;;  %v6351_v15 = vadd.f32 %v8478_v14, %v6073_v43  ;;  %v14194_v49 = vld [vmem:[#allocation107_spill] sm:$0xff] }
 0x5e0   : > { %v6306_v6 = vpop.f32.mrf.mxu1  ;;  %v6068_v39 = vadd.f32 %v6067_v33, %v14194_v49 }
 0x5e1   : > { %6452 = vst [vmem:[%s13189_s7 + $0xd8] sm:$0xff] %v6420_v13  ;;  %v6418_v57 = vadd.f32 %v6386_v32, %v14193_v41  ;;  %v6391_v59 = vadd.f32 %v13169_v10, %v6351_v15  ;;  %v6349_v58 = vadd.f32 %v6306_v6, %v6065_v63 }
 0x5e2   : > { %v8479_v25 = vpop.f32.mrf.mxu1 }
 0x5e3   : > { %6450 = vst [vmem:[%s13189_s7 + $0xc8] sm:$0xff] %v6418_v57  ;;  %v6423_v42 = vadd.f32 %v6391_v59, %v14195_v21  ;;  %v6389_v31 = vadd.f32 %v13169_v10, %v6349_v58  ;;  %v6352_v29 = vadd.f32 %v8479_v25, %v6076_v2 }
 0x5e4   : > { %v6309_v11 = vpop.f32.mrf.mxu1 }
 0x5e5   : > { %6455 = vst [vmem:[%s13189_s7 + $0xf0] sm:$0xff] %v6423_v42  ;;  %v6421_v22 = vadd.f32 %v6389_v31, %v14196_v36  ;;  %v6392_v37 = vadd.f32 %v13169_v10, %v6352_v29  ;;  %v6350_v53 = vadd.f32 %v6309_v11, %v6068_v39 }
 0x5e7   : > { %6453 = vst [vmem:[%s13189_s7 + $0xe0] sm:$0xff] %v6421_v22  ;;  %v6424_v52 = vadd.f32 %v6392_v37, %v14197_v0  ;;  %v6390_v54 = vadd.f32 %v13169_v10, %v6350_v53 }
 0x5e9   : > { %6456 = vst [vmem:[%s13189_s7 + $0xf8] sm:$0xff] %v6424_v52  ;;  %v6422_v12 = vadd.f32 %v6390_v54, %v14198_v4 }
 0x5eb   : > { %6454 = vst [vmem:[%s13189_s7 + $0xe8] sm:$0xff] %v6422_v12 }
 0x5ec   : > { %8924 = shalt.err (!%p8921_p13)
}
 0x5ed   : > { %s8925_s10 = scalar_lea.hbm %s13337_s26, 4096  ;;  %s8929_s21 = scalar_lea.hbm %s13388_s3, 8192 }
 0x5ee   : > { %p8926_p5 = scmp.ne.s32.totalorder %s13337_s26, %s8925_s10  ;;  %p8930_p8 = scmp.lt.s32.totalorder %s13337_s26, %s13388_s3 }
 0x5ef   : > { %p8931_p7 = scmp.lt.s32.totalorder %s8929_s21, %s8925_s10 }
 0x5f0   : > { %p8927_p0 = pnand %p8926_p5, %p14138_p10 }
 0x5f1   : > { %p8932_p11 = por %p8931_p7, %p8930_p8 }
 0x5f2   : > { %p8928_p4 = pneg %p8927_p0 }
 0x5f4   : > { %p8933_p1 = pnand %p8932_p11, %p8928_p4 }
 0x5f6   : > { %8936 = shalt.err (!%p8933_p1)
}
 0x5f7   : > { %s8997_s7 = smov 128   ;;  %s8998_s12 = smov 8  }
 0x5f8   : > { %8490 = dma.vmem_to_hbm [thread:$0]  (%p14138_p10), %s13339_s8, 4096, %s13337_s26, %s6563_s19, %s8997_s7, %s8997_s7, %s8998_s12  }
 0x5f9 PF: > { %s6610_s9 = sand.u32 1, %s8971_s15   ;;  %p14199_p2 = scmp.ne.s32.totalorder %s13544_s22, 0 }
 0x5fa   : > { %p14200_p6 = scmp.ge.s32.totalorder %s8983_s18, 2  ;;  %s6611_s27 = scalar_lea.sflag [#allocation4], %s6610_s9 }
 0x5fc   : > { %p8506_p12 = pnand %p14200_p6, %p14199_p2 }
 0x5fe   : > { %p8507_p3 = pneg %p8506_p12 }
 0x600   : > { %8962 = dma.done.wait (%p8507_p3), %s6611_s27, 4096  }
 0x601   : > { %8964 = vsyncadd (%p8507_p3), %s6611_s27, 4294963200  ;;  %s6620_s28 = scalar_lea.sflag [#allocation10], %s6610_s9 }
 0x602   : > { %8966 = dma.done.wait (%p8507_p3), %s6620_s28, 128  }
 0x603   : > { %8968 = vsyncadd (%p8507_p3), %s6620_s28, 4294967168  ;;  %p22_p10 = scmp.ge.s32.totalorder %s9096_s13, 4   ;;  %s14201_s15 = smov %s8975_s16 }
 0x604   : > { %s14202_s16 = smov %s8979_s17  ;;  %s14203_s17 = smov %s9105_s24 }
 0x605   : > { %s14204_s18 = smov %s9096_s13  ;;  %24 = sbr.rel (!%p22_p10) target bundleno = 8 (0x8), region = 124 }
 0x60a   :  { %6625 = vsyncpa [#allocation3], 1 }
 0x60b   :  { %6627 = vsyncpa [#allocation3 + $0x1], 1 }
 0x60c   :  { %6628 = vsyncpa [#allocation6], 1 }
 0x60d   :  { %6629 = vsyncpa [#allocation4], 1 }
 0x60e   :  { %6631 = vsyncpa [#allocation4 + $0x1], 1 }
 0x60f   :  { %6632 = vsyncpa [#allocation10], 1 }
 0x610   :  { %6634 = vsyncpa [#allocation10 + $0x1], 1 }

</bundles_post_ra>
